<compile_context>
chip_gen: v7x
topology: tpu7x:2x2x1
jax: 0.10.0
libtpu: 0.0.40
codegen_flags: <defaults>
</compile_context>

<pallas_src>
import jax
import jax.numpy as jnp
from jax.experimental import pallas as pl
from jax.experimental.pallas import tpu as pltpu

EPS = 1e-3   # BatchNorm2d eps from the module
TN = 128     # output-channel tile (lane aligned)


# ----------------------------------------------------------------------------
# Pallas kernel: conv (as matmul) + training-mode BatchNorm + ReLU
# ----------------------------------------------------------------------------
def conv_bn_relu_kernel(a_ref, w_ref, p_ref, o_ref):
    """One grid step = TN output channels.

    y = A @ W (bf16 inputs, f32 accumulation), then training-mode BatchNorm
    over the M rows (= N*H*W) with one-pass sum / sum-of-squares stats, affine
    (gamma, beta packed in p_ref) and ReLU.  BN stats are per-channel, so the
    channel tiles are fully independent -> 'parallel' grid.
    """
    y = jnp.dot(a_ref[...], w_ref[...], preferred_element_type=jnp.float32)
    m_rows = y.shape[0]
    inv_m = 1.0 / m_rows
    s = jnp.sum(y, axis=0, keepdims=True)
    ss = jnp.sum(y * y, axis=0, keepdims=True)
    mean = s * inv_m
    var = jnp.maximum(ss * inv_m - mean * mean, 0.0)      # biased variance
    inv_std = jax.lax.rsqrt(var + EPS)
    gamma = p_ref[0:1, :]
    beta = p_ref[1:2, :]
    out = jnp.maximum((y - mean) * inv_std * gamma + beta, 0.0)
    o_ref[...] = out.astype(o_ref.dtype)


# ----------------------------------------------------------------------------
# Host-side wrapper
# ----------------------------------------------------------------------------
def _pad_last(a, n):
    return jnp.pad(a, [(0, 0)] * (a.ndim - 1) + [(0, n - a.shape[-1])])


def _pad_vec(v, n):
    return jnp.pad(v, (0, n - v.shape[0]))


def conv_bn_relu(a, w, gamma, beta, out_dtype=jnp.float32):
    """a: (M, K) im2col rows, w: (K, Cout) f32.  Returns relu(bn(a @ w))."""
    m, k = a.shape
    cout = w.shape[1]
    npad = pl.cdiv(cout, TN) * TN

    a16 = a.astype(jnp.bfloat16)
    w16 = _pad_last(w, npad).astype(jnp.bfloat16)
    # Packed per-channel BN params: row 0 = gamma, row 1 = beta (padded cols
    # are zero -> padded outputs are exactly 0 and get sliced off below).
    prm = jnp.stack([_pad_vec(gamma, npad), _pad_vec(beta, npad)], axis=0)

    out = pl.pallas_call(
        conv_bn_relu_kernel,
        out_shape=jax.ShapeDtypeStruct((m, npad), out_dtype),
        grid=(npad // TN,),
        in_specs=[
            pl.BlockSpec((m, k), lambda j: (0, 0)),     # full A every step
            pl.BlockSpec((k, TN), lambda j: (0, j)),    # channel tile of W
            pl.BlockSpec((2, TN), lambda j: (0, j)),    # gamma/beta tile
        ],
        out_specs=pl.BlockSpec((m, TN), lambda j: (0, j)),
        compiler_params=pltpu.CompilerParams(
            dimension_semantics=("parallel",),
            vmem_limit_bytes=32 * 1024 * 1024,
        ),
    )(a16, w16, prm)
    return out[:, :cout]


# ----------------------------------------------------------------------------
# Glue: im2col (NHWC), average pool, parameters
# ----------------------------------------------------------------------------
def im2col_nhwc(x, kh, kw, ph, pw):
    """x: (N, H, W, C) -> (N*H*W, kh*kw*C), position-major / channel-minor
    (matches the weight layout produced by conv_params)."""
    n, h, w, c = x.shape
    xp = jnp.pad(x, ((0, 0), (ph, ph), (pw, pw), (0, 0)))
    cols = [xp[:, i:i + h, j:j + w, :] for i in range(kh) for j in range(kw)]
    return jnp.concatenate(cols, axis=-1).reshape(n * h * w, kh * kw * c)


def avg_pool_3x3_nhwc(x):
    """AvgPool2d(3, stride=1, padding=1), count_include_pad=True, on NHWC."""
    n, h, w, c = x.shape
    xp = jnp.pad(x, ((0, 0), (1, 1), (1, 1), (0, 0)))
    acc = jnp.zeros_like(x)
    for i in range(3):
        for j in range(3):
            acc = acc + xp[:, i:i + h, j:j + w, :]
    return acc * (1.0 / 9.0)


def conv_params(key, cout, cin, kh, kw):
    """Random conv weight, returned as a (kh*kw*cin, cout) matmul matrix whose
    row ordering matches im2col_nhwc (position-major, channel-minor)."""
    w = jax.random.normal(key, (cout, cin, kh, kw), jnp.float32) * 0.05
    return w.transpose(2, 3, 1, 0).reshape(kh * kw * cin, cout)


def bn_params(key, c):
    k1, k2 = jax.random.split(key)
    gamma = 1.0 + 0.1 * jax.random.normal(k1, (c,), jnp.float32)
    beta = 0.1 * jax.random.normal(k2, (c,), jnp.float32)
    return gamma, beta


def init_params(key, cin):
    ks = jax.random.split(key, 20)
    p = {}
    p['w1_1'] = conv_params(ks[0], 192, cin, 1, 1); p['g1_1'], p['be1_1'] = bn_params(ks[1], 192)
    p['w2_1'] = conv_params(ks[2], 128, cin, 1, 1); p['g2_1'], p['be2_1'] = bn_params(ks[3], 128)
    p['w2_2'] = conv_params(ks[4], 128, 128, 1, 7); p['g2_2'], p['be2_2'] = bn_params(ks[5], 128)
    p['w2_3'] = conv_params(ks[6], 192, 128, 7, 1); p['g2_3'], p['be2_3'] = bn_params(ks[7], 192)
    p['w3_1'] = conv_params(ks[8], 128, cin, 1, 1); p['g3_1'], p['be3_1'] = bn_params(ks[9], 128)
    p['w3_2'] = conv_params(ks[10], 128, 128, 7, 1); p['g3_2'], p['be3_2'] = bn_params(ks[11], 128)
    p['w3_3'] = conv_params(ks[12], 128, 128, 1, 7); p['g3_3'], p['be3_3'] = bn_params(ks[13], 128)
    p['w3_4'] = conv_params(ks[14], 128, 128, 7, 1); p['g3_4'], p['be3_4'] = bn_params(ks[15], 128)
    p['w3_5'] = conv_params(ks[16], 192, 128, 1, 7); p['g3_5'], p['be3_5'] = bn_params(ks[17], 192)
    p['w4_1'] = conv_params(ks[18], 192, cin, 1, 1); p['g4_1'], p['be4_1'] = bn_params(ks[19], 192)
    return p


# ----------------------------------------------------------------------------
# Forward pass (mirrors Inception3.forward exactly)
# ----------------------------------------------------------------------------
def inception3_forward(params, x):
    n, cin, h, w = x.shape
    m = n * h * w
    p = params

    x_nhwc = x.transpose(0, 2, 3, 1)                       # NCHW -> NHWC once
    xm = x_nhwc.reshape(m, cin)

    def as_nhwc(mat, c):
        return mat.reshape(n, h, w, c)

    # ---- fused branch heads: conv1_1 (192) | conv2_1 (128) | conv3_1 (128)
    #      (per-channel BN -> fusing along Cout is exact)
    w_head = jnp.concatenate([p['w1_1'], p['w2_1'], p['w3_1']], axis=1)  # (cin, 448)
    g_head = jnp.concatenate([p['g1_1'], p['g2_1'], p['g3_1']])
    be_head = jnp.concatenate([p['be1_1'], p['be2_1'], p['be3_1']])
    head = conv_bn_relu(xm, w_head, g_head, be_head, out_dtype=jnp.float32)
    out1 = head[:, :192]                                   # branch-1 final
    in2 = head[:, 192:320].astype(jnp.bfloat16)            # branch-2 input
    in3 = head[:, 320:448].astype(jnp.bfloat16)            # branch-3 input

    # ---- branch 2: (1,7) 128->128, then (7,1) 128->192
    a = im2col_nhwc(as_nhwc(in2, 128), 1, 7, 0, 3)
    t = conv_bn_relu(a, p['w2_2'], p['g2_2'], p['be2_2'], out_dtype=jnp.bfloat16)
    a = im2col_nhwc(as_nhwc(t, 128), 7, 1, 3, 0)
    out2 = conv_bn_relu(a, p['w2_3'], p['g2_3'], p['be2_3'], out_dtype=jnp.float32)

    # ---- branch 3: (7,1), (1,7), (7,1), (1,7) -> 192
    a = im2col_nhwc(as_nhwc(in3, 128), 7, 1, 3, 0)
    t = conv_bn_relu(a, p['w3_2'], p['g3_2'], p['be3_2'], out_dtype=jnp.bfloat16)
    a = im2col_nhwc(as_nhwc(t, 128), 1, 7, 0, 3)
    t = conv_bn_relu(a, p['w3_3'], p['g3_3'], p['be3_3'], out_dtype=jnp.bfloat16)
    a = im2col_nhwc(as_nhwc(t, 128), 7, 1, 3, 0)
    t = conv_bn_relu(a, p['w3_4'], p['g3_4'], p['be3_4'], out_dtype=jnp.bfloat16)
    a = im2col_nhwc(as_nhwc(t, 128), 1, 7, 0, 3)
    out3 = conv_bn_relu(a, p['w3_5'], p['g3_5'], p['be3_5'], out_dtype=jnp.float32)

    # ---- branch 4: AvgPool2d(3,1,1) (cheap shifted-add pass) then 1x1 -> 192
    pooled = avg_pool_3x3_nhwc(x_nhwc).reshape(m, cin)
    out4 = conv_bn_relu(pooled, p['w4_1'], p['g4_1'], p['be4_1'], out_dtype=jnp.float32)

    out = jnp.concatenate([out1, out2, out3, out4], axis=1)   # (M, 768)
    return out.reshape(n, h, w, 768).transpose(0, 3, 1, 2)    # NCHW


if __name__ == "__main__":
    key = jax.random.PRNGKey(0)
    kp, kx = jax.random.split(key)
    cin = 4
    params = init_params(kp, cin)
    x = jax.random.normal(kx, (2, cin, 16, 16), jnp.float32)   # NCHW, M = 512

    out = jax.jit(inception3_forward)(params, x)
    jax.block_until_ready(out)
    assert out.shape == (2, 768, 16, 16), out.shape
    assert bool(jnp.all(jnp.isfinite(out)))
    print("KERNEL_OK")
</pallas_src>

<mosaic_0001>
module attributes {stable_mosaic.version = 11 : i64} {
  func.func @conv_bn_relu_kernel(%arg0: i32, %arg1: memref<512x4xbf16, #tpu.memory_space<vmem>>, %arg2: memref<4x128xbf16, #tpu.memory_space<vmem>>, %arg3: memref<2x128xf32, #tpu.memory_space<vmem>>, %arg4: memref<512x128xf32, #tpu.memory_space<vmem>>) attributes {dimension_semantics = [#tpu.dimension_semantics<parallel>], iteration_bounds = array<i64: 4>, scalar_prefetch = 0 : i64, scratch_operands = 0 : i64, tpu.core_type = #tpu.core_type<tc>, window_params = [{pipeline_mode = #tpu.pipeline_mode<synchronous>, transform_indices = @transform_0, window_bounds = array<i64: 512, 4>}, {transform_indices = @transform_1, window_bounds = array<i64: 4, 128>}, {transform_indices = @transform_2, window_bounds = array<i64: 2, 128>}, {transform_indices = @transform_3, window_bounds = array<i64: 512, 128>}]} {
    %c0 = arith.constant 0 : index
    %c0_0 = arith.constant 0 : index
    %0 = vector.load %arg1[%c0, %c0_0] : memref<512x4xbf16, #tpu.memory_space<vmem>>, vector<512x4xbf16>
    %c0_1 = arith.constant 0 : index
    %c0_2 = arith.constant 0 : index
    %1 = vector.load %arg2[%c0_1, %c0_2] : memref<4x128xbf16, #tpu.memory_space<vmem>>, vector<4x128xbf16>
    %cst = arith.constant dense<0.000000e+00> : vector<512x128xf32>
    %2 = tpu.matmul %0, %1, %cst {dimension_numbers = #tpu.dot_dimension_numbers<[1], [0], [0], [1], [0, 0, 1, 1], [], []>} : vector<512x4xbf16>, vector<4x128xbf16>, vector<512x128xf32> -> vector<512x128xf32>
    %cst_3 = arith.constant dense<0.000000e+00> : vector<128xf32>
    %3 = vector.multi_reduction <add>, %2, %cst_3 [0] : vector<512x128xf32> to vector<128xf32>
    %4 = vector.shape_cast %3 : vector<128xf32> to vector<1x128xf32>
    %5 = arith.mulf %2, %2 : vector<512x128xf32>
    %cst_4 = arith.constant dense<0.000000e+00> : vector<128xf32>
    %6 = vector.multi_reduction <add>, %5, %cst_4 [0] : vector<512x128xf32> to vector<128xf32>
    %7 = vector.shape_cast %6 : vector<128xf32> to vector<1x128xf32>
    %cst_5 = arith.constant 0.001953125 : f32
    %8 = vector.broadcast %cst_5 : f32 to vector<1x128xf32>
    %9 = arith.mulf %4, %8 : vector<1x128xf32>
    %cst_6 = arith.constant 0.001953125 : f32
    %10 = vector.broadcast %cst_6 : f32 to vector<1x128xf32>
    %11 = arith.mulf %7, %10 : vector<1x128xf32>
    %12 = arith.mulf %9, %9 : vector<1x128xf32>
    %13 = arith.subf %11, %12 : vector<1x128xf32>
    %cst_7 = arith.constant 0.000000e+00 : f32
    %14 = vector.broadcast %cst_7 : f32 to vector<1x128xf32>
    %15 = arith.maximumf %13, %14 : vector<1x128xf32>
    %cst_8 = arith.constant 1.000000e-03 : f32
    %16 = vector.broadcast %cst_8 : f32 to vector<1x128xf32>
    %17 = arith.addf %15, %16 : vector<1x128xf32>
    %18 = math.rsqrt %17 : vector<1x128xf32>
    %c0_9 = arith.constant 0 : index
    %c0_10 = arith.constant 0 : index
    %19 = vector.load %arg3[%c0_9, %c0_10] : memref<2x128xf32, #tpu.memory_space<vmem>>, vector<1x128xf32>
    %c1 = arith.constant 1 : index
    %c0_11 = arith.constant 0 : index
    %20 = vector.load %arg3[%c1, %c0_11] : memref<2x128xf32, #tpu.memory_space<vmem>>, vector<1x128xf32>
    %21 = vector.broadcast %9 : vector<1x128xf32> to vector<512x128xf32>
    %22 = arith.subf %2, %21 : vector<512x128xf32>
    %23 = vector.broadcast %18 : vector<1x128xf32> to vector<512x128xf32>
    %24 = arith.mulf %22, %23 : vector<512x128xf32>
    %25 = vector.broadcast %19 : vector<1x128xf32> to vector<512x128xf32>
    %26 = arith.mulf %24, %25 : vector<512x128xf32>
    %27 = vector.broadcast %20 : vector<1x128xf32> to vector<512x128xf32>
    %28 = arith.addf %26, %27 : vector<512x128xf32>
    %cst_12 = arith.constant 0.000000e+00 : f32
    %29 = vector.broadcast %cst_12 : f32 to vector<512x128xf32>
    %30 = arith.maximumf %28, %29 : vector<512x128xf32>
    %c0_13 = arith.constant 0 : index
    %c0_14 = arith.constant 0 : index
    %31 = vector.load %arg4[%c0_13, %c0_14] : memref<512x128xf32, #tpu.memory_space<vmem>>, vector<512x128xf32>
    tpu.vector_store %arg4[%c0_13, %c0_14], %30 {strides = array<i32>} : memref<512x128xf32, #tpu.memory_space<vmem>>, vector<512x128xf32>,
    return
  }
  func.func @transform_0(%arg0: i32) -> (i32, i32) {
    %c0_i32 = arith.constant 0 : i32
    %c0_i32_0 = arith.constant 0 : i32
    %c0_i32_1 = arith.constant 0 : i32
    return %c0_i32, %c0_i32_0 : i32, i32
  }
  func.func @transform_1(%arg0: i32) -> (i32, i32) {
    %c0_i32 = arith.constant 0 : i32
    %c0_i32_0 = arith.constant 0 : i32
    return %c0_i32, %arg0 : i32, i32
  }
  func.func @transform_2(%arg0: i32) -> (i32, i32) {
    %c0_i32 = arith.constant 0 : i32
    %c0_i32_0 = arith.constant 0 : i32
    return %c0_i32, %arg0 : i32, i32
  }
  func.func @transform_3(%arg0: i32) -> (i32, i32) {
    %c0_i32 = arith.constant 0 : i32
    %c0_i32_0 = arith.constant 0 : i32
    return %c0_i32, %arg0 : i32, i32
  }
}

module attributes {stable_mosaic.version = 11 : i64} {
  func.func @conv_bn_relu_kernel(%arg0: i32, %arg1: memref<512x896xbf16, #tpu.memory_space<vmem>>, %arg2: memref<896x128xbf16, #tpu.memory_space<vmem>>, %arg3: memref<2x128xf32, #tpu.memory_space<vmem>>, %arg4: memref<512x128xbf16, #tpu.memory_space<vmem>>) attributes {dimension_semantics = [#tpu.dimension_semantics<parallel>], iteration_bounds = array<i64: 1>, scalar_prefetch = 0 : i64, scratch_operands = 0 : i64, tpu.core_type = #tpu.core_type<tc>, window_params = [{pipeline_mode = #tpu.pipeline_mode<synchronous>, transform_indices = @transform_0, window_bounds = array<i64: 512, 896>}, {transform_indices = @transform_1, window_bounds = array<i64: 896, 128>}, {transform_indices = @transform_2, window_bounds = array<i64: 2, 128>}, {transform_indices = @transform_3, window_bounds = array<i64: 512, 128>}]} {
    %c0 = arith.constant 0 : index
    %c0_0 = arith.constant 0 : index
    %0 = vector.load %arg1[%c0, %c0_0] : memref<512x896xbf16, #tpu.memory_space<vmem>>, vector<512x896xbf16>
    %c0_1 = arith.constant 0 : index
    %c0_2 = arith.constant 0 : index
    %1 = vector.load %arg2[%c0_1, %c0_2] : memref<896x128xbf16, #tpu.memory_space<vmem>>, vector<896x128xbf16>
    %cst = arith.constant dense<0.000000e+00> : vector<512x128xf32>
    %2 = tpu.matmul %0, %1, %cst {dimension_numbers = #tpu.dot_dimension_numbers<[1], [0], [0], [1], [0, 0, 1, 1], [], []>} : vector<512x896xbf16>, vector<896x128xbf16>, vector<512x128xf32> -> vector<512x128xf32>
    %cst_3 = arith.constant dense<0.000000e+00> : vector<128xf32>
    %3 = vector.multi_reduction <add>, %2, %cst_3 [0] : vector<512x128xf32> to vector<128xf32>
    %4 = vector.shape_cast %3 : vector<128xf32> to vector<1x128xf32>
    %5 = arith.mulf %2, %2 : vector<512x128xf32>
    %cst_4 = arith.constant dense<0.000000e+00> : vector<128xf32>
    %6 = vector.multi_reduction <add>, %5, %cst_4 [0] : vector<512x128xf32> to vector<128xf32>
    %7 = vector.shape_cast %6 : vector<128xf32> to vector<1x128xf32>
    %cst_5 = arith.constant 0.001953125 : f32
    %8 = vector.broadcast %cst_5 : f32 to vector<1x128xf32>
    %9 = arith.mulf %4, %8 : vector<1x128xf32>
    %cst_6 = arith.constant 0.001953125 : f32
    %10 = vector.broadcast %cst_6 : f32 to vector<1x128xf32>
    %11 = arith.mulf %7, %10 : vector<1x128xf32>
    %12 = arith.mulf %9, %9 : vector<1x128xf32>
    %13 = arith.subf %11, %12 : vector<1x128xf32>
    %cst_7 = arith.constant 0.000000e+00 : f32
    %14 = vector.broadcast %cst_7 : f32 to vector<1x128xf32>
    %15 = arith.maximumf %13, %14 : vector<1x128xf32>
    %cst_8 = arith.constant 1.000000e-03 : f32
    %16 = vector.broadcast %cst_8 : f32 to vector<1x128xf32>
    %17 = arith.addf %15, %16 : vector<1x128xf32>
    %18 = math.rsqrt %17 : vector<1x128xf32>
    %c0_9 = arith.constant 0 : index
    %c0_10 = arith.constant 0 : index
    %19 = vector.load %arg3[%c0_9, %c0_10] : memref<2x128xf32, #tpu.memory_space<vmem>>, vector<1x128xf32>
    %c1 = arith.constant 1 : index
    %c0_11 = arith.constant 0 : index
    %20 = vector.load %arg3[%c1, %c0_11] : memref<2x128xf32, #tpu.memory_space<vmem>>, vector<1x128xf32>
    %21 = vector.broadcast %9 : vector<1x128xf32> to vector<512x128xf32>
    %22 = arith.subf %2, %21 : vector<512x128xf32>
    %23 = vector.broadcast %18 : vector<1x128xf32> to vector<512x128xf32>
    %24 = arith.mulf %22, %23 : vector<512x128xf32>
    %25 = vector.broadcast %19 : vector<1x128xf32> to vector<512x128xf32>
    %26 = arith.mulf %24, %25 : vector<512x128xf32>
    %27 = vector.broadcast %20 : vector<1x128xf32> to vector<512x128xf32>
    %28 = arith.addf %26, %27 : vector<512x128xf32>
    %cst_12 = arith.constant 0.000000e+00 : f32
    %29 = vector.broadcast %cst_12 : f32 to vector<512x128xf32>
    %30 = arith.maximumf %28, %29 : vector<512x128xf32>
    %31 = arith.truncf %30 : vector<512x128xf32> to vector<512x128xbf16>
    %c0_13 = arith.constant 0 : index
    %c0_14 = arith.constant 0 : index
    %32 = vector.load %arg4[%c0_13, %c0_14] : memref<512x128xbf16, #tpu.memory_space<vmem>>, vector<512x128xbf16>
    tpu.vector_store %arg4[%c0_13, %c0_14], %31 {strides = array<i32>} : memref<512x128xbf16, #tpu.memory_space<vmem>>, vector<512x128xbf16>,
    return
  }
  func.func @transform_0(%arg0: i32) -> (i32, i32) {
    %c0_i32 = arith.constant 0 : i32
    %c0_i32_0 = arith.constant 0 : i32
    %c0_i32_1 = arith.constant 0 : i32
    return %c0_i32, %c0_i32_0 : i32, i32
  }
  func.func @transform_1(%arg0: i32) -> (i32, i32) {
    %c0_i32 = arith.constant 0 : i32
    %c0_i32_0 = arith.constant 0 : i32
    return %c0_i32, %arg0 : i32, i32
  }
  func.func @transform_2(%arg0: i32) -> (i32, i32) {
    %c0_i32 = arith.constant 0 : i32
    %c0_i32_0 = arith.constant 0 : i32
    return %c0_i32, %arg0 : i32, i32
  }
  func.func @transform_3(%arg0: i32) -> (i32, i32) {
    %c0_i32 = arith.constant 0 : i32
    %c0_i32_0 = arith.constant 0 : i32
    return %c0_i32, %arg0 : i32, i32
  }
}

module attributes {stable_mosaic.version = 11 : i64} {
  func.func @conv_bn_relu_kernel(%arg0: i32, %arg1: memref<512x896xbf16, #tpu.memory_space<vmem>>, %arg2: memref<896x128xbf16, #tpu.memory_space<vmem>>, %arg3: memref<2x128xf32, #tpu.memory_space<vmem>>, %arg4: memref<512x128xf32, #tpu.memory_space<vmem>>) attributes {dimension_semantics = [#tpu.dimension_semantics<parallel>], iteration_bounds = array<i64: 2>, scalar_prefetch = 0 : i64, scratch_operands = 0 : i64, tpu.core_type = #tpu.core_type<tc>, window_params = [{pipeline_mode = #tpu.pipeline_mode<synchronous>, transform_indices = @transform_0, window_bounds = array<i64: 512, 896>}, {transform_indices = @transform_1, window_bounds = array<i64: 896, 128>}, {transform_indices = @transform_2, window_bounds = array<i64: 2, 128>}, {transform_indices = @transform_3, window_bounds = array<i64: 512, 128>}]} {
    %c0 = arith.constant 0 : index
    %c0_0 = arith.constant 0 : index
    %0 = vector.load %arg1[%c0, %c0_0] : memref<512x896xbf16, #tpu.memory_space<vmem>>, vector<512x896xbf16>
    %c0_1 = arith.constant 0 : index
    %c0_2 = arith.constant 0 : index
    %1 = vector.load %arg2[%c0_1, %c0_2] : memref<896x128xbf16, #tpu.memory_space<vmem>>, vector<896x128xbf16>
    %cst = arith.constant dense<0.000000e+00> : vector<512x128xf32>
    %2 = tpu.matmul %0, %1, %cst {dimension_numbers = #tpu.dot_dimension_numbers<[1], [0], [0], [1], [0, 0, 1, 1], [], []>} : vector<512x896xbf16>, vector<896x128xbf16>, vector<512x128xf32> -> vector<512x128xf32>
    %cst_3 = arith.constant dense<0.000000e+00> : vector<128xf32>
    %3 = vector.multi_reduction <add>, %2, %cst_3 [0] : vector<512x128xf32> to vector<128xf32>
    %4 = vector.shape_cast %3 : vector<128xf32> to vector<1x128xf32>
    %5 = arith.mulf %2, %2 : vector<512x128xf32>
    %cst_4 = arith.constant dense<0.000000e+00> : vector<128xf32>
    %6 = vector.multi_reduction <add>, %5, %cst_4 [0] : vector<512x128xf32> to vector<128xf32>
    %7 = vector.shape_cast %6 : vector<128xf32> to vector<1x128xf32>
    %cst_5 = arith.constant 0.001953125 : f32
    %8 = vector.broadcast %cst_5 : f32 to vector<1x128xf32>
    %9 = arith.mulf %4, %8 : vector<1x128xf32>
    %cst_6 = arith.constant 0.001953125 : f32
    %10 = vector.broadcast %cst_6 : f32 to vector<1x128xf32>
    %11 = arith.mulf %7, %10 : vector<1x128xf32>
    %12 = arith.mulf %9, %9 : vector<1x128xf32>
    %13 = arith.subf %11, %12 : vector<1x128xf32>
    %cst_7 = arith.constant 0.000000e+00 : f32
    %14 = vector.broadcast %cst_7 : f32 to vector<1x128xf32>
    %15 = arith.maximumf %13, %14 : vector<1x128xf32>
    %cst_8 = arith.constant 1.000000e-03 : f32
    %16 = vector.broadcast %cst_8 : f32 to vector<1x128xf32>
    %17 = arith.addf %15, %16 : vector<1x128xf32>
    %18 = math.rsqrt %17 : vector<1x128xf32>
    %c0_9 = arith.constant 0 : index
    %c0_10 = arith.constant 0 : index
    %19 = vector.load %arg3[%c0_9, %c0_10] : memref<2x128xf32, #tpu.memory_space<vmem>>, vector<1x128xf32>
    %c1 = arith.constant 1 : index
    %c0_11 = arith.constant 0 : index
    %20 = vector.load %arg3[%c1, %c0_11] : memref<2x128xf32, #tpu.memory_space<vmem>>, vector<1x128xf32>
    %21 = vector.broadcast %9 : vector<1x128xf32> to vector<512x128xf32>
    %22 = arith.subf %2, %21 : vector<512x128xf32>
    %23 = vector.broadcast %18 : vector<1x128xf32> to vector<512x128xf32>
    %24 = arith.mulf %22, %23 : vector<512x128xf32>
    %25 = vector.broadcast %19 : vector<1x128xf32> to vector<512x128xf32>
    %26 = arith.mulf %24, %25 : vector<512x128xf32>
    %27 = vector.broadcast %20 : vector<1x128xf32> to vector<512x128xf32>
    %28 = arith.addf %26, %27 : vector<512x128xf32>
    %cst_12 = arith.constant 0.000000e+00 : f32
    %29 = vector.broadcast %cst_12 : f32 to vector<512x128xf32>
    %30 = arith.maximumf %28, %29 : vector<512x128xf32>
    %c0_13 = arith.constant 0 : index
    %c0_14 = arith.constant 0 : index
    %31 = vector.load %arg4[%c0_13, %c0_14] : memref<512x128xf32, #tpu.memory_space<vmem>>, vector<512x128xf32>
    tpu.vector_store %arg4[%c0_13, %c0_14], %30 {strides = array<i32>} : memref<512x128xf32, #tpu.memory_space<vmem>>, vector<512x128xf32>,
    return
  }
  func.func @transform_0(%arg0: i32) -> (i32, i32) {
    %c0_i32 = arith.constant 0 : i32
    %c0_i32_0 = arith.constant 0 : i32
    %c0_i32_1 = arith.constant 0 : i32
    return %c0_i32, %c0_i32_0 : i32, i32
  }
  func.func @transform_1(%arg0: i32) -> (i32, i32) {
    %c0_i32 = arith.constant 0 : i32
    %c0_i32_0 = arith.constant 0 : i32
    return %c0_i32, %arg0 : i32, i32
  }
  func.func @transform_2(%arg0: i32) -> (i32, i32) {
    %c0_i32 = arith.constant 0 : i32
    %c0_i32_0 = arith.constant 0 : i32
    return %c0_i32, %arg0 : i32, i32
  }
  func.func @transform_3(%arg0: i32) -> (i32, i32) {
    %c0_i32 = arith.constant 0 : i32
    %c0_i32_0 = arith.constant 0 : i32
    return %c0_i32, %arg0 : i32, i32
  }
}

module attributes {stable_mosaic.version = 11 : i64} {
  func.func @conv_bn_relu_kernel(%arg0: i32, %arg1: memref<512x4xbf16, #tpu.memory_space<vmem>>, %arg2: memref<4x128xbf16, #tpu.memory_space<vmem>>, %arg3: memref<2x128xf32, #tpu.memory_space<vmem>>, %arg4: memref<512x128xf32, #tpu.memory_space<vmem>>) attributes {dimension_semantics = [#tpu.dimension_semantics<parallel>], iteration_bounds = array<i64: 2>, scalar_prefetch = 0 : i64, scratch_operands = 0 : i64, tpu.core_type = #tpu.core_type<tc>, window_params = [{pipeline_mode = #tpu.pipeline_mode<synchronous>, transform_indices = @transform_0, window_bounds = array<i64: 512, 4>}, {transform_indices = @transform_1, window_bounds = array<i64: 4, 128>}, {transform_indices = @transform_2, window_bounds = array<i64: 2, 128>}, {transform_indices = @transform_3, window_bounds = array<i64: 512, 128>}]} {
    %c0 = arith.constant 0 : index
    %c0_0 = arith.constant 0 : index
    %0 = vector.load %arg1[%c0, %c0_0] : memref<512x4xbf16, #tpu.memory_space<vmem>>, vector<512x4xbf16>
    %c0_1 = arith.constant 0 : index
    %c0_2 = arith.constant 0 : index
    %1 = vector.load %arg2[%c0_1, %c0_2] : memref<4x128xbf16, #tpu.memory_space<vmem>>, vector<4x128xbf16>
    %cst = arith.constant dense<0.000000e+00> : vector<512x128xf32>
    %2 = tpu.matmul %0, %1, %cst {dimension_numbers = #tpu.dot_dimension_numbers<[1], [0], [0], [1], [0, 0, 1, 1], [], []>} : vector<512x4xbf16>, vector<4x128xbf16>, vector<512x128xf32> -> vector<512x128xf32>
    %cst_3 = arith.constant dense<0.000000e+00> : vector<128xf32>
    %3 = vector.multi_reduction <add>, %2, %cst_3 [0] : vector<512x128xf32> to vector<128xf32>
    %4 = vector.shape_cast %3 : vector<128xf32> to vector<1x128xf32>
    %5 = arith.mulf %2, %2 : vector<512x128xf32>
    %cst_4 = arith.constant dense<0.000000e+00> : vector<128xf32>
    %6 = vector.multi_reduction <add>, %5, %cst_4 [0] : vector<512x128xf32> to vector<128xf32>
    %7 = vector.shape_cast %6 : vector<128xf32> to vector<1x128xf32>
    %cst_5 = arith.constant 0.001953125 : f32
    %8 = vector.broadcast %cst_5 : f32 to vector<1x128xf32>
    %9 = arith.mulf %4, %8 : vector<1x128xf32>
    %cst_6 = arith.constant 0.001953125 : f32
    %10 = vector.broadcast %cst_6 : f32 to vector<1x128xf32>
    %11 = arith.mulf %7, %10 : vector<1x128xf32>
    %12 = arith.mulf %9, %9 : vector<1x128xf32>
    %13 = arith.subf %11, %12 : vector<1x128xf32>
    %cst_7 = arith.constant 0.000000e+00 : f32
    %14 = vector.broadcast %cst_7 : f32 to vector<1x128xf32>
    %15 = arith.maximumf %13, %14 : vector<1x128xf32>
    %cst_8 = arith.constant 1.000000e-03 : f32
    %16 = vector.broadcast %cst_8 : f32 to vector<1x128xf32>
    %17 = arith.addf %15, %16 : vector<1x128xf32>
    %18 = math.rsqrt %17 : vector<1x128xf32>
    %c0_9 = arith.constant 0 : index
    %c0_10 = arith.constant 0 : index
    %19 = vector.load %arg3[%c0_9, %c0_10] : memref<2x128xf32, #tpu.memory_space<vmem>>, vector<1x128xf32>
    %c1 = arith.constant 1 : index
    %c0_11 = arith.constant 0 : index
    %20 = vector.load %arg3[%c1, %c0_11] : memref<2x128xf32, #tpu.memory_space<vmem>>, vector<1x128xf32>
    %21 = vector.broadcast %9 : vector<1x128xf32> to vector<512x128xf32>
    %22 = arith.subf %2, %21 : vector<512x128xf32>
    %23 = vector.broadcast %18 : vector<1x128xf32> to vector<512x128xf32>
    %24 = arith.mulf %22, %23 : vector<512x128xf32>
    %25 = vector.broadcast %19 : vector<1x128xf32> to vector<512x128xf32>
    %26 = arith.mulf %24, %25 : vector<512x128xf32>
    %27 = vector.broadcast %20 : vector<1x128xf32> to vector<512x128xf32>
    %28 = arith.addf %26, %27 : vector<512x128xf32>
    %cst_12 = arith.constant 0.000000e+00 : f32
    %29 = vector.broadcast %cst_12 : f32 to vector<512x128xf32>
    %30 = arith.maximumf %28, %29 : vector<512x128xf32>
    %c0_13 = arith.constant 0 : index
    %c0_14 = arith.constant 0 : index
    %31 = vector.load %arg4[%c0_13, %c0_14] : memref<512x128xf32, #tpu.memory_space<vmem>>, vector<512x128xf32>
    tpu.vector_store %arg4[%c0_13, %c0_14], %30 {strides = array<i32>} : memref<512x128xf32, #tpu.memory_space<vmem>>, vector<512x128xf32>,
    return
  }
  func.func @transform_0(%arg0: i32) -> (i32, i32) {
    %c0_i32 = arith.constant 0 : i32
    %c0_i32_0 = arith.constant 0 : i32
    %c0_i32_1 = arith.constant 0 : i32
    return %c0_i32, %c0_i32_0 : i32, i32
  }
  func.func @transform_1(%arg0: i32) -> (i32, i32) {
    %c0_i32 = arith.constant 0 : i32
    %c0_i32_0 = arith.constant 0 : i32
    return %c0_i32, %arg0 : i32, i32
  }
  func.func @transform_2(%arg0: i32) -> (i32, i32) {
    %c0_i32 = arith.constant 0 : i32
    %c0_i32_0 = arith.constant 0 : i32
    return %c0_i32, %arg0 : i32, i32
  }
  func.func @transform_3(%arg0: i32) -> (i32, i32) {
    %c0_i32 = arith.constant 0 : i32
    %c0_i32_0 = arith.constant 0 : i32
    return %c0_i32, %arg0 : i32, i32
  }
}

</mosaic_0001>

<bundles_post_ra>
// kernel: inception3_forward.8
= control target key start
LH: loop header
LB: loop body
LE: loop exit
PB: predicated region body
PF: predicated region fallthrough
CT: control target
= control target key end

     0   :  { %s2036_s12 = smov 0   ;;  %s2038_s13 = smov 0   ;;  %s3843_s0 = inlined_call_operand.vmem [shape: bf16[512,4], index: 0, kind: input, shape index: {}]   ;;  %s3844_s1 = inlined_call_operand.vmem [shape: bf16[4,512], index: 1, kind: input, shape index: {}]   ;;  %s3845_s2 = inlined_call_operand.vmem [shape: f32[2,512], index: 2, kind: input, shape index: {}]   ;;  %s3846_s3 = inlined_call_operand.vmem [shape: f32[512,512], index: 3, kind: output, shape index: {}]  }
   0x1   :  { %s2040_s14 = smov 0  }
   0x2 LB: > { %s2049_s15 = sadd.s32 4294967295, %s2014_s14   ;;  %s2051_s16 = sadd.s32 1, %s2014_s14   ;;  %s2014_s14 = sphi %s2040_s14, %s4075_s14   ;;  %s2010_s13 = sphi %s2038_s13, %s4074_s13   ;;  %s2006_s12 = sphi %s2036_s12, %s4073_s12  }
   0x3   : > { %s90_s17 = ssub.s32 %s2014_s14, %s2051_s16  ;;  %s93_s18 = sadd.s32 1, %s2010_s13 }
   0x4   : > { %p91_p0 = scmp.eq.s32.totalorder %s90_s17, 0  ;;  %p103_p1 = scmp.ne.s32.totalorder %s2010_s13, %s2006_s12 }
   0x5   : > { %p104_p2 = scmp.eq.s32.totalorder %s2049_s15, 3  ;;  %p1757_p3 = scmp.ge.s32.totalorder %s2014_s14, 1 }
   0x6   : > { %s2059_s19 = scalar_select %p91_p0, %s2010_s13, %s93_s18  }
   0x7   : > { %p2061_p4 = por %p104_p2, %p103_p1  ;;  %p145_p5 = scmp.lt.s32.totalorder %s2014_s14, 5 }
   0x9   : > { %p146_p6 = pnand %p1757_p3, %p145_p5 }
   0xb   : > { %149 = sbr.rel (%p146_p6) target bundleno = 548 (0x224), region = 32 }
  0x12   : > { %p171_p7 = scmp.lt.s32.totalorder %s2049_s15, 3  ;;  %v1958_v0 = vld [vmem:[%s3843_s0] sm:$0xff]   ;;  %vm405_vm0 = vcmask 31744   ;;  %vm502_vm1 = vcmask 1041408   ;;  %v1959_v3 = vld [vmem:[%s3843_s0 + $0x8] sm:$0xff]   ;;  %v1960_v4 = vld [vmem:[%s3843_s0 + $0x10] sm:$0xff]  }
  0x13   : > { %1866 = vmatprep.mubr.msk.bf16.mxu0 %vm405_vm0, %v1958_v0  ;;  %v1961_v5 = vld [vmem:[%s3843_s0 + $0x18] sm:$0xff]   ;;  %v1962_v6 = vld [vmem:[%s3843_s0 + $0x20] sm:$0xff]   ;;  %v1975_v8 = vld [vmem:[%s3843_s0 + $0x88] sm:$0xff]   ;;  %s1828_s9 = sshll.u32 (%p2061_p4), %s2049_s15, 3 }
  0x14   : > { %s2070_s23 = scalar_select %p171_p7, %s2049_s15, 3  ;;  %v1974_v7 = vld [vmem:[%s3843_s0 + $0x80] sm:$0xff]   ;;  %v1976_v9 = vld [vmem:[%s3843_s0 + $0x90] sm:$0xff]   ;;  %v1963_v10 = vld [vmem:[%s3843_s0 + $0x28] sm:$0xff]  }
  0x15   : > { %1898 = vmatprep.mubr.msk.bf16.mxu1 %vm405_vm0, %v1974_v7  ;;  %v1964_v11 = vld [vmem:[%s3843_s0 + $0x30] sm:$0xff]   ;;  %v1977_v12 = vld [vmem:[%s3843_s0 + $0x98] sm:$0xff]   ;;  %v1978_v13 = vld [vmem:[%s3843_s0 + $0xa0] sm:$0xff]   ;;  %s3706_s14 = scalar_lea.vmem (%p2061_p4), %s3846_s3, %s1828_s9 }
  0x16   : > { %s1759_s24 = sshll.u32 %s2070_s23, 1  ;;  %v1965_v14 = vld [vmem:[%s3843_s0 + $0x38] sm:$0xff]   ;;  %v1966_v15 = vld [vmem:[%s3843_s0 + $0x40] sm:$0xff]   ;;  %v1979_v16 = vld [vmem:[%s3843_s0 + $0xa8] sm:$0xff]   ;;  %s168_s23 = sand.u32 1, %s2006_s12  }
  0x17   : > { %s174_s27 = scalar_lea.vmem %s3844_s1, %s1759_s24  ;;  %v1980_v17 = vld [vmem:[%s3843_s0 + $0xb0] sm:$0xff]   ;;  %v1967_v18 = vld [vmem:[%s3843_s0 + $0x48] sm:$0xff]   ;;  %v1981_v20 = vld [vmem:[%s3843_s0 + $0xb8] sm:$0xff]   ;;  %s2902_s8 = scalar_lea.vmem %s3845_s2, %s1759_s24 }
  0x18   : > { %v244_v1 = vld [vmem:[%s174_s27] sm:$0x3]  ;;  %v1968_v19 = vld [vmem:[%s3843_s0 + $0x50] sm:$0xff]   ;;  %v1969_v22 = vld [vmem:[%s3843_s0 + $0x58] sm:$0xff]   ;;  %s1758_s12 = sshll.u32 %s168_s23, 9 }
  0x19   : > { %1932 = vmatprep.subr.msk.bf16.mxu0 %vm502_vm1, %v244_v1  ;;  %v504_v2 = vsel %vm502_vm1, %v244_v1, 0  ;;  %1933 = vmatprep.subr.msk.bf16.mxu1 %vm502_vm1, %v244_v1  ;;  %v1982_v21 = vld [vmem:[%s3843_s0 + $0xc0] sm:$0xff]   ;;  %v1983_v24 = vld [vmem:[%s3843_s0 + $0xc8] sm:$0xff]   ;;  %v1984_v25 = vld [vmem:[%s3843_s0 + $0xd0] sm:$0xff]   ;;  %s3579_s24 = scalar_lea.vmem [#allocation2], %s1758_s12 }
  0x1a   : > { %1865 = vmatpush3.bf16.msra.mxu0 %v504_v2  ;;  %1931 = vmatpush3.bf16.msra.mxu1 %v504_v2  ;;  %v1970_v23 = vld [vmem:[%s3843_s0 + $0x60] sm:$0xff]   ;;  %v1971_v26 = vld [vmem:[%s3843_s0 + $0x68] sm:$0xff]   ;;  %v1972_v27 = vld [vmem:[%s3843_s0 + $0x70] sm:$0xff]  }
  0x1b   : > { %v1985_v28 = vld [vmem:[%s3843_s0 + $0xd8] sm:$0xff]   ;;  %v1986_v29 = vld [vmem:[%s3843_s0 + $0xe0] sm:$0xff]   ;;  %v1987_v31 = vld [vmem:[%s3843_s0 + $0xe8] sm:$0xff]  }
  0x1c   : > { %v1973_v30 = vld [vmem:[%s3843_s0 + $0x78] sm:$0xff]   ;;  %v1988_v32 = vld [vmem:[%s3843_s0 + $0xf0] sm:$0xff]  }
  0x1d   : > { %1867 = vmatmul.mubr.msk.bf16.vlgmr.msra.gmra.mrb[0].mxu0 %vm405_vm0, %v1959_v3  ;;  %1899 = vmatmul.mubr.msk.bf16.vlgmr.msra.gmra.mrb[0].mxu1 %vm405_vm0, %v1975_v8  ;;  %v1989_v33 = vld [vmem:[%s3843_s0 + $0xf8] sm:$0xff]  }
  0x1e   : > { %1870 = vmatprep.mubr.msk.bf16.mxu0 %vm405_vm0, %v1960_v4  ;;  %1902 = vmatprep.mubr.msk.bf16.mxu1 %vm405_vm0, %v1976_v9 }
  0x25   : > { %1871 = vmatmul.mubr.msk.bf16.gmra.mrb[4].mxu0 %vm405_vm0, %v1961_v5  ;;  %1903 = vmatmul.mubr.msk.bf16.gmra.mrb[4].mxu1 %vm405_vm0, %v1977_v12 }
  0x26   : > { %1874 = vmatprep.mubr.msk.bf16.mxu0 %vm405_vm0, %v1962_v6  ;;  %1906 = vmatprep.mubr.msk.bf16.mxu1 %vm405_vm0, %v1978_v13 }
  0x2d   : > { %1875 = vmatmul.mubr.msk.bf16.gmra.mrb[8].mxu0 %vm405_vm0, %v1963_v10  ;;  %1907 = vmatmul.mubr.msk.bf16.gmra.mrb[8].mxu1 %vm405_vm0, %v1979_v16 }
  0x2e   : > { %1878 = vmatprep.mubr.msk.bf16.mxu0 %vm405_vm0, %v1964_v11  ;;  %1910 = vmatprep.mubr.msk.bf16.mxu1 %vm405_vm0, %v1980_v17 }
  0x35   : > { %1879 = vmatmul.mubr.msk.bf16.gmra.mrb[12].mxu0 %vm405_vm0, %v1965_v14  ;;  %1911 = vmatmul.mubr.msk.bf16.gmra.mrb[12].mxu1 %vm405_vm0, %v1981_v20 }
  0x36   : > { %1882 = vmatprep.mubr.msk.bf16.mxu0 %vm405_vm0, %v1966_v15  ;;  %1914 = vmatprep.mubr.msk.bf16.mxu1 %vm405_vm0, %v1982_v21 }
  0x3d   : > { %1883 = vmatmul.mubr.msk.bf16.gmra.mrb[16].mxu0 %vm405_vm0, %v1967_v18  ;;  %1915 = vmatmul.mubr.msk.bf16.gmra.mrb[16].mxu1 %vm405_vm0, %v1983_v24 }
  0x3e   : > { %1886 = vmatprep.mubr.msk.bf16.mxu0 %vm405_vm0, %v1968_v19  ;;  %1918 = vmatprep.mubr.msk.bf16.mxu1 %vm405_vm0, %v1984_v25 }
  0x45   : > { %1887 = vmatmul.mubr.msk.bf16.gmra.mrb[20].mxu0 %vm405_vm0, %v1969_v22  ;;  %1919 = vmatmul.mubr.msk.bf16.gmra.mrb[20].mxu1 %vm405_vm0, %v1985_v28 }
  0x46   : > { %1890 = vmatprep.mubr.msk.bf16.mxu0 %vm405_vm0, %v1970_v23  ;;  %1922 = vmatprep.mubr.msk.bf16.mxu1 %vm405_vm0, %v1986_v29 }
  0x4d   : > { %1891 = vmatmul.mubr.msk.bf16.gmra.mrb[24].mxu0 %vm405_vm0, %v1971_v26  ;;  %1923 = vmatmul.mubr.msk.bf16.gmra.mrb[24].mxu1 %vm405_vm0, %v1987_v31 }
  0x4e   : > { %1894 = vmatprep.mubr.msk.bf16.mxu0 %vm405_vm0, %v1972_v27  ;;  %1926 = vmatprep.mubr.msk.bf16.mxu1 %vm405_vm0, %v1988_v32 }
  0x55   : > { %1895 = vmatmul.mubr.msk.bf16.gmra.mrb[28].mxu0 %vm405_vm0, %v1973_v30  ;;  %1927 = vmatmul.mubr.msk.bf16.gmra.mrb[28].mxu1 %vm405_vm0, %v1989_v33 }
  0xf0   : > { %v2203_v34 = vpop.f32.mrb[0].mxu0  ;;  %v2232_v53 = vpop.f32.mrb[0].mxu1 }
  0xf1   : > { %v2205_v35 = vpop.f32.mrb[1].mxu0  ;;  %v866_v41 = vmul.f32 %v2203_v34, %v2203_v34  ;;  %v2236_v55 = vpop.f32.mrb[1].mxu1 }
  0xf2   : > { %v2207_v36 = vpop.f32.mrb[2].mxu0  ;;  %v864_v38 = vmul.f32 %v2205_v35, %v2205_v35  ;;  %3896 = vst [vmem:[#allocation3_spill] sm:$0xff] %v2236_v55  ;;  %v2241_v59 = vpop.f32.mrb[2].mxu1 }
  0xf3   : > { %v2209_v37 = vpop.f32.mrb[3].mxu0  ;;  %v867_v44 = vmul.f32 %v2207_v36, %v2207_v36  ;;  %v2243_v60 = vpop.f32.mrb[3].mxu1 }
  0xf4   : > { %v795_v39 = vadd.f32 %v2209_v37, %v2205_v35  ;;  %v865_v40 = vmul.f32 %v2209_v37, %v2209_v37  ;;  %3897 = vst [vmem:[#allocation4_spill] sm:$0xff] %v2243_v60 }
  0xf6   : > { %v796_v42 = vadd.f32 %v2203_v34, %v795_v39  ;;  %v928_v43 = vadd.f32 %v865_v40, %v864_v38 }
  0xf8   : > { %v929_v45 = vadd.f32 %v928_v43, %v866_v41  ;;  %v2222_v46 = vpop.f32.mrb[4].mxu0  ;;  %v797_v47 = vadd.f32 %v2207_v36, %v796_v42  ;;  %v2260_v9 = vpop.f32.mrb[4].mxu1 }
  0xf9   : > { %v2225_v48 = vpop.f32.mrb[5].mxu0  ;;  %v870_v61 = vmul.f32 %v2222_v46, %v2222_v46  ;;  %v2264_v11 = vpop.f32.mrb[5].mxu1 }
  0xfa   : > { %v798_v49 = vadd.f32 %v797_v47, %v2225_v48  ;;  %v868_v50 = vmul.f32 %v2225_v48, %v2225_v48  ;;  %v930_v51 = vadd.f32 %v929_v45, %v867_v44  ;;  %v2230_v52 = vpop.f32.mrb[6].mxu0  ;;  %v2269_v15 = vpop.f32.mrb[6].mxu1 }
  0xfb   : > { %v2234_v54 = vpop.f32.mrb[7].mxu0  ;;  %v871_v0 = vmul.f32 %v2230_v52, %v2230_v52  ;;  %v2271_v16 = vpop.f32.mrb[7].mxu1 }
  0xfc   : > { %v931_v56 = vadd.f32 %v930_v51, %v868_v50  ;;  %v799_v57 = vadd.f32 %v798_v49, %v2234_v54  ;;  %v869_v58 = vmul.f32 %v2234_v54, %v2234_v54 }
  0xfe   : > { %v800_v62 = vadd.f32 %v2222_v46, %v799_v57  ;;  %v932_v63 = vadd.f32 %v931_v56, %v869_v58 }
 0x100   : > { %v933_v1 = vadd.f32 %v932_v63, %v870_v61  ;;  %v2250_v2 = vpop.f32.mrb[8].mxu0  ;;  %v801_v3 = vadd.f32 %v2230_v52, %v800_v62  ;;  %v2288_v29 = vpop.f32.mrb[8].mxu1 }
 0x101   : > { %v2253_v4 = vpop.f32.mrb[9].mxu0  ;;  %v874_v17 = vmul.f32 %v2250_v2, %v2250_v2  ;;  %v2292_v31 = vpop.f32.mrb[9].mxu1 }
 0x102   : > { %v802_v5 = vadd.f32 %v801_v3, %v2253_v4  ;;  %v872_v6 = vmul.f32 %v2253_v4, %v2253_v4  ;;  %v934_v7 = vadd.f32 %v933_v1, %v871_v0  ;;  %v2258_v8 = vpop.f32.mrb[10].mxu0  ;;  %v2297_v39 = vpop.f32.mrb[10].mxu1 }
 0x103   : > { %v2262_v10 = vpop.f32.mrb[11].mxu0  ;;  %v875_v20 = vmul.f32 %v2258_v8, %v2258_v8  ;;  %v2299_v40 = vpop.f32.mrb[11].mxu1 }
 0x104   : > { %v935_v12 = vadd.f32 %v934_v7, %v872_v6  ;;  %v803_v13 = vadd.f32 %v802_v5, %v2262_v10  ;;  %v873_v14 = vmul.f32 %v2262_v10, %v2262_v10 }
 0x106   : > { %v804_v18 = vadd.f32 %v2250_v2, %v803_v13  ;;  %v936_v19 = vadd.f32 %v935_v12, %v873_v14 }
 0x108   : > { %v937_v21 = vadd.f32 %v936_v19, %v874_v17  ;;  %v2278_v22 = vpop.f32.mrb[12].mxu0  ;;  %v805_v23 = vadd.f32 %v2258_v8, %v804_v18  ;;  %v2316_v61 = vpop.f32.mrb[12].mxu1 }
 0x109   : > { %v2281_v24 = vpop.f32.mrb[13].mxu0  ;;  %v878_v41 = vmul.f32 %v2278_v22, %v2278_v22  ;;  %v2320_v63 = vpop.f32.mrb[13].mxu1 }
 0x10a   : > { %v806_v25 = vadd.f32 %v805_v23, %v2281_v24  ;;  %v876_v26 = vmul.f32 %v2281_v24, %v2281_v24  ;;  %v938_v27 = vadd.f32 %v937_v21, %v875_v20  ;;  %v2286_v28 = vpop.f32.mrb[14].mxu0  ;;  %v2325_v5 = vpop.f32.mrb[14].mxu1 }
 0x10b   : > { %v2290_v30 = vpop.f32.mrb[15].mxu0  ;;  %v879_v44 = vmul.f32 %v2286_v28, %v2286_v28  ;;  %v2327_v6 = vpop.f32.mrb[15].mxu1 }
 0x10c   : > { %v939_v32 = vadd.f32 %v938_v27, %v876_v26  ;;  %v807_v33 = vadd.f32 %v806_v25, %v2290_v30  ;;  %v877_v38 = vmul.f32 %v2290_v30, %v2290_v30 }
 0x10e   : > { %v808_v42 = vadd.f32 %v2278_v22, %v807_v33  ;;  %v940_v43 = vadd.f32 %v939_v32, %v877_v38 }
 0x110   : > { %v941_v45 = vadd.f32 %v940_v43, %v878_v41  ;;  %v2306_v47 = vpop.f32.mrb[16].mxu0  ;;  %v809_v49 = vadd.f32 %v2286_v28, %v808_v42  ;;  %v2344_v27 = vpop.f32.mrb[16].mxu1 }
 0x111   : > { %v2309_v50 = vpop.f32.mrb[17].mxu0  ;;  %v882_v7 = vmul.f32 %v2306_v47, %v2306_v47  ;;  %3902 = vst [vmem:[#allocation9_spill] sm:$0xff] %v2344_v27  ;;  %v2348_v33 = vpop.f32.mrb[17].mxu1 }
 0x112   : > { %v810_v51 = vadd.f32 %v809_v49, %v2309_v50  ;;  %v880_v56 = vmul.f32 %v2309_v50, %v2309_v50  ;;  %v942_v57 = vadd.f32 %v941_v45, %v879_v44  ;;  %v2314_v58 = vpop.f32.mrb[18].mxu0  ;;  %v2353_v43 = vpop.f32.mrb[18].mxu1 }
 0x113   : > { %3898 = vst [vmem:[#allocation5_spill] sm:$0xff] %v2314_v58  ;;  %v2318_v62 = vpop.f32.mrb[19].mxu0  ;;  %v883_v14 = vmul.f32 %v2314_v58, %v2314_v58  ;;  %3904 = vst [vmem:[#allocation11_spill] sm:$0xff] %v2353_v43  ;;  %v2355_v44 = vpop.f32.mrb[19].mxu1 }
 0x114   : > { %v943_v0 = vadd.f32 %v942_v57, %v880_v56  ;;  %v811_v1 = vadd.f32 %v810_v51, %v2318_v62  ;;  %v881_v3 = vmul.f32 %v2318_v62, %v2318_v62  ;;  %3905 = vst [vmem:[#allocation12_spill] sm:$0xff] %v2355_v44 }
 0x116   : > { %v812_v12 = vadd.f32 %v2306_v47, %v811_v1  ;;  %v944_v13 = vadd.f32 %v943_v0, %v881_v3 }
 0x118   : > { %v945_v17 = vadd.f32 %v944_v13, %v882_v7  ;;  %v2334_v18 = vpop.f32.mrb[20].mxu0  ;;  %v813_v19 = vadd.f32 %v2314_v58, %v812_v12 }
 0x119   : > { %3899 = vst [vmem:[#allocation6_spill] sm:$0xff] %v2334_v18  ;;  %v2337_v20 = vpop.f32.mrb[21].mxu0  ;;  %v886_v45 = vmul.f32 %v2334_v18, %v2334_v18 }
 0x11a   : > { %3900 = vst [vmem:[#allocation7_spill] sm:$0xff] %v2337_v20  ;;  %v814_v21 = vadd.f32 %v813_v19, %v2337_v20  ;;  %v884_v23 = vmul.f32 %v2337_v20, %v2337_v20  ;;  %v946_v25 = vadd.f32 %v945_v17, %v883_v14  ;;  %v2342_v26 = vpop.f32.mrb[22].mxu0  ;;  %v2372_v17 = vpop.f32.mrb[20].mxu1 }
 0x11b   : > { %3901 = vst [vmem:[#allocation8_spill] sm:$0xff] %v2342_v26  ;;  %v2346_v32 = vpop.f32.mrb[23].mxu0  ;;  %v887_v56 = vmul.f32 %v2342_v26, %v2342_v26  ;;  %3909 = vst [vmem:[#allocation16_spill] sm:$0xff] %v2372_v17 }
 0x11c   : > { %3903 = vst [vmem:[#allocation10_spill] sm:$0xff] %v2346_v32  ;;  %v947_v38 = vadd.f32 %v946_v25, %v884_v23  ;;  %v815_v41 = vadd.f32 %v814_v21, %v2346_v32  ;;  %v885_v42 = vmul.f32 %v2346_v32, %v2346_v32  ;;  %v2376_v21 = vpop.f32.mrb[21].mxu1 }
 0x11d   : > { %3911 = vst [vmem:[#allocation18_spill] sm:$0xff] %v2376_v21 }
 0x11e   : > { %v816_v49 = vadd.f32 %v2334_v18, %v815_v41  ;;  %v948_v51 = vadd.f32 %v947_v38, %v885_v42  ;;  %v2381_v41 = vpop.f32.mrb[22].mxu1 }
 0x11f   : > { %v2383_v42 = vpop.f32.mrb[23].mxu1 }
 0x120   : > { %v949_v57 = vadd.f32 %v948_v51, %v886_v45  ;;  %v2362_v0 = vpop.f32.mrb[24].mxu0  ;;  %v817_v1 = vadd.f32 %v2342_v26, %v816_v49  ;;  %3912 = vst [vmem:[#allocation19_spill] sm:$0xff] %v2383_v42 }
 0x121   : > { %3906 = vst [vmem:[#allocation13_spill] sm:$0xff] %v2362_v0  ;;  %v2365_v3 = vpop.f32.mrb[25].mxu0  ;;  %v890_v45 = vmul.f32 %v2362_v0, %v2362_v0 }
 0x122   : > { %3907 = vst [vmem:[#allocation14_spill] sm:$0xff] %v2365_v3  ;;  %v818_v7 = vadd.f32 %v817_v1, %v2365_v3  ;;  %v888_v12 = vmul.f32 %v2365_v3, %v2365_v3  ;;  %v950_v13 = vadd.f32 %v949_v57, %v887_v56  ;;  %v2370_v14 = vpop.f32.mrb[26].mxu0 }
 0x123   : > { %3908 = vst [vmem:[#allocation15_spill] sm:$0xff] %v2370_v14  ;;  %v2374_v19 = vpop.f32.mrb[27].mxu0  ;;  %v891_v56 = vmul.f32 %v2370_v14, %v2370_v14 }
 0x124   : > { %3910 = vst [vmem:[#allocation17_spill] sm:$0xff] %v2374_v19  ;;  %v951_v23 = vadd.f32 %v950_v13, %v888_v12  ;;  %v819_v25 = vadd.f32 %v818_v7, %v2374_v19  ;;  %v889_v38 = vmul.f32 %v2374_v19, %v2374_v19 }
 0x126   : > { %v820_v49 = vadd.f32 %v2362_v0, %v819_v25  ;;  %v952_v51 = vadd.f32 %v951_v23, %v889_v38  ;;  %v2400_v25 = vpop.f32.mrb[24].mxu1 }
 0x127   : > { %3916 = vst [vmem:[#allocation23_spill] sm:$0xff] %v2400_v25  ;;  %v2404_v38 = vpop.f32.mrb[25].mxu1 }
 0x128   : > { %v953_v57 = vadd.f32 %v952_v51, %v890_v45  ;;  %v2390_v1 = vpop.f32.mrb[28].mxu0  ;;  %v821_v7 = vadd.f32 %v2370_v14, %v820_v49  ;;  %3918 = vst [vmem:[#allocation25_spill] sm:$0xff] %v2404_v38  ;;  %v2409_v14 = vpop.f32.mrb[26].mxu1 }
 0x129   : > { %3913 = vst [vmem:[#allocation20_spill] sm:$0xff] %v2390_v1  ;;  %v2393_v12 = vpop.f32.mrb[29].mxu0  ;;  %3919 = vst [vmem:[#allocation26_spill] sm:$0xff] %v2409_v14 }
 0x12a   : > { %3914 = vst [vmem:[#allocation21_spill] sm:$0xff] %v2393_v12  ;;  %v822_v13 = vadd.f32 %v821_v7, %v2393_v12  ;;  %v892_v19 = vmul.f32 %v2393_v12, %v2393_v12  ;;  %v954_v3 = vadd.f32 %v953_v57, %v891_v56  ;;  %v2398_v26 = vpop.f32.mrb[30].mxu0  ;;  %v2411_v7 = vpop.f32.mrb[27].mxu1  ;;  %v894_v56 = vmul.f32 %v2390_v1, %v2390_v1 }
 0x12b   : > { %3915 = vst [vmem:[#allocation22_spill] sm:$0xff] %v2398_v26  ;;  %v2402_v23 = vpop.f32.mrb[31].mxu0  ;;  %3920 = vst [vmem:[#allocation27_spill] sm:$0xff] %v2411_v7  ;;  %v895_v0 = vmul.f32 %v2398_v26, %v2398_v26  ;;  %v2422_v32 = vpop.f32.mrb[28].mxu1 }
 0x12c   : > { %3917 = vst [vmem:[#allocation24_spill] sm:$0xff] %v2402_v23  ;;  %v955_v45 = vadd.f32 %v954_v3, %v892_v19  ;;  %v823_v51 = vadd.f32 %v822_v13, %v2402_v23  ;;  %v893_v49 = vmul.f32 %v2402_v23, %v2402_v23  ;;  %v896_v19 = vmul.f32 %v2236_v55, %v2236_v55  ;;  %v2424_v20 = vpop.f32.mrb[29].mxu1 }
 0x12d   : > { %3921 = vst [vmem:[#allocation28_spill] sm:$0xff] %v2424_v20 }
 0x12e   : > { %v824_v57 = vadd.f32 %v2390_v1, %v823_v51  ;;  %v956_v12 = vadd.f32 %v955_v45, %v893_v49  ;;  %v897_v45 = vmul.f32 %v2243_v60, %v2243_v60  ;;  %v2429_v49 = vpop.f32.mrb[30].mxu1  ;;  %v901_v1 = vmul.f32 %v2271_v16, %v2271_v16 }
 0x130   : > { %v957_v18 = vadd.f32 %v956_v12, %v894_v56  ;;  %v825_v3 = vadd.f32 %v2398_v26, %v824_v57  ;;  %v2431_v12 = vpop.f32.mrb[31].mxu1  ;;  %v898_v56 = vmul.f32 %v2232_v53, %v2232_v53 }
 0x131   : > { %3922 = vst [vmem:[#allocation29_spill] sm:$0xff] %v2431_v12 }
 0x132   : > { %v826_v13 = vadd.f32 %v825_v3, %v2236_v55  ;;  %v958_v23 = vadd.f32 %v957_v18, %v895_v0  ;;  %v899_v0 = vmul.f32 %v2241_v59, %v2241_v59 }
 0x134   : > { %v959_v58 = vadd.f32 %v958_v23, %v896_v19  ;;  %v827_v51 = vadd.f32 %v826_v13, %v2243_v60  ;;  %v900_v19 = vmul.f32 %v2264_v11, %v2264_v11 }
 0x136   : > { %v828_v57 = vadd.f32 %v2232_v53, %v827_v51  ;;  %v960_v18 = vadd.f32 %v959_v58, %v897_v45  ;;  %v902_v58 = vmul.f32 %v2260_v9, %v2260_v9 }
 0x138   : > { %v961_v3 = vadd.f32 %v960_v18, %v898_v56  ;;  %v829_v23 = vadd.f32 %v2241_v59, %v828_v57  ;;  %v903_v56 = vmul.f32 %v2269_v15, %v2269_v15 }
 0x13a   : > { %v830_v13 = vadd.f32 %v829_v23, %v2264_v11  ;;  %v962_v60 = vadd.f32 %v961_v3, %v899_v0 }
 0x13c   : > { %v963_v55 = vadd.f32 %v962_v60, %v900_v19  ;;  %v831_v26 = vadd.f32 %v830_v13, %v2271_v16  ;;  %v904_v60 = vmul.f32 %v2292_v31, %v2292_v31  ;;  %v905_v13 = vmul.f32 %v2299_v40, %v2299_v40 }
 0x13e   : > { %v832_v51 = vadd.f32 %v2260_v9, %v831_v26  ;;  %v964_v45 = vadd.f32 %v963_v55, %v901_v1  ;;  %v906_v55 = vmul.f32 %v2288_v29, %v2288_v29 }
 0x140   : > { %v965_v57 = vadd.f32 %v964_v45, %v902_v58  ;;  %v833_v18 = vadd.f32 %v2269_v15, %v832_v51  ;;  %v907_v58 = vmul.f32 %v2297_v39, %v2297_v39 }
 0x142   : > { %v834_v0 = vadd.f32 %v833_v18, %v2292_v31  ;;  %v966_v3 = vadd.f32 %v965_v57, %v903_v56  ;;  %v908_v56 = vmul.f32 %v2320_v63, %v2320_v63 }
 0x144   : > { %v967_v23 = vadd.f32 %v966_v3, %v904_v60  ;;  %v835_v19 = vadd.f32 %v834_v0, %v2299_v40  ;;  %v909_v3 = vmul.f32 %v2327_v6, %v2327_v6 }
 0x146   : > { %v836_v26 = vadd.f32 %v2288_v29, %v835_v19  ;;  %v968_v1 = vadd.f32 %v967_v23, %v905_v13  ;;  %v910_v23 = vmul.f32 %v2316_v61, %v2316_v61 }
 0x148   : > { %v969_v51 = vadd.f32 %v968_v1, %v906_v55  ;;  %v837_v45 = vadd.f32 %v2297_v39, %v836_v26  ;;  %v911_v55 = vmul.f32 %v2325_v5, %v2325_v5 }
 0x14a   : > { %v838_v57 = vadd.f32 %v837_v45, %v2320_v63  ;;  %v970_v18 = vadd.f32 %v969_v51, %v907_v58  ;;  %v912_v58 = vmul.f32 %v2348_v33, %v2348_v33 }
 0x14c   : > { %v971_v60 = vadd.f32 %v970_v18, %v908_v56  ;;  %v839_v0 = vadd.f32 %v838_v57, %v2327_v6  ;;  %v913_v18 = vmul.f32 %v2355_v44, %v2355_v44 }
 0x14e   : > { %v840_v19 = vadd.f32 %v2316_v61, %v839_v0  ;;  %v972_v13 = vadd.f32 %v971_v60, %v909_v3  ;;  %v914_v60 = vmul.f32 %v2344_v27, %v2344_v27 }
 0x150   : > { %v973_v26 = vadd.f32 %v972_v13, %v910_v23  ;;  %v841_v1 = vadd.f32 %v2325_v5, %v840_v19  ;;  %v915_v23 = vmul.f32 %v2353_v43, %v2353_v43 }
 0x152   : > { %v842_v51 = vadd.f32 %v841_v1, %v2348_v33  ;;  %v974_v45 = vadd.f32 %v973_v26, %v911_v55  ;;  %v916_v55 = vmul.f32 %v2376_v21, %v2376_v21 }
 0x154   : > { %v975_v56 = vadd.f32 %v974_v45, %v912_v58  ;;  %v843_v57 = vadd.f32 %v842_v51, %v2355_v44  ;;  %v917_v45 = vmul.f32 %v2383_v42, %v2383_v42 }
 0x156   : > { %v844_v0 = vadd.f32 %v2344_v27, %v843_v57  ;;  %v976_v3 = vadd.f32 %v975_v56, %v913_v18  ;;  %v918_v56 = vmul.f32 %v2372_v17, %v2372_v17 }
 0x158   : > { %v977_v19 = vadd.f32 %v976_v3, %v914_v60  ;;  %v845_v13 = vadd.f32 %v2353_v43, %v844_v0  ;;  %v919_v60 = vmul.f32 %v2381_v41, %v2381_v41 }
 0x15a   : > { %v846_v26 = vadd.f32 %v845_v13, %v2376_v21  ;;  %v978_v1 = vadd.f32 %v977_v19, %v915_v23  ;;  %v920_v23 = vmul.f32 %v2404_v38, %v2404_v38 }
 0x15c   : > { %v979_v58 = vadd.f32 %v978_v1, %v916_v55  ;;  %v847_v51 = vadd.f32 %v846_v26, %v2383_v42  ;;  %v921_v1 = vmul.f32 %v2411_v7, %v2411_v7 }
 0x15e   : > { %v848_v57 = vadd.f32 %v2372_v17, %v847_v51  ;;  %v980_v18 = vadd.f32 %v979_v58, %v917_v45  ;;  %v922_v58 = vmul.f32 %v2400_v25, %v2400_v25 }
 0x160   : > { %v981_v0 = vadd.f32 %v980_v18, %v918_v56  ;;  %v849_v3 = vadd.f32 %v2381_v41, %v848_v57  ;;  %v923_v56 = vmul.f32 %v2409_v14, %v2409_v14 }
 0x162   : > { %v850_v19 = vadd.f32 %v849_v3, %v2404_v38  ;;  %v982_v13 = vadd.f32 %v981_v0, %v919_v60  ;;  %v924_v60 = vmul.f32 %v2424_v20, %v2424_v20 }
 0x164   : > { %v983_v55 = vadd.f32 %v982_v13, %v920_v23  ;;  %v851_v26 = vadd.f32 %v850_v19, %v2411_v7  ;;  %v925_v13 = vmul.f32 %v2431_v12, %v2431_v12 }
 0x166   : > { %v852_v51 = vadd.f32 %v2400_v25, %v851_v26  ;;  %v984_v45 = vadd.f32 %v983_v55, %v921_v1  ;;  %v926_v55 = vmul.f32 %v2422_v32, %v2422_v32 }
 0x168   : > { %v985_v57 = vadd.f32 %v984_v45, %v922_v58  ;;  %v853_v18 = vadd.f32 %v2409_v14, %v852_v51  ;;  %v927_v58 = vmul.f32 %v2429_v49, %v2429_v49 }
 0x16a   : > { %v854_v0 = vadd.f32 %v853_v18, %v2424_v20  ;;  %v986_v3 = vadd.f32 %v985_v57, %v923_v56 }
 0x16c   : > { %v987_v23 = vadd.f32 %v986_v3, %v924_v60  ;;  %v855_v19 = vadd.f32 %v854_v0, %v2431_v12 }
 0x16e   : > { %v856_v26 = vadd.f32 %v2422_v32, %v855_v19  ;;  %v988_v1 = vadd.f32 %v987_v23, %v925_v13 }
 0x170   : > { %v857_v51 = vadd.f32 %v2429_v49, %v856_v26  ;;  %v989_v45 = vadd.f32 %v988_v1, %v926_v55  ;;  %v3939_v1 = vld [vmem:[#allocation27_spill] sm:$0xff] }
 0x171   : > { %v3940_v55 = vld [vmem:[#allocation23_spill] sm:$0xff] }
 0x172   : > { %v858_v18 = vrot.slane %v857_v51, 4  ;;  %v990_v56 = vadd.f32 %v989_v45, %v927_v58  ;;  %v3931_v45 = vld [vmem:[#allocation15_spill] sm:$0xff] }
 0x174   : > { %v859_v57 = vadd.f32 %v858_v18, %v857_v51  ;;  %v991_v60 = vrot.slane %v990_v56, 4  ;;  %v3932_v51 = vld [vmem:[#allocation21_spill] sm:$0xff] }
 0x176   : > { %v860_v0 = vrot.slane %v859_v57, 2  ;;  %v992_v3 = vadd.f32 %v991_v60, %v990_v56  ;;  %v3942_v56 = vld [vmem:[#allocation28_spill] sm:$0xff] }
 0x178   : > { %v861_v20 = vadd.f32 %v860_v0, %v859_v57  ;;  %v993_v12 = vrot.slane %v992_v3, 2  ;;  %v3924_v0 = vld [vmem:[#allocation7_spill] sm:$0xff]  ;;  %v3943_v57 = vld [vmem:[#allocation29_spill] sm:$0xff] }
 0x17a   : > { %v862_v14 = vrot.slane %v861_v20, 1  ;;  %v994_v25 = vadd.f32 %v993_v12, %v992_v3  ;;  %v3925_v3 = vld [vmem:[#allocation10_spill] sm:$0xff]  ;;  %v3933_v12 = vld [vmem:[#allocation24_spill] sm:$0xff] }
 0x17c   : > { %v863_v7 = vadd.f32 %v862_v14, %v861_v20  ;;  %v995_v38 = vrot.slane %v994_v25, 1  ;;  %v3936_v14 = vld [vmem:[#allocation3_spill] sm:$0xff] }
 0x17e   : > { %v996_v19 = vadd.f32 %v995_v38, %v994_v25  ;;  %v2523_v23 = vmul.f32 0.001953125, %v863_v7  ;;  %v3934_v7 = vld [vmem:[#allocation20_spill] sm:$0xff]  ;;  %v3935_v25 = vld [vmem:[#allocation22_spill] sm:$0xff] }
 0x180   : > { %v998_v13 = vmul.f32 0.001953125, %v996_v19  ;;  %v999_v26 = vmul.f32 %v2523_v23, %v2523_v23  ;;  %v3926_v19 = vld [vmem:[#allocation6_spill] sm:$0xff]  ;;  %v3944_v43 = vsub.f32 %v2205_v35, %v2523_v23  ;;  %v3945_v42 = vsub.f32 %v2209_v37, %v2523_v23 }
 0x181   : > { %v3946_v20 = vsub.f32 %v2203_v34, %v2523_v23  ;;  %v3947_v44 = vsub.f32 %v2207_v36, %v2523_v23 }
 0x182   : > { %v1000_v38 = vsub.f32 %v998_v13, %v999_v26  ;;  %v3927_v13 = vld [vmem:[#allocation8_spill] sm:$0xff]  ;;  %v3941_v26 = vld [vmem:[#allocation26_spill] sm:$0xff] }
 0x184   : > { %v1001_v60 = vmax.f32 %v1000_v38, 0.0  ;;  %v3923_v38 = vld [vmem:[#allocation5_spill] sm:$0xff] }
 0x186   : > { %v1002_v18 = vadd.f32 0.001, %v1001_v60  ;;  %v3930_v60 = vld [vmem:[#allocation13_spill] sm:$0xff] }
 0x188   : > { %1990 = vrsqrt.f32 %v1002_v18  ;;  %v3937_v18 = vld [vmem:[#allocation4_spill] sm:$0xff] }
 0x192   : > { %v2655_v58 = vpop.eup %1990 }
 0x193   : > { %v2661_v27 = vmul.f32 %v2655_v58, %v3944_v43  ;;  %v2667_v21 = vmul.f32 %v2655_v58, %v3945_v42  ;;  %v2673_v17 = vmul.f32 %v2655_v58, %v3946_v20  ;;  %v2679_v35 = vmul.f32 %v2655_v58, %v3947_v44 }
 0x194   : > { %v3948_v43 = vsub.f32 %v2225_v48, %v2523_v23  ;;  %v3949_v42 = vsub.f32 %v2234_v54, %v2523_v23  ;;  %v3950_v20 = vsub.f32 %v2222_v46, %v2523_v23  ;;  %v3951_v44 = vsub.f32 %v2230_v52, %v2523_v23 }
 0x196   : > { %v2685_v37 = vmul.f32 %v2655_v58, %v3948_v43  ;;  %v2691_v34 = vmul.f32 %v2655_v58, %v3949_v42  ;;  %v2697_v36 = vmul.f32 %v2655_v58, %v3950_v20  ;;  %v2703_v48 = vmul.f32 %v2655_v58, %v3951_v44 }
 0x197   : > { %v3952_v43 = vsub.f32 %v2253_v4, %v2523_v23  ;;  %v3953_v42 = vsub.f32 %v2262_v10, %v2523_v23  ;;  %v3954_v20 = vsub.f32 %v2250_v2, %v2523_v23  ;;  %v3955_v44 = vsub.f32 %v2258_v8, %v2523_v23 }
 0x199   : > { %v2709_v54 = vmul.f32 %v2655_v58, %v3952_v43  ;;  %v2715_v46 = vmul.f32 %v2655_v58, %v3953_v42  ;;  %v2721_v52 = vmul.f32 %v2655_v58, %v3954_v20  ;;  %v2727_v4 = vmul.f32 %v2655_v58, %v3955_v44 }
 0x19a   : > { %v3956_v43 = vsub.f32 %v2281_v24, %v2523_v23  ;;  %v3957_v42 = vsub.f32 %v2290_v30, %v2523_v23  ;;  %v3958_v20 = vsub.f32 %v2278_v22, %v2523_v23  ;;  %v3959_v44 = vsub.f32 %v2286_v28, %v2523_v23 }
 0x19c   : > { %v2733_v10 = vmul.f32 %v2655_v58, %v3956_v43  ;;  %v2739_v2 = vmul.f32 %v2655_v58, %v3957_v42  ;;  %v2745_v8 = vmul.f32 %v2655_v58, %v3958_v20  ;;  %v2751_v24 = vmul.f32 %v2655_v58, %v3959_v44 }
 0x19d   : > { %v3960_v43 = vsub.f32 %v2309_v50, %v2523_v23  ;;  %v3961_v42 = vsub.f32 %v2318_v62, %v2523_v23  ;;  %v3962_v20 = vsub.f32 %v2306_v47, %v2523_v23  ;;  %v3963_v44 = vsub.f32 %v3923_v38, %v2523_v23 }
 0x19f   : > { %v2757_v30 = vmul.f32 %v2655_v58, %v3960_v43  ;;  %v2763_v22 = vmul.f32 %v2655_v58, %v3961_v42  ;;  %v2769_v28 = vmul.f32 %v2655_v58, %v3962_v20  ;;  %v2775_v50 = vmul.f32 %v2655_v58, %v3963_v44 }
 0x1a0   : > { %v3964_v43 = vsub.f32 %v3924_v0, %v2523_v23  ;;  %v3966_v42 = vsub.f32 %v3925_v3, %v2523_v23  ;;  %v3968_v20 = vsub.f32 %v3926_v19, %v2523_v23  ;;  %v3969_v44 = vsub.f32 %v3927_v13, %v2523_v23 }
 0x1a2   : > { %v2781_v62 = vmul.f32 %v2655_v58, %v3964_v43  ;;  %v2787_v47 = vmul.f32 %v2655_v58, %v3966_v42  ;;  %v2793_v38 = vmul.f32 %v2655_v58, %v3968_v20  ;;  %v2799_v0 = vmul.f32 %v2655_v58, %v3969_v44  ;;  %v3970_v43 = vld [vmem:[#allocation14_spill] sm:$0xff]  ;;  %v3972_v42 = vld [vmem:[#allocation17_spill] sm:$0xff] }
 0x1a3   : > { %v3974_v20 = vsub.f32 %v3930_v60, %v2523_v23  ;;  %v3975_v44 = vsub.f32 %v3931_v45, %v2523_v23 }
 0x1a4   : > { %3965 = vst [vmem:[#allocation5_spill] sm:$0xff] %v2781_v62  ;;  %3967 = vst [vmem:[#allocation7_spill] sm:$0xff] %v2787_v47  ;;  %v3971_v62 = vsub.f32 %v3970_v43, %v2523_v23  ;;  %v3973_v47 = vsub.f32 %v3972_v42, %v2523_v23 }
 0x1a5   : > { %v2817_v13 = vmul.f32 %v2655_v58, %v3974_v20  ;;  %v2823_v43 = vmul.f32 %v2655_v58, %v3975_v44  ;;  %v3978_v20 = vsub.f32 %v3934_v7, %v2523_v23  ;;  %v3979_v44 = vsub.f32 %v3935_v25, %v2523_v23 }
 0x1a6   : > { %v2805_v3 = vmul.f32 %v2655_v58, %v3971_v62  ;;  %v2811_v19 = vmul.f32 %v2655_v58, %v3973_v47  ;;  %v3976_v62 = vsub.f32 %v3932_v51, %v2523_v23  ;;  %v3977_v47 = vsub.f32 %v3933_v12, %v2523_v23 }
 0x1a7   : > { %v2841_v45 = vmul.f32 %v2655_v58, %v3978_v20  ;;  %v2847_v51 = vmul.f32 %v2655_v58, %v3979_v44  ;;  %v3982_v20 = vsub.f32 %v2232_v53, %v2523_v23  ;;  %v3983_v44 = vsub.f32 %v2241_v59, %v2523_v23 }
 0x1a8   : > { %v2829_v42 = vmul.f32 %v2655_v58, %v3976_v62  ;;  %v2835_v60 = vmul.f32 %v2655_v58, %v3977_v47  ;;  %v3980_v62 = vsub.f32 %v3936_v14, %v2523_v23  ;;  %v3981_v47 = vsub.f32 %v3937_v18, %v2523_v23 }
 0x1a9   : > { %v2865_v25 = vmul.f32 %v2655_v58, %v3982_v20  ;;  %v2871_v14 = vmul.f32 %v2655_v58, %v3983_v44  ;;  %v3986_v20 = vsub.f32 %v2260_v9, %v2523_v23  ;;  %v3987_v44 = vsub.f32 %v2269_v15, %v2523_v23 }
 0x1aa   : > { %v2853_v12 = vmul.f32 %v2655_v58, %v3980_v62  ;;  %v2859_v7 = vmul.f32 %v2655_v58, %v3981_v47  ;;  %v3984_v62 = vsub.f32 %v2264_v11, %v2523_v23  ;;  %v3985_v47 = vsub.f32 %v2271_v16, %v2523_v23 }
 0x1ab   : > { %v2889_v59 = vmul.f32 %v2655_v58, %v3986_v20  ;;  %v2895_v11 = vmul.f32 %v2655_v58, %v3987_v44  ;;  %v3988_v16 = vsub.f32 %v2292_v31, %v2523_v23  ;;  %v3991_v44 = vsub.f32 %v2297_v39, %v2523_v23 }
 0x1ac   : > { %v2877_v18 = vmul.f32 %v2655_v58, %v3984_v62  ;;  %v2883_v53 = vmul.f32 %v2655_v58, %v3985_v47  ;;  %v3989_v62 = vsub.f32 %v2299_v40, %v2523_v23  ;;  %v3990_v47 = vsub.f32 %v2288_v29, %v2523_v23 }
 0x1ad   : > { %v2908_v9 = vmul.f32 %v2655_v58, %v3988_v16  ;;  %v2926_v31 = vmul.f32 %v2655_v58, %v3991_v44  ;;  %v3992_v16 = vsub.f32 %v2320_v63, %v2523_v23  ;;  %v3997_v44 = vsub.f32 %v2325_v5, %v2523_v23 }
 0x1ae   : > { %v2914_v15 = vmul.f32 %v2655_v58, %v3989_v62  ;;  %v2920_v20 = vmul.f32 %v2655_v58, %v3990_v47  ;;  %v3993_v62 = vsub.f32 %v2327_v6, %v2523_v23  ;;  %v3995_v47 = vsub.f32 %v2316_v61, %v2523_v23 }
 0x1af   : > { %v2932_v40 = vmul.f32 %v2655_v58, %v3992_v16  ;;  %v2950_v63 = vmul.f32 %v2655_v58, %v3997_v44  ;;  %v3999_v16 = vsub.f32 %v2348_v33, %v2523_v23  ;;  %v4007_v44 = vld [vmem:[#allocation11_spill] sm:$0xff] }
 0x1b0   : > { %v2938_v29 = vmul.f32 %v2655_v58, %v3993_v62  ;;  %v2944_v39 = vmul.f32 %v2655_v58, %v3995_v47  ;;  %v4001_v62 = vld [vmem:[#allocation12_spill] sm:$0xff]  ;;  %v4004_v47 = vld [vmem:[#allocation9_spill] sm:$0xff] }
 0x1b1   : > { %3998 = vst [vmem:[#allocation8_spill] sm:$0xff] %v2950_v63  ;;  %v2956_v6 = vmul.f32 %v2655_v58, %v3999_v16  ;;  %v4008_v63 = vsub.f32 %v4007_v44, %v2523_v23  ;;  %v2977_v16 = vld [vmem:[%s2902_s8] ss:$0 sm:$0xff] }
 0x1b2   : > { %3994 = vst [vmem:[#allocation10_spill] sm:$0xff] %v2938_v29  ;;  %3996 = vst [vmem:[#allocation6_spill] sm:$0xff] %v2944_v39  ;;  %v4002_v29 = vsub.f32 %v4001_v62, %v2523_v23  ;;  %v4005_v39 = vsub.f32 %v4004_v47, %v2523_v23 }
 0x1b3   : > { %4000 = vst [vmem:[#allocation13_spill] sm:$0xff] %v2956_v6  ;;  %v2974_v33 = vmul.f32 %v2655_v58, %v4008_v63  ;;  %v4010_v6 = vld [vmem:[#allocation18_spill] sm:$0xff] }
 0x1b4   : > { %v2962_v61 = vmul.f32 %v2655_v58, %v4002_v29  ;;  %v2968_v5 = vmul.f32 %v2655_v58, %v4005_v39  ;;  %v4011_v62 = vsub.f32 %v4010_v6, %v2523_v23 }
 0x1b5   : > { %4009 = vst [vmem:[#allocation24_spill] sm:$0xff] %v2974_v33  ;;  %v4017_v33 = vsub.f32 %v2381_v41, %v2523_v23 }
 0x1b6   : > { %4003 = vst [vmem:[#allocation15_spill] sm:$0xff] %v2962_v61  ;;  %4006 = vst [vmem:[#allocation21_spill] sm:$0xff] %v2968_v5  ;;  %v2983_v29 = vmul.f32 %v2655_v58, %v4011_v62  ;;  %v4013_v61 = vld [vmem:[#allocation19_spill] sm:$0xff]  ;;  %v4015_v5 = vld [vmem:[#allocation16_spill] sm:$0xff] }
 0x1b7   : > { %v4014_v47 = vsub.f32 %v4013_v61, %v2523_v23  ;;  %v4016_v44 = vsub.f32 %v4015_v5, %v2523_v23  ;;  %v3001_v6 = vmul.f32 %v2655_v58, %v4017_v33  ;;  %v4018_v62 = vld [vmem:[#allocation25_spill] sm:$0xff]  ;;  %v4022_v33 = vsub.f32 %v3941_v26, %v2523_v23 }
 0x1b8   : > { %4012 = vst [vmem:[#allocation20_spill] sm:$0xff] %v2983_v29  ;;  %v4019_v29 = vsub.f32 %v4018_v62, %v2523_v23 }
 0x1b9   : > { %v2989_v39 = vmul.f32 %v2655_v58, %v4014_v47  ;;  %v2995_v63 = vmul.f32 %v2655_v58, %v4016_v44  ;;  %v4020_v47 = vsub.f32 %v3939_v1, %v2523_v23  ;;  %v4021_v44 = vsub.f32 %v3940_v55, %v2523_v23 }
 0x1ba   : > { %v3007_v61 = vmul.f32 %v2655_v58, %v4019_v29  ;;  %v3025_v62 = vmul.f32 %v2655_v58, %v4022_v33  ;;  %v4023_v29 = vsub.f32 %v3942_v56, %v2523_v23  ;;  %v4026_v33 = vsub.f32 %v2429_v49, %v2523_v23 }
 0x1bb   : > { %v3013_v5 = vmul.f32 %v2655_v58, %v4020_v47  ;;  %v3019_v41 = vmul.f32 %v2655_v58, %v4021_v44  ;;  %v4024_v47 = vsub.f32 %v3943_v57, %v2523_v23  ;;  %v4025_v44 = vsub.f32 %v2422_v32, %v2523_v23 }
 0x1bc   : > { %v3031_v1 = vmul.f32 %v2655_v58, %v4023_v29  ;;  %v3049_v56 = vmul.f32 %v2655_v58, %v4026_v33  ;;  %v3053_v29 = vmul.f32 %v2977_v16, %v2661_v27  ;;  %v3057_v57 = vmul.f32 %v2977_v16, %v2667_v21 }
 0x1bd   : > { %v3037_v55 = vmul.f32 %v2655_v58, %v4024_v47  ;;  %v3043_v26 = vmul.f32 %v2655_v58, %v4025_v44  ;;  %v3061_v32 = vmul.f32 %v2977_v16, %v2673_v17  ;;  %v3065_v47 = vmul.f32 %v2977_v16, %v2679_v35 }
 0x1be   : > { %v3069_v49 = vmul.f32 %v2977_v16, %v2685_v37  ;;  %v3073_v27 = vmul.f32 %v2977_v16, %v2691_v34  ;;  %v3077_v21 = vmul.f32 %v2977_v16, %v2697_v36  ;;  %v3081_v17 = vmul.f32 %v2977_v16, %v2703_v48 }
 0x1bf   : > { %v3085_v23 = vmul.f32 %v2977_v16, %v2709_v54  ;;  %v3089_v58 = vmul.f32 %v2977_v16, %v2715_v46  ;;  %v3093_v35 = vmul.f32 %v2977_v16, %v2721_v52  ;;  %v3097_v37 = vmul.f32 %v2977_v16, %v2727_v4 }
 0x1c0   : > { %v3101_v34 = vmul.f32 %v2977_v16, %v2733_v10  ;;  %v3105_v36 = vmul.f32 %v2977_v16, %v2739_v2  ;;  %v3109_v48 = vmul.f32 %v2977_v16, %v2745_v8  ;;  %v3113_v54 = vmul.f32 %v2977_v16, %v2751_v24  ;;  %v4027_v2 = vld [vmem:[#allocation5_spill] sm:$0xff]  ;;  %v4028_v24 = vld [vmem:[#allocation7_spill] sm:$0xff] }
 0x1c1   : > { %v3117_v46 = vmul.f32 %v2977_v16, %v2757_v30  ;;  %v3121_v52 = vmul.f32 %v2977_v16, %v2763_v22  ;;  %v3125_v4 = vmul.f32 %v2977_v16, %v2769_v28  ;;  %v3129_v10 = vmul.f32 %v2977_v16, %v2775_v50 }
 0x1c2   : > { %v3133_v8 = vmul.f32 %v2977_v16, %v4027_v2  ;;  %v3137_v30 = vmul.f32 %v2977_v16, %v4028_v24  ;;  %v3141_v22 = vmul.f32 %v2977_v16, %v2793_v38  ;;  %v3145_v28 = vmul.f32 %v2977_v16, %v2799_v0  ;;  %v4033_v2 = vld [vmem:[#allocation10_spill] sm:$0xff] }
 0x1c3   : > { %v3149_v50 = vmul.f32 %v2977_v16, %v2805_v3  ;;  %v3153_v44 = vmul.f32 %v2977_v16, %v2811_v19  ;;  %v3157_v33 = vmul.f32 %v2977_v16, %v2817_v13  ;;  %v3161_v38 = vmul.f32 %v2977_v16, %v2823_v43  ;;  %v4035_v24 = vld [vmem:[#allocation6_spill] sm:$0xff] }
 0x1c4   : > { %v3165_v0 = vmul.f32 %v2977_v16, %v2829_v42  ;;  %v3169_v3 = vmul.f32 %v2977_v16, %v2835_v60  ;;  %v3173_v19 = vmul.f32 %v2977_v16, %v2841_v45  ;;  %v3177_v13 = vmul.f32 %v2977_v16, %v2847_v51 }
 0x1c5   : > { %v3181_v43 = vmul.f32 %v2977_v16, %v2853_v12  ;;  %v3185_v42 = vmul.f32 %v2977_v16, %v2859_v7  ;;  %v3189_v60 = vmul.f32 %v2977_v16, %v2865_v25  ;;  %v3193_v45 = vmul.f32 %v2977_v16, %v2871_v14 }
 0x1c6   : > { %v3197_v51 = vmul.f32 %v2977_v16, %v2877_v18  ;;  %v3201_v12 = vmul.f32 %v2977_v16, %v2883_v53  ;;  %v3205_v7 = vmul.f32 %v2977_v16, %v2889_v59  ;;  %v3209_v25 = vmul.f32 %v2977_v16, %v2895_v11 }
 0x1c7   : > { %v3213_v14 = vmul.f32 %v2977_v16, %v2908_v9  ;;  %v3217_v18 = vmul.f32 %v2977_v16, %v2914_v15  ;;  %v3221_v53 = vmul.f32 %v2977_v16, %v2920_v20  ;;  %v3225_v59 = vmul.f32 %v2977_v16, %v2926_v31 }
 0x1c8   : > { %v3229_v11 = vmul.f32 %v2977_v16, %v2932_v40  ;;  %v3233_v9 = vmul.f32 %v2977_v16, %v4033_v2  ;;  %v3237_v15 = vmul.f32 %v2977_v16, %v4035_v24 }
 0x1c9   : > { %4029 = vst [vmem:[#allocation22_spill] sm:$0xff] %v3217_v18  ;;  %4030 = vst [vmem:[#allocation3_spill] sm:$0xff] %v3221_v53  ;;  %v4037_v18 = vld [vmem:[#allocation8_spill] sm:$0xff]  ;;  %v4039_v53 = vld [vmem:[#allocation13_spill] sm:$0xff] }
 0x1ca   : > { %4031 = vst [vmem:[#allocation4_spill] sm:$0xff] %v3225_v59  ;;  %4032 = vst [vmem:[#allocation27_spill] sm:$0xff] %v3229_v11  ;;  %v3241_v20 = vmul.f32 %v2977_v16, %v4037_v18  ;;  %v3245_v31 = vmul.f32 %v2977_v16, %v4039_v53  ;;  %v4040_v59 = vld [vmem:[#allocation15_spill] sm:$0xff]  ;;  %v4041_v11 = vld [vmem:[#allocation21_spill] sm:$0xff]  ;;  %v3268_v53 = vmul.f32 %v2977_v16, %v2989_v39 }
 0x1cb   : > { %4034 = vst [vmem:[#allocation23_spill] sm:$0xff] %v3233_v9  ;;  %4036 = vst [vmem:[#allocation26_spill] sm:$0xff] %v3237_v15  ;;  %v3249_v40 = vmul.f32 %v2977_v16, %v4040_v59  ;;  %v3253_v2 = vmul.f32 %v2977_v16, %v4041_v11  ;;  %v4042_v9 = vld [vmem:[#allocation24_spill] sm:$0xff]  ;;  %v3260_v15 = vld [vmem:[%s2902_s8 + $0x1] ss:$0 sm:$0xff]  ;;  %v3272_v59 = vmul.f32 %v2977_v16, %v2995_v63 }
 0x1cc   : > { %4038 = vst [vmem:[#allocation28_spill] sm:$0xff] %v3241_v20  ;;  %v3257_v24 = vmul.f32 %v2977_v16, %v4042_v9  ;;  %v4043_v18 = vld [vmem:[#allocation20_spill] sm:$0xff]  ;;  %v3276_v11 = vmul.f32 %v2977_v16, %v3001_v6  ;;  %v3280_v9 = vmul.f32 %v2977_v16, %v3007_v61  ;;  %v3288_v39 = vmul.f32 %v2977_v16, %v3019_v41 }
 0x1cd   : > { %v3264_v20 = vmul.f32 %v2977_v16, %v4043_v18  ;;  %v3284_v18 = vmul.f32 %v2977_v16, %v3013_v5  ;;  %v3292_v63 = vmul.f32 %v2977_v16, %v3025_v62  ;;  %v3296_v6 = vmul.f32 %v2977_v16, %v3031_v1 }
 0x1ce   : > { %v3300_v61 = vmul.f32 %v2977_v16, %v3037_v55  ;;  %v3304_v5 = vmul.f32 %v2977_v16, %v3043_v26  ;;  %v3308_v41 = vmul.f32 %v2977_v16, %v3049_v56  ;;  %v3312_v62 = vadd.f32 %v3260_v15, %v3053_v29 }
 0x1cf   : > { %v3316_v1 = vadd.f32 %v3260_v15, %v3057_v57  ;;  %v3320_v55 = vadd.f32 %v3260_v15, %v3061_v32  ;;  %v3324_v26 = vadd.f32 %v3260_v15, %v3065_v47  ;;  %v3328_v16 = vadd.f32 %v3260_v15, %v3069_v49 }
 0x1d0   : > { %v3332_v56 = vadd.f32 %v3260_v15, %v3073_v27  ;;  %v3336_v29 = vadd.f32 %v3260_v15, %v3077_v21  ;;  %v3340_v57 = vadd.f32 %v3260_v15, %v3081_v17  ;;  %v3344_v32 = vadd.f32 %v3260_v15, %v3085_v23 }
 0x1d1   : > { %v3348_v47 = vadd.f32 %v3260_v15, %v3089_v58  ;;  %v3352_v49 = vadd.f32 %v3260_v15, %v3093_v35  ;;  %v3356_v27 = vadd.f32 %v3260_v15, %v3097_v37  ;;  %v3360_v21 = vadd.f32 %v3260_v15, %v3101_v34 }
 0x1d2   : > { %v3364_v17 = vadd.f32 %v3260_v15, %v3105_v36  ;;  %v3368_v23 = vadd.f32 %v3260_v15, %v3109_v48  ;;  %v3372_v58 = vadd.f32 %v3260_v15, %v3113_v54  ;;  %v3376_v35 = vadd.f32 %v3260_v15, %v3117_v46 }
 0x1d3   : > { %v3380_v37 = vadd.f32 %v3260_v15, %v3121_v52  ;;  %v3384_v34 = vadd.f32 %v3260_v15, %v3125_v4  ;;  %v3388_v36 = vadd.f32 %v3260_v15, %v3129_v10  ;;  %v3392_v48 = vadd.f32 %v3260_v15, %v3133_v8 }
 0x1d4   : > { %v3396_v54 = vadd.f32 %v3260_v15, %v3137_v30  ;;  %v3400_v46 = vadd.f32 %v3260_v15, %v3141_v22  ;;  %v3404_v52 = vadd.f32 %v3260_v15, %v3145_v28  ;;  %v3408_v4 = vadd.f32 %v3260_v15, %v3149_v50 }
 0x1d5   : > { %v3412_v10 = vadd.f32 %v3260_v15, %v3153_v44  ;;  %v3416_v8 = vadd.f32 %v3260_v15, %v3157_v33  ;;  %v3420_v30 = vadd.f32 %v3260_v15, %v3161_v38  ;;  %v3424_v22 = vadd.f32 %v3260_v15, %v3165_v0 }
 0x1d6   : > { %v3428_v28 = vadd.f32 %v3260_v15, %v3169_v3  ;;  %v3432_v50 = vadd.f32 %v3260_v15, %v3173_v19  ;;  %v3436_v44 = vadd.f32 %v3260_v15, %v3177_v13  ;;  %v3440_v33 = vadd.f32 %v3260_v15, %v3181_v43 }
 0x1d7   : > { %v3444_v38 = vadd.f32 %v3260_v15, %v3185_v42  ;;  %v3448_v0 = vadd.f32 %v3260_v15, %v3189_v60  ;;  %v3452_v3 = vadd.f32 %v3260_v15, %v3193_v45  ;;  %v3457_v19 = vadd.f32 %v3260_v15, %v3197_v51  ;;  %v4049_v45 = vld [vmem:[#allocation22_spill] sm:$0xff] }
 0x1d8   : > { %v3461_v13 = vadd.f32 %v3260_v15, %v3201_v12  ;;  %v3465_v43 = vadd.f32 %v3260_v15, %v3205_v7  ;;  %v3469_v42 = vadd.f32 %v3260_v15, %v3209_v25  ;;  %v3473_v60 = vadd.f32 %v3260_v15, %v3213_v14 }
 0x1d9   : > { %4044 = vst [vmem:[#allocation29_spill] sm:$0xff] %v3457_v19  ;;  %v3477_v51 = vadd.f32 %v3260_v15, %v4049_v45  ;;  %v4051_v19 = vld [vmem:[#allocation3_spill] sm:$0xff] }
 0x1da   : > { %4045 = vst [vmem:[#allocation14_spill] sm:$0xff] %v3461_v13  ;;  %4046 = vst [vmem:[#allocation17_spill] sm:$0xff] %v3465_v43  ;;  %v3481_v12 = vadd.f32 %v3260_v15, %v4051_v19  ;;  %v4052_v13 = vld [vmem:[#allocation4_spill] sm:$0xff]  ;;  %v4053_v43 = vld [vmem:[#allocation27_spill] sm:$0xff] }
 0x1db   : > { %4047 = vst [vmem:[#allocation12_spill] sm:$0xff] %v3469_v42  ;;  %4048 = vst [vmem:[#allocation9_spill] sm:$0xff] %v3473_v60  ;;  %v3485_v7 = vadd.f32 %v3260_v15, %v4052_v13  ;;  %v3489_v25 = vadd.f32 %v3260_v15, %v4053_v43  ;;  %v4054_v42 = vld [vmem:[#allocation23_spill] sm:$0xff]  ;;  %v4055_v60 = vld [vmem:[#allocation26_spill] sm:$0xff]  ;;  %v3505_v13 = vadd.f32 %v3260_v15, %v3245_v31 }
 0x1dc   : > { %4050 = vst [vmem:[#allocation11_spill] sm:$0xff] %v3477_v51  ;;  %v3493_v14 = vadd.f32 %v3260_v15, %v4054_v42  ;;  %v3497_v45 = vadd.f32 %v3260_v15, %v4055_v60  ;;  %v4056_v51 = vld [vmem:[#allocation28_spill] sm:$0xff]  ;;  %v3509_v43 = vadd.f32 %v3260_v15, %v3249_v40  ;;  %v3513_v42 = vadd.f32 %v3260_v15, %v3253_v2 }
 0x1dd   : > { %v3501_v19 = vadd.f32 %v3260_v15, %v4056_v51  ;;  %v3517_v60 = vadd.f32 %v3260_v15, %v3257_v24  ;;  %v3521_v51 = vadd.f32 %v3260_v15, %v3264_v20  ;;  %v3525_v31 = vadd.f32 %v3260_v15, %v3268_v53 }
 0x1de   : > { %v3529_v40 = vadd.f32 %v3260_v15, %v3272_v59  ;;  %v3533_v2 = vadd.f32 %v3260_v15, %v3276_v11  ;;  %v3537_v24 = vadd.f32 %v3260_v15, %v3280_v9  ;;  %v3541_v20 = vadd.f32 %v3260_v15, %v3284_v18 }
 0x1df   : > { %v3545_v53 = vadd.f32 %v3260_v15, %v3288_v39  ;;  %v3549_v59 = vadd.f32 %v3260_v15, %v3292_v63  ;;  %v3553_v11 = vadd.f32 %v3260_v15, %v3296_v6  ;;  %v3557_v9 = vadd.f32 %v3260_v15, %v3300_v61 }
 0x1e0   : > { %v3561_v18 = vadd.f32 %v3260_v15, %v3304_v5  ;;  %v3565_v39 = vadd.f32 %v3260_v15, %v3308_v41  ;;  %v1271_v63 = vmax.f32 %v3316_v1, 0.0  ;;  %v1273_v6 = vmax.f32 %v3324_v26, 0.0 }
 0x1e1   : > { %4057 = vst [vmem:[#allocation18_spill] sm:$0xff] %v3545_v53  ;;  %4058 = vst [vmem:[#allocation19_spill] sm:$0xff] %v3549_v59  ;;  %v1270_v53 = vmax.f32 %v3312_v62, 0.0  ;;  %v1272_v59 = vmax.f32 %v3320_v55, 0.0  ;;  %v1275_v61 = vmax.f32 %v3332_v56, 0.0  ;;  %v1277_v5 = vmax.f32 %v3340_v57, 0.0 }
 0x1e2   : > { %4059 = vst [vmem:[#allocation16_spill] sm:$0xff] %v3553_v11  ;;  %4060 = vst [vmem:[#allocation25_spill] sm:$0xff] %v3557_v9  ;;  %v1274_v11 = vmax.f32 %v3328_v16, 0.0  ;;  %v1276_v9 = vmax.f32 %v3336_v29, 0.0  ;;  %v1279_v15 = vmax.f32 %v3348_v47, 0.0  ;;  %v1280_v41 = vmax.f32 %v3352_v49, 0.0 }
 0x1e3   : > { %4061 = vst [vmem:[#allocation5_spill] sm:$0xff] %v3561_v18  ;;  %v1278_v18 = vmax.f32 %v3344_v32, 0.0  ;;  %v1281_v62 = vmax.f32 %v3356_v27, 0.0  ;;  %1334 = vst [vmem:[%s3579_s24] sm:$0xff] %v1270_v53  ;;  %v1282_v1 = vmax.f32 %v3360_v21, 0.0  ;;  %v1283_v55 = vmax.f32 %v3364_v17, 0.0 }
 0x1e4   : > { %1335 = vst [vmem:[%s3579_s24 + $0x8] sm:$0xff] %v1271_v63  ;;  %1336 = vst [vmem:[%s3579_s24 + $0x10] sm:$0xff] %v1272_v59  ;;  %v1284_v26 = vmax.f32 %v3368_v23, 0.0  ;;  %v1285_v16 = vmax.f32 %v3372_v58, 0.0  ;;  %v1286_v56 = vmax.f32 %v3376_v35, 0.0  ;;  %v1287_v29 = vmax.f32 %v3380_v37, 0.0 }
 0x1e5   : > { %1337 = vst [vmem:[%s3579_s24 + $0x18] sm:$0xff] %v1273_v6  ;;  %1338 = vst [vmem:[%s3579_s24 + $0x20] sm:$0xff] %v1274_v11  ;;  %v1288_v57 = vmax.f32 %v3384_v34, 0.0  ;;  %v1289_v32 = vmax.f32 %v3388_v36, 0.0  ;;  %v1290_v47 = vmax.f32 %v3392_v48, 0.0  ;;  %v1291_v49 = vmax.f32 %v3396_v54, 0.0 }
 0x1e6   : > { %1339 = vst [vmem:[%s3579_s24 + $0x28] sm:$0xff] %v1275_v61  ;;  %1340 = vst [vmem:[%s3579_s24 + $0x30] sm:$0xff] %v1276_v9  ;;  %v1292_v27 = vmax.f32 %v3400_v46, 0.0  ;;  %v1293_v21 = vmax.f32 %v3404_v52, 0.0  ;;  %v1294_v17 = vmax.f32 %v3408_v4, 0.0  ;;  %v1295_v23 = vmax.f32 %v3412_v10, 0.0 }
 0x1e7   : > { %1341 = vst [vmem:[%s3579_s24 + $0x38] sm:$0xff] %v1277_v5  ;;  %1342 = vst [vmem:[%s3579_s24 + $0x40] sm:$0xff] %v1278_v18  ;;  %v1296_v58 = vmax.f32 %v3416_v8, 0.0  ;;  %v1297_v35 = vmax.f32 %v3420_v30, 0.0  ;;  %v1298_v37 = vmax.f32 %v3424_v22, 0.0  ;;  %v1299_v34 = vmax.f32 %v3428_v28, 0.0 }
 0x1e8   : > { %1343 = vst [vmem:[%s3579_s24 + $0x48] sm:$0xff] %v1279_v15  ;;  %1344 = vst [vmem:[%s3579_s24 + $0x50] sm:$0xff] %v1280_v41  ;;  %v1300_v36 = vmax.f32 %v3432_v50, 0.0  ;;  %v1301_v48 = vmax.f32 %v3436_v44, 0.0  ;;  %v1302_v54 = vmax.f32 %v3440_v33, 0.0  ;;  %v1303_v46 = vmax.f32 %v3444_v38, 0.0 }
 0x1e9   : > { %1345 = vst [vmem:[%s3579_s24 + $0x58] sm:$0xff] %v1281_v62  ;;  %1346 = vst [vmem:[%s3579_s24 + $0x60] sm:$0xff] %v1282_v1  ;;  %v1304_v52 = vmax.f32 %v3448_v0, 0.0  ;;  %v1305_v4 = vmax.f32 %v3452_v3, 0.0  ;;  %v4062_v10 = vld [vmem:[#allocation29_spill] sm:$0xff]  ;;  %v4063_v30 = vld [vmem:[#allocation14_spill] sm:$0xff] }
 0x1ea   : > { %1347 = vst [vmem:[%s3579_s24 + $0x68] sm:$0xff] %v1283_v55  ;;  %1348 = vst [vmem:[%s3579_s24 + $0x70] sm:$0xff] %v1284_v26  ;;  %v1306_v8 = vmax.f32 %v4062_v10, 0.0  ;;  %v1307_v22 = vmax.f32 %v4063_v30, 0.0  ;;  %v4064_v28 = vld [vmem:[#allocation17_spill] sm:$0xff]  ;;  %v4065_v44 = vld [vmem:[#allocation12_spill] sm:$0xff] }
 0x1eb   : > { %1349 = vst [vmem:[%s3579_s24 + $0x78] sm:$0xff] %v1285_v16  ;;  %1350 = vst [vmem:[%s3579_s24 + $0x80] sm:$0xff] %v1286_v56  ;;  %v1308_v50 = vmax.f32 %v4064_v28, 0.0  ;;  %v1309_v33 = vmax.f32 %v4065_v44, 0.0  ;;  %v4066_v38 = vld [vmem:[#allocation9_spill] sm:$0xff]  ;;  %v4067_v3 = vld [vmem:[#allocation11_spill] sm:$0xff] }
 0x1ec   : > { %1351 = vst [vmem:[%s3579_s24 + $0x88] sm:$0xff] %v1287_v29  ;;  %1352 = vst [vmem:[%s3579_s24 + $0x90] sm:$0xff] %v1288_v57  ;;  %v1310_v0 = vmax.f32 %v4066_v38, 0.0  ;;  %v1311_v53 = vmax.f32 %v4067_v3, 0.0  ;;  %v1312_v59 = vmax.f32 %v3481_v12, 0.0  ;;  %v1313_v11 = vmax.f32 %v3485_v7, 0.0 }
 0x1ed   : > { %1353 = vst [vmem:[%s3579_s24 + $0x98] sm:$0xff] %v1289_v32  ;;  %1354 = vst [vmem:[%s3579_s24 + $0xa0] sm:$0xff] %v1290_v47  ;;  %v1314_v9 = vmax.f32 %v3489_v25, 0.0  ;;  %v1315_v18 = vmax.f32 %v3493_v14, 0.0  ;;  %v1316_v63 = vmax.f32 %v3497_v45, 0.0  ;;  %v1317_v6 = vmax.f32 %v3501_v19, 0.0 }
 0x1ee   : > { %1355 = vst [vmem:[%s3579_s24 + $0xa8] sm:$0xff] %v1291_v49  ;;  %1356 = vst [vmem:[%s3579_s24 + $0xb0] sm:$0xff] %v1292_v27  ;;  %v1318_v12 = vmax.f32 %v3505_v13, 0.0  ;;  %v1319_v7 = vmax.f32 %v3509_v43, 0.0  ;;  %v1320_v25 = vmax.f32 %v3513_v42, 0.0  ;;  %v1321_v14 = vmax.f32 %v3517_v60, 0.0 }
 0x1ef   : > { %1357 = vst [vmem:[%s3579_s24 + $0xb8] sm:$0xff] %v1293_v21  ;;  %1358 = vst [vmem:[%s3579_s24 + $0xc0] sm:$0xff] %v1294_v17  ;;  %v1322_v45 = vmax.f32 %v3521_v51, 0.0  ;;  %v1323_v19 = vmax.f32 %v3525_v31, 0.0  ;;  %v1324_v13 = vmax.f32 %v3529_v40, 0.0  ;;  %v1325_v43 = vmax.f32 %v3533_v2, 0.0 }
 0x1f0   : > { %1359 = vst [vmem:[%s3579_s24 + $0xc8] sm:$0xff] %v1295_v23  ;;  %1360 = vst [vmem:[%s3579_s24 + $0xd0] sm:$0xff] %v1296_v58  ;;  %v1326_v42 = vmax.f32 %v3537_v24, 0.0  ;;  %v1327_v60 = vmax.f32 %v3541_v20, 0.0  ;;  %v4068_v51 = vld [vmem:[#allocation18_spill] sm:$0xff]  ;;  %v4069_v61 = vld [vmem:[#allocation19_spill] sm:$0xff] }
 0x1f1   : > { %1361 = vst [vmem:[%s3579_s24 + $0xd8] sm:$0xff] %v1297_v35  ;;  %1362 = vst [vmem:[%s3579_s24 + $0xe0] sm:$0xff] %v1298_v37  ;;  %v1328_v31 = vmax.f32 %v4068_v51, 0.0  ;;  %v1329_v40 = vmax.f32 %v4069_v61, 0.0  ;;  %v4070_v2 = vld [vmem:[#allocation16_spill] sm:$0xff]  ;;  %v4071_v5 = vld [vmem:[#allocation25_spill] sm:$0xff] }
 0x1f2   : > { %1363 = vst [vmem:[%s3579_s24 + $0xe8] sm:$0xff] %v1299_v34  ;;  %1364 = vst [vmem:[%s3579_s24 + $0xf0] sm:$0xff] %v1300_v36  ;;  %v1330_v24 = vmax.f32 %v4070_v2, 0.0  ;;  %v1331_v15 = vmax.f32 %v4071_v5, 0.0  ;;  %v4072_v20 = vld [vmem:[#allocation5_spill] sm:$0xff]  ;;  %v1333_v62 = vmax.f32 %v3565_v39, 0.0 }
 0x1f3   : > { %1365 = vst [vmem:[%s3579_s24 + $0xf8] sm:$0xff] %v1301_v48  ;;  %1366 = vst [vmem:[%s3579_s24 + $0x100] sm:$0xff] %v1302_v54  ;;  %v1332_v41 = vmax.f32 %v4072_v20, 0.0  ;;  %v1560_v39 = vld [vmem:[%s3579_s24] sm:$0xff] (%p2061_p4)  ;;  %v1562_v1 = vld [vmem:[%s3579_s24 + $0x8] sm:$0xff] (%p2061_p4) }
 0x1f4   : > { %1367 = vst [vmem:[%s3579_s24 + $0x108] sm:$0xff] %v1303_v46  ;;  %1368 = vst [vmem:[%s3579_s24 + $0x110] sm:$0xff] %v1304_v52  ;;  %v1564_v55 = vld [vmem:[%s3579_s24 + $0x10] sm:$0xff] (%p2061_p4)  ;;  %v1566_v26 = vld [vmem:[%s3579_s24 + $0x18] sm:$0xff] (%p2061_p4) }
 0x1f5   : > { %1369 = vst [vmem:[%s3579_s24 + $0x118] sm:$0xff] %v1305_v4  ;;  %1370 = vst [vmem:[%s3579_s24 + $0x120] sm:$0xff] %v1306_v8  ;;  %v1568_v16 = vld [vmem:[%s3579_s24 + $0x20] sm:$0xff] (%p2061_p4)  ;;  %v1570_v56 = vld [vmem:[%s3579_s24 + $0x28] sm:$0xff] (%p2061_p4) }
 0x1f6   : > { %1371 = vst [vmem:[%s3579_s24 + $0x128] sm:$0xff] %v1307_v22  ;;  %1372 = vst [vmem:[%s3579_s24 + $0x130] sm:$0xff] %v1308_v50  ;;  %v1572_v29 = vld [vmem:[%s3579_s24 + $0x30] sm:$0xff] (%p2061_p4)  ;;  %v1574_v57 = vld [vmem:[%s3579_s24 + $0x38] sm:$0xff] (%p2061_p4) }
 0x1f7   : > { %1373 = vst [vmem:[%s3579_s24 + $0x138] sm:$0xff] %v1309_v33  ;;  %1374 = vst [vmem:[%s3579_s24 + $0x140] sm:$0xff] %v1310_v0  ;;  %v1576_v32 = vld [vmem:[%s3579_s24 + $0x40] sm:$0xff] (%p2061_p4)  ;;  %v1578_v47 = vld [vmem:[%s3579_s24 + $0x48] sm:$0xff] (%p2061_p4) }
 0x1f8   : > { %1375 = vst [vmem:[%s3579_s24 + $0x148] sm:$0xff] %v1311_v53  ;;  %1376 = vst [vmem:[%s3579_s24 + $0x150] sm:$0xff] %v1312_v59  ;;  %v1580_v49 = vld [vmem:[%s3579_s24 + $0x50] sm:$0xff] (%p2061_p4)  ;;  %v1582_v27 = vld [vmem:[%s3579_s24 + $0x58] sm:$0xff] (%p2061_p4) }
 0x1f9   : > { %1377 = vst [vmem:[%s3579_s24 + $0x158] sm:$0xff] %v1313_v11  ;;  %1378 = vst [vmem:[%s3579_s24 + $0x160] sm:$0xff] %v1314_v9  ;;  %v1584_v21 = vld [vmem:[%s3579_s24 + $0x60] sm:$0xff] (%p2061_p4)  ;;  %v1586_v17 = vld [vmem:[%s3579_s24 + $0x68] sm:$0xff] (%p2061_p4) }
 0x1fa   : > { %1379 = vst [vmem:[%s3579_s24 + $0x168] sm:$0xff] %v1315_v18  ;;  %1380 = vst [vmem:[%s3579_s24 + $0x170] sm:$0xff] %v1316_v63  ;;  %v1588_v23 = vld [vmem:[%s3579_s24 + $0x70] sm:$0xff] (%p2061_p4)  ;;  %v1590_v58 = vld [vmem:[%s3579_s24 + $0x78] sm:$0xff] (%p2061_p4) }
 0x1fb   : > { %1381 = vst [vmem:[%s3579_s24 + $0x178] sm:$0xff] %v1317_v6  ;;  %1382 = vst [vmem:[%s3579_s24 + $0x180] sm:$0xff] %v1318_v12  ;;  %v1592_v35 = vld [vmem:[%s3579_s24 + $0x80] sm:$0xff] (%p2061_p4)  ;;  %v1594_v37 = vld [vmem:[%s3579_s24 + $0x88] sm:$0xff] (%p2061_p4) }
 0x1fc   : > { %1383 = vst [vmem:[%s3579_s24 + $0x188] sm:$0xff] %v1319_v7  ;;  %1384 = vst [vmem:[%s3579_s24 + $0x190] sm:$0xff] %v1320_v25  ;;  %v1596_v34 = vld [vmem:[%s3579_s24 + $0x90] sm:$0xff] (%p2061_p4)  ;;  %v1598_v36 = vld [vmem:[%s3579_s24 + $0x98] sm:$0xff] (%p2061_p4) }
 0x1fd   : > { %1385 = vst [vmem:[%s3579_s24 + $0x198] sm:$0xff] %v1321_v14  ;;  %1386 = vst [vmem:[%s3579_s24 + $0x1a0] sm:$0xff] %v1322_v45  ;;  %1404 = sbr.rel (!%p2061_p4) target bundleno = 548 (0x224), region = 36  ;;  %v1600_v48 = vld [vmem:[%s3579_s24 + $0xa0] sm:$0xff] (%p2061_p4)  ;;  %v1602_v54 = vld [vmem:[%s3579_s24 + $0xa8] sm:$0xff] (%p2061_p4) }
 0x1fe   : > { %1387 = vst [vmem:[%s3579_s24 + $0x1a8] sm:$0xff] %v1323_v19  ;;  %1388 = vst [vmem:[%s3579_s24 + $0x1b0] sm:$0xff] %v1324_v13  ;;  %v1604_v46 = vld [vmem:[%s3579_s24 + $0xb0] sm:$0xff] (%p2061_p4)  ;;  %v1606_v52 = vld [vmem:[%s3579_s24 + $0xb8] sm:$0xff] (%p2061_p4) }
 0x1ff   : > { %1389 = vst [vmem:[%s3579_s24 + $0x1b8] sm:$0xff] %v1325_v43  ;;  %1390 = vst [vmem:[%s3579_s24 + $0x1c0] sm:$0xff] %v1326_v42  ;;  %v1608_v4 = vld [vmem:[%s3579_s24 + $0xc0] sm:$0xff] (%p2061_p4)  ;;  %v1610_v10 = vld [vmem:[%s3579_s24 + $0xc8] sm:$0xff] (%p2061_p4) }
 0x200   : > { %1391 = vst [vmem:[%s3579_s24 + $0x1c8] sm:$0xff] %v1327_v60  ;;  %1392 = vst [vmem:[%s3579_s24 + $0x1d0] sm:$0xff] %v1328_v31  ;;  %v1612_v8 = vld [vmem:[%s3579_s24 + $0xd0] sm:$0xff] (%p2061_p4)  ;;  %v1614_v30 = vld [vmem:[%s3579_s24 + $0xd8] sm:$0xff] (%p2061_p4) }
 0x201   : > { %1393 = vst [vmem:[%s3579_s24 + $0x1d8] sm:$0xff] %v1329_v40  ;;  %1394 = vst [vmem:[%s3579_s24 + $0x1e0] sm:$0xff] %v1330_v24  ;;  %v1616_v22 = vld [vmem:[%s3579_s24 + $0xe0] sm:$0xff] (%p2061_p4)  ;;  %v1618_v28 = vld [vmem:[%s3579_s24 + $0xe8] sm:$0xff] (%p2061_p4) }
 0x202   : > { %1395 = vst [vmem:[%s3579_s24 + $0x1e8] sm:$0xff] %v1331_v15  ;;  %1396 = vst [vmem:[%s3579_s24 + $0x1f0] sm:$0xff] %v1332_v41  ;;  %v1620_v50 = vld [vmem:[%s3579_s24 + $0xf0] sm:$0xff] (%p2061_p4)  ;;  %v1622_v44 = vld [vmem:[%s3579_s24 + $0xf8] sm:$0xff] (%p2061_p4) }
 0x203   : > { %1397 = vst [vmem:[%s3579_s24 + $0x1f8] sm:$0xff] %v1333_v62  ;;  %1561 = vst [vmem:[%s3706_s14] sm:$0xff] (%p2061_p4), %v1560_v39  ;;  %v1624_v33 = vld [vmem:[%s3579_s24 + $0x100] sm:$0xff] (%p2061_p4)  ;;  %v1626_v38 = vld [vmem:[%s3579_s24 + $0x108] sm:$0xff] (%p2061_p4) }
 0x204   : > { %1563 = vst [vmem:[%s3706_s14 + $0x20] sm:$0xff] %v1562_v1  ;;  %1565 = vst [vmem:[%s3706_s14 + $0x40] sm:$0xff] %v1564_v55  ;;  %v1628_v0 = vld [vmem:[%s3579_s24 + $0x110] sm:$0xff]  ;;  %v1630_v3 = vld [vmem:[%s3579_s24 + $0x118] sm:$0xff] }
 0x205   : > { %1567 = vst [vmem:[%s3706_s14 + $0x60] sm:$0xff] %v1566_v26  ;;  %1569 = vst [vmem:[%s3706_s14 + $0x80] sm:$0xff] %v1568_v16  ;;  %v1632_v53 = vld [vmem:[%s3579_s24 + $0x120] sm:$0xff]  ;;  %v1634_v59 = vld [vmem:[%s3579_s24 + $0x128] sm:$0xff] }
 0x206   : > { %1571 = vst [vmem:[%s3706_s14 + $0xa0] sm:$0xff] %v1570_v56  ;;  %1573 = vst [vmem:[%s3706_s14 + $0xc0] sm:$0xff] %v1572_v29  ;;  %v1636_v11 = vld [vmem:[%s3579_s24 + $0x130] sm:$0xff]  ;;  %v1638_v9 = vld [vmem:[%s3579_s24 + $0x138] sm:$0xff] }
 0x207   : > { %1575 = vst [vmem:[%s3706_s14 + $0xe0] sm:$0xff] %v1574_v57  ;;  %1577 = vst [vmem:[%s3706_s14 + $0x100] sm:$0xff] %v1576_v32  ;;  %v1640_v18 = vld [vmem:[%s3579_s24 + $0x140] sm:$0xff]  ;;  %v1642_v63 = vld [vmem:[%s3579_s24 + $0x148] sm:$0xff] }
 0x208   : > { %1579 = vst [vmem:[%s3706_s14 + $0x120] sm:$0xff] %v1578_v47  ;;  %1581 = vst [vmem:[%s3706_s14 + $0x140] sm:$0xff] %v1580_v49  ;;  %v1644_v6 = vld [vmem:[%s3579_s24 + $0x150] sm:$0xff]  ;;  %v1646_v12 = vld [vmem:[%s3579_s24 + $0x158] sm:$0xff] }
 0x209   : > { %1583 = vst [vmem:[%s3706_s14 + $0x160] sm:$0xff] %v1582_v27  ;;  %1585 = vst [vmem:[%s3706_s14 + $0x180] sm:$0xff] %v1584_v21  ;;  %v1648_v7 = vld [vmem:[%s3579_s24 + $0x160] sm:$0xff]  ;;  %v1650_v25 = vld [vmem:[%s3579_s24 + $0x168] sm:$0xff] }
 0x20a   : > { %1587 = vst [vmem:[%s3706_s14 + $0x1a0] sm:$0xff] %v1586_v17  ;;  %1589 = vst [vmem:[%s3706_s14 + $0x1c0] sm:$0xff] %v1588_v23  ;;  %v1652_v14 = vld [vmem:[%s3579_s24 + $0x170] sm:$0xff]  ;;  %v1654_v45 = vld [vmem:[%s3579_s24 + $0x178] sm:$0xff] }
 0x20b   : > { %1591 = vst [vmem:[%s3706_s14 + $0x1e0] sm:$0xff] %v1590_v58  ;;  %1593 = vst [vmem:[%s3706_s14 + $0x200] sm:$0xff] %v1592_v35  ;;  %v1656_v19 = vld [vmem:[%s3579_s24 + $0x180] sm:$0xff]  ;;  %v1658_v13 = vld [vmem:[%s3579_s24 + $0x188] sm:$0xff] }
 0x20c   : > { %1595 = vst [vmem:[%s3706_s14 + $0x220] sm:$0xff] %v1594_v37  ;;  %1597 = vst [vmem:[%s3706_s14 + $0x240] sm:$0xff] %v1596_v34  ;;  %v1660_v43 = vld [vmem:[%s3579_s24 + $0x190] sm:$0xff]  ;;  %v1662_v42 = vld [vmem:[%s3579_s24 + $0x198] sm:$0xff] }
 0x20d   : > { %1599 = vst [vmem:[%s3706_s14 + $0x260] sm:$0xff] %v1598_v36  ;;  %1601 = vst [vmem:[%s3706_s14 + $0x280] sm:$0xff] %v1600_v48  ;;  %v1664_v60 = vld [vmem:[%s3579_s24 + $0x1a0] sm:$0xff]  ;;  %v1666_v51 = vld [vmem:[%s3579_s24 + $0x1a8] sm:$0xff] }
 0x20e   : > { %1603 = vst [vmem:[%s3706_s14 + $0x2a0] sm:$0xff] %v1602_v54  ;;  %1605 = vst [vmem:[%s3706_s14 + $0x2c0] sm:$0xff] %v1604_v46  ;;  %v1668_v31 = vld [vmem:[%s3579_s24 + $0x1b0] sm:$0xff]  ;;  %v1670_v61 = vld [vmem:[%s3579_s24 + $0x1b8] sm:$0xff] }
 0x20f   : > { %1607 = vst [vmem:[%s3706_s14 + $0x2e0] sm:$0xff] %v1606_v52  ;;  %1609 = vst [vmem:[%s3706_s14 + $0x300] sm:$0xff] %v1608_v4  ;;  %v1672_v40 = vld [vmem:[%s3579_s24 + $0x1c0] sm:$0xff]  ;;  %v1674_v2 = vld [vmem:[%s3579_s24 + $0x1c8] sm:$0xff] }
 0x210   : > { %1611 = vst [vmem:[%s3706_s14 + $0x320] sm:$0xff] %v1610_v10  ;;  %1613 = vst [vmem:[%s3706_s14 + $0x340] sm:$0xff] %v1612_v8  ;;  %v1676_v24 = vld [vmem:[%s3579_s24 + $0x1d0] sm:$0xff]  ;;  %v1678_v5 = vld [vmem:[%s3579_s24 + $0x1d8] sm:$0xff] }
 0x211   : > { %1615 = vst [vmem:[%s3706_s14 + $0x360] sm:$0xff] %v1614_v30  ;;  %1617 = vst [vmem:[%s3706_s14 + $0x380] sm:$0xff] %v1616_v22  ;;  %v1680_v15 = vld [vmem:[%s3579_s24 + $0x1e0] sm:$0xff]  ;;  %v1682_v20 = vld [vmem:[%s3579_s24 + $0x1e8] sm:$0xff] }
 0x212   : > { %1619 = vst [vmem:[%s3706_s14 + $0x3a0] sm:$0xff] %v1618_v28  ;;  %1621 = vst [vmem:[%s3706_s14 + $0x3c0] sm:$0xff] %v1620_v50  ;;  %v1684_v41 = vld [vmem:[%s3579_s24 + $0x1f0] sm:$0xff]  ;;  %v1686_v62 = vld [vmem:[%s3579_s24 + $0x1f8] sm:$0xff] }
 0x213   : > { %1623 = vst [vmem:[%s3706_s14 + $0x3e0] sm:$0xff] %v1622_v44  ;;  %1625 = vst [vmem:[%s3706_s14 + $0x400] sm:$0xff] %v1624_v33 }
 0x214   : > { %1627 = vst [vmem:[%s3706_s14 + $0x420] sm:$0xff] %v1626_v38  ;;  %1629 = vst [vmem:[%s3706_s14 + $0x440] sm:$0xff] %v1628_v0 }
 0x215   : > { %1631 = vst [vmem:[%s3706_s14 + $0x460] sm:$0xff] %v1630_v3  ;;  %1633 = vst [vmem:[%s3706_s14 + $0x480] sm:$0xff] %v1632_v53 }
 0x216   : > { %1635 = vst [vmem:[%s3706_s14 + $0x4a0] sm:$0xff] %v1634_v59  ;;  %1637 = vst [vmem:[%s3706_s14 + $0x4c0] sm:$0xff] %v1636_v11 }
 0x217   : > { %1639 = vst [vmem:[%s3706_s14 + $0x4e0] sm:$0xff] %v1638_v9  ;;  %1641 = vst [vmem:[%s3706_s14 + $0x500] sm:$0xff] %v1640_v18 }
 0x218   : > { %1643 = vst [vmem:[%s3706_s14 + $0x520] sm:$0xff] %v1642_v63  ;;  %1645 = vst [vmem:[%s3706_s14 + $0x540] sm:$0xff] %v1644_v6 }
 0x219   : > { %1647 = vst [vmem:[%s3706_s14 + $0x560] sm:$0xff] %v1646_v12  ;;  %1649 = vst [vmem:[%s3706_s14 + $0x580] sm:$0xff] %v1648_v7 }
 0x21a   : > { %1651 = vst [vmem:[%s3706_s14 + $0x5a0] sm:$0xff] %v1650_v25  ;;  %1653 = vst [vmem:[%s3706_s14 + $0x5c0] sm:$0xff] %v1652_v14 }
 0x21b   : > { %1655 = vst [vmem:[%s3706_s14 + $0x5e0] sm:$0xff] %v1654_v45  ;;  %1657 = vst [vmem:[%s3706_s14 + $0x600] sm:$0xff] %v1656_v19 }
 0x21c   : > { %1659 = vst [vmem:[%s3706_s14 + $0x620] sm:$0xff] %v1658_v13  ;;  %1661 = vst [vmem:[%s3706_s14 + $0x640] sm:$0xff] %v1660_v43 }
 0x21d   : > { %1663 = vst [vmem:[%s3706_s14 + $0x660] sm:$0xff] %v1662_v42  ;;  %1665 = vst [vmem:[%s3706_s14 + $0x680] sm:$0xff] %v1664_v60 }
 0x21e   : > { %1667 = vst [vmem:[%s3706_s14 + $0x6a0] sm:$0xff] %v1666_v51  ;;  %1669 = vst [vmem:[%s3706_s14 + $0x6c0] sm:$0xff] %v1668_v31 }
 0x21f   : > { %1671 = vst [vmem:[%s3706_s14 + $0x6e0] sm:$0xff] %v1670_v61  ;;  %1673 = vst [vmem:[%s3706_s14 + $0x700] sm:$0xff] %v1672_v40 }
 0x220   : > { %1675 = vst [vmem:[%s3706_s14 + $0x720] sm:$0xff] %v1674_v2  ;;  %1677 = vst [vmem:[%s3706_s14 + $0x740] sm:$0xff] %v1676_v24 }
 0x221   : > { %1679 = vst [vmem:[%s3706_s14 + $0x760] sm:$0xff] %v1678_v5  ;;  %1681 = vst [vmem:[%s3706_s14 + $0x780] sm:$0xff] %v1680_v15 }
 0x222   : > { %1683 = vst [vmem:[%s3706_s14 + $0x7a0] sm:$0xff] %v1682_v20  ;;  %1685 = vst [vmem:[%s3706_s14 + $0x7c0] sm:$0xff] %v1684_v41 }
 0x223   : > { %1687 = vst [vmem:[%s3706_s14 + $0x7e0] sm:$0xff] %v1686_v62 }
 0x224 PF: > { %p10_p8 = scmp.ge.s32.totalorder %s2051_s16, 6   ;;  %s4073_s12 = smov %s2010_s13 }
 0x225   : > { %s4074_s13 = smov %s2059_s19  ;;  %s4075_s14 = smov %s2051_s16 }
 0x226   :  { %12 = sbr.rel (!%p10_p8) target bundleno = 2 (0x2), region = 103 }

// kernel: inception3_forward.9
= control target key start
LH: loop header
LB: loop body
LE: loop exit
PB: predicated region body
PF: predicated region fallthrough
CT: control target
= control target key end

     0   :  { %v5214_v0 = vmov 0   ;;  %s8073_s1 = inlined_call_operand.vmem [shape: bf16[896,128], index: 1, kind: input, shape index: {}]   ;;  %s8074_s0 = inlined_call_operand.vmem [shape: bf16[512,896], index: 0, kind: input, shape index: {}]   ;;  %s8075_s2 = inlined_call_operand.vmem [shape: f32[2,128], index: 2, kind: input, shape index: {}]   ;;  %s8076_s3 = inlined_call_operand.vmem [shape: bf16[512,128], index: 3, kind: output, shape index: {}]  }
   0x1   :  { %1871 = vmatprep.subr.bf16.mxu1 %v5214_v0  ;;  %2160 = vmatprep.subr.bf16.mxu0 %v5214_v0  ;;  %v4836_v1 = vld [vmem:[%s8073_s1] sm:$0xff]   ;;  %v4838_v3 = vld [vmem:[%s8073_s1 + $0x8] sm:$0xff]   ;;  %v4840_v5 = vld [vmem:[%s8073_s1 + $0x10] sm:$0xff]  }
   0x2   :  { %v5243_v2 = vld [vmem:[%s8073_s1 + $0x80] sm:$0xff]   ;;  %1872 = vmatpush1.bf16.msra.mxu1 %v4836_v1  ;;  %v5253_v4 = vld [vmem:[%s8073_s1 + $0x88] sm:$0xff]   ;;  %v5264_v6 = vld [vmem:[%s8073_s1 + $0x90] sm:$0xff]  }
   0x3   :  { %2161 = vmatpush1.bf16.msra.mxu0 %v5243_v2  ;;  %1873 = vmatprep.subr.bf16.mxu1 %v5214_v0  ;;  %v4842_v7 = vld [vmem:[%s8073_s1 + $0x18] sm:$0xff]   ;;  %v4844_v9 = vld [vmem:[%s8073_s1 + $0x20] sm:$0xff]   ;;  %v4846_v11 = vld [vmem:[%s8073_s1 + $0x28] sm:$0xff]  }
   0x4   :  { %2162 = vmatprep.subr.bf16.mxu0 %v5214_v0  ;;  %v5275_v8 = vld [vmem:[%s8073_s1 + $0x98] sm:$0xff]   ;;  %v5286_v10 = vld [vmem:[%s8073_s1 + $0xa0] sm:$0xff]   ;;  %v5297_v12 = vld [vmem:[%s8073_s1 + $0xa8] sm:$0xff]  }
   0x5   :  { %v4848_v13 = vld [vmem:[%s8073_s1 + $0x30] sm:$0xff]   ;;  %v4850_v15 = vld [vmem:[%s8073_s1 + $0x38] sm:$0xff]   ;;  %v4852_v17 = vld [vmem:[%s8073_s1 + $0x40] sm:$0xff]  }
   0x6   :  { %1874 = vmatpush1.bf16.msra.mxu1 %v4838_v3  ;;  %v5308_v14 = vld [vmem:[%s8073_s1 + $0xb0] sm:$0xff]   ;;  %v5319_v16 = vld [vmem:[%s8073_s1 + $0xb8] sm:$0xff]   ;;  %v5330_v18 = vld [vmem:[%s8073_s1 + $0xc0] sm:$0xff]  }
   0x7   :  { %2163 = vmatpush1.bf16.msra.mxu0 %v5253_v4  ;;  %1875 = vmatprep.subr.bf16.mxu1 %v5214_v0  ;;  %v4870_v19 = vld [vmem:[%s8074_s0 + $0x4] ss:$28 sps:$4 sm:$0xff]   ;;  %v4854_v20 = vld [vmem:[%s8073_s1 + $0x48] sm:$0xff]   ;;  %v4856_v23 = vld [vmem:[%s8073_s1 + $0x50] sm:$0xff]  }
   0x8   :  { %2164 = vmatprep.subr.bf16.mxu0 %v5214_v0  ;;  %v4873_v21 = vld [vmem:[%s8074_s0 + $0xc] ss:$28 sps:$4 sm:$0xff]   ;;  %1903 = vmatprep.mubr.bf16.mxu1 %v4870_v19  ;;  %v5358_v24 = vld [vmem:[%s8073_s1 + $0xd0] sm:$0xff]   ;;  %v4858_v25 = vld [vmem:[%s8073_s1 + $0x58] sm:$0xff]  }
   0x9   :  { %v5347_v22 = vld [vmem:[%s8073_s1 + $0xc8] sm:$0xff]   ;;  %2192 = vmatprep.mubr.bf16.mxu0 %v4873_v21  ;;  %v5369_v26 = vld [vmem:[%s8073_s1 + $0xd8] sm:$0xff]   ;;  %v4860_v27 = vld [vmem:[%s8073_s1 + $0x60] sm:$0xff]  }
   0xa   :  { %1876 = vmatpush1.bf16.msra.mxu1 %v4840_v5  ;;  %v5380_v28 = vld [vmem:[%s8073_s1 + $0xe0] sm:$0xff]   ;;  %v4862_v29 = vld [vmem:[%s8073_s1 + $0x68] sm:$0xff]   ;;  %v4864_v31 = vld [vmem:[%s8073_s1 + $0x70] sm:$0xff]  }
   0xb   :  { %2165 = vmatpush1.bf16.msra.mxu0 %v5264_v6  ;;  %1877 = vmatprep.subr.bf16.mxu1 %v5214_v0  ;;  %v5391_v30 = vld [vmem:[%s8073_s1 + $0xe8] sm:$0xff]   ;;  %v5402_v32 = vld [vmem:[%s8073_s1 + $0xf0] sm:$0xff]   ;;  %v4866_v33 = vld [vmem:[%s8073_s1 + $0x78] sm:$0xff]  }
   0xc   :  { %2166 = vmatprep.subr.bf16.mxu0 %v5214_v0  ;;  %v5413_v34 = vld [vmem:[%s8073_s1 + $0xf8] sm:$0xff]   ;;  %v4871_v36 = vld [vmem:[%s8074_s0 + $0x8] ss:$28 sps:$4 sm:$0xff]   ;;  %v4881_v43 = vld [vmem:[%s8074_s0 + $0x74] ss:$28 sps:$4 sm:$0xff]  }
   0xd   :  { %v4868_v35 = vld [vmem:[%s8074_s0] ss:$28 sps:$4 sm:$0xff]   ;;  %v4887_v40 = vld [vmem:[%s8073_s1 + $0x108] sm:$0xff]   ;;  %v4879_v41 = vld [vmem:[%s8074_s0 + $0x38] ss:$28 sps:$4 sm:$0xff]  }
   0xe   :  { %1878 = vmatpush1.bf16.msra.mxu1 %v4842_v7  ;;  %v4874_v37 = vld [vmem:[%s8073_s1 + $0x100] sm:$0xff]   ;;  %v4875_v38 = vld [vmem:[%s8074_s0 + $0x3c] ss:$28 sps:$4 sm:$0xff]   ;;  %v4894_v45 = vld [vmem:[%s8073_s1 + $0x110] sm:$0xff]  }
   0xf   :  { %2167 = vmatpush1.bf16.msra.mxu0 %v5275_v8  ;;  %1879 = vmatprep.subr.bf16.mxu1 %v5214_v0  ;;  %v4877_v39 = vld [vmem:[%s8074_s0 + $0x44] ss:$28 sps:$4 sm:$0xff]   ;;  %v4883_v44 = vld [vmem:[%s8074_s0 + $0x7c] ss:$28 sps:$4 sm:$0xff]   ;;  %v4885_v47 = vld [vmem:[%s8074_s0 + $0x70] ss:$28 sps:$4 sm:$0xff]  }
  0x10   :  { %2168 = vmatprep.subr.bf16.mxu0 %v5214_v0  ;;  %v4880_v42 = vld [vmem:[%s8074_s0 + $0x40] ss:$28 sps:$4 sm:$0xff]   ;;  %v4886_v48 = vld [vmem:[%s8074_s0 + $0x78] ss:$28 sps:$4 sm:$0xff]   ;;  %v4888_v49 = vld [vmem:[%s8074_s0 + $0xac] ss:$28 sps:$4 sm:$0xff]  }
  0x11   :  { %v4907_v46 = vld [vmem:[%s8073_s1 + $0x118] sm:$0xff]   ;;  %v4890_v50 = vld [vmem:[%s8074_s0 + $0xb4] ss:$28 sps:$4 sm:$0xff]   ;;  %v4914_v51 = vld [vmem:[%s8073_s1 + $0x120] sm:$0xff]  }
  0x12   :  { %1880 = vmatpush1.bf16.msra.mxu1 %v4844_v9  ;;  %v4927_v52 = vld [vmem:[%s8073_s1 + $0x128] sm:$0xff]   ;;  %v4895_v55 = vld [vmem:[%s8074_s0 + $0xe4] ss:$28 sps:$4 sm:$0xff]   ;;  %v4934_v57 = vld [vmem:[%s8073_s1 + $0x130] sm:$0xff]  }
  0x13   :  { %2169 = vmatpush1.bf16.msra.mxu0 %v5286_v10  ;;  %1881 = vmatprep.subr.bf16.mxu1 %v5214_v0  ;;  %v4892_v53 = vld [vmem:[%s8074_s0 + $0xa8] ss:$28 sps:$4 sm:$0xff]   ;;  %v4893_v54 = vld [vmem:[%s8074_s0 + $0xb0] ss:$28 sps:$4 sm:$0xff]   ;;  %v4947_v58 = vld [vmem:[%s8073_s1 + $0x138] sm:$0xff]  }
  0x14   :  { %2170 = vmatprep.subr.bf16.mxu0 %v5214_v0  ;;  %v4897_v56 = vld [vmem:[%s8074_s0 + $0xec] ss:$28 sps:$4 sm:$0xff]   ;;  %v4899_v59 = vld [vmem:[%s8074_s0 + $0xe0] ss:$28 sps:$4 sm:$0xff]   ;;  %v4913_v9 = vld [vmem:[%s8074_s0 + $0x158] ss:$28 sps:$4 sm:$0xff]  }
  0x15   :  { %v4900_v60 = vld [vmem:[%s8074_s0 + $0xe8] ss:$28 sps:$4 sm:$0xff]   ;;  %v4901_v61 = vld [vmem:[%s8074_s0 + $0x11c] ss:$28 sps:$4 sm:$0xff]   ;;  %v4912_v7 = vld [vmem:[%s8074_s0 + $0x150] ss:$28 sps:$4 sm:$0xff]  }
  0x16   :  { %1882 = vmatpush1.bf16.msra.mxu1 %v4846_v11  ;;  %v4903_v62 = vld [vmem:[%s8074_s0 + $0x124] ss:$28 sps:$4 sm:$0xff]   ;;  %v4967_v1 = vld [vmem:[%s8073_s1 + $0x148] sm:$0xff]   ;;  %v4910_v5 = vld [vmem:[%s8074_s0 + $0x15c] ss:$28 sps:$4 sm:$0xff]  }
  0x17   :  { %2171 = vmatpush1.bf16.msra.mxu0 %v5297_v12  ;;  %1883 = vmatprep.subr.bf16.mxu1 %v5214_v0  ;;  %v4954_v63 = vld [vmem:[%s8073_s1 + $0x140] sm:$0xff]   ;;  %v4917_v11 = vld [vmem:[%s8074_s0 + $0x194] ss:$28 sps:$4 sm:$0xff]  }
  0x18   :  { %2172 = vmatprep.subr.bf16.mxu0 %v5214_v0  ;;  %v4906_v3 = vld [vmem:[%s8074_s0 + $0x120] ss:$28 sps:$4 sm:$0xff]   ;;  %v4926_v21 = vld [vmem:[%s8074_s0 + $0x1c8] ss:$28 sps:$4 sm:$0xff]  }
  0x19   :  { %v4925_v19 = vld [vmem:[%s8074_s0 + $0x1c0] ss:$28 sps:$4 sm:$0xff]  }
  0x1a   :  { %1884 = vmatpush1.bf16.msra.mxu1 %v4848_v13  ;;  %v4919_v13 = vld [vmem:[%s8074_s0 + $0x188] ss:$28 sps:$4 sm:$0xff]  }
  0x1b   :  { %2173 = vmatpush1.bf16.msra.mxu0 %v5308_v14  ;;  %1885 = vmatprep.subr.bf16.mxu1 %v5214_v0 }
  0x1c   :  { %2174 = vmatprep.subr.bf16.mxu0 %v5214_v0 }
  0x1e   :  { %1886 = vmatpush1.bf16.msra.mxu1 %v4850_v15  ;;  %v4920_v15 = vld [vmem:[%s8074_s0 + $0x190] ss:$28 sps:$4 sm:$0xff]  }
  0x1f   :  { %2175 = vmatpush1.bf16.msra.mxu0 %v5319_v16  ;;  %1887 = vmatprep.subr.bf16.mxu1 %v5214_v0 }
  0x20   :  { %2176 = vmatprep.subr.bf16.mxu0 %v5214_v0 }
  0x22   :  { %1888 = vmatpush1.bf16.msra.mxu1 %v4852_v17  ;;  %v4923_v17 = vld [vmem:[%s8074_s0 + $0x1cc] ss:$28 sps:$4 sm:$0xff]  }
  0x23   :  { %2177 = vmatpush1.bf16.msra.mxu0 %v5330_v18  ;;  %1889 = vmatprep.subr.bf16.mxu1 %v5214_v0 }
  0x24   :  { %2178 = vmatprep.subr.bf16.mxu0 %v5214_v0 }
  0x26   :  { %1890 = vmatpush1.bf16.msra.mxu1 %v4854_v20  ;;  %v5027_v20 = vld [vmem:[%s8073_s1 + $0x178] sm:$0xff]  }
  0x27   :  { %2179 = vmatpush1.bf16.msra.mxu0 %v5347_v22  ;;  %1891 = vmatprep.subr.bf16.mxu1 %v5214_v0 }
  0x28   :  { %2180 = vmatprep.subr.bf16.mxu0 %v5214_v0 }
  0x2a   :  { %1892 = vmatpush1.bf16.msra.mxu1 %v4856_v23  ;;  %v4930_v23 = vld [vmem:[%s8074_s0 + $0x204] ss:$28 sps:$4 sm:$0xff]  }
  0x2b   :  { %2181 = vmatpush1.bf16.msra.mxu0 %v5358_v24  ;;  %1893 = vmatprep.subr.bf16.mxu1 %v5214_v0 }
  0x2c   :  { %2182 = vmatprep.subr.bf16.mxu0 %v5214_v0 }
  0x2e   :  { %1894 = vmatpush1.bf16.msra.mxu1 %v4858_v25  ;;  %v4933_v25 = vld [vmem:[%s8074_s0 + $0x200] ss:$28 sps:$4 sm:$0xff]  }
  0x2f   :  { %2183 = vmatpush1.bf16.msra.mxu0 %v5369_v26  ;;  %1895 = vmatprep.subr.bf16.mxu1 %v5214_v0 }
  0x30   :  { %2184 = vmatprep.subr.bf16.mxu0 %v5214_v0 }
  0x32   :  { %1896 = vmatpush1.bf16.msra.mxu1 %v4860_v27  ;;  %v4939_v27 = vld [vmem:[%s8074_s0 + $0x230] ss:$28 sps:$4 sm:$0xff]  }
  0x33   :  { %2185 = vmatpush1.bf16.msra.mxu0 %v5380_v28  ;;  %1897 = vmatprep.subr.bf16.mxu1 %v5214_v0 }
  0x34   :  { %2186 = vmatprep.subr.bf16.mxu0 %v5214_v0 }
  0x36   :  { %1898 = vmatpush1.bf16.msra.mxu1 %v4862_v29  ;;  %v4941_v29 = vld [vmem:[%s8074_s0 + $0x26c] ss:$28 sps:$4 sm:$0xff]  }
  0x37   :  { %2187 = vmatpush1.bf16.msra.mxu0 %v5391_v30  ;;  %1899 = vmatprep.subr.bf16.mxu1 %v5214_v0 }
  0x38   :  { %2188 = vmatprep.subr.bf16.mxu0 %v5214_v0 }
  0x3a   :  { %1900 = vmatpush1.bf16.msra.mxu1 %v4864_v31  ;;  %v4945_v31 = vld [vmem:[%s8074_s0 + $0x268] ss:$28 sps:$4 sm:$0xff]  }
  0x3b   :  { %2189 = vmatpush1.bf16.msra.mxu0 %v5402_v32  ;;  %1901 = vmatprep.subr.bf16.mxu1 %v5214_v0 }
  0x3c   :  { %2190 = vmatprep.subr.bf16.mxu0 %v5214_v0 }
  0x3e   :  { %1902 = vmatpush1.bf16.msra.mxu1 %v4866_v33  ;;  %v4948_v33 = vld [vmem:[%s8074_s0 + $0x2a4] ss:$28 sps:$4 sm:$0xff]  }
  0x3f   :  { %2191 = vmatpush1.bf16.msra.mxu0 %v5413_v34  ;;  %4611 = vmatprep.subr.bf16.mxu1 %v5214_v0 }
  0x40   :  { %2449 = vmatprep.subr.bf16.mxu0 %v5214_v0 }
  0x41   :  { %1904 = vmatmul.mubr.bf16.vlgmr.msra.gmra.mrb[0].mxu1 %v4868_v35  ;;  %v4952_v35 = vld [vmem:[%s8074_s0 + $0x2a0] ss:$28 sps:$4 sm:$0xff]  }
  0x42   :  { %2193 = vmatmul.mubr.bf16.vlgmr.msra.gmra.mrb[0].mxu0 %v4871_v36  ;;  %4627 = vmatpush1.bf16.msra.mxu1 %v5243_v2  ;;  %v4905_v2 = vld [vmem:[%s8074_s0 + $0x118] ss:$28 sps:$4 sm:$0xff]   ;;  %v4953_v36 = vld [vmem:[%s8074_s0 + $0x2a8] ss:$28 sps:$4 sm:$0xff]  }
  0x43   :  { %2450 = vmatpush1.bf16.msra.mxu0 %v4874_v37  ;;  %1911 = vmatprep.mubr.bf16.mxu1 %v4875_v38  ;;  %v4955_v37 = vld [vmem:[%s8074_s0 + $0x2dc] ss:$28 sps:$4 sm:$0xff]   ;;  %v4957_v38 = vld [vmem:[%s8074_s0 + $0x2e4] ss:$28 sps:$4 sm:$0xff]  }
  0x44   :  { %2200 = vmatprep.mubr.bf16.mxu0 %v4877_v39  ;;  %2451 = vmatprep.subr.bf16.mxu0 %v5214_v0  ;;  %v4959_v39 = vld [vmem:[%s8074_s0 + $0x2d8] ss:$28 sps:$4 sm:$0xff]  }
  0x45   :  { %4612 = vmatprep.subr.bf16.mxu1 %v5214_v0 }
  0x46   :  { %4628 = vmatpush1.bf16.msra.mxu1 %v5253_v4  ;;  %v4908_v4 = vld [vmem:[%s8074_s0 + $0x154] ss:$28 sps:$4 sm:$0xff]  }
  0x47   :  { %2452 = vmatpush1.bf16.msra.mxu0 %v4887_v40  ;;  %4613 = vmatprep.subr.bf16.mxu1 %v5214_v0  ;;  %v4960_v40 = vld [vmem:[%s8074_s0 + $0x2e0] ss:$28 sps:$4 sm:$0xff]  }
  0x48   :  { %2453 = vmatprep.subr.bf16.mxu0 %v5214_v0 }
  0x49   :  { %1912 = vmatmul.mubr.bf16.gmra.mrb[4].mxu1 %v4879_v41  ;;  %v4961_v41 = vld [vmem:[%s8074_s0 + $0x314] ss:$28 sps:$4 sm:$0xff]  }
  0x4a   :  { %2201 = vmatmul.mubr.bf16.gmra.mrb[4].mxu0 %v4880_v42  ;;  %1919 = vmatprep.mubr.bf16.mxu1 %v4881_v43  ;;  %v4963_v42 = vld [vmem:[%s8074_s0 + $0x31c] ss:$28 sps:$4 sm:$0xff]   ;;  %v4965_v43 = vld [vmem:[%s8074_s0 + $0x310] ss:$28 sps:$4 sm:$0xff]  }
  0x4b   :  { %2208 = vmatprep.mubr.bf16.mxu0 %v4883_v44  ;;  %2454 = vmatpush1.bf16.msra.mxu0 %v4894_v45  ;;  %v4966_v44 = vld [vmem:[%s8074_s0 + $0x318] ss:$28 sps:$4 sm:$0xff]   ;;  %v4968_v45 = vld [vmem:[%s8074_s0 + $0x34c] ss:$28 sps:$4 sm:$0xff]  }
  0x4c   :  { %4629 = vmatpush1.bf16.msra.mxu1 %v5264_v6  ;;  %2455 = vmatprep.subr.bf16.mxu0 %v5214_v0  ;;  %v4974_v6 = vld [vmem:[%s8073_s1 + $0x150] sm:$0xff]  }
  0x4d   :  { %4614 = vmatprep.subr.bf16.mxu1 %v5214_v0 }
  0x4f   :  { %2456 = vmatpush1.bf16.msra.mxu0 %v4907_v46  ;;  %v4970_v46 = vld [vmem:[%s8074_s0 + $0x354] ss:$28 sps:$4 sm:$0xff]  }
  0x50   :  { %4630 = vmatpush1.bf16.msra.mxu1 %v5275_v8  ;;  %2457 = vmatprep.subr.bf16.mxu0 %v5214_v0  ;;  %v4987_v8 = vld [vmem:[%s8073_s1 + $0x158] sm:$0xff]  }
  0x51   :  { %1920 = vmatmul.mubr.bf16.gmra.mrb[8].mxu1 %v4885_v47  ;;  %4615 = vmatprep.subr.bf16.mxu1 %v5214_v0  ;;  %v4972_v47 = vld [vmem:[%s8074_s0 + $0x348] ss:$28 sps:$4 sm:$0xff]  }
  0x52   :  { %2209 = vmatmul.mubr.bf16.gmra.mrb[8].mxu0 %v4886_v48  ;;  %1927 = vmatprep.mubr.bf16.mxu1 %v4888_v49  ;;  %v4973_v48 = vld [vmem:[%s8074_s0 + $0x350] ss:$28 sps:$4 sm:$0xff]   ;;  %v4975_v49 = vld [vmem:[%s8074_s0 + $0x384] ss:$28 sps:$4 sm:$0xff]  }
  0x53   :  { %2216 = vmatprep.mubr.bf16.mxu0 %v4890_v50  ;;  %2458 = vmatpush1.bf16.msra.mxu0 %v4914_v51  ;;  %v4977_v50 = vld [vmem:[%s8074_s0 + $0x38c] ss:$28 sps:$4 sm:$0xff]   ;;  %v4979_v51 = vld [vmem:[%s8074_s0 + $0x380] ss:$28 sps:$4 sm:$0xff]  }
  0x54   :  { %2459 = vmatprep.subr.bf16.mxu0 %v5214_v0  ;;  %4631 = vmatpush1.bf16.msra.mxu1 %v5286_v10  ;;  %v4915_v10 = vld [vmem:[%s8074_s0 + $0x18c] ss:$28 sps:$4 sm:$0xff]  }
  0x55   :  { %4616 = vmatprep.subr.bf16.mxu1 %v5214_v0 }
  0x57   :  { %2460 = vmatpush1.bf16.msra.mxu0 %v4927_v52  ;;  %v4980_v52 = vld [vmem:[%s8074_s0 + $0x388] ss:$28 sps:$4 sm:$0xff]  }
  0x58   :  { %2461 = vmatprep.subr.bf16.mxu0 %v5214_v0  ;;  %4632 = vmatpush1.bf16.msra.mxu1 %v5297_v12  ;;  %v4994_v12 = vld [vmem:[%s8073_s1 + $0x160] sm:$0xff]  }
  0x59   :  { %1928 = vmatmul.mubr.bf16.gmra.mrb[12].mxu1 %v4892_v53  ;;  %4617 = vmatprep.subr.bf16.mxu1 %v5214_v0  ;;  %v4981_v53 = vld [vmem:[%s8074_s0 + $0x3bc] ss:$28 sps:$4 sm:$0xff]  }
  0x5a   :  { %2217 = vmatmul.mubr.bf16.gmra.mrb[12].mxu0 %v4893_v54  ;;  %1935 = vmatprep.mubr.bf16.mxu1 %v4895_v55  ;;  %v4983_v54 = vld [vmem:[%s8074_s0 + $0x3c4] ss:$28 sps:$4 sm:$0xff]  }
  0x5b   :  { %2224 = vmatprep.mubr.bf16.mxu0 %v4897_v56  ;;  %2462 = vmatpush1.bf16.msra.mxu0 %v4934_v57  ;;  %v5720_v55 = vld [vmem:[%s8073_s1 + $0x180] sm:$0xff]   ;;  %v4985_v56 = vld [vmem:[%s8074_s0 + $0x3b8] ss:$28 sps:$4 sm:$0xff]  }
  0x5c   :  { %2463 = vmatprep.subr.bf16.mxu0 %v5214_v0  ;;  %4633 = vmatpush1.bf16.msra.mxu1 %v5308_v14  ;;  %v5007_v14 = vld [vmem:[%s8073_s1 + $0x168] sm:$0xff]   ;;  %v4986_v57 = vld [vmem:[%s8074_s0 + $0x3c0] ss:$28 sps:$4 sm:$0xff]  }
  0x5d   :  { %4618 = vmatprep.subr.bf16.mxu1 %v5214_v0 }
  0x5f   :  { %2464 = vmatpush1.bf16.msra.mxu0 %v4947_v58  ;;  %v4988_v58 = vld [vmem:[%s8074_s0 + $0x3f4] ss:$28 sps:$4 sm:$0xff]  }
  0x60   :  { %2465 = vmatprep.subr.bf16.mxu0 %v5214_v0  ;;  %4634 = vmatpush1.bf16.msra.mxu1 %v5319_v16  ;;  %v4921_v16 = vld [vmem:[%s8074_s0 + $0x1c4] ss:$28 sps:$4 sm:$0xff]  }
  0x61   :  { %1936 = vmatmul.mubr.bf16.gmra.mrb[16].mxu1 %v4899_v59  ;;  %4619 = vmatprep.subr.bf16.mxu1 %v5214_v0  ;;  %v4990_v59 = vld [vmem:[%s8074_s0 + $0x3fc] ss:$28 sps:$4 sm:$0xff]  }
  0x62   :  { %2225 = vmatmul.mubr.bf16.gmra.mrb[16].mxu0 %v4900_v60  ;;  %1943 = vmatprep.mubr.bf16.mxu1 %v4901_v61  ;;  %v4992_v60 = vld [vmem:[%s8074_s0 + $0x3f0] ss:$28 sps:$4 sm:$0xff]   ;;  %v4993_v61 = vld [vmem:[%s8074_s0 + $0x3f8] ss:$28 sps:$4 sm:$0xff]  }
  0x63   :  { %2232 = vmatprep.mubr.bf16.mxu0 %v4903_v62  ;;  %2466 = vmatpush1.bf16.msra.mxu0 %v4954_v63  ;;  %v4995_v62 = vld [vmem:[%s8074_s0 + $0x42c] ss:$28 sps:$4 sm:$0xff]   ;;  %v4997_v63 = vld [vmem:[%s8074_s0 + $0x434] ss:$28 sps:$4 sm:$0xff]  }
  0x64   :  { %2467 = vmatprep.subr.bf16.mxu0 %v5214_v0  ;;  %4635 = vmatpush1.bf16.msra.mxu1 %v5330_v18  ;;  %v5014_v18 = vld [vmem:[%s8073_s1 + $0x170] sm:$0xff]  }
  0x65   :  { %4620 = vmatprep.subr.bf16.mxu1 %v5214_v0 }
  0x67   :  { %2468 = vmatpush1.bf16.msra.mxu0 %v4967_v1  ;;  %v4999_v1 = vld [vmem:[%s8074_s0 + $0x428] ss:$28 sps:$4 sm:$0xff]  }
  0x68   :  { %2469 = vmatprep.subr.bf16.mxu0 %v5214_v0  ;;  %4636 = vmatpush1.bf16.msra.mxu1 %v5347_v22  ;;  %v4928_v22 = vld [vmem:[%s8074_s0 + $0x1fc] ss:$28 sps:$4 sm:$0xff]  }
  0x69   :  { %1944 = vmatmul.mubr.bf16.gmra.mrb[20].mxu1 %v4905_v2  ;;  %4621 = vmatprep.subr.bf16.mxu1 %v5214_v0  ;;  %v5000_v2 = vld [vmem:[%s8074_s0 + $0x430] ss:$28 sps:$4 sm:$0xff]  }
  0x6a   :  { %2233 = vmatmul.mubr.bf16.gmra.mrb[20].mxu0 %v4906_v3  ;;  %1951 = vmatprep.mubr.bf16.mxu1 %v4908_v4  ;;  %v5001_v3 = vld [vmem:[%s8074_s0 + $0x464] ss:$28 sps:$4 sm:$0xff]   ;;  %v5003_v4 = vld [vmem:[%s8074_s0 + $0x46c] ss:$28 sps:$4 sm:$0xff]  }
  0x6b   :  { %2240 = vmatprep.mubr.bf16.mxu0 %v4910_v5  ;;  %2470 = vmatpush1.bf16.msra.mxu0 %v4974_v6  ;;  %v5005_v5 = vld [vmem:[%s8074_s0 + $0x460] ss:$28 sps:$4 sm:$0xff]   ;;  %v5006_v6 = vld [vmem:[%s8074_s0 + $0x468] ss:$28 sps:$4 sm:$0xff]  }
  0x6c   :  { %2471 = vmatprep.subr.bf16.mxu0 %v5214_v0  ;;  %4637 = vmatpush1.bf16.msra.mxu1 %v5358_v24  ;;  %v4932_v24 = vld [vmem:[%s8074_s0 + $0x1f8] ss:$28 sps:$4 sm:$0xff]  }
  0x6d   :  { %4622 = vmatprep.subr.bf16.mxu1 %v5214_v0 }
  0x6f   :  { %2472 = vmatpush1.bf16.msra.mxu0 %v4987_v8  ;;  %v5010_v8 = vld [vmem:[%s8074_s0 + $0x4a4] ss:$28 sps:$4 sm:$0xff]  }
  0x70   :  { %2473 = vmatprep.subr.bf16.mxu0 %v5214_v0  ;;  %4638 = vmatpush1.bf16.msra.mxu1 %v5369_v26  ;;  %v4935_v26 = vld [vmem:[%s8074_s0 + $0x234] ss:$28 sps:$4 sm:$0xff]  }
  0x71   :  { %1952 = vmatmul.mubr.bf16.gmra.mrb[24].mxu1 %v4912_v7  ;;  %4623 = vmatprep.subr.bf16.mxu1 %v5214_v0  ;;  %v5008_v7 = vld [vmem:[%s8074_s0 + $0x49c] ss:$28 sps:$4 sm:$0xff]  }
  0x72   :  { %2241 = vmatmul.mubr.bf16.gmra.mrb[24].mxu0 %v4913_v9  ;;  %1959 = vmatprep.mubr.bf16.mxu1 %v4915_v10  ;;  %v5012_v9 = vld [vmem:[%s8074_s0 + $0x498] ss:$28 sps:$4 sm:$0xff]   ;;  %v5013_v10 = vld [vmem:[%s8074_s0 + $0x4a0] ss:$28 sps:$4 sm:$0xff]  }
  0x73   :  { %2248 = vmatprep.mubr.bf16.mxu0 %v4917_v11  ;;  %2474 = vmatpush1.bf16.msra.mxu0 %v4994_v12  ;;  %v5015_v11 = vld [vmem:[%s8074_s0 + $0x4d4] ss:$28 sps:$4 sm:$0xff]   ;;  %v5017_v12 = vld [vmem:[%s8074_s0 + $0x4dc] ss:$28 sps:$4 sm:$0xff]  }
  0x74   :  { %2475 = vmatprep.subr.bf16.mxu0 %v5214_v0  ;;  %4639 = vmatpush1.bf16.msra.mxu1 %v5380_v28  ;;  %v4940_v28 = vld [vmem:[%s8074_s0 + $0x238] ss:$28 sps:$4 sm:$0xff]  }
  0x75   :  { %4624 = vmatprep.subr.bf16.mxu1 %v5214_v0 }
  0x77   :  { %2476 = vmatpush1.bf16.msra.mxu0 %v5007_v14  ;;  %v5020_v14 = vld [vmem:[%s8074_s0 + $0x4d8] ss:$28 sps:$4 sm:$0xff]  }
  0x78   :  { %2477 = vmatprep.subr.bf16.mxu0 %v5214_v0  ;;  %4640 = vmatpush1.bf16.msra.mxu1 %v5391_v30  ;;  %v4943_v30 = vld [vmem:[%s8074_s0 + $0x274] ss:$28 sps:$4 sm:$0xff]  }
  0x79   :  { %1960 = vmatmul.mubr.bf16.gmra.mrb[28].mxu1 %v4919_v13  ;;  %4625 = vmatprep.subr.bf16.mxu1 %v5214_v0  ;;  %v5019_v13 = vld [vmem:[%s8074_s0 + $0x4d0] ss:$28 sps:$4 sm:$0xff]  }
  0x7a   :  { %2249 = vmatmul.mubr.bf16.gmra.mrb[28].mxu0 %v4920_v15  ;;  %1967 = vmatprep.mubr.bf16.mxu1 %v4921_v16  ;;  %v5021_v15 = vld [vmem:[%s8074_s0 + $0x50c] ss:$28 sps:$4 sm:$0xff]   ;;  %v5023_v16 = vld [vmem:[%s8074_s0 + $0x514] ss:$28 sps:$4 sm:$0xff]  }
  0x7b   :  { %2256 = vmatprep.mubr.bf16.mxu0 %v4923_v17  ;;  %2478 = vmatpush1.bf16.msra.mxu0 %v5014_v18  ;;  %v5025_v17 = vld [vmem:[%s8074_s0 + $0x508] ss:$28 sps:$4 sm:$0xff]   ;;  %v5026_v18 = vld [vmem:[%s8074_s0 + $0x510] ss:$28 sps:$4 sm:$0xff]  }
  0x7c   :  { %2479 = vmatprep.subr.bf16.mxu0 %v5214_v0  ;;  %4641 = vmatpush1.bf16.msra.mxu1 %v5402_v32  ;;  %v4946_v32 = vld [vmem:[%s8074_s0 + $0x270] ss:$28 sps:$4 sm:$0xff]  }
  0x7d   :  { %4626 = vmatprep.subr.bf16.mxu1 %v5214_v0  ;;  %v4937_v0 = vld [vmem:[%s8074_s0 + $0x23c] ss:$28 sps:$4 sm:$0xff]  }
  0x7f   :  { %2480 = vmatpush1.bf16.msra.mxu0 %v5027_v20  ;;  %v5032_v20 = vld [vmem:[%s8074_s0 + $0x14] ss:$28 sps:$4 sm:$0xff]  }
  0x80   :  { %4642 = vmatpush1.bf16.msra.mxu1 %v5413_v34  ;;  %v4950_v34 = vld [vmem:[%s8074_s0 + $0x2ac] ss:$28 sps:$4 sm:$0xff]  }
  0x81   :  { %1968 = vmatmul.mubr.bf16.gmra.mrb[32].mxu1 %v4925_v19  ;;  %4531 = vmatprep.subr.bf16.mxu1 %v5720_v55  ;;  %v5028_v19 = vld [vmem:[%s8074_s0 + $0x544] ss:$28 sps:$4 sm:$0xff]  }
  0x82   :  { %2257 = vmatmul.mubr.bf16.gmra.mrb[32].mxu0 %v4926_v21  ;;  %1975 = vmatprep.mubr.bf16.mxu1 %v4928_v22  ;;  %v5033_v21 = vld [vmem:[%s8074_s0 + $0x540] ss:$28 sps:$4 sm:$0xff]   ;;  %v5030_v22 = vld [vmem:[%s8074_s0 + $0x10] ss:$28 sps:$4 sm:$0xff]  }
  0x83   :  { %2264 = vmatprep.mubr.bf16.mxu0 %v4930_v23  ;;  %v5034_v23 = vld [vmem:[%s8074_s0 + $0x57c] ss:$28 sps:$4 sm:$0xff]  }
  0x89   :  { %1976 = vmatmul.mubr.bf16.gmra.mrb[36].mxu1 %v4932_v24  ;;  %v5036_v24 = vld [vmem:[%s8074_s0 + $0x4c] ss:$28 sps:$4 sm:$0xff]  }
  0x8a   :  { %2265 = vmatmul.mubr.bf16.gmra.mrb[36].mxu0 %v4933_v25  ;;  %1983 = vmatprep.mubr.bf16.mxu1 %v4935_v26  ;;  %v5038_v25 = vld [vmem:[%s8074_s0 + $0x578] ss:$28 sps:$4 sm:$0xff]   ;;  %v5039_v26 = vld [vmem:[%s8074_s0 + $0x48] ss:$28 sps:$4 sm:$0xff]  }
  0x8b   :  { %2272 = vmatprep.mubr.bf16.mxu0 %v4937_v0  ;;  %v5040_v0 = vld [vmem:[%s8074_s0 + $0x5b4] ss:$28 sps:$4 sm:$0xff]  }
  0x91   :  { %1984 = vmatmul.mubr.bf16.gmra.mrb[40].mxu1 %v4939_v27  ;;  %v5042_v27 = vld [vmem:[%s8074_s0 + $0x84] ss:$28 sps:$4 sm:$0xff]  }
  0x92   :  { %2273 = vmatmul.mubr.bf16.gmra.mrb[40].mxu0 %v4940_v28  ;;  %1991 = vmatprep.mubr.bf16.mxu1 %v4941_v29  ;;  %v5044_v28 = vld [vmem:[%s8074_s0 + $0x5b0] ss:$28 sps:$4 sm:$0xff]   ;;  %v5045_v29 = vld [vmem:[%s8074_s0 + $0x80] ss:$28 sps:$4 sm:$0xff]  }
  0x93   :  { %2280 = vmatprep.mubr.bf16.mxu0 %v4943_v30  ;;  %v5046_v30 = vld [vmem:[%s8074_s0 + $0x5ec] ss:$28 sps:$4 sm:$0xff]  }
  0x99   :  { %1992 = vmatmul.mubr.bf16.gmra.mrb[44].mxu1 %v4945_v31  ;;  %v5048_v31 = vld [vmem:[%s8074_s0 + $0xbc] ss:$28 sps:$4 sm:$0xff]  }
  0x9a   :  { %2281 = vmatmul.mubr.bf16.gmra.mrb[44].mxu0 %v4946_v32  ;;  %1999 = vmatprep.mubr.bf16.mxu1 %v4948_v33 }
  0x9b   :  { %2288 = vmatprep.mubr.bf16.mxu0 %v4950_v34  ;;  %v5050_v34 = vld [vmem:[%s8074_s0 + $0x5e8] ss:$28 sps:$4 sm:$0xff]  }
  0xa1   :  { %2000 = vmatmul.mubr.bf16.gmra.mrb[48].mxu1 %v4952_v35 }
  0xa2   :  { %2289 = vmatmul.mubr.bf16.gmra.mrb[48].mxu0 %v4953_v36  ;;  %2007 = vmatprep.mubr.bf16.mxu1 %v4955_v37  ;;  %v5051_v36 = vld [vmem:[%s8074_s0 + $0xb8] ss:$28 sps:$4 sm:$0xff]   ;;  %v5052_v37 = vld [vmem:[%s8074_s0 + $0x624] ss:$28 sps:$4 sm:$0xff]  }
  0xa3   :  { %2296 = vmatprep.mubr.bf16.mxu0 %v4957_v38 }
  0xa9   :  { %2008 = vmatmul.mubr.bf16.gmra.mrb[52].mxu1 %v4959_v39  ;;  %v5054_v39 = vld [vmem:[%s8074_s0 + $0xf4] ss:$28 sps:$4 sm:$0xff]  }
  0xaa   :  { %2297 = vmatmul.mubr.bf16.gmra.mrb[52].mxu0 %v4960_v40  ;;  %2015 = vmatprep.mubr.bf16.mxu1 %v4961_v41 }
  0xab   :  { %2304 = vmatprep.mubr.bf16.mxu0 %v4963_v42  ;;  %v5056_v42 = vld [vmem:[%s8074_s0 + $0x620] ss:$28 sps:$4 sm:$0xff]  }
  0xb1   :  { %2016 = vmatmul.mubr.bf16.gmra.mrb[56].mxu1 %v4965_v43 }
  0xb2   :  { %2305 = vmatmul.mubr.bf16.gmra.mrb[56].mxu0 %v4966_v44  ;;  %2023 = vmatprep.mubr.bf16.mxu1 %v4968_v45  ;;  %v5057_v44 = vld [vmem:[%s8074_s0 + $0xf0] ss:$28 sps:$4 sm:$0xff]   ;;  %v5058_v45 = vld [vmem:[%s8074_s0 + $0x65c] ss:$28 sps:$4 sm:$0xff]  }
  0xb3   :  { %2312 = vmatprep.mubr.bf16.mxu0 %v4970_v46 }
  0xb9   :  { %2024 = vmatmul.mubr.bf16.gmra.mrb[60].mxu1 %v4972_v47  ;;  %v5060_v47 = vld [vmem:[%s8074_s0 + $0x12c] ss:$28 sps:$4 sm:$0xff]  }
  0xba   :  { %2313 = vmatmul.mubr.bf16.gmra.mrb[60].mxu0 %v4973_v48  ;;  %2031 = vmatprep.mubr.bf16.mxu1 %v4975_v49 }
  0xbb   :  { %2320 = vmatprep.mubr.bf16.mxu0 %v4977_v50  ;;  %v5062_v50 = vld [vmem:[%s8074_s0 + $0x658] ss:$28 sps:$4 sm:$0xff]  }
  0xc1   :  { %2032 = vmatmul.mubr.bf16.gmra.mrb[64].mxu1 %v4979_v51 }
  0xc2   :  { %2321 = vmatmul.mubr.bf16.gmra.mrb[64].mxu0 %v4980_v52  ;;  %2039 = vmatprep.mubr.bf16.mxu1 %v4981_v53  ;;  %v5063_v52 = vld [vmem:[%s8074_s0 + $0x128] ss:$28 sps:$4 sm:$0xff]   ;;  %v5064_v53 = vld [vmem:[%s8074_s0 + $0x694] ss:$28 sps:$4 sm:$0xff]  }
  0xc3   :  { %2328 = vmatprep.mubr.bf16.mxu0 %v4983_v54 }
  0xc9   :  { %2040 = vmatmul.mubr.bf16.gmra.mrb[68].mxu1 %v4985_v56  ;;  %v5066_v56 = vld [vmem:[%s8074_s0 + $0x164] ss:$28 sps:$4 sm:$0xff]  }
  0xca   :  { %2329 = vmatmul.mubr.bf16.gmra.mrb[68].mxu0 %v4986_v57  ;;  %2047 = vmatprep.mubr.bf16.mxu1 %v4988_v58 }
  0xcb   :  { %2336 = vmatprep.mubr.bf16.mxu0 %v4990_v59  ;;  %v5068_v59 = vld [vmem:[%s8074_s0 + $0x690] ss:$28 sps:$4 sm:$0xff]  }
  0xd1   :  { %2048 = vmatmul.mubr.bf16.gmra.mrb[72].mxu1 %v4992_v60 }
  0xd2   :  { %2337 = vmatmul.mubr.bf16.gmra.mrb[72].mxu0 %v4993_v61  ;;  %2055 = vmatprep.mubr.bf16.mxu1 %v4995_v62  ;;  %v5069_v61 = vld [vmem:[%s8074_s0 + $0x160] ss:$28 sps:$4 sm:$0xff]   ;;  %v5070_v62 = vld [vmem:[%s8074_s0 + $0x6cc] ss:$28 sps:$4 sm:$0xff]  }
  0xd3   :  { %2344 = vmatprep.mubr.bf16.mxu0 %v4997_v63 }
  0xd9   :  { %2056 = vmatmul.mubr.bf16.gmra.mrb[76].mxu1 %v4999_v1  ;;  %v5072_v1 = vld [vmem:[%s8074_s0 + $0x19c] ss:$28 sps:$4 sm:$0xff]  }
  0xda   :  { %2345 = vmatmul.mubr.bf16.gmra.mrb[76].mxu0 %v5000_v2  ;;  %2063 = vmatprep.mubr.bf16.mxu1 %v5001_v3 }
  0xdb   :  { %2352 = vmatprep.mubr.bf16.mxu0 %v5003_v4  ;;  %v5074_v4 = vld [vmem:[%s8074_s0 + $0x6c8] ss:$28 sps:$4 sm:$0xff]  }
  0xe1   :  { %2064 = vmatmul.mubr.bf16.gmra.mrb[80].mxu1 %v5005_v5 }
  0xe2   :  { %2353 = vmatmul.mubr.bf16.gmra.mrb[80].mxu0 %v5006_v6  ;;  %2071 = vmatprep.mubr.bf16.mxu1 %v5008_v7  ;;  %v5075_v6 = vld [vmem:[%s8074_s0 + $0x198] ss:$28 sps:$4 sm:$0xff]   ;;  %v5078_v7 = vld [vmem:[%s8074_s0 + $0x54c] ss:$28 sps:$4 sm:$0xff]  }
  0xe3   :  { %2360 = vmatprep.mubr.bf16.mxu0 %v5010_v8 }
  0xe9   :  { %2072 = vmatmul.mubr.bf16.gmra.mrb[84].mxu1 %v5012_v9  ;;  %v5079_v9 = vld [vmem:[%s8074_s0 + $0x1d4] ss:$28 sps:$4 sm:$0xff]  }
  0xea   :  { %2361 = vmatmul.mubr.bf16.gmra.mrb[84].mxu0 %v5013_v10  ;;  %2079 = vmatprep.mubr.bf16.mxu1 %v5015_v11 }
  0xeb   :  { %2368 = vmatprep.mubr.bf16.mxu0 %v5017_v12  ;;  %v5076_v12 = vld [vmem:[%s8074_s0 + $0x548] ss:$28 sps:$4 sm:$0xff]  }
  0xf1   :  { %2080 = vmatmul.mubr.bf16.gmra.mrb[88].mxu1 %v5019_v13 }
  0xf2   :  { %2369 = vmatmul.mubr.bf16.gmra.mrb[88].mxu0 %v5020_v14  ;;  %2087 = vmatprep.mubr.bf16.mxu1 %v5021_v15  ;;  %v5081_v14 = vld [vmem:[%s8074_s0 + $0x1d0] ss:$28 sps:$4 sm:$0xff]  }
  0xf3   :  { %2376 = vmatprep.mubr.bf16.mxu0 %v5023_v16  ;;  %v5083_v16 = vld [vmem:[%s8074_s0 + $0x584] ss:$28 sps:$4 sm:$0xff]  }
  0xf9   :  { %2088 = vmatmul.mubr.bf16.gmra.mrb[92].mxu1 %v5025_v17  ;;  %v5085_v17 = vld [vmem:[%s8074_s0 + $0x20c] ss:$28 sps:$4 sm:$0xff]  }
  0xfa   :  { %2377 = vmatmul.mubr.bf16.gmra.mrb[92].mxu0 %v5026_v18  ;;  %2095 = vmatprep.mubr.bf16.mxu1 %v5028_v19  ;;  %v5089_v18 = vld [vmem:[%s8073_s1 + $0x188] sm:$0xff]   ;;  %v5096_v19 = vld [vmem:[%s8073_s1 + $0x190] sm:$0xff]  }
  0xfb   :  { %2481 = vmatprep.mubr.bf16.mxu0 %v5032_v20 }
 0x101   :  { %2096 = vmatmul.mubr.bf16.gmra.mrb[96].mxu1 %v5033_v21 }
 0x102   :  { %2482 = vmatmul.mubr.bf16.vlgmr.msra.gmra.mrb[0].mxu0 %v5030_v22  ;;  %2103 = vmatprep.mubr.bf16.mxu1 %v5034_v23  ;;  %v5087_v22 = vld [vmem:[%s8074_s0 + $0x580] ss:$28 sps:$4 sm:$0xff]  }
 0x103   :  { %2489 = vmatprep.mubr.bf16.mxu0 %v5036_v24  ;;  %v5090_v24 = vld [vmem:[%s8074_s0 + $0x5bc] ss:$28 sps:$4 sm:$0xff]  }
 0x109   :  { %2104 = vmatmul.mubr.bf16.gmra.mrb[100].mxu1 %v5038_v25 }
 0x10a   :  { %2490 = vmatmul.mubr.bf16.gmra.mrb[4].mxu0 %v5039_v26  ;;  %2111 = vmatprep.mubr.bf16.mxu1 %v5040_v0  ;;  %v5092_v26 = vld [vmem:[%s8074_s0 + $0x244] ss:$28 sps:$4 sm:$0xff]   ;;  %v5103_v0 = vld [vmem:[%s8073_s1 + $0x198] sm:$0xff]  }
 0x10b   :  { %2497 = vmatprep.mubr.bf16.mxu0 %v5042_v27 }
 0x111   :  { %2112 = vmatmul.mubr.bf16.gmra.mrb[104].mxu1 %v5044_v28  ;;  %v5110_v28 = vld [vmem:[%s8073_s1 + $0x1a0] sm:$0xff]  }
 0x112   :  { %2498 = vmatmul.mubr.bf16.gmra.mrb[8].mxu0 %v5045_v29  ;;  %2119 = vmatprep.mubr.bf16.mxu1 %v5046_v30  ;;  %v5094_v30 = vld [vmem:[%s8074_s0 + $0x5b8] ss:$28 sps:$4 sm:$0xff]  }
 0x113   :  { %2505 = vmatprep.mubr.bf16.mxu0 %v5048_v31 }
 0x114   :  { %v5843_v32 = vpop.f32.mrb[0].mxu1 }
 0x115   :  { %v1907_v33 = vpop.f32.mrb[1].mxu1 }
 0x116   :  { %v5848_v35 = vpop.f32.mrb[2].mxu1  ;;  %v5095_v33 = vld [vmem:[%s8074_s0 + $0x240] ss:$28 sps:$4 sm:$0xff]  }
 0x117   :  { %v1910_v38 = vpop.f32.mrb[3].mxu1 }
 0x118   :  { %v5117_v38 = vld [vmem:[%s8073_s1 + $0x1a8] sm:$0xff]  }
 0x119   :  { %2120 = vmatmul.mubr.bf16.gmra.mrb[108].mxu1 %v5050_v34  ;;  %v5097_v34 = vld [vmem:[%s8074_s0 + $0x5f4] ss:$28 sps:$4 sm:$0xff]  }
 0x11a   :  { %2506 = vmatmul.mubr.bf16.gmra.mrb[12].mxu0 %v5051_v36  ;;  %2127 = vmatprep.mubr.bf16.mxu1 %v5052_v37  ;;  %v5099_v37 = vld [vmem:[%s8074_s0 + $0x27c] ss:$28 sps:$4 sm:$0xff]  }
 0x11b   :  { %2513 = vmatprep.mubr.bf16.mxu0 %v5054_v39 }
 0x11c   :  { %v5859_v40 = vpop.f32.mrb[4].mxu1 }
 0x11d   :  { %v1915_v41 = vpop.f32.mrb[5].mxu1 }
 0x11e   :  { %v5864_v43 = vpop.f32.mrb[6].mxu1  ;;  %v5124_v41 = vld [vmem:[%s8073_s1 + $0x1b0] sm:$0xff]  }
 0x11f   :  { %v1918_v46 = vpop.f32.mrb[7].mxu1 }
 0x120   :  { %v5102_v46 = vld [vmem:[%s8074_s0 + $0x278] ss:$28 sps:$4 sm:$0xff]  }
 0x121   :  { %2128 = vmatmul.mubr.bf16.gmra.mrb[112].mxu1 %v5056_v42 }
 0x122   :  { %2514 = vmatmul.mubr.bf16.gmra.mrb[16].mxu0 %v5057_v44  ;;  %2135 = vmatprep.mubr.bf16.mxu1 %v5058_v45  ;;  %v5101_v44 = vld [vmem:[%s8074_s0 + $0x5f0] ss:$28 sps:$4 sm:$0xff]  }
 0x123   :  { %2521 = vmatprep.mubr.bf16.mxu0 %v5060_v47  ;;  %v5104_v47 = vld [vmem:[%s8074_s0 + $0x62c] ss:$28 sps:$4 sm:$0xff]  }
 0x124   :  { %v5875_v48 = vpop.f32.mrb[8].mxu1 }
 0x125   :  { %v1923_v49 = vpop.f32.mrb[9].mxu1 }
 0x126   :  { %v5880_v51 = vpop.f32.mrb[10].mxu1 }
 0x127   :  { %v1926_v54 = vpop.f32.mrb[11].mxu1 }
 0x129   :  { %2136 = vmatmul.mubr.bf16.gmra.mrb[116].mxu1 %v5062_v50  ;;  %v5106_v50 = vld [vmem:[%s8074_s0 + $0x2b4] ss:$28 sps:$4 sm:$0xff]  }
 0x12a   :  { %2522 = vmatmul.mubr.bf16.gmra.mrb[20].mxu0 %v5063_v52  ;;  %2143 = vmatprep.mubr.bf16.mxu1 %v5064_v53  ;;  %v5131_v52 = vld [vmem:[%s8073_s1 + $0x1b8] sm:$0xff]  }
 0x12b   :  { %2529 = vmatprep.mubr.bf16.mxu0 %v5066_v56  ;;  %v5108_v56 = vld [vmem:[%s8074_s0 + $0x628] ss:$28 sps:$4 sm:$0xff]  }
 0x12c   :  { %v5891_v57 = vpop.f32.mrb[12].mxu1 }
 0x12d   :  { %v1931_v58 = vpop.f32.mrb[13].mxu1 }
 0x12e   :  { %v5896_v60 = vpop.f32.mrb[14].mxu1 }
 0x12f   :  { %v1934_v63 = vpop.f32.mrb[15].mxu1 }
 0x130   :  { %v5113_v63 = vld [vmem:[%s8074_s0 + $0x2ec] ss:$28 sps:$4 sm:$0xff]  }
 0x131   :  { %2144 = vmatmul.mubr.bf16.gmra.mrb[120].mxu1 %v5068_v59  ;;  %v5109_v59 = vld [vmem:[%s8074_s0 + $0x2b0] ss:$28 sps:$4 sm:$0xff]  }
 0x132   :  { %2530 = vmatmul.mubr.bf16.gmra.mrb[24].mxu0 %v5069_v61  ;;  %2151 = vmatprep.mubr.bf16.mxu1 %v5070_v62  ;;  %v5111_v61 = vld [vmem:[%s8074_s0 + $0x664] ss:$28 sps:$4 sm:$0xff]  }
 0x133   :  { %2537 = vmatprep.mubr.bf16.mxu0 %v5072_v1 }
 0x134   :  { %v5907_v2 = vpop.f32.mrb[16].mxu1 }
 0x135   :  { %v1939_v3 = vpop.f32.mrb[17].mxu1 }
 0x136   :  { %v5912_v5 = vpop.f32.mrb[18].mxu1 }
 0x137   :  { %v1942_v8 = vpop.f32.mrb[19].mxu1 }
 0x138   :  { %v5118_v8 = vld [vmem:[%s8074_s0 + $0x69c] ss:$28 sps:$4 sm:$0xff]  }
 0x139   :  { %2152 = vmatmul.mubr.bf16.gmra.mrb[124].mxu1 %v5074_v4  ;;  %v5115_v4 = vld [vmem:[%s8074_s0 + $0x660] ss:$28 sps:$4 sm:$0xff]  }
 0x13a   :  { %2538 = vmatmul.mubr.bf16.gmra.mrb[28].mxu0 %v5075_v6  ;;  %2384 = vmatprep.mubr.bf16.mxu1 %v5078_v7  ;;  %v5116_v7 = vld [vmem:[%s8074_s0 + $0x2e8] ss:$28 sps:$4 sm:$0xff]  }
 0x13b   :  { %2545 = vmatprep.mubr.bf16.mxu0 %v5079_v9 }
 0x13c   :  { %v5923_v10 = vpop.f32.mrb[20].mxu1 }
 0x13d   :  { %v1947_v11 = vpop.f32.mrb[21].mxu1 }
 0x13e   :  { %v5928_v13 = vpop.f32.mrb[22].mxu1  ;;  %v5120_v11 = vld [vmem:[%s8074_s0 + $0x324] ss:$28 sps:$4 sm:$0xff]  }
 0x13f   :  { %v1950_v15 = vpop.f32.mrb[23].mxu1 }
 0x140   :  { %v5122_v15 = vld [vmem:[%s8074_s0 + $0x698] ss:$28 sps:$4 sm:$0xff]  }
 0x141   :  { %2385 = vmatmul.mubr.bf16.vlgmr.msra.gmra.mrb[96].mxu1 %v5076_v12 }
 0x142   :  { %2546 = vmatmul.mubr.bf16.gmra.mrb[32].mxu0 %v5081_v14  ;;  %4532 = vmatpush3.bf16.msra.mxu1 %v5720_v55  ;;  %v5088_v55 = vld [vmem:[%s8074_s0 + $0x208] ss:$28 sps:$4 sm:$0xff]  }
 0x143   :  { %2392 = vmatprep.mubr.bf16.mxu1 %v5083_v16  ;;  %2553 = vmatprep.mubr.bf16.mxu0 %v5085_v17  ;;  %v5123_v17 = vld [vmem:[%s8074_s0 + $0x320] ss:$28 sps:$4 sm:$0xff]  }
 0x144   :  { %v5946_v20 = vpop.f32.mrb[24].mxu1  ;;  %4533 = vmatprep.subr.bf16.mxu1 %v5089_v18 }
 0x145   :  { %v1955_v21 = vpop.f32.mrb[25].mxu1 }
 0x146   :  { %v5951_v23 = vpop.f32.mrb[26].mxu1  ;;  %4534 = vmatpush3.bf16.msra.mxu1 %v5089_v18  ;;  %v5125_v18 = vld [vmem:[%s8074_s0 + $0x6d4] ss:$28 sps:$4 sm:$0xff]   ;;  %v5127_v21 = vld [vmem:[%s8074_s0 + $0x35c] ss:$28 sps:$4 sm:$0xff]  }
 0x147   :  { %v1958_v25 = vpop.f32.mrb[27].mxu1  ;;  %4535 = vmatprep.subr.bf16.mxu1 %v5096_v19 }
 0x149   :  { %2393 = vmatmul.mubr.bf16.gmra.mrb[100].mxu1 %v5087_v22 }
 0x14a   :  { %2554 = vmatmul.mubr.bf16.gmra.mrb[36].mxu0 %v5088_v55  ;;  %2400 = vmatprep.mubr.bf16.mxu1 %v5090_v24  ;;  %v5129_v24 = vld [vmem:[%s8074_s0 + $0x6d0] ss:$28 sps:$4 sm:$0xff]  }
 0x14b   :  { %2561 = vmatprep.mubr.bf16.mxu0 %v5092_v26  ;;  %4536 = vmatpush3.bf16.msra.mxu1 %v5096_v19  ;;  %v5130_v26 = vld [vmem:[%s8074_s0 + $0x358] ss:$28 sps:$4 sm:$0xff]  }
 0x14c   :  { %v5965_v27 = vpop.f32.mrb[28].mxu1  ;;  %4537 = vmatprep.subr.bf16.mxu1 %v5103_v0 }
 0x14d   :  { %v1963_v29 = vpop.f32.mrb[29].mxu1 }
 0x14e   :  { %v5973_v31 = vpop.f32.mrb[30].mxu1  ;;  %v5132_v29 = vld [vmem:[%s8074_s0 + $0x394] ss:$28 sps:$4 sm:$0xff]  }
 0x14f   :  { %v1966_v36 = vpop.f32.mrb[31].mxu1  ;;  %4538 = vmatpush3.bf16.msra.mxu1 %v5103_v0  ;;  %v5134_v0 = vld [vmem:[%s8074_s0 + $0x18] ss:$28 sps:$4 sm:$0xff]  }
 0x150   :  { %4539 = vmatprep.subr.bf16.mxu1 %v5110_v28 }
 0x151   :  { %2401 = vmatmul.mubr.bf16.gmra.mrb[104].mxu1 %v5094_v30 }
 0x152   :  { %2562 = vmatmul.mubr.bf16.gmra.mrb[40].mxu0 %v5095_v33  ;;  %2408 = vmatprep.mubr.bf16.mxu1 %v5097_v34  ;;  %v5136_v34 = vld [vmem:[%s8074_s0 + $0x50] ss:$28 sps:$4 sm:$0xff]  }
 0x153   :  { %2569 = vmatprep.mubr.bf16.mxu0 %v5099_v37  ;;  %4540 = vmatpush3.bf16.msra.mxu1 %v5110_v28  ;;  %v5135_v37 = vld [vmem:[%s8074_s0 + $0x390] ss:$28 sps:$4 sm:$0xff]  }
 0x154   :  { %v5987_v39 = vpop.f32.mrb[32].mxu1  ;;  %4541 = vmatprep.subr.bf16.mxu1 %v5117_v38 }
 0x155   :  { %v1971_v42 = vpop.f32.mrb[33].mxu1 }
 0x156   :  { %v5995_v45 = vpop.f32.mrb[34].mxu1  ;;  %v5137_v42 = vld [vmem:[%s8074_s0 + $0x3cc] ss:$28 sps:$4 sm:$0xff]  }
 0x157   :  { %v1974_v49 = vpop.f32.mrb[35].mxu1  ;;  %4542 = vmatpush3.bf16.msra.mxu1 %v5117_v38  ;;  %v5139_v38 = vld [vmem:[%s8074_s0 + $0x88] ss:$28 sps:$4 sm:$0xff]  }
 0x158   :  { %4543 = vmatprep.subr.bf16.mxu1 %v5124_v41 }
 0x159   :  { %2409 = vmatmul.mubr.bf16.gmra.mrb[108].mxu1 %v5101_v44 }
 0x15a   :  { %2570 = vmatmul.mubr.bf16.gmra.mrb[44].mxu0 %v5102_v46  ;;  %2416 = vmatprep.mubr.bf16.mxu1 %v5104_v47  ;;  %v5141_v47 = vld [vmem:[%s8074_s0 + $0xc0] ss:$28 sps:$4 sm:$0xff]  }
 0x15b   :  { %2577 = vmatprep.mubr.bf16.mxu0 %v5106_v50  ;;  %4544 = vmatpush3.bf16.msra.mxu1 %v5124_v41  ;;  %v5140_v50 = vld [vmem:[%s8074_s0 + $0x3c8] ss:$28 sps:$4 sm:$0xff]  }
 0x15c   :  { %v6009_v53 = vpop.f32.mrb[36].mxu1  ;;  %4545 = vmatprep.subr.bf16.mxu1 %v5131_v52 }
 0x15d   :  { %v1979_v54 = vpop.f32.mrb[37].mxu1 }
 0x15e   :  { %v6014_v58 = vpop.f32.mrb[38].mxu1 }
 0x15f   :  { %v1982_v62 = vpop.f32.mrb[39].mxu1  ;;  %4546 = vmatpush3.bf16.msra.mxu1 %v5131_v52  ;;  %v5144_v52 = vld [vmem:[%s8074_s0 + $0xf8] ss:$28 sps:$4 sm:$0xff]  }
 0x160   :  { %v5146_v62 = vld [vmem:[%s8074_s0 + $0x130] ss:$28 sps:$4 sm:$0xff]  }
 0x161   :  { %2417 = vmatmul.mubr.bf16.gmra.mrb[112].mxu1 %v5108_v56  ;;  %v5142_v56 = vld [vmem:[%s8074_s0 + $0x404] ss:$28 sps:$4 sm:$0xff]  }
 0x162   :  { %2578 = vmatmul.mubr.bf16.gmra.mrb[48].mxu0 %v5109_v59  ;;  %2424 = vmatprep.mubr.bf16.mxu1 %v5111_v61 }
 0x163   :  { %2585 = vmatprep.mubr.bf16.mxu0 %v5113_v63 }
 0x164   :  { %v6025_v1 = vpop.f32.mrb[40].mxu1 }
 0x165   :  { %v1987_v3 = vpop.f32.mrb[41].mxu1 }
 0x166   :  { %v6030_v6 = vpop.f32.mrb[42].mxu1  ;;  %v5145_v3 = vld [vmem:[%s8074_s0 + $0x400] ss:$28 sps:$4 sm:$0xff]  }
 0x167   :  { %v1990_v9 = vpop.f32.mrb[43].mxu1 }
 0x169   :  { %2425 = vmatmul.mubr.bf16.gmra.mrb[116].mxu1 %v5115_v4  ;;  %v5149_v4 = vld [vmem:[%s8074_s0 + $0x168] ss:$28 sps:$4 sm:$0xff]  }
 0x16a   :  { %2586 = vmatmul.mubr.bf16.gmra.mrb[52].mxu0 %v5116_v7  ;;  %2432 = vmatprep.mubr.bf16.mxu1 %v5118_v8  ;;  %v5147_v8 = vld [vmem:[%s8074_s0 + $0x43c] ss:$28 sps:$4 sm:$0xff]  }
 0x16b   :  { %2593 = vmatprep.mubr.bf16.mxu0 %v5120_v11 }
 0x16c   :  { %v6041_v12 = vpop.f32.mrb[44].mxu1 }
 0x16d   :  { %v1995_v14 = vpop.f32.mrb[45].mxu1 }
 0x16e   :  { %v6046_v16 = vpop.f32.mrb[46].mxu1  ;;  %v5151_v14 = vld [vmem:[%s8074_s0 + $0x1a0] ss:$28 sps:$4 sm:$0xff]  }
 0x16f   :  { %v1998_v19 = vpop.f32.mrb[47].mxu1 }
 0x171   :  { %2433 = vmatmul.mubr.bf16.gmra.mrb[120].mxu1 %v5122_v15 }
 0x172   :  { %2594 = vmatmul.mubr.bf16.gmra.mrb[56].mxu0 %v5123_v17  ;;  %2440 = vmatprep.mubr.bf16.mxu1 %v5125_v18  ;;  %v5150_v17 = vld [vmem:[%s8074_s0 + $0x438] ss:$28 sps:$4 sm:$0xff]  }
 0x173   :  { %2601 = vmatprep.mubr.bf16.mxu0 %v5127_v21  ;;  %v5154_v18 = vld [vmem:[%s8074_s0 + $0x1d8] ss:$28 sps:$4 sm:$0xff]  }
 0x174   :  { %v6057_v22 = vpop.f32.mrb[48].mxu1  ;;  %v5152_v21 = vld [vmem:[%s8074_s0 + $0x474] ss:$28 sps:$4 sm:$0xff]  }
 0x175   :  { %v2003_v55 = vpop.f32.mrb[49].mxu1 }
 0x176   :  { %v6062_v25 = vpop.f32.mrb[50].mxu1 }
 0x177   :  { %v2006_v28 = vpop.f32.mrb[51].mxu1 }
 0x178   :  { %v5155_v28 = vld [vmem:[%s8074_s0 + $0x470] ss:$28 sps:$4 sm:$0xff]  }
 0x179   :  { %2441 = vmatmul.mubr.bf16.gmra.mrb[124].mxu1 %v5129_v24 }
 0x17a   :  { %2602 = vmatmul.mubr.bf16.gmra.mrb[60].mxu0 %v5130_v26  ;;  %4547 = vmatprep.mubr.bf16.mxu1 %v5134_v0  ;;  %v5156_v26 = vld [vmem:[%s8074_s0 + $0x210] ss:$28 sps:$4 sm:$0xff]  }
 0x17b   :  { %2609 = vmatprep.mubr.bf16.mxu0 %v5132_v29  ;;  %v5159_v29 = vld [vmem:[%s8074_s0 + $0x248] ss:$28 sps:$4 sm:$0xff]  }
 0x17c   :  { %v6073_v30 = vpop.f32.mrb[52].mxu1 }
 0x17d   :  { %v2011_v33 = vpop.f32.mrb[53].mxu1 }
 0x17e   :  { %v6078_v36 = vpop.f32.mrb[54].mxu1 }
 0x17f   :  { %v2014_v41 = vpop.f32.mrb[55].mxu1 }
 0x180   :  { %v5161_v41 = vld [vmem:[%s8074_s0 + $0x280] ss:$28 sps:$4 sm:$0xff]  }
 0x181   :  { %4548 = vmatmul.mubr.bf16.vlgmr.msra.gmra.mrb[128].mxu1 %v5136_v34  ;;  %v5157_v34 = vld [vmem:[%s8074_s0 + $0x4ac] ss:$28 sps:$4 sm:$0xff]  }
 0x182   :  { %2610 = vmatmul.mubr.bf16.gmra.mrb[64].mxu0 %v5135_v37  ;;  %4551 = vmatprep.mubr.bf16.mxu1 %v5139_v38 }
 0x183   :  { %2617 = vmatprep.mubr.bf16.mxu0 %v5137_v42 }
 0x184   :  { %v6089_v44 = vpop.f32.mrb[56].mxu1 }
 0x185   :  { %v2019_v46 = vpop.f32.mrb[57].mxu1 }
 0x186   :  { %v6094_v49 = vpop.f32.mrb[58].mxu1  ;;  %v5160_v46 = vld [vmem:[%s8074_s0 + $0x4a8] ss:$28 sps:$4 sm:$0xff]  }
 0x187   :  { %v2022_v54 = vpop.f32.mrb[59].mxu1 }
 0x189   :  { %4552 = vmatmul.mubr.bf16.gmra.mrb[132].mxu1 %v5141_v47  ;;  %v5164_v47 = vld [vmem:[%s8074_s0 + $0x2b8] ss:$28 sps:$4 sm:$0xff]  }
 0x18a   :  { %2618 = vmatmul.mubr.bf16.gmra.mrb[68].mxu0 %v5140_v50  ;;  %4555 = vmatprep.mubr.bf16.mxu1 %v5144_v52  ;;  %v5162_v52 = vld [vmem:[%s8074_s0 + $0x4e4] ss:$28 sps:$4 sm:$0xff]  }
 0x18b   :  { %2625 = vmatprep.mubr.bf16.mxu0 %v5142_v56 }
 0x18c   :  { %v6105_v59 = vpop.f32.mrb[60].mxu1 }
 0x18d   :  { %v2027_v61 = vpop.f32.mrb[61].mxu1 }
 0x18e   :  { %v6110_v63 = vpop.f32.mrb[62].mxu1  ;;  %v5166_v61 = vld [vmem:[%s8074_s0 + $0x2f0] ss:$28 sps:$4 sm:$0xff]  }
 0x18f   :  { %v2030_v7 = vpop.f32.mrb[63].mxu1 }
 0x191   :  { %4556 = vmatmul.mubr.bf16.gmra.mrb[136].mxu1 %v5146_v62 }
 0x192   :  { %2626 = vmatmul.mubr.bf16.gmra.mrb[72].mxu0 %v5145_v3  ;;  %4559 = vmatprep.mubr.bf16.mxu1 %v5149_v4  ;;  %v5165_v3 = vld [vmem:[%s8074_s0 + $0x4e0] ss:$28 sps:$4 sm:$0xff]   ;;  %v5169_v4 = vld [vmem:[%s8074_s0 + $0x328] ss:$28 sps:$4 sm:$0xff]  }
 0x193   :  { %2633 = vmatprep.mubr.bf16.mxu0 %v5147_v8  ;;  %v5167_v8 = vld [vmem:[%s8074_s0 + $0x51c] ss:$28 sps:$4 sm:$0xff]  }
 0x194   :  { %v6121_v9 = vpop.f32.mrb[64].mxu1 }
 0x195   :  { %v2035_v11 = vpop.f32.mrb[65].mxu1 }
 0x196   :  { %v6126_v15 = vpop.f32.mrb[66].mxu1 }
 0x197   :  { %v2038_v19 = vpop.f32.mrb[67].mxu1 }
 0x198   :  { %v5170_v19 = vld [vmem:[%s8074_s0 + $0x518] ss:$28 sps:$4 sm:$0xff]  }
 0x199   :  { %4560 = vmatmul.mubr.bf16.gmra.mrb[140].mxu1 %v5151_v14 }
 0x19a   :  { %2634 = vmatmul.mubr.bf16.gmra.mrb[76].mxu0 %v5150_v17  ;;  %4563 = vmatprep.mubr.bf16.mxu1 %v5154_v18  ;;  %v5171_v17 = vld [vmem:[%s8074_s0 + $0x360] ss:$28 sps:$4 sm:$0xff]  }
 0x19b   :  { %2641 = vmatprep.mubr.bf16.mxu0 %v5152_v21  ;;  %v5174_v21 = vld [vmem:[%s8074_s0 + $0x398] ss:$28 sps:$4 sm:$0xff]  }
 0x19c   :  { %v6137_v55 = vpop.f32.mrb[68].mxu1 }
 0x19d   :  { %v2043_v24 = vpop.f32.mrb[69].mxu1 }
 0x19e   :  { %v6142_v0 = vpop.f32.mrb[70].mxu1 }
 0x19f   :  { %v2046_v33 = vpop.f32.mrb[71].mxu1 }
 0x1a0   :  { %v5176_v33 = vld [vmem:[%s8074_s0 + $0x3d0] ss:$28 sps:$4 sm:$0xff]  }
 0x1a1   :  { %4564 = vmatmul.mubr.bf16.gmra.mrb[144].mxu1 %v5156_v26  ;;  %v5172_v26 = vld [vmem:[%s8074_s0 + $0x554] ss:$28 sps:$4 sm:$0xff]  }
 0x1a2   :  { %2642 = vmatmul.mubr.bf16.gmra.mrb[80].mxu0 %v5155_v28  ;;  %4567 = vmatprep.mubr.bf16.mxu1 %v5159_v29 }
 0x1a3   :  { %2649 = vmatprep.mubr.bf16.mxu0 %v5157_v34 }
 0x1a4   :  { %v6153_v37 = vpop.f32.mrb[72].mxu1 }
 0x1a5   :  { %v2051_v38 = vpop.f32.mrb[73].mxu1 }
 0x1a6   :  { %v6158_v42 = vpop.f32.mrb[74].mxu1  ;;  %v5175_v38 = vld [vmem:[%s8074_s0 + $0x550] ss:$28 sps:$4 sm:$0xff]  }
 0x1a7   :  { %v2054_v50 = vpop.f32.mrb[75].mxu1 }
 0x1a9   :  { %4568 = vmatmul.mubr.bf16.gmra.mrb[148].mxu1 %v5161_v41  ;;  %v5179_v41 = vld [vmem:[%s8074_s0 + $0x408] ss:$28 sps:$4 sm:$0xff]  }
 0x1aa   :  { %2650 = vmatmul.mubr.bf16.gmra.mrb[84].mxu0 %v5160_v46  ;;  %4571 = vmatprep.mubr.bf16.mxu1 %v5164_v47  ;;  %v5177_v47 = vld [vmem:[%s8074_s0 + $0x58c] ss:$28 sps:$4 sm:$0xff]  }
 0x1ab   :  { %2657 = vmatprep.mubr.bf16.mxu0 %v5162_v52 }
 0x1ac   :  { %v6169_v54 = vpop.f32.mrb[76].mxu1 }
 0x1ad   :  { %v2059_v56 = vpop.f32.mrb[77].mxu1 }
 0x1ae   :  { %v6174_v62 = vpop.f32.mrb[78].mxu1  ;;  %v5181_v56 = vld [vmem:[%s8074_s0 + $0x440] ss:$28 sps:$4 sm:$0xff]  }
 0x1af   :  { %v2062_v7 = vpop.f32.mrb[79].mxu1 }
 0x1b1   :  { %4572 = vmatmul.mubr.bf16.gmra.mrb[152].mxu1 %v5166_v61 }
 0x1b2   :  { %2658 = vmatmul.mubr.bf16.gmra.mrb[88].mxu0 %v5165_v3  ;;  %4575 = vmatprep.mubr.bf16.mxu1 %v5169_v4  ;;  %v5180_v3 = vld [vmem:[%s8074_s0 + $0x588] ss:$28 sps:$4 sm:$0xff]   ;;  %v5184_v4 = vld [vmem:[%s8074_s0 + $0x478] ss:$28 sps:$4 sm:$0xff]  }
 0x1b3   :  { %2665 = vmatprep.mubr.bf16.mxu0 %v5167_v8  ;;  %v5182_v8 = vld [vmem:[%s8074_s0 + $0x5c4] ss:$28 sps:$4 sm:$0xff]  }
 0x1b4   :  { %v6185_v11 = vpop.f32.mrb[80].mxu1 }
 0x1b5   :  { %v2067_v14 = vpop.f32.mrb[81].mxu1 }
 0x1b6   :  { %v6190_v18 = vpop.f32.mrb[82].mxu1 }
 0x1b7   :  { %v2070_v24 = vpop.f32.mrb[83].mxu1 }
 0x1b8   :  { %v5185_v24 = vld [vmem:[%s8074_s0 + $0x5c0] ss:$28 sps:$4 sm:$0xff]  }
 0x1b9   :  { %4576 = vmatmul.mubr.bf16.gmra.mrb[156].mxu1 %v5171_v17 }
 0x1ba   :  { %2666 = vmatmul.mubr.bf16.gmra.mrb[92].mxu0 %v5170_v19  ;;  %4579 = vmatprep.mubr.bf16.mxu1 %v5174_v21  ;;  %v5186_v19 = vld [vmem:[%s8074_s0 + $0x4b0] ss:$28 sps:$4 sm:$0xff]  }
 0x1bb   :  { %2673 = vmatprep.mubr.bf16.mxu0 %v5172_v26  ;;  %v5189_v26 = vld [vmem:[%s8074_s0 + $0x4e8] ss:$28 sps:$4 sm:$0xff]  }
 0x1bc   :  { %v6201_v28 = vpop.f32.mrb[84].mxu1 }
 0x1bd   :  { %v2075_v29 = vpop.f32.mrb[85].mxu1 }
 0x1be   :  { %v6206_v34 = vpop.f32.mrb[86].mxu1 }
 0x1bf   :  { %v2078_v46 = vpop.f32.mrb[87].mxu1 }
 0x1c1   :  { %4580 = vmatmul.mubr.bf16.gmra.mrb[160].mxu1 %v5176_v33  ;;  %v5187_v33 = vld [vmem:[%s8074_s0 + $0x5fc] ss:$28 sps:$4 sm:$0xff]  }
 0x1c2   :  { %2674 = vmatmul.mubr.bf16.gmra.mrb[96].mxu0 %v5175_v38  ;;  %4583 = vmatprep.mubr.bf16.mxu1 %v5179_v41  ;;  %v5191_v41 = vld [vmem:[%s8074_s0 + $0x520] ss:$28 sps:$4 sm:$0xff]  }
 0x1c3   :  { %2681 = vmatprep.mubr.bf16.mxu0 %v5177_v47 }
 0x1c4   :  { %v6217_v50 = vpop.f32.mrb[88].mxu1 }
 0x1c5   :  { %v2083_v52 = vpop.f32.mrb[89].mxu1 }
 0x1c6   :  { %v6222_v61 = vpop.f32.mrb[90].mxu1  ;;  %v5190_v52 = vld [vmem:[%s8074_s0 + $0x5f8] ss:$28 sps:$4 sm:$0xff]  }
 0x1c7   :  { %v2086_v7 = vpop.f32.mrb[91].mxu1 }
 0x1c9   :  { %4584 = vmatmul.mubr.bf16.gmra.mrb[164].mxu1 %v5181_v56  ;;  %v5194_v56 = vld [vmem:[%s8074_s0 + $0x558] ss:$28 sps:$4 sm:$0xff]  }
 0x1ca   :  { %2682 = vmatmul.mubr.bf16.gmra.mrb[100].mxu0 %v5180_v3  ;;  %4587 = vmatprep.mubr.bf16.mxu1 %v5184_v4  ;;  %v5192_v4 = vld [vmem:[%s8074_s0 + $0x634] ss:$28 sps:$4 sm:$0xff]  }
 0x1cb   :  { %2689 = vmatprep.mubr.bf16.mxu0 %v5182_v8 }
 0x1cc   :  { %v6233_v14 = vpop.f32.mrb[92].mxu1 }
 0x1cd   :  { %v2091_v17 = vpop.f32.mrb[93].mxu1 }
 0x1ce   :  { %v6238_v21 = vpop.f32.mrb[94].mxu1  ;;  %v5196_v17 = vld [vmem:[%s8074_s0 + $0x590] ss:$28 sps:$4 sm:$0xff]  }
 0x1cf   :  { %v2094_v29 = vpop.f32.mrb[95].mxu1 }
 0x1d1   :  { %4588 = vmatmul.mubr.bf16.gmra.mrb[168].mxu1 %v5186_v19 }
 0x1d2   :  { %2690 = vmatmul.mubr.bf16.gmra.mrb[104].mxu0 %v5185_v24  ;;  %4591 = vmatprep.mubr.bf16.mxu1 %v5189_v26  ;;  %v5195_v26 = vld [vmem:[%s8074_s0 + $0x630] ss:$28 sps:$4 sm:$0xff]  }
 0x1d3   :  { %2697 = vmatprep.mubr.bf16.mxu0 %v5187_v33  ;;  %v5197_v33 = vld [vmem:[%s8074_s0 + $0x66c] ss:$28 sps:$4 sm:$0xff]  }
 0x1d5   :  { %v2483_v38 = vpop.f32.mrb[0].mxu0 }
 0x1d6   :  { %v6253_v46 = vadd.f32 %v2483_v38, %v5843_v32  ;;  %v2485_v47 = vpop.f32.mrb[1].mxu0 }
 0x1d7   :  { %v2486_v3 = vpop.f32.mrb[2].mxu0  ;;  %v5201_v47 = vld [vmem:[%s8074_s0 + $0x600] ss:$28 sps:$4 sm:$0xff]  }
 0x1d8   :  { %v6265_v7 = vadd.f32 %v2486_v3, %v5848_v35  ;;  %v2488_v8 = vpop.f32.mrb[3].mxu0  ;;  %v5199_v35 = vld [vmem:[%s8074_s0 + $0x5c8] ss:$28 sps:$4 sm:$0xff]  }
 0x1d9   :  { %4592 = vmatmul.mubr.bf16.gmra.mrb[172].mxu1 %v5191_v41  ;;  %v5200_v3 = vld [vmem:[%s8074_s0 + $0x668] ss:$28 sps:$4 sm:$0xff]  }
 0x1da   :  { %2698 = vmatmul.mubr.bf16.gmra.mrb[108].mxu0 %v5190_v52  ;;  %4595 = vmatprep.mubr.bf16.mxu1 %v5194_v56  ;;  %v5202_v8 = vld [vmem:[%s8074_s0 + $0x6a4] ss:$28 sps:$4 sm:$0xff]  }
 0x1db   :  { %2705 = vmatprep.mubr.bf16.mxu0 %v5192_v4 }
 0x1dd   :  { %v2491_v32 = vpop.f32.mrb[4].mxu0 }
 0x1de   :  { %v6271_v19 = vadd.f32 %v2491_v32, %v5859_v40  ;;  %v2493_v24 = vpop.f32.mrb[5].mxu0 }
 0x1df   :  { %v2494_v29 = vpop.f32.mrb[6].mxu0  ;;  %v5206_v24 = vld [vmem:[%s8074_s0 + $0x670] ss:$28 sps:$4 sm:$0xff]  }
 0x1e0   :  { %v6283_v38 = vadd.f32 %v2494_v29, %v5864_v43  ;;  %v2496_v41 = vpop.f32.mrb[7].mxu0  ;;  %v5204_v43 = vld [vmem:[%s8074_s0 + $0x638] ss:$28 sps:$4 sm:$0xff]   ;;  %v5205_v29 = vld [vmem:[%s8074_s0 + $0x6a0] ss:$28 sps:$4 sm:$0xff]  }
 0x1e1   :  { %4596 = vmatmul.mubr.bf16.gmra.mrb[176].mxu1 %v5196_v17  ;;  %v5207_v41 = vld [vmem:[%s8074_s0 + $0x6dc] ss:$28 sps:$4 sm:$0xff]  }
 0x1e2   :  { %2706 = vmatmul.mubr.bf16.gmra.mrb[112].mxu0 %v5195_v26  ;;  %4599 = vmatprep.mubr.bf16.mxu1 %v5199_v35 }
 0x1e3   :  { %2713 = vmatprep.mubr.bf16.mxu0 %v5197_v33 }
 0x1e5   :  { %v2499_v40 = vpop.f32.mrb[8].mxu0 }
 0x1e6   :  { %v6289_v52 = vadd.f32 %v2499_v40, %v5875_v48  ;;  %v2501_v56 = vpop.f32.mrb[9].mxu0 }
 0x1e7   :  { %v2502_v4 = vpop.f32.mrb[10].mxu0  ;;  %v5211_v56 = vld [vmem:[%s8074_s0 + $0x6e0] ss:$28 sps:$4 sm:$0xff]  }
 0x1e8   :  { %v6301_v32 = vadd.f32 %v2502_v4, %v5880_v51  ;;  %v2504_v17 = vpop.f32.mrb[11].mxu0  ;;  %v5209_v51 = vld [vmem:[%s8074_s0 + $0x6a8] ss:$28 sps:$4 sm:$0xff]   ;;  %v5210_v4 = vld [vmem:[%s8074_s0 + $0x6d8] ss:$28 sps:$4 sm:$0xff]  }
 0x1e9   :  { %4600 = vmatmul.mubr.bf16.gmra.mrb[180].mxu1 %v5201_v47 }
 0x1ea   :  { %2714 = vmatmul.mubr.bf16.gmra.mrb[116].mxu0 %v5200_v3  ;;  %4603 = vmatprep.mubr.bf16.mxu1 %v5204_v43 }
 0x1eb   :  { %2721 = vmatprep.mubr.bf16.mxu0 %v5202_v8 }
 0x1ed   :  { %v2507_v48 = vpop.f32.mrb[12].mxu0 }
 0x1ee   :  { %v6307_v26 = vadd.f32 %v2507_v48, %v5891_v57  ;;  %v2509_v35 = vpop.f32.mrb[13].mxu0 }
 0x1ef   :  { %v2510_v33 = vpop.f32.mrb[14].mxu0 }
 0x1f0   :  { %v6319_v40 = vadd.f32 %v2510_v33, %v5896_v60  ;;  %v2512_v47 = vpop.f32.mrb[15].mxu0 }
 0x1f1   :  { %4604 = vmatmul.mubr.bf16.gmra.mrb[184].mxu1 %v5206_v24 }
 0x1f2   :  { %2722 = vmatmul.mubr.bf16.gmra.mrb[120].mxu0 %v5205_v29  ;;  %4607 = vmatprep.mubr.bf16.mxu1 %v5209_v51 }
 0x1f3   :  { %2729 = vmatprep.mubr.bf16.mxu0 %v5207_v41 }
 0x1f5   :  { %v2515_v57 = vpop.f32.mrb[16].mxu0 }
 0x1f6   :  { %v6325_v3 = vadd.f32 %v2515_v57, %v5907_v2  ;;  %v2517_v43 = vpop.f32.mrb[17].mxu0 }
 0x1f7   :  { %v2518_v60 = vpop.f32.mrb[18].mxu0 }
 0x1f8   :  { %v6331_v8 = vadd.f32 %v2518_v60, %v5912_v5  ;;  %v2520_v17 = vpop.f32.mrb[19].mxu0 }
 0x1f9   :  { %4608 = vmatmul.mubr.bf16.gmra.mrb[188].mxu1 %v5211_v56 }
 0x1fa   :  { %2730 = vmatmul.mubr.bf16.gmra.mrb[124].mxu0 %v5210_v4 }
 0x1fd   :  { %v2523_v48 = vpop.f32.mrb[20].mxu0 }
 0x1fe   :  { %v6334_v24 = vadd.f32 %v2523_v48, %v5923_v10  ;;  %v2525_v35 = vpop.f32.mrb[21].mxu0 }
 0x1ff   :  { %v2526_v29 = vpop.f32.mrb[22].mxu0 }
 0x200   :  { %v6337_v2 = vadd.f32 %v2526_v29, %v5928_v13  ;;  %v2528_v51 = vpop.f32.mrb[23].mxu0 }
 0x205   :  { %v2531_v33 = vpop.f32.mrb[24].mxu0 }
 0x206   :  { %v6340_v41 = vadd.f32 %v2531_v33, %v5946_v20  ;;  %v2533_v47 = vpop.f32.mrb[25].mxu0 }
 0x207   :  { %v2534_v5 = vpop.f32.mrb[26].mxu0 }
 0x208   :  { %v6343_v57 = vadd.f32 %v2534_v5, %v5951_v23  ;;  %v2536_v56 = vpop.f32.mrb[27].mxu0 }
 0x20d   :  { %v2539_v43 = vpop.f32.mrb[28].mxu0 }
 0x20e   :  { %v6346_v10 = vadd.f32 %v2539_v43, %v5965_v27  ;;  %v2541_v4 = vpop.f32.mrb[29].mxu0 }
 0x20f   :  { %v2542_v60 = vpop.f32.mrb[30].mxu0 }
 0x210   :  { %v6349_v13 = vadd.f32 %v2542_v60, %v5973_v31  ;;  %v2544_v17 = vpop.f32.mrb[31].mxu0 }
 0x214   :  { %v6351_v48 = vpop.f32.mrb[96].mxu1 }
 0x215   :  { %v2547_v20 = vpop.f32.mrb[32].mxu0  ;;  %v2388_v35 = vpop.f32.mrb[97].mxu1 }
 0x216   :  { %v6354_v29 = vadd.f32 %v2547_v20, %v5987_v39  ;;  %v2549_v23 = vpop.f32.mrb[33].mxu0  ;;  %v6356_v51 = vpop.f32.mrb[98].mxu1 }
 0x217   :  { %v2550_v33 = vpop.f32.mrb[34].mxu0  ;;  %v2391_v47 = vpop.f32.mrb[99].mxu1 }
 0x218   :  { %v6359_v27 = vadd.f32 %v2550_v33, %v5995_v45  ;;  %v2552_v5 = vpop.f32.mrb[35].mxu0 }
 0x21c   :  { %v6361_v56 = vpop.f32.mrb[100].mxu1 }
 0x21d   :  { %8122 = vst [vmem:[#allocation2_spill] sm:$0xff] %v6361_v56  ;;  %v2555_v31 = vpop.f32.mrb[36].mxu0  ;;  %v2396_v43 = vpop.f32.mrb[101].mxu1 }
 0x21e   :  { %v6364_v4 = vadd.f32 %v2555_v31, %v6009_v53  ;;  %v2557_v60 = vpop.f32.mrb[37].mxu0  ;;  %v6366_v17 = vpop.f32.mrb[102].mxu1 }
 0x21f   :  { %8123 = vst [vmem:[#allocation3_spill] sm:$0xff] %v6366_v17  ;;  %v2558_v39 = vpop.f32.mrb[38].mxu0  ;;  %v2399_v20 = vpop.f32.mrb[103].mxu1 }
 0x220   :  { %v6369_v35 = vadd.f32 %v2558_v39, %v6014_v58  ;;  %v2560_v23 = vpop.f32.mrb[39].mxu0 }
 0x224   :  { %v6371_v47 = vpop.f32.mrb[104].mxu1 }
 0x225   :  { %8124 = vst [vmem:[#allocation4_spill] sm:$0xff] %v6371_v47  ;;  %v2563_v45 = vpop.f32.mrb[40].mxu0  ;;  %v2404_v33 = vpop.f32.mrb[105].mxu1 }
 0x226   :  { %v6374_v5 = vadd.f32 %v2563_v45, %v6025_v1  ;;  %v2565_v43 = vpop.f32.mrb[41].mxu0  ;;  %v6376_v56 = vpop.f32.mrb[106].mxu1 }
 0x227   :  { %8125 = vst [vmem:[#allocation5_spill] sm:$0xff] %v6376_v56  ;;  %v2566_v53 = vpop.f32.mrb[42].mxu0  ;;  %v2407_v31 = vpop.f32.mrb[107].mxu1 }
 0x228   :  { %v6379_v60 = vadd.f32 %v2566_v53, %v6030_v6  ;;  %v2568_v20 = vpop.f32.mrb[43].mxu0 }
 0x22c   :  { %v6381_v17 = vpop.f32.mrb[108].mxu1 }
 0x22d   :  { %8126 = vst [vmem:[#allocation6_spill] sm:$0xff] %v6381_v17  ;;  %v2571_v58 = vpop.f32.mrb[44].mxu0  ;;  %v2412_v39 = vpop.f32.mrb[109].mxu1 }
 0x22e   :  { %v6384_v23 = vadd.f32 %v2571_v58, %v6041_v12  ;;  %v2573_v33 = vpop.f32.mrb[45].mxu0  ;;  %v6386_v47 = vpop.f32.mrb[110].mxu1 }
 0x22f   :  { %8127 = vst [vmem:[#allocation7_spill] sm:$0xff] %v6386_v47  ;;  %v2574_v1 = vpop.f32.mrb[46].mxu0  ;;  %v2415_v45 = vpop.f32.mrb[111].mxu1 }
 0x230   :  { %v6389_v43 = vadd.f32 %v2574_v1, %v6046_v16  ;;  %v2576_v31 = vpop.f32.mrb[47].mxu0 }
 0x234   :  { %v6391_v56 = vpop.f32.mrb[112].mxu1 }
 0x235   :  { %8128 = vst [vmem:[#allocation8_spill] sm:$0xff] %v6391_v56  ;;  %v2579_v6 = vpop.f32.mrb[48].mxu0  ;;  %v2420_v53 = vpop.f32.mrb[113].mxu1 }
 0x236   :  { %v6394_v20 = vadd.f32 %v2579_v6, %v6057_v22  ;;  %v2581_v39 = vpop.f32.mrb[49].mxu0  ;;  %v6396_v17 = vpop.f32.mrb[114].mxu1 }
 0x237   :  { %8129 = vst [vmem:[#allocation9_spill] sm:$0xff] %v6396_v17  ;;  %v2582_v12 = vpop.f32.mrb[50].mxu0  ;;  %v2423_v58 = vpop.f32.mrb[115].mxu1 }
 0x238   :  { %v6399_v33 = vadd.f32 %v2582_v12, %v6062_v25  ;;  %v2584_v45 = vpop.f32.mrb[51].mxu0 }
 0x23c   :  { %v6401_v47 = vpop.f32.mrb[116].mxu1 }
 0x23d   :  { %8130 = vst [vmem:[#allocation10_spill] sm:$0xff] %v6401_v47  ;;  %v2587_v16 = vpop.f32.mrb[52].mxu0  ;;  %v2428_v1 = vpop.f32.mrb[117].mxu1 }
 0x23e   :  { %v6404_v31 = vadd.f32 %v2587_v16, %v6073_v30  ;;  %v2589_v53 = vpop.f32.mrb[53].mxu0  ;;  %v6406_v56 = vpop.f32.mrb[118].mxu1 }
 0x23f   :  { %8131 = vst [vmem:[#allocation11_spill] sm:$0xff] %v6406_v56  ;;  %v2590_v22 = vpop.f32.mrb[54].mxu0  ;;  %v2431_v6 = vpop.f32.mrb[119].mxu1 }
 0x240   :  { %v6409_v39 = vadd.f32 %v2590_v22, %v6078_v36  ;;  %v2592_v58 = vpop.f32.mrb[55].mxu0 }
 0x244   :  { %v6411_v17 = vpop.f32.mrb[120].mxu1 }
 0x245   :  { %8132 = vst [vmem:[#allocation12_spill] sm:$0xff] %v6411_v17  ;;  %v2595_v25 = vpop.f32.mrb[56].mxu0  ;;  %v2436_v12 = vpop.f32.mrb[121].mxu1 }
 0x246   :  { %v6414_v45 = vadd.f32 %v2595_v25, %v6089_v44  ;;  %v2597_v1 = vpop.f32.mrb[57].mxu0  ;;  %v6416_v47 = vpop.f32.mrb[122].mxu1 }
 0x247   :  { %8133 = vst [vmem:[#allocation13_spill] sm:$0xff] %v6416_v47  ;;  %v2598_v30 = vpop.f32.mrb[58].mxu0  ;;  %v2439_v16 = vpop.f32.mrb[123].mxu1 }
 0x248   :  { %v6419_v53 = vadd.f32 %v2598_v30, %v6094_v49  ;;  %v2600_v6 = vpop.f32.mrb[59].mxu0 }
 0x24c   :  { %v6421_v56 = vpop.f32.mrb[124].mxu1 }
 0x24d   :  { %8134 = vst [vmem:[#allocation14_spill] sm:$0xff] %v6421_v56  ;;  %v2603_v36 = vpop.f32.mrb[60].mxu0  ;;  %v2444_v22 = vpop.f32.mrb[125].mxu1 }
 0x24e   :  { %v6424_v58 = vadd.f32 %v2603_v36, %v6105_v59  ;;  %v2605_v12 = vpop.f32.mrb[61].mxu0  ;;  %v6426_v17 = vpop.f32.mrb[126].mxu1 }
 0x24f   :  { %8135 = vst [vmem:[#allocation15_spill] sm:$0xff] %v6426_v17  ;;  %v2606_v44 = vpop.f32.mrb[62].mxu0  ;;  %v2447_v25 = vpop.f32.mrb[127].mxu1 }
 0x250   :  { %v6429_v1 = vadd.f32 %v2606_v44, %v6110_v63  ;;  %v2608_v16 = vpop.f32.mrb[63].mxu0 }
 0x254   :  { %v4549_v47 = vpop.f32.mrb[128].mxu1 }
 0x255   :  { %v2611_v49 = vpop.f32.mrb[64].mxu0  ;;  %v6432_v30 = vadd.f32 %v6271_v19, %v4549_v47  ;;  %v2772_v6 = vpop.f32.mrb[129].mxu1 }
 0x256   :  { %v6435_v22 = vadd.f32 %v2611_v49, %v6121_v9  ;;  %v2613_v59 = vpop.f32.mrb[65].mxu0  ;;  %v6438_v36 = vadd.f32 %v6253_v46, %v2772_v6  ;;  %v4550_v12 = vpop.f32.mrb[130].mxu1 }
 0x257   :  { %8136 = vst [vmem:[#allocation16_spill] sm:$0xff] %v6432_v30  ;;  %v2614_v17 = vpop.f32.mrb[66].mxu0  ;;  %v6441_v25 = vadd.f32 %v6283_v38, %v4550_v12  ;;  %v2775_v63 = vpop.f32.mrb[131].mxu1  ;;  %v3098_v38 = vmul.f32 %v6432_v30, %v6432_v30 }
 0x258   :  { %8137 = vst [vmem:[#allocation17_spill] sm:$0xff] %v6438_v36  ;;  %v6444_v44 = vadd.f32 %v2614_v17, %v6126_v15  ;;  %v2616_v16 = vpop.f32.mrb[67].mxu0  ;;  %v6447_v19 = vadd.f32 %v6265_v7, %v2775_v63  ;;  %v3096_v9 = vmul.f32 %v6438_v36, %v6438_v36 }
 0x259   :  { %v3099_v7 = vmul.f32 %v6441_v25, %v6441_v25 }
 0x25a   :  { %8138 = vst [vmem:[#allocation18_spill] sm:$0xff] %v6447_v19  ;;  %v3027_v46 = vadd.f32 %v6447_v19, %v6438_v36  ;;  %v3097_v47 = vmul.f32 %v6447_v19, %v6447_v19 }
 0x25c   :  { %v3028_v49 = vadd.f32 %v3027_v46, %v6432_v30  ;;  %v3160_v15 = vadd.f32 %v3097_v47, %v3096_v9  ;;  %v4553_v17 = vpop.f32.mrb[132].mxu1 }
 0x25d   :  { %v2619_v6 = vpop.f32.mrb[68].mxu0  ;;  %v6461_v59 = vadd.f32 %v6307_v26, %v4553_v17  ;;  %v2788_v12 = vpop.f32.mrb[133].mxu1 }
 0x25e   :  { %v3161_v63 = vadd.f32 %v3160_v15, %v3098_v38  ;;  %v6464_v16 = vadd.f32 %v2619_v6, %v6137_v55  ;;  %v2621_v19 = vpop.f32.mrb[69].mxu0  ;;  %v6467_v36 = vadd.f32 %v6289_v52, %v2788_v12  ;;  %v3029_v46 = vadd.f32 %v3028_v49, %v6441_v25  ;;  %v4554_v9 = vpop.f32.mrb[134].mxu1 }
 0x25f   :  { %v2622_v47 = vpop.f32.mrb[70].mxu0  ;;  %v6471_v30 = vadd.f32 %v6319_v40, %v4554_v9  ;;  %v2791_v56 = vpop.f32.mrb[135].mxu1  ;;  %v3102_v12 = vmul.f32 %v6461_v59, %v6461_v59 }
 0x260   :  { %v3030_v26 = vadd.f32 %v3029_v46, %v6467_v36  ;;  %v3100_v38 = vmul.f32 %v6467_v36, %v6467_v36  ;;  %v3162_v15 = vadd.f32 %v3161_v63, %v3099_v7  ;;  %v6477_v55 = vadd.f32 %v2622_v47, %v6142_v0  ;;  %v2624_v19 = vpop.f32.mrb[71].mxu0 }
 0x261   :  { %v6480_v52 = vadd.f32 %v6301_v32, %v2791_v56 }
 0x262   :  { %v3163_v49 = vadd.f32 %v3162_v15, %v3100_v38  ;;  %v3103_v38 = vmul.f32 %v6471_v30, %v6471_v30 }
 0x263   :  { %v3031_v17 = vadd.f32 %v3030_v26, %v6480_v52  ;;  %v3101_v40 = vmul.f32 %v6480_v52, %v6480_v52 }
 0x264   :  { %v4557_v6 = vpop.f32.mrb[136].mxu1 }
 0x265   :  { %v3032_v46 = vadd.f32 %v3031_v17, %v6461_v59  ;;  %v3164_v7 = vadd.f32 %v3163_v49, %v3101_v40  ;;  %v2627_v63 = vpop.f32.mrb[72].mxu0  ;;  %v6489_v0 = vadd.f32 %v6334_v24, %v4557_v6  ;;  %v2804_v9 = vpop.f32.mrb[137].mxu1 }
 0x266   :  { %v6492_v32 = vadd.f32 %v2627_v63, %v6153_v37  ;;  %v2629_v56 = vpop.f32.mrb[73].mxu0  ;;  %v6495_v47 = vadd.f32 %v6325_v3, %v2804_v9  ;;  %v4558_v26 = vpop.f32.mrb[138].mxu1 }
 0x267   :  { %v3165_v15 = vadd.f32 %v3164_v7, %v3102_v12  ;;  %v3033_v19 = vadd.f32 %v3032_v46, %v6471_v30  ;;  %v2630_v49 = vpop.f32.mrb[74].mxu0  ;;  %v6501_v17 = vadd.f32 %v6337_v2, %v4558_v26  ;;  %v2807_v24 = vpop.f32.mrb[139].mxu1  ;;  %v3106_v56 = vmul.f32 %v6489_v0, %v6489_v0 }
 0x268   :  { %v3104_v37 = vmul.f32 %v6495_v47, %v6495_v47  ;;  %v6506_v40 = vadd.f32 %v2630_v49, %v6158_v42  ;;  %v2632_v3 = vpop.f32.mrb[75].mxu0  ;;  %v6509_v6 = vadd.f32 %v6331_v8, %v2807_v24 }
 0x269   :  { %v3034_v63 = vadd.f32 %v3033_v19, %v6495_v47  ;;  %v3166_v12 = vadd.f32 %v3165_v15, %v3103_v38  ;;  %v3107_v3 = vmul.f32 %v6501_v17, %v6501_v17 }
 0x26a   :  { %v3105_v46 = vmul.f32 %v6509_v6, %v6509_v6 }
 0x26b   :  { %v3167_v7 = vadd.f32 %v3166_v12, %v3104_v37  ;;  %v3035_v2 = vadd.f32 %v3034_v63, %v6509_v6 }
 0x26c   :  { %v4561_v9 = vpop.f32.mrb[140].mxu1 }
 0x26d   :  { %v3036_v42 = vadd.f32 %v3035_v2, %v6489_v0  ;;  %v3168_v26 = vadd.f32 %v3167_v7, %v3105_v46  ;;  %v2635_v49 = vpop.f32.mrb[76].mxu0  ;;  %v6519_v8 = vadd.f32 %v6346_v10, %v4561_v9  ;;  %v2820_v24 = vpop.f32.mrb[141].mxu1 }
 0x26e   :  { %v6522_v38 = vadd.f32 %v2635_v49, %v6169_v54  ;;  %v2637_v15 = vpop.f32.mrb[77].mxu0  ;;  %v6525_v19 = vadd.f32 %v6340_v41, %v2820_v24  ;;  %v4562_v37 = vpop.f32.mrb[142].mxu1 }
 0x26f   :  { %v3169_v63 = vadd.f32 %v3168_v26, %v3106_v56  ;;  %v3037_v12 = vadd.f32 %v3036_v42, %v6501_v17  ;;  %v2638_v46 = vpop.f32.mrb[78].mxu0  ;;  %v6531_v7 = vadd.f32 %v6349_v13, %v4562_v37  ;;  %v2823_v10 = vpop.f32.mrb[143].mxu1  ;;  %v3110_v15 = vmul.f32 %v6519_v8, %v6519_v8 }
 0x270   :  { %v3108_v54 = vmul.f32 %v6525_v19, %v6525_v19  ;;  %v6536_v2 = vadd.f32 %v2638_v46, %v6174_v62  ;;  %v2640_v41 = vpop.f32.mrb[79].mxu0  ;;  %v6539_v9 = vadd.f32 %v6343_v57, %v2823_v10 }
 0x271   :  { %v3038_v49 = vadd.f32 %v3037_v12, %v6525_v19  ;;  %v3170_v56 = vadd.f32 %v3169_v63, %v3107_v3  ;;  %v3111_v41 = vmul.f32 %v6531_v7, %v6531_v7 }
 0x272   :  { %v3109_v42 = vmul.f32 %v6539_v9, %v6539_v9 }
 0x273   :  { %v3171_v26 = vadd.f32 %v3170_v56, %v3108_v54  ;;  %v3039_v13 = vadd.f32 %v3038_v49, %v6539_v9 }
 0x274   :  { %v4565_v24 = vpop.f32.mrb[144].mxu1 }
 0x275   :  { %v3040_v62 = vadd.f32 %v3039_v13, %v6519_v8  ;;  %v3172_v37 = vadd.f32 %v3171_v26, %v3109_v42  ;;  %v2643_v46 = vpop.f32.mrb[80].mxu0  ;;  %v6549_v57 = vadd.f32 %v6364_v4, %v4565_v24  ;;  %v2836_v10 = vpop.f32.mrb[145].mxu1 }
 0x276   :  { %v6552_v3 = vadd.f32 %v2643_v46, %v6185_v11  ;;  %v2645_v63 = vpop.f32.mrb[81].mxu0  ;;  %v6555_v12 = vadd.f32 %v6354_v29, %v2836_v10  ;;  %v4566_v54 = vpop.f32.mrb[146].mxu1 }
 0x277   :  { %v3173_v49 = vadd.f32 %v3172_v37, %v3110_v15  ;;  %v3041_v56 = vadd.f32 %v3040_v62, %v6531_v7  ;;  %v2646_v42 = vpop.f32.mrb[82].mxu0  ;;  %v6561_v26 = vadd.f32 %v6369_v35, %v4566_v54  ;;  %v2839_v4 = vpop.f32.mrb[147].mxu1  ;;  %v3114_v63 = vmul.f32 %v6549_v57, %v6549_v57 }
 0x278   :  { %v3112_v11 = vmul.f32 %v6555_v12, %v6555_v12  ;;  %v6566_v13 = vadd.f32 %v2646_v42, %v6190_v18  ;;  %v2648_v29 = vpop.f32.mrb[83].mxu0  ;;  %v6569_v24 = vadd.f32 %v6359_v27, %v2839_v4 }
 0x279   :  { %v3042_v46 = vadd.f32 %v3041_v56, %v6555_v12  ;;  %v3174_v15 = vadd.f32 %v3173_v49, %v3111_v41  ;;  %v3115_v29 = vmul.f32 %v6561_v26, %v6561_v26 }
 0x27a   :  { %v3113_v62 = vmul.f32 %v6569_v24, %v6569_v24 }
 0x27b   :  { %v3175_v37 = vadd.f32 %v3174_v15, %v3112_v11  ;;  %v3043_v35 = vadd.f32 %v3042_v46, %v6569_v24 }
 0x27c   :  { %v4569_v10 = vpop.f32.mrb[148].mxu1 }
 0x27d   :  { %v3044_v18 = vadd.f32 %v3043_v35, %v6549_v57  ;;  %v3176_v54 = vadd.f32 %v3175_v37, %v3113_v62  ;;  %v2651_v42 = vpop.f32.mrb[84].mxu0  ;;  %v6579_v27 = vadd.f32 %v6384_v23, %v4569_v10  ;;  %v2852_v4 = vpop.f32.mrb[149].mxu1 }
 0x27e   :  { %v6582_v41 = vadd.f32 %v2651_v42, %v6201_v28  ;;  %v2653_v49 = vpop.f32.mrb[85].mxu0  ;;  %v6585_v56 = vadd.f32 %v6374_v5, %v2852_v4  ;;  %v4570_v11 = vpop.f32.mrb[150].mxu1 }
 0x27f   :  { %v3177_v46 = vadd.f32 %v3176_v54, %v3114_v63  ;;  %v3045_v15 = vadd.f32 %v3044_v18, %v6561_v26  ;;  %v2654_v62 = vpop.f32.mrb[86].mxu0  ;;  %v6591_v37 = vadd.f32 %v6389_v43, %v4570_v11  ;;  %v2855_v23 = vpop.f32.mrb[151].mxu1  ;;  %v3118_v49 = vmul.f32 %v6579_v27, %v6579_v27 }
 0x280   :  { %v3116_v28 = vmul.f32 %v6585_v56, %v6585_v56  ;;  %v6596_v35 = vadd.f32 %v2654_v62, %v6206_v34  ;;  %v2656_v5 = vpop.f32.mrb[87].mxu0  ;;  %v6599_v10 = vadd.f32 %v6379_v60, %v2855_v23 }
 0x281   :  { %v3046_v42 = vadd.f32 %v3045_v15, %v6585_v56  ;;  %v3178_v63 = vadd.f32 %v3177_v46, %v3115_v29  ;;  %v3119_v5 = vmul.f32 %v6591_v37, %v6591_v37 }
 0x282   :  { %v3117_v18 = vmul.f32 %v6599_v10, %v6599_v10 }
 0x283   :  { %v3179_v54 = vadd.f32 %v3178_v63, %v3116_v28  ;;  %v3047_v43 = vadd.f32 %v3046_v42, %v6599_v10 }
 0x284   :  { %v4573_v4 = vpop.f32.mrb[152].mxu1 }
 0x285   :  { %v3048_v34 = vadd.f32 %v3047_v43, %v6579_v27  ;;  %v3180_v11 = vadd.f32 %v3179_v54, %v3117_v18  ;;  %v2659_v62 = vpop.f32.mrb[88].mxu0  ;;  %v6609_v60 = vadd.f32 %v6404_v31, %v4573_v4  ;;  %v2868_v23 = vpop.f32.mrb[153].mxu1 }
 0x286   :  { %v6612_v29 = vadd.f32 %v2659_v62, %v6217_v50  ;;  %v2661_v46 = vpop.f32.mrb[89].mxu0  ;;  %v6615_v15 = vadd.f32 %v6394_v20, %v2868_v23  ;;  %v4574_v28 = vpop.f32.mrb[154].mxu1 }
 0x287   :  { %v3181_v42 = vadd.f32 %v3180_v11, %v3118_v49  ;;  %v3049_v63 = vadd.f32 %v3048_v34, %v6591_v37  ;;  %v2662_v18 = vpop.f32.mrb[90].mxu0  ;;  %v6621_v54 = vadd.f32 %v6409_v39, %v4574_v28  ;;  %v2871_v31 = vpop.f32.mrb[155].mxu1  ;;  %v3122_v46 = vmul.f32 %v6609_v60, %v6609_v60 }
 0x288   :  { %v3120_v50 = vmul.f32 %v6615_v15, %v6615_v15  ;;  %v6626_v43 = vadd.f32 %v2662_v18, %v6222_v61  ;;  %v2664_v20 = vpop.f32.mrb[91].mxu0  ;;  %v6629_v4 = vadd.f32 %v6399_v33, %v2871_v31 }
 0x289   :  { %v3050_v62 = vadd.f32 %v3049_v63, %v6615_v15  ;;  %v3182_v49 = vadd.f32 %v3181_v42, %v3119_v5  ;;  %v3123_v20 = vmul.f32 %v6621_v54, %v6621_v54 }
 0x28a   :  { %v3121_v34 = vmul.f32 %v6629_v4, %v6629_v4 }
 0x28b   :  { %v3183_v11 = vadd.f32 %v3182_v49, %v3120_v50  ;;  %v3051_v39 = vadd.f32 %v3050_v62, %v6629_v4 }
 0x28c   :  { %v4577_v23 = vpop.f32.mrb[156].mxu1 }
 0x28d   :  { %v3052_v61 = vadd.f32 %v3051_v39, %v6609_v60  ;;  %v3184_v28 = vadd.f32 %v3183_v11, %v3121_v34  ;;  %v2667_v18 = vpop.f32.mrb[92].mxu0  ;;  %v6639_v33 = vadd.f32 %v6424_v58, %v4577_v23  ;;  %v2884_v31 = vpop.f32.mrb[157].mxu1 }
 0x28e   :  { %v6642_v5 = vadd.f32 %v2667_v18, %v6233_v14  ;;  %v2669_v42 = vpop.f32.mrb[93].mxu0  ;;  %v6645_v63 = vadd.f32 %v6414_v45, %v2884_v31  ;;  %v4578_v50 = vpop.f32.mrb[158].mxu1 }
 0x28f   :  { %v3185_v62 = vadd.f32 %v3184_v28, %v3122_v46  ;;  %v3053_v49 = vadd.f32 %v3052_v61, %v6621_v54  ;;  %v2670_v34 = vpop.f32.mrb[94].mxu0  ;;  %v6651_v11 = vadd.f32 %v6429_v1, %v4578_v50  ;;  %v2887_v58 = vpop.f32.mrb[159].mxu1  ;;  %v3126_v42 = vmul.f32 %v6639_v33, %v6639_v33 }
 0x290   :  { %v3124_v14 = vmul.f32 %v6645_v63, %v6645_v63  ;;  %v6656_v39 = vadd.f32 %v2670_v34, %v6238_v21  ;;  %v2672_v45 = vpop.f32.mrb[95].mxu0  ;;  %v6659_v23 = vadd.f32 %v6419_v53, %v2887_v58 }
 0x291   :  { %v3054_v18 = vadd.f32 %v3053_v49, %v6645_v63  ;;  %v3186_v46 = vadd.f32 %v3185_v62, %v3123_v20  ;;  %v3127_v45 = vmul.f32 %v6651_v11, %v6651_v11 }
 0x292   :  { %v3125_v61 = vmul.f32 %v6659_v23, %v6659_v23 }
 0x293   :  { %v3187_v28 = vadd.f32 %v3186_v46, %v3124_v14  ;;  %v3055_v1 = vadd.f32 %v3054_v18, %v6659_v23 }
 0x294   :  { %v4581_v31 = vpop.f32.mrb[160].mxu1 }
 0x295   :  { %v3056_v21 = vadd.f32 %v3055_v1, %v6639_v33  ;;  %v3188_v50 = vadd.f32 %v3187_v28, %v3125_v61  ;;  %v2675_v34 = vpop.f32.mrb[96].mxu0  ;;  %v6669_v53 = vadd.f32 %v6464_v16, %v4581_v31  ;;  %v2900_v58 = vpop.f32.mrb[161].mxu1 }
 0x296   :  { %v6672_v20 = vadd.f32 %v2675_v34, %v6351_v48  ;;  %v2677_v62 = vpop.f32.mrb[97].mxu0  ;;  %v6675_v49 = vadd.f32 %v6435_v22, %v2900_v58  ;;  %v4582_v14 = vpop.f32.mrb[162].mxu1 }
 0x297   :  { %8139 = vst [vmem:[#allocation19_spill] sm:$0xff] %v6669_v53  ;;  %v3189_v18 = vadd.f32 %v3188_v50, %v3126_v42  ;;  %v3057_v46 = vadd.f32 %v3056_v21, %v6651_v11  ;;  %v2678_v61 = vpop.f32.mrb[98].mxu0  ;;  %v6681_v28 = vadd.f32 %v6477_v55, %v4582_v14  ;;  %v2903_v16 = vpop.f32.mrb[163].mxu1  ;;  %v3130_v62 = vmul.f32 %v6669_v53, %v6669_v53 }
 0x298   :  { %v3128_v48 = vmul.f32 %v6675_v49, %v6675_v49  ;;  %v6686_v1 = vadd.f32 %v2678_v61, %v6356_v51  ;;  %v6689_v22 = vadd.f32 %v6444_v44, %v2903_v16  ;;  %v2680_v31 = vpop.f32.mrb[99].mxu0 }
 0x299   :  { %8140 = vst [vmem:[#allocation20_spill] sm:$0xff] %v6681_v28  ;;  %v3058_v34 = vadd.f32 %v3057_v46, %v6675_v49  ;;  %v3190_v42 = vadd.f32 %v3189_v18, %v3127_v45  ;;  %v8142_v46 = vld [vmem:[#allocation2_spill] sm:$0xff] }
 0x29a   :  { %v3129_v21 = vmul.f32 %v6689_v22, %v6689_v22 }
 0x29b   :  { %v3191_v50 = vadd.f32 %v3190_v42, %v3128_v48  ;;  %v3059_v55 = vadd.f32 %v3058_v34, %v6689_v22  ;;  %v3131_v34 = vmul.f32 %v6681_v28, %v6681_v28 }
 0x29c   :  { %v4585_v58 = vpop.f32.mrb[164].mxu1 }
 0x29d   :  { %v3060_v51 = vadd.f32 %v3059_v55, %v6669_v53  ;;  %v3192_v14 = vadd.f32 %v3191_v50, %v3129_v21  ;;  %v2683_v61 = vpop.f32.mrb[100].mxu0  ;;  %v6699_v44 = vadd.f32 %v6522_v38, %v4585_v58  ;;  %v2916_v16 = vpop.f32.mrb[165].mxu1 }
 0x29e   :  { %v6702_v45 = vadd.f32 %v2683_v61, %v8142_v46  ;;  %v2685_v18 = vpop.f32.mrb[101].mxu0  ;;  %v6705_v48 = vadd.f32 %v6492_v32, %v2916_v16  ;;  %v4586_v31 = vpop.f32.mrb[166].mxu1  ;;  %v8144_v61 = vld [vmem:[#allocation3_spill] sm:$0xff] }
 0x29f   :  { %8141 = vst [vmem:[#allocation21_spill] sm:$0xff] %v6699_v44  ;;  %v3193_v42 = vadd.f32 %v3192_v14, %v3130_v62  ;;  %v3061_v55 = vadd.f32 %v3060_v51, %v6681_v28  ;;  %v2686_v21 = vpop.f32.mrb[102].mxu0  ;;  %v6711_v50 = vadd.f32 %v6536_v2, %v4586_v31  ;;  %v2919_v38 = vpop.f32.mrb[167].mxu1  ;;  %v3134_v28 = vmul.f32 %v6699_v44, %v6699_v44 }
 0x2a0   :  { %v3132_v58 = vmul.f32 %v6705_v48, %v6705_v48  ;;  %v6716_v46 = vadd.f32 %v2686_v21, %v8144_v61  ;;  %v6719_v32 = vadd.f32 %v6506_v40, %v2919_v38  ;;  %v2688_v16 = vpop.f32.mrb[103].mxu0 }
 0x2a1   :  { %8143 = vst [vmem:[#allocation2_spill] sm:$0xff] %v6711_v50  ;;  %v3062_v18 = vadd.f32 %v3061_v55, %v6705_v48  ;;  %v3194_v62 = vadd.f32 %v3193_v42, %v3131_v34  ;;  %v8146_v55 = vld [vmem:[#allocation4_spill] sm:$0xff] }
 0x2a2   :  { %v3133_v51 = vmul.f32 %v6719_v32, %v6719_v32 }
 0x2a3   :  { %v3195_v14 = vadd.f32 %v3194_v62, %v3132_v58  ;;  %v3063_v2 = vadd.f32 %v3062_v18, %v6719_v32  ;;  %v3135_v18 = vmul.f32 %v6711_v50, %v6711_v50 }
 0x2a4   :  { %v4589_v31 = vpop.f32.mrb[168].mxu1 }
 0x2a5   :  { %v3064_v21 = vadd.f32 %v3063_v2, %v6699_v44  ;;  %v3196_v61 = vadd.f32 %v3195_v14, %v3133_v51  ;;  %v2691_v53 = vpop.f32.mrb[104].mxu0  ;;  %v6729_v40 = vadd.f32 %v6582_v41, %v4589_v31  ;;  %v2932_v38 = vpop.f32.mrb[169].mxu1  ;;  %v8148_v31 = vld [vmem:[#allocation5_spill] sm:$0xff] }
 0x2a6   :  { %v6732_v34 = vadd.f32 %v2691_v53, %v8146_v55  ;;  %v2693_v42 = vpop.f32.mrb[105].mxu0  ;;  %v6735_v58 = vadd.f32 %v6552_v3, %v2932_v38  ;;  %v4590_v16 = vpop.f32.mrb[170].mxu1 }
 0x2a7   :  { %8145 = vst [vmem:[#allocation3_spill] sm:$0xff] %v6729_v40  ;;  %v3197_v62 = vadd.f32 %v3196_v61, %v3134_v28  ;;  %v3065_v2 = vadd.f32 %v3064_v21, %v6711_v50  ;;  %v2694_v51 = vpop.f32.mrb[106].mxu0  ;;  %v6741_v14 = vadd.f32 %v6596_v35, %v4590_v16  ;;  %v2935_v41 = vpop.f32.mrb[171].mxu1  ;;  %v3138_v50 = vmul.f32 %v6729_v40, %v6729_v40 }
 0x2a8   :  { %v3136_v53 = vmul.f32 %v6735_v58, %v6735_v58  ;;  %v6746_v55 = vadd.f32 %v2694_v51, %v8148_v31  ;;  %v6749_v3 = vadd.f32 %v6566_v13, %v2935_v41  ;;  %v2696_v38 = vpop.f32.mrb[107].mxu0 }
 0x2a9   :  { %8147 = vst [vmem:[#allocation4_spill] sm:$0xff] %v6741_v14  ;;  %v3066_v42 = vadd.f32 %v3065_v2, %v6735_v58  ;;  %v3198_v28 = vadd.f32 %v3197_v62, %v3135_v18  ;;  %v8151_v2 = vld [vmem:[#allocation6_spill] sm:$0xff] }
 0x2aa   :  { %8149 = vst [vmem:[#allocation5_spill] sm:$0xff] %v6749_v3  ;;  %v3137_v21 = vmul.f32 %v6749_v3, %v6749_v3 }
 0x2ab   :  { %v3199_v61 = vadd.f32 %v3198_v28, %v3136_v53  ;;  %v3067_v35 = vadd.f32 %v3066_v42, %v6749_v3  ;;  %v3139_v42 = vmul.f32 %v6741_v14, %v6741_v14 }
 0x2ac   :  { %v4593_v16 = vpop.f32.mrb[172].mxu1 }
 0x2ad   :  { %v3068_v51 = vadd.f32 %v3067_v35, %v6729_v40  ;;  %v3200_v31 = vadd.f32 %v3199_v61, %v3137_v21  ;;  %v2699_v44 = vpop.f32.mrb[108].mxu0  ;;  %v6759_v13 = vadd.f32 %v6642_v5, %v4593_v16  ;;  %v2948_v41 = vpop.f32.mrb[173].mxu1 }
 0x2ae   :  { %v4697_v18 = vadd.f32 %v2699_v44, %v8151_v2  ;;  %v2701_v62 = vpop.f32.mrb[109].mxu0  ;;  %v6763_v38 = vadd.f32 %v6612_v29, %v2948_v41  ;;  %v4594_v53 = vpop.f32.mrb[174].mxu1  ;;  %v8154_v44 = vld [vmem:[#allocation7_spill] sm:$0xff] }
 0x2af   :  { %8150 = vst [vmem:[#allocation22_spill] sm:$0xff] %v6759_v13  ;;  %v3201_v28 = vadd.f32 %v3200_v31, %v3138_v50  ;;  %v3069_v3 = vadd.f32 %v3068_v51, %v6741_v14  ;;  %v2702_v35 = vpop.f32.mrb[110].mxu0  ;;  %v6769_v21 = vadd.f32 %v6656_v39, %v4594_v53  ;;  %v2951_v5 = vpop.f32.mrb[175].mxu1  ;;  %v3142_v53 = vmul.f32 %v6759_v13, %v6759_v13 }
 0x2b0   :  { %8152 = vst [vmem:[#allocation6_spill] sm:$0xff] %v6763_v38  ;;  %v3140_v61 = vmul.f32 %v6763_v38, %v6763_v38  ;;  %v4698_v16 = vadd.f32 %v2702_v35, %v8154_v44  ;;  %v6775_v29 = vadd.f32 %v6626_v43, %v2951_v5  ;;  %v2704_v41 = vpop.f32.mrb[111].mxu0 }
 0x2b1   :  { %8153 = vst [vmem:[#allocation23_spill] sm:$0xff] %v6769_v21  ;;  %v3070_v2 = vadd.f32 %v3069_v3, %v6763_v38  ;;  %v3202_v62 = vadd.f32 %v3201_v28, %v3139_v42  ;;  %v8156_v3 = vld [vmem:[#allocation8_spill] sm:$0xff] }
 0x2b2   :  { %8155 = vst [vmem:[#allocation7_spill] sm:$0xff] %v6775_v29  ;;  %v3141_v50 = vmul.f32 %v6775_v29, %v6775_v29 }
 0x2b3   :  { %v3203_v51 = vadd.f32 %v3202_v62, %v3140_v61  ;;  %v3071_v39 = vadd.f32 %v3070_v2, %v6775_v29  ;;  %v3143_v2 = vmul.f32 %v6769_v21, %v6769_v21 }
 0x2b4   :  { %v4597_v31 = vpop.f32.mrb[176].mxu1 }
 0x2b5   :  { %v3072_v14 = vadd.f32 %v3071_v39, %v6759_v13  ;;  %v3204_v35 = vadd.f32 %v3203_v51, %v3141_v50  ;;  %v2707_v44 = vpop.f32.mrb[112].mxu0  ;;  %v6785_v43 = vadd.f32 %v6702_v45, %v4597_v31  ;;  %v2964_v5 = vpop.f32.mrb[177].mxu1  ;;  %v8157_v31 = vld [vmem:[#allocation9_spill] sm:$0xff] }
 0x2b6   :  { %v4699_v42 = vadd.f32 %v2707_v44, %v8156_v3  ;;  %v2709_v28 = vpop.f32.mrb[113].mxu0  ;;  %v6789_v41 = vadd.f32 %v6672_v20, %v2964_v5  ;;  %v4598_v61 = vpop.f32.mrb[178].mxu1 }
 0x2b7   :  { %v3205_v62 = vadd.f32 %v3204_v35, %v3142_v53  ;;  %v3073_v29 = vadd.f32 %v3072_v14, %v6769_v21  ;;  %v2710_v39 = vpop.f32.mrb[114].mxu0  ;;  %v6795_v50 = vadd.f32 %v6716_v46, %v4598_v61  ;;  %v2967_v45 = vpop.f32.mrb[179].mxu1  ;;  %v3146_v61 = vmul.f32 %v6785_v43, %v6785_v43 }
 0x2b8   :  { %v3144_v51 = vmul.f32 %v6789_v41, %v6789_v41  ;;  %v4700_v44 = vadd.f32 %v2710_v39, %v8157_v31  ;;  %v6801_v20 = vadd.f32 %v6686_v1, %v2967_v45  ;;  %v2712_v5 = vpop.f32.mrb[115].mxu0 }
 0x2b9   :  { %v3074_v3 = vadd.f32 %v3073_v29, %v6789_v41  ;;  %v3206_v28 = vadd.f32 %v3205_v62, %v3143_v2  ;;  %v8159_v5 = vld [vmem:[#allocation10_spill] sm:$0xff] }
 0x2ba   :  { %v3145_v14 = vmul.f32 %v6801_v20, %v6801_v20 }
 0x2bb   :  { %v3207_v53 = vadd.f32 %v3206_v28, %v3144_v51  ;;  %v3075_v46 = vadd.f32 %v3074_v3, %v6801_v20  ;;  %v3147_v3 = vmul.f32 %v6795_v50, %v6795_v50 }
 0x2bc   :  { %v4601_v35 = vpop.f32.mrb[180].mxu1 }
 0x2bd   :  { %v3076_v21 = vadd.f32 %v3075_v46, %v6785_v43  ;;  %v3208_v39 = vadd.f32 %v3207_v53, %v3145_v14  ;;  %v2715_v31 = vpop.f32.mrb[116].mxu0  ;;  %v6810_v1 = vadd.f32 %v4697_v18, %v4601_v35  ;;  %v2980_v45 = vpop.f32.mrb[181].mxu1  ;;  %v8162_v53 = vld [vmem:[#allocation11_spill] sm:$0xff] }
 0x2be   :  { %v4701_v29 = vadd.f32 %v2715_v31, %v8159_v5  ;;  %v2717_v2 = vpop.f32.mrb[117].mxu0  ;;  %v6814_v62 = vadd.f32 %v6732_v34, %v2980_v45  ;;  %v4602_v51 = vpop.f32.mrb[182].mxu1 }
 0x2bf   :  { %8158 = vst [vmem:[#allocation8_spill] sm:$0xff] %v6810_v1  ;;  %v3209_v28 = vadd.f32 %v3208_v39, %v3146_v61  ;;  %v3077_v13 = vadd.f32 %v3076_v21, %v6795_v50  ;;  %v2718_v38 = vpop.f32.mrb[118].mxu0  ;;  %v6819_v46 = vadd.f32 %v4698_v16, %v4602_v51  ;;  %v2983_v14 = vpop.f32.mrb[183].mxu1  ;;  %v3150_v2 = vmul.f32 %v6810_v1, %v6810_v1 }
 0x2c0   :  { %8160 = vst [vmem:[#allocation9_spill] sm:$0xff] %v6814_v62  ;;  %v3148_v18 = vmul.f32 %v6814_v62, %v6814_v62  ;;  %v4702_v35 = vadd.f32 %v2718_v38, %v8162_v53  ;;  %v6825_v31 = vadd.f32 %v6746_v55, %v2983_v14  ;;  %v2720_v34 = vpop.f32.mrb[119].mxu0 }
 0x2c1   :  { %8161 = vst [vmem:[#allocation10_spill] sm:$0xff] %v6819_v46  ;;  %v3078_v45 = vadd.f32 %v3077_v13, %v6814_v62  ;;  %v3210_v5 = vadd.f32 %v3209_v28, %v3147_v3  ;;  %v8165_v34 = vld [vmem:[#allocation12_spill] sm:$0xff] }
 0x2c2   :  { %8163 = vst [vmem:[#allocation11_spill] sm:$0xff] %v6825_v31  ;;  %v3149_v61 = vmul.f32 %v6825_v31, %v6825_v31 }
 0x2c3   :  { %v3211_v21 = vadd.f32 %v3210_v5, %v3148_v18  ;;  %v3079_v16 = vadd.f32 %v3078_v45, %v6825_v31  ;;  %v3151_v18 = vmul.f32 %v6819_v46, %v6819_v46 }
 0x2c4   :  { %v4605_v39 = vpop.f32.mrb[184].mxu1 }
 0x2c5   :  { %v3080_v51 = vadd.f32 %v3079_v16, %v6810_v1  ;;  %v3212_v38 = vadd.f32 %v3211_v21, %v3149_v61  ;;  %v2723_v53 = vpop.f32.mrb[120].mxu0  ;;  %v6834_v55 = vadd.f32 %v4701_v29, %v4605_v39  ;;  %v2996_v14 = vpop.f32.mrb[185].mxu1  ;;  %v8168_v21 = vld [vmem:[#allocation13_spill] sm:$0xff] }
 0x2c6   :  { %v4703_v13 = vadd.f32 %v2723_v53, %v8165_v34  ;;  %v2725_v3 = vpop.f32.mrb[121].mxu0  ;;  %v6837_v28 = vadd.f32 %v4699_v42, %v2996_v14  ;;  %v4606_v40 = vpop.f32.mrb[186].mxu1 }
 0x2c7   :  { %8164 = vst [vmem:[#allocation24_spill] sm:$0xff] %v6834_v55  ;;  %v3213_v45 = vadd.f32 %v3212_v38, %v3150_v2  ;;  %v3081_v5 = vadd.f32 %v3080_v51, %v6819_v46  ;;  %v2726_v31 = vpop.f32.mrb[122].mxu0  ;;  %v6842_v62 = vadd.f32 %v4702_v35, %v4606_v40  ;;  %v2999_v61 = vpop.f32.mrb[187].mxu1  ;;  %v3154_v35 = vmul.f32 %v6834_v55, %v6834_v55 }
 0x2c8   :  { %8166 = vst [vmem:[#allocation12_spill] sm:$0xff] %v6837_v28  ;;  %v3152_v29 = vmul.f32 %v6837_v28, %v6837_v28  ;;  %v4704_v16 = vadd.f32 %v2726_v31, %v8168_v21  ;;  %v6847_v39 = vadd.f32 %v4700_v44, %v2999_v61  ;;  %v2728_v42 = vpop.f32.mrb[123].mxu0  ;;  %v8170_v61 = vld [vmem:[#allocation14_spill] sm:$0xff] }
 0x2c9   :  { %8167 = vst [vmem:[#allocation25_spill] sm:$0xff] %v6842_v62  ;;  %v3082_v53 = vadd.f32 %v3081_v5, %v6837_v28  ;;  %v3214_v14 = vadd.f32 %v3213_v45, %v3151_v18  ;;  %v3155_v45 = vmul.f32 %v6842_v62, %v6842_v62 }
 0x2ca   :  { %8169 = vst [vmem:[#allocation13_spill] sm:$0xff] %v6847_v39  ;;  %v3153_v2 = vmul.f32 %v6847_v39, %v6847_v39 }
 0x2cb   :  { %v3215_v38 = vadd.f32 %v3214_v14, %v3152_v29  ;;  %v3083_v51 = vadd.f32 %v3082_v53, %v6847_v39 }
 0x2cc   :  { %v4609_v40 = vpop.f32.mrb[188].mxu1 }
 0x2cd   :  { %v3084_v34 = vadd.f32 %v3083_v51, %v6834_v55  ;;  %v3216_v3 = vadd.f32 %v3215_v38, %v3153_v2  ;;  %v2731_v31 = vpop.f32.mrb[124].mxu0  ;;  %v3012_v44 = vpop.f32.mrb[189].mxu1  ;;  %v8173_v38 = vld [vmem:[#allocation15_spill] sm:$0xff] }
 0x2ce   :  { %v4705_v21 = vadd.f32 %v2731_v31, %v8170_v61  ;;  %v2733_v42 = vpop.f32.mrb[125].mxu0  ;;  %v6857_v5 = vadd.f32 %v4703_v13, %v3012_v44  ;;  %v4610_v18 = vpop.f32.mrb[190].mxu1 }
 0x2cf   :  { %v3217_v29 = vadd.f32 %v3216_v3, %v3154_v35  ;;  %v3085_v53 = vadd.f32 %v3084_v34, %v6842_v62  ;;  %v2734_v14 = vpop.f32.mrb[126].mxu0  ;;  %v3015_v39 = vpop.f32.mrb[191].mxu1 }
 0x2d0   :  { %8171 = vst [vmem:[#allocation14_spill] sm:$0xff] %v6857_v5  ;;  %v6862_v28 = vadd.f32 %v4705_v21, %v4609_v40  ;;  %v3156_v2 = vmul.f32 %v6857_v5, %v6857_v5  ;;  %v4706_v51 = vadd.f32 %v2734_v14, %v8173_v38  ;;  %v6867_v31 = vadd.f32 %v4704_v16, %v3015_v39  ;;  %v2736_v13 = vpop.f32.mrb[127].mxu0 }
 0x2d1   :  { %v3086_v44 = vadd.f32 %v3085_v53, %v6857_v5  ;;  %v3218_v61 = vadd.f32 %v3217_v29, %v3155_v45 }
 0x2d2   :  { %8172 = vst [vmem:[#allocation26_spill] sm:$0xff] %v6862_v28  ;;  %8174 = vst [vmem:[#allocation15_spill] sm:$0xff] %v6867_v31  ;;  %v6870_v42 = vadd.f32 %v4706_v51, %v4610_v18  ;;  %v3157_v35 = vmul.f32 %v6867_v31, %v6867_v31  ;;  %v3158_v3 = vmul.f32 %v6862_v28, %v6862_v28 }
 0x2d3   :  { %v3219_v34 = vadd.f32 %v3218_v61, %v3156_v2  ;;  %v3087_v40 = vadd.f32 %v3086_v44, %v6867_v31 }
 0x2d4   :  { %v3159_v16 = vmul.f32 %v6870_v42, %v6870_v42 }
 0x2d5   :  { %v3088_v21 = vadd.f32 %v3087_v40, %v6862_v28  ;;  %v3220_v14 = vadd.f32 %v3219_v34, %v3157_v35 }
 0x2d7   :  { %v3089_v39 = vadd.f32 %v3088_v21, %v6870_v42  ;;  %v3221_v45 = vadd.f32 %v3220_v14, %v3158_v3  ;;  %v8175_v14 = vld [vmem:[#allocation17_spill] sm:$0xff] }
 0x2d9   :  { %v3090_v18 = vrot.slane %v3089_v39, 4  ;;  %v3222_v29 = vadd.f32 %v3221_v45, %v3159_v16  ;;  %v8192_v16 = vld [vmem:[#allocation6_spill] sm:$0xff] }
 0x2db   :  { %v3091_v53 = vadd.f32 %v3090_v18, %v3089_v39  ;;  %v3223_v38 = vrot.slane %v3222_v29, 4  ;;  %v8176_v39 = vld [vmem:[#allocation18_spill] sm:$0xff]  ;;  %v8177_v18 = vld [vmem:[#allocation16_spill] sm:$0xff] }
 0x2dd   :  { %v3092_v51 = vrot.slane %v3091_v53, 2  ;;  %v3224_v2 = vadd.f32 %v3223_v38, %v3222_v29  ;;  %v8191_v29 = vld [vmem:[#allocation4_spill] sm:$0xff] }
 0x2df   :  { %v3093_v13 = vadd.f32 %v3092_v51, %v3091_v53  ;;  %v3225_v44 = vrot.slane %v3224_v2, 2  ;;  %v8193_v53 = vld [vmem:[#allocation7_spill] sm:$0xff] }
 0x2e1   :  { %v3094_v61 = vrot.slane %v3093_v13, 1  ;;  %v3226_v31 = vadd.f32 %v3225_v44, %v3224_v2  ;;  %v8180_v44 = vld [vmem:[#allocation21_spill] sm:$0xff] }
 0x2e3   :  { %v3095_v5 = vadd.f32 %v3094_v61, %v3093_v13  ;;  %v3227_v62 = vrot.slane %v3226_v31, 1  ;;  %v8181_v61 = vld [vmem:[#allocation2_spill] sm:$0xff]  ;;  %v8186_v13 = vld [vmem:[#allocation13_spill] sm:$0xff] }
 0x2e5   :  { %v3228_v40 = vadd.f32 %v3227_v62, %v3226_v31  ;;  %v6881_v35 = vmul.f32 0.001953125, %v3095_v5  ;;  %v8183_v31 = vld [vmem:[#allocation9_spill] sm:$0xff]  ;;  %v8194_v5 = vld [vmem:[#allocation22_spill] sm:$0xff]  ;;  %v8195_v62 = vld [vmem:[#allocation23_spill] sm:$0xff] }
 0x2e7   :  { %v3230_v34 = vmul.f32 0.001953125, %v3228_v40  ;;  %v3231_v21 = vmul.f32 %v6881_v35, %v6881_v35  ;;  %v3281_v2 = vsub.f32 %v8191_v29, %v6881_v35  ;;  %v3282_v40 = vsub.f32 %v8192_v16, %v6881_v35 }
 0x2e8   :  { %v3283_v1 = vsub.f32 %v8193_v53, %v6881_v35  ;;  %v3285_v29 = vsub.f32 %v8195_v62, %v6881_v35  ;;  %v8196_v45 = vsub.f32 %v8175_v14, %v6881_v35  ;;  %v8197_v51 = vsub.f32 %v8176_v39, %v6881_v35 }
 0x2e9   :  { %v3232_v3 = vsub.f32 %v3230_v34, %v3231_v21  ;;  %v8190_v34 = vld [vmem:[#allocation3_spill] sm:$0xff]  ;;  %v8198_v53 = vsub.f32 %v8177_v18, %v6881_v35  ;;  %v8199_v62 = vsub.f32 %v6441_v25, %v6881_v35 }
 0x2ea   :  { %v3280_v46 = vsub.f32 %v8190_v34, %v6881_v35  ;;  %v3284_v34 = vsub.f32 %v8194_v5, %v6881_v35 }
 0x2eb   :  { %v3233_v38 = vmax.f32 %v3232_v3, 0.0  ;;  %v8179_v3 = vld [vmem:[#allocation20_spill] sm:$0xff] }
 0x2ed   :  { %v3234_v21 = vadd.f32 0.001, %v3233_v38  ;;  %v8182_v38 = vld [vmem:[#allocation5_spill] sm:$0xff] }
 0x2ef   :  { %5212 = vrsqrt.f32 %v3234_v21  ;;  %v8178_v21 = vld [vmem:[#allocation19_spill] sm:$0xff] }
 0x2f9   :  { %v7005_v55 = vpop.eup %5212 }
 0x2fa   :  { %v7019_v28 = vmul.f32 %v7005_v55, %v8196_v45  ;;  %v7025_v16 = vmul.f32 %v7005_v55, %v8197_v51  ;;  %v7031_v5 = vmul.f32 %v7005_v55, %v8198_v53  ;;  %v7037_v14 = vmul.f32 %v7005_v55, %v8199_v62 }
 0x2fb   :  { %v8200_v45 = vsub.f32 %v6467_v36, %v6881_v35  ;;  %v8201_v51 = vsub.f32 %v6480_v52, %v6881_v35  ;;  %v8202_v53 = vsub.f32 %v6461_v59, %v6881_v35  ;;  %v8203_v62 = vsub.f32 %v6471_v30, %v6881_v35 }
 0x2fd   :  { %v7043_v39 = vmul.f32 %v7005_v55, %v8200_v45  ;;  %v7049_v18 = vmul.f32 %v7005_v55, %v8201_v51  ;;  %v7055_v25 = vmul.f32 %v7005_v55, %v8202_v53  ;;  %v7061_v36 = vmul.f32 %v7005_v55, %v8203_v62 }
 0x2fe   :  { %v8204_v45 = vsub.f32 %v6495_v47, %v6881_v35  ;;  %v8205_v51 = vsub.f32 %v6509_v6, %v6881_v35  ;;  %v8206_v53 = vsub.f32 %v6489_v0, %v6881_v35  ;;  %v8207_v62 = vsub.f32 %v6501_v17, %v6881_v35 }
 0x300   :  { %v7067_v52 = vmul.f32 %v7005_v55, %v8204_v45  ;;  %v7073_v59 = vmul.f32 %v7005_v55, %v8205_v51  ;;  %v7079_v30 = vmul.f32 %v7005_v55, %v8206_v53  ;;  %v7085_v47 = vmul.f32 %v7005_v55, %v8207_v62 }
 0x301   :  { %v8208_v45 = vsub.f32 %v6525_v19, %v6881_v35  ;;  %v8209_v51 = vsub.f32 %v6539_v9, %v6881_v35  ;;  %v8210_v53 = vsub.f32 %v6519_v8, %v6881_v35  ;;  %v8211_v62 = vsub.f32 %v6531_v7, %v6881_v35 }
 0x303   :  { %v7091_v6 = vmul.f32 %v7005_v55, %v8208_v45  ;;  %v7097_v0 = vmul.f32 %v7005_v55, %v8209_v51  ;;  %v7103_v17 = vmul.f32 %v7005_v55, %v8210_v53  ;;  %v7109_v19 = vmul.f32 %v7005_v55, %v8211_v62 }
 0x304   :  { %v8212_v45 = vsub.f32 %v6555_v12, %v6881_v35  ;;  %v8213_v51 = vsub.f32 %v6569_v24, %v6881_v35  ;;  %v8214_v53 = vsub.f32 %v6549_v57, %v6881_v35  ;;  %v8215_v62 = vsub.f32 %v6561_v26, %v6881_v35 }
 0x306   :  { %v7115_v9 = vmul.f32 %v7005_v55, %v8212_v45  ;;  %v7121_v8 = vmul.f32 %v7005_v55, %v8213_v51  ;;  %v7127_v7 = vmul.f32 %v7005_v55, %v8214_v53  ;;  %v7133_v12 = vmul.f32 %v7005_v55, %v8215_v62 }
 0x307   :  { %v8216_v45 = vsub.f32 %v6585_v56, %v6881_v35  ;;  %v8217_v51 = vsub.f32 %v6599_v10, %v6881_v35  ;;  %v8218_v53 = vsub.f32 %v6579_v27, %v6881_v35  ;;  %v8219_v62 = vsub.f32 %v6591_v37, %v6881_v35 }
 0x309   :  { %v7139_v24 = vmul.f32 %v7005_v55, %v8216_v45  ;;  %v7145_v57 = vmul.f32 %v7005_v55, %v8217_v51  ;;  %v7151_v26 = vmul.f32 %v7005_v55, %v8218_v53  ;;  %v7157_v56 = vmul.f32 %v7005_v55, %v8219_v62 }
 0x30a   :  { %v8220_v45 = vsub.f32 %v6615_v15, %v6881_v35  ;;  %v8221_v51 = vsub.f32 %v6629_v4, %v6881_v35  ;;  %v8222_v53 = vsub.f32 %v6609_v60, %v6881_v35  ;;  %v8223_v62 = vsub.f32 %v6621_v54, %v6881_v35 }
 0x30c   :  { %v7163_v10 = vmul.f32 %v7005_v55, %v8220_v45  ;;  %v7169_v27 = vmul.f32 %v7005_v55, %v8221_v51  ;;  %v7175_v37 = vmul.f32 %v7005_v55, %v8222_v53  ;;  %v7181_v15 = vmul.f32 %v7005_v55, %v8223_v62 }
 0x30d   :  { %v8224_v45 = vsub.f32 %v6645_v63, %v6881_v35  ;;  %v8225_v51 = vsub.f32 %v6659_v23, %v6881_v35  ;;  %v8226_v53 = vsub.f32 %v6639_v33, %v6881_v35  ;;  %v8227_v62 = vsub.f32 %v6651_v11, %v6881_v35 }
 0x30f   :  { %v7187_v4 = vmul.f32 %v7005_v55, %v8224_v45  ;;  %v7193_v60 = vmul.f32 %v7005_v55, %v8225_v51  ;;  %v7199_v54 = vmul.f32 %v7005_v55, %v8226_v53  ;;  %v7205_v63 = vmul.f32 %v7005_v55, %v8227_v62 }
 0x310   :  { %v8228_v45 = vsub.f32 %v6675_v49, %v6881_v35  ;;  %v8229_v51 = vsub.f32 %v6689_v22, %v6881_v35  ;;  %v8230_v53 = vsub.f32 %v8178_v21, %v6881_v35  ;;  %v8231_v62 = vsub.f32 %v8179_v3, %v6881_v35 }
 0x312   :  { %v7211_v23 = vmul.f32 %v7005_v55, %v8228_v45  ;;  %v7217_v33 = vmul.f32 %v7005_v55, %v8229_v51  ;;  %v7223_v11 = vmul.f32 %v7005_v55, %v8230_v53  ;;  %v7229_v49 = vmul.f32 %v7005_v55, %v8231_v62 }
 0x313   :  { %v8232_v45 = vsub.f32 %v6705_v48, %v6881_v35  ;;  %v8233_v51 = vsub.f32 %v6719_v32, %v6881_v35  ;;  %v8234_v53 = vsub.f32 %v8180_v44, %v6881_v35  ;;  %v8235_v62 = vsub.f32 %v8181_v61, %v6881_v35 }
 0x314   :  { %v7271_v61 = vmul.f32 %v7005_v55, %v3281_v2  ;;  %v8240_v2 = vsub.f32 %v6801_v20, %v6881_v35  ;;  %v8246_v20 = vsub.f32 %v8183_v31, %v6881_v35 }
 0x315   :  { %v7235_v22 = vmul.f32 %v7005_v55, %v8232_v45  ;;  %v7241_v21 = vmul.f32 %v7005_v55, %v8233_v51  ;;  %v7247_v3 = vmul.f32 %v7005_v55, %v8234_v53  ;;  %v7253_v48 = vmul.f32 %v7005_v55, %v8235_v62 }
 0x316   :  { %v8236_v45 = vsub.f32 %v6735_v58, %v6881_v35  ;;  %v8237_v51 = vsub.f32 %v8182_v38, %v6881_v35  ;;  %v7268_v53 = vmul.f32 %v7005_v55, %v3280_v46  ;;  %v7274_v62 = vmul.f32 %v7005_v55, %v3282_v40 }
 0x317   :  { %v7277_v58 = vmul.f32 %v7005_v55, %v3283_v1  ;;  %v7283_v38 = vmul.f32 %v7005_v55, %v3285_v29  ;;  %v7295_v40 = vmul.f32 %v7005_v55, %v8240_v2  ;;  %v8242_v1 = vsub.f32 %v6785_v43, %v6881_v35  ;;  %v8248_v43 = vld [vmem:[#allocation11_spill] sm:$0xff] }
 0x318   :  { %v7259_v32 = vmul.f32 %v7005_v55, %v8236_v45  ;;  %v7265_v44 = vmul.f32 %v7005_v55, %v8237_v51  ;;  %v7280_v45 = vmul.f32 %v7005_v55, %v3284_v34  ;;  %v8238_v51 = vsub.f32 %v6789_v41, %v6881_v35 }
 0x319   :  { %8241 = vst [vmem:[#allocation18_spill] sm:$0xff] %v7295_v40  ;;  %v7301_v34 = vmul.f32 %v7005_v55, %v8242_v1  ;;  %v8244_v29 = vsub.f32 %v6795_v50, %v6881_v35  ;;  %v7318_v2 = vmul.f32 %v7005_v55, %v8246_v20  ;;  %v8249_v1 = vsub.f32 %v8248_v43, %v6881_v35  ;;  %v8250_v50 = vld [vmem:[#allocation8_spill] sm:$0xff]  ;;  %v8253_v40 = vld [vmem:[#allocation10_spill] sm:$0xff] }
 0x31a   :  { %v7289_v46 = vmul.f32 %v7005_v55, %v8238_v51  ;;  %v7312_v51 = vld [vmem:[%s8075_s2] ss:$0 sm:$0xff]  ;;  %v8256_v20 = vld [vmem:[#allocation12_spill] sm:$0xff] }
 0x31b   :  { %8243 = vst [vmem:[#allocation16_spill] sm:$0xff] %v7301_v34  ;;  %v7307_v41 = vmul.f32 %v7005_v55, %v8244_v29  ;;  %8247 = vst [vmem:[#allocation20_spill] sm:$0xff] %v7318_v2  ;;  %v7324_v34 = vmul.f32 %v7005_v55, %v8249_v1  ;;  %v8251_v29 = vsub.f32 %v8250_v50, %v6881_v35 }
 0x31c   :  { %8239 = vst [vmem:[#allocation17_spill] sm:$0xff] %v7289_v46  ;;  %v8254_v46 = vsub.f32 %v8253_v40, %v6881_v35  ;;  %v8257_v2 = vsub.f32 %v8256_v20, %v6881_v35  ;;  %v8259_v1 = vsub.f32 %v8186_v13, %v6881_v35 }
 0x31d   :  { %8245 = vst [vmem:[#allocation19_spill] sm:$0xff] %v7307_v41  ;;  %v7330_v41 = vmul.f32 %v7005_v55, %v8251_v29  ;;  %v8261_v29 = vld [vmem:[#allocation24_spill] sm:$0xff] }
 0x31e   :  { %v7336_v31 = vmul.f32 %v7005_v55, %v8254_v46  ;;  %v7342_v43 = vmul.f32 %v7005_v55, %v8257_v2  ;;  %v7348_v50 = vmul.f32 %v7005_v55, %v8259_v1  ;;  %v8264_v46 = vld [vmem:[#allocation25_spill] sm:$0xff]  ;;  %v8266_v2 = vld [vmem:[#allocation14_spill] sm:$0xff]  ;;  %v8268_v1 = vld [vmem:[#allocation15_spill] sm:$0xff] }
 0x31f   :  { %8252 = vst [vmem:[#allocation21_spill] sm:$0xff] %v7330_v41  ;;  %v8262_v41 = vsub.f32 %v8261_v29, %v6881_v35 }
 0x320   :  { %8255 = vst [vmem:[#allocation2_spill] sm:$0xff] %v7336_v31  ;;  %8258 = vst [vmem:[#allocation5_spill] sm:$0xff] %v7342_v43  ;;  %v8265_v31 = vsub.f32 %v8264_v46, %v6881_v35  ;;  %v8267_v43 = vsub.f32 %v8266_v2, %v6881_v35 }
 0x321   :  { %8260 = vst [vmem:[#allocation9_spill] sm:$0xff] %v7348_v50  ;;  %v7354_v40 = vmul.f32 %v7005_v55, %v8262_v41  ;;  %v8269_v50 = vsub.f32 %v8268_v1, %v6881_v35  ;;  %v8270_v41 = vld [vmem:[#allocation26_spill] sm:$0xff]  ;;  %v7396_v1 = vmul.f32 %v7312_v51, %v7031_v5  ;;  %v7424_v5 = vmul.f32 %v7312_v51, %v7073_v59 }
 0x322   :  { %v7360_v20 = vmul.f32 %v7005_v55, %v8265_v31  ;;  %v7366_v13 = vmul.f32 %v7005_v55, %v8267_v43  ;;  %v8272_v31 = vsub.f32 %v6870_v42, %v6881_v35  ;;  %v7388_v43 = vmul.f32 %v7312_v51, %v7019_v28 }
 0x323   :  { %8263 = vst [vmem:[#allocation13_spill] sm:$0xff] %v7354_v40  ;;  %v7372_v29 = vmul.f32 %v7005_v55, %v8269_v50  ;;  %v8271_v40 = vsub.f32 %v8270_v41, %v6881_v35  ;;  %v7392_v50 = vmul.f32 %v7312_v51, %v7025_v16  ;;  %v7408_v28 = vmul.f32 %v7312_v51, %v7049_v18  ;;  %v8279_v41 = vld [vmem:[#allocation16_spill] sm:$0xff] }
 0x324   :  { %v7384_v2 = vmul.f32 %v7005_v55, %v8272_v31  ;;  %v7412_v42 = vmul.f32 %v7312_v51, %v7055_v25  ;;  %v7416_v35 = vmul.f32 %v7312_v51, %v7061_v36  ;;  %v7420_v16 = vmul.f32 %v7312_v51, %v7067_v52  ;;  %v8281_v31 = vld [vmem:[#allocation19_spill] sm:$0xff] }
 0x325   :  { %v7378_v46 = vmul.f32 %v7005_v55, %v8271_v40  ;;  %v7400_v40 = vmul.f32 %v7312_v51, %v7037_v14  ;;  %v7404_v55 = vmul.f32 %v7312_v51, %v7043_v39  ;;  %v7428_v14 = vmul.f32 %v7312_v51, %v7079_v30 }
 0x326   :  { %v7432_v39 = vmul.f32 %v7312_v51, %v7085_v47  ;;  %v7436_v18 = vmul.f32 %v7312_v51, %v7091_v6  ;;  %v7440_v25 = vmul.f32 %v7312_v51, %v7097_v0  ;;  %v7444_v36 = vmul.f32 %v7312_v51, %v7103_v17 }
 0x327   :  { %v7448_v52 = vmul.f32 %v7312_v51, %v7109_v19  ;;  %v7452_v59 = vmul.f32 %v7312_v51, %v7115_v9  ;;  %v7456_v30 = vmul.f32 %v7312_v51, %v7121_v8  ;;  %v7460_v47 = vmul.f32 %v7312_v51, %v7127_v7 }
 0x328   :  { %v7464_v6 = vmul.f32 %v7312_v51, %v7133_v12  ;;  %v7468_v0 = vmul.f32 %v7312_v51, %v7139_v24  ;;  %v7472_v17 = vmul.f32 %v7312_v51, %v7145_v57  ;;  %v7476_v19 = vmul.f32 %v7312_v51, %v7151_v26 }
 0x329   :  { %v7480_v9 = vmul.f32 %v7312_v51, %v7157_v56  ;;  %v7484_v8 = vmul.f32 %v7312_v51, %v7163_v10  ;;  %v7488_v7 = vmul.f32 %v7312_v51, %v7169_v27  ;;  %v7492_v12 = vmul.f32 %v7312_v51, %v7175_v37 }
 0x32a   :  { %v7496_v24 = vmul.f32 %v7312_v51, %v7181_v15  ;;  %v7500_v57 = vmul.f32 %v7312_v51, %v7187_v4  ;;  %v7504_v26 = vmul.f32 %v7312_v51, %v7193_v60  ;;  %v7508_v56 = vmul.f32 %v7312_v51, %v7199_v54 }
 0x32b   :  { %v7512_v10 = vmul.f32 %v7312_v51, %v7205_v63  ;;  %v7516_v27 = vmul.f32 %v7312_v51, %v7211_v23  ;;  %v7520_v37 = vmul.f32 %v7312_v51, %v7217_v33  ;;  %v7524_v15 = vmul.f32 %v7312_v51, %v7223_v11 }
 0x32c   :  { %v7528_v4 = vmul.f32 %v7312_v51, %v7229_v49  ;;  %v7532_v60 = vmul.f32 %v7312_v51, %v7235_v22  ;;  %v7536_v54 = vmul.f32 %v7312_v51, %v7241_v21  ;;  %v7540_v63 = vmul.f32 %v7312_v51, %v7247_v3 }
 0x32d   :  { %v7544_v23 = vmul.f32 %v7312_v51, %v7253_v48  ;;  %v7548_v33 = vmul.f32 %v7312_v51, %v7259_v32  ;;  %v7552_v11 = vmul.f32 %v7312_v51, %v7265_v44  ;;  %v7556_v49 = vmul.f32 %v7312_v51, %v7268_v53  ;;  %v8275_v44 = vld [vmem:[#allocation17_spill] sm:$0xff] }
 0x32e   :  { %v7560_v22 = vmul.f32 %v7312_v51, %v7271_v61  ;;  %v7564_v21 = vmul.f32 %v7312_v51, %v7274_v62  ;;  %v7568_v3 = vmul.f32 %v7312_v51, %v7277_v58  ;;  %v7572_v48 = vmul.f32 %v7312_v51, %v7280_v45  ;;  %v8277_v61 = vld [vmem:[#allocation18_spill] sm:$0xff] }
 0x32f   :  { %v7576_v32 = vmul.f32 %v7312_v51, %v7283_v38  ;;  %v7580_v53 = vmul.f32 %v7312_v51, %v8275_v44  ;;  %v7584_v62 = vmul.f32 %v7312_v51, %v8277_v61  ;;  %v7588_v58 = vmul.f32 %v7312_v51, %v8279_v41  ;;  %v7597_v38 = vld [vmem:[%s8075_s2 + $0x1] ss:$0 sm:$0xff] }
 0x330   :  { %8273 = vst [vmem:[#allocation3_spill] sm:$0xff] %v7572_v48  ;;  %v7592_v45 = vmul.f32 %v7312_v51, %v8281_v31  ;;  %v7605_v61 = vmul.f32 %v7312_v51, %v7324_v34  ;;  %v8288_v48 = vld [vmem:[#allocation9_spill] sm:$0xff] }
 0x331   :  { %8274 = vst [vmem:[#allocation4_spill] sm:$0xff] %v7576_v32  ;;  %8276 = vst [vmem:[#allocation6_spill] sm:$0xff] %v7580_v53  ;;  %v8283_v32 = vld [vmem:[#allocation20_spill] sm:$0xff] }
 0x332   :  { %8278 = vst [vmem:[#allocation7_spill] sm:$0xff] %v7584_v62  ;;  %8280 = vst [vmem:[#allocation22_spill] sm:$0xff] %v7588_v58  ;;  %v7601_v44 = vmul.f32 %v7312_v51, %v8283_v32  ;;  %v8285_v62 = vld [vmem:[#allocation21_spill] sm:$0xff]  ;;  %v8286_v58 = vld [vmem:[#allocation2_spill] sm:$0xff]  ;;  %v7621_v32 = vmul.f32 %v7312_v51, %v8288_v48  ;;  %v7641_v48 = vmul.f32 %v7312_v51, %v7378_v46 }
 0x333   :  { %8282 = vst [vmem:[#allocation23_spill] sm:$0xff] %v7592_v45  ;;  %v7609_v41 = vmul.f32 %v7312_v51, %v8285_v62  ;;  %v7613_v31 = vmul.f32 %v7312_v51, %v8286_v58  ;;  %v8287_v45 = vld [vmem:[#allocation5_spill] sm:$0xff]  ;;  %v7629_v62 = vmul.f32 %v7312_v51, %v7360_v20  ;;  %v7633_v58 = vmul.f32 %v7312_v51, %v7366_v13 }
 0x334   :  { %8284 = vst [vmem:[#allocation11_spill] sm:$0xff] %v7601_v44  ;;  %v7617_v53 = vmul.f32 %v7312_v51, %v8287_v45  ;;  %v8289_v44 = vld [vmem:[#allocation13_spill] sm:$0xff]  ;;  %v7637_v45 = vmul.f32 %v7312_v51, %v7372_v29  ;;  %v7649_v20 = vadd.f32 %v7597_v38, %v7388_v43  ;;  %v7653_v13 = vadd.f32 %v7597_v38, %v7392_v50 }
 0x335   :  { %v7625_v34 = vmul.f32 %v7312_v51, %v8289_v44  ;;  %v7645_v44 = vmul.f32 %v7312_v51, %v7384_v2  ;;  %v7657_v29 = vadd.f32 %v7597_v38, %v7396_v1  ;;  %v7661_v46 = vadd.f32 %v7597_v38, %v7400_v40 }
 0x336   :  { %8290 = vst [vmem:[#allocation8_spill] sm:$0xff] %v7649_v20  ;;  %8291 = vst [vmem:[#allocation10_spill] sm:$0xff] %v7653_v13  ;;  %v7665_v51 = vadd.f32 %v7597_v38, %v7404_v55  ;;  %v7669_v2 = vadd.f32 %v7597_v38, %v7408_v28  ;;  %v7673_v43 = vadd.f32 %v7597_v38, %v7412_v42 }
 0x337   :  { %8292 = vst [vmem:[#allocation12_spill] sm:$0xff] %v7657_v29  ;;  %8293 = vst [vmem:[#allocation24_spill] sm:$0xff] %v7661_v46  ;;  %v7677_v50 = vadd.f32 %v7597_v38, %v7416_v35  ;;  %v7681_v1 = vadd.f32 %v7597_v38, %v7420_v16  ;;  %v7685_v40 = vadd.f32 %v7597_v38, %v7424_v5 }
 0x338   :  { %8294 = vst [vmem:[#allocation25_spill] sm:$0xff] %v7665_v51  ;;  %v7689_v55 = vadd.f32 %v7597_v38, %v7428_v14  ;;  %v7693_v28 = vadd.f32 %v7597_v38, %v7432_v39  ;;  %v7697_v42 = vadd.f32 %v7597_v38, %v7436_v18  ;;  %v7701_v35 = vadd.f32 %v7597_v38, %v7440_v25 }
 0x339   :  { %v7705_v16 = vadd.f32 %v7597_v38, %v7444_v36  ;;  %v7709_v5 = vadd.f32 %v7597_v38, %v7448_v52  ;;  %v7713_v14 = vadd.f32 %v7597_v38, %v7452_v59  ;;  %v7717_v39 = vadd.f32 %v7597_v38, %v7456_v30 }
 0x33a   :  { %v7721_v18 = vadd.f32 %v7597_v38, %v7460_v47  ;;  %v7725_v25 = vadd.f32 %v7597_v38, %v7464_v6  ;;  %v7729_v36 = vadd.f32 %v7597_v38, %v7468_v0  ;;  %v7733_v52 = vadd.f32 %v7597_v38, %v7472_v17 }
 0x33b   :  { %v7737_v59 = vadd.f32 %v7597_v38, %v7476_v19  ;;  %v7741_v30 = vadd.f32 %v7597_v38, %v7480_v9  ;;  %v7745_v47 = vadd.f32 %v7597_v38, %v7484_v8  ;;  %v7749_v6 = vadd.f32 %v7597_v38, %v7488_v7 }
 0x33c   :  { %v7753_v0 = vadd.f32 %v7597_v38, %v7492_v12  ;;  %v7757_v17 = vadd.f32 %v7597_v38, %v7496_v24  ;;  %v7761_v19 = vadd.f32 %v7597_v38, %v7500_v57  ;;  %v7765_v9 = vadd.f32 %v7597_v38, %v7504_v26 }
 0x33d   :  { %v7769_v8 = vadd.f32 %v7597_v38, %v7508_v56  ;;  %v7773_v7 = vadd.f32 %v7597_v38, %v7512_v10  ;;  %v7777_v12 = vadd.f32 %v7597_v38, %v7516_v27  ;;  %v7781_v24 = vadd.f32 %v7597_v38, %v7520_v37 }
 0x33e   :  { %v7785_v57 = vadd.f32 %v7597_v38, %v7524_v15  ;;  %v7789_v26 = vadd.f32 %v7597_v38, %v7528_v4  ;;  %v7793_v56 = vadd.f32 %v7597_v38, %v7532_v60  ;;  %v7797_v10 = vadd.f32 %v7597_v38, %v7536_v54 }
 0x33f   :  { %v7801_v27 = vadd.f32 %v7597_v38, %v7540_v63  ;;  %v7805_v37 = vadd.f32 %v7597_v38, %v7544_v23  ;;  %v7809_v15 = vadd.f32 %v7597_v38, %v7548_v33  ;;  %v7813_v4 = vadd.f32 %v7597_v38, %v7552_v11  ;;  %v8300_v33 = vld [vmem:[#allocation3_spill] sm:$0xff] }
 0x340   :  { %v7817_v60 = vadd.f32 %v7597_v38, %v7556_v49  ;;  %v7821_v54 = vadd.f32 %v7597_v38, %v7560_v22  ;;  %v7825_v63 = vadd.f32 %v7597_v38, %v7564_v21  ;;  %v7829_v23 = vadd.f32 %v7597_v38, %v7568_v3 }
 0x341   :  { %8295 = vst [vmem:[#allocation14_spill] sm:$0xff] %v7813_v4  ;;  %v7833_v11 = vadd.f32 %v7597_v38, %v8300_v33  ;;  %v8302_v4 = vld [vmem:[#allocation4_spill] sm:$0xff] }
 0x342   :  { %8296 = vst [vmem:[#allocation15_spill] sm:$0xff] %v7817_v60  ;;  %8297 = vst [vmem:[#allocation26_spill] sm:$0xff] %v7821_v54  ;;  %v7837_v49 = vadd.f32 %v7597_v38, %v8302_v4  ;;  %v8303_v60 = vld [vmem:[#allocation6_spill] sm:$0xff]  ;;  %v8304_v54 = vld [vmem:[#allocation7_spill] sm:$0xff] }
 0x343   :  { %8298 = vst [vmem:[#allocation17_spill] sm:$0xff] %v7825_v63  ;;  %8299 = vst [vmem:[#allocation18_spill] sm:$0xff] %v7829_v23  ;;  %v7841_v22 = vadd.f32 %v7597_v38, %v8303_v60  ;;  %v7845_v21 = vadd.f32 %v7597_v38, %v8304_v54  ;;  %v8305_v63 = vld [vmem:[#allocation22_spill] sm:$0xff]  ;;  %v8306_v23 = vld [vmem:[#allocation23_spill] sm:$0xff]  ;;  %v7861_v60 = vadd.f32 %v7597_v38, %v7605_v61 }
 0x344   :  { %8301 = vst [vmem:[#allocation16_spill] sm:$0xff] %v7833_v11  ;;  %v7849_v3 = vadd.f32 %v7597_v38, %v8305_v63  ;;  %v7853_v33 = vadd.f32 %v7597_v38, %v8306_v23  ;;  %v8307_v11 = vld [vmem:[#allocation11_spill] sm:$0xff]  ;;  %v7865_v54 = vadd.f32 %v7597_v38, %v7609_v41  ;;  %v7869_v63 = vadd.f32 %v7597_v38, %v7613_v31 }
 0x345   :  { %v7857_v4 = vadd.f32 %v7597_v38, %v8307_v11  ;;  %v7873_v23 = vadd.f32 %v7597_v38, %v7617_v53  ;;  %v7877_v11 = vadd.f32 %v7597_v38, %v7621_v32  ;;  %v7881_v61 = vadd.f32 %v7597_v38, %v7625_v34 }
 0x346   :  { %v7885_v41 = vadd.f32 %v7597_v38, %v7629_v62  ;;  %v7889_v31 = vadd.f32 %v7597_v38, %v7633_v58  ;;  %v7893_v53 = vadd.f32 %v7597_v38, %v7637_v45  ;;  %v7897_v32 = vadd.f32 %v7597_v38, %v7641_v48 }
 0x347   :  { %8308 = vst [vmem:[#allocation19_spill] sm:$0xff] %v7881_v61  ;;  %v7901_v34 = vadd.f32 %v7597_v38, %v7645_v44  ;;  %v3507_v45 = vmax.f32 %v7669_v2, 0.0  ;;  %v3509_v48 = vmax.f32 %v7677_v50, 0.0  ;;  %v3511_v38 = vmax.f32 %v7685_v40, 0.0 }
 0x348   :  { %8309 = vst [vmem:[#allocation20_spill] sm:$0xff] %v7885_v41  ;;  %8310 = vst [vmem:[#allocation21_spill] sm:$0xff] %v7889_v31  ;;  %v3512_v44 = vmax.f32 %v7689_v55, 0.0  ;;  %v3513_v62 = vmax.f32 %v7693_v28, 0.0  ;;  %v3514_v41 = vmax.f32 %v7697_v42, 0.0  ;;  %v3515_v58 = vmax.f32 %v7701_v35, 0.0 }
 0x349   :  { %8311 = vst [vmem:[#allocation2_spill] sm:$0xff] %v7893_v53  ;;  %8312 = vst [vmem:[#allocation5_spill] sm:$0xff] %v7897_v32  ;;  %v3508_v53 = vmax.f32 %v7673_v43, 0.0  ;;  %v3510_v32 = vmax.f32 %v7681_v1, 0.0  ;;  %v3516_v31 = vmax.f32 %v7705_v16, 0.0  ;;  %v3517_v2 = vmax.f32 %v7709_v5, 0.0 }
 0x34a   :  { %8313 = vst [vmem:[#allocation9_spill] sm:$0xff] %v7901_v34  ;;  %v3518_v43 = vmax.f32 %v7713_v14, 0.0  ;;  %v3519_v50 = vmax.f32 %v7717_v39, 0.0  ;;  %v3520_v1 = vmax.f32 %v7721_v18, 0.0  ;;  %v3521_v40 = vmax.f32 %v7725_v25, 0.0  ;;  %v8314_v61 = vld [vmem:[#allocation14_spill] sm:$0xff] }
 0x34b   :  { %v3522_v55 = vmax.f32 %v7729_v36, 0.0  ;;  %v3523_v28 = vmax.f32 %v7733_v52, 0.0  ;;  %v3524_v42 = vmax.f32 %v7737_v59, 0.0  ;;  %v3525_v35 = vmax.f32 %v7741_v30, 0.0  ;;  %v8315_v51 = vld [vmem:[#allocation15_spill] sm:$0xff]  ;;  %v8316_v46 = vld [vmem:[#allocation26_spill] sm:$0xff] }
 0x34c   :  { %v3526_v16 = vmax.f32 %v7745_v47, 0.0  ;;  %v3527_v5 = vmax.f32 %v7749_v6, 0.0  ;;  %v3528_v14 = vmax.f32 %v7753_v0, 0.0  ;;  %v3529_v39 = vmax.f32 %v7757_v17, 0.0  ;;  %v8317_v29 = vld [vmem:[#allocation17_spill] sm:$0xff]  ;;  %v8318_v13 = vld [vmem:[#allocation18_spill] sm:$0xff] }
 0x34d   :  { %v3530_v18 = vmax.f32 %v7761_v19, 0.0  ;;  %v3531_v25 = vmax.f32 %v7765_v9, 0.0  ;;  %v3532_v36 = vmax.f32 %v7769_v8, 0.0  ;;  %v3533_v52 = vmax.f32 %v7773_v7, 0.0  ;;  %v8319_v20 = vld [vmem:[#allocation16_spill] sm:$0xff] }
 0x34e   :  { %v3534_v59 = vmax.f32 %v7777_v12, 0.0  ;;  %v3535_v30 = vmax.f32 %v7781_v24, 0.0  ;;  %v3536_v47 = vmax.f32 %v7785_v57, 0.0  ;;  %v3537_v6 = vmax.f32 %v7789_v26, 0.0  ;;  %v8320_v34 = vld [vmem:[#allocation19_spill] sm:$0xff] }
 0x34f   :  { %v3538_v0 = vmax.f32 %v7793_v56, 0.0  ;;  %v3539_v17 = vmax.f32 %v7797_v10, 0.0  ;;  %v3540_v19 = vmax.f32 %v7801_v27, 0.0  ;;  %v3541_v9 = vmax.f32 %v7805_v37, 0.0 }
 0x350   :  { %v3542_v8 = vmax.f32 %v7809_v15, 0.0  ;;  %v3543_v7 = vmax.f32 %v8314_v61, 0.0  ;;  %v3544_v12 = vmax.f32 %v8315_v51, 0.0  ;;  %v3545_v24 = vmax.f32 %v8316_v46, 0.0 }
 0x351   :  { %v3546_v57 = vmax.f32 %v8317_v29, 0.0  ;;  %v3547_v26 = vmax.f32 %v8318_v13, 0.0  ;;  %v3548_v56 = vmax.f32 %v8319_v20, 0.0  ;;  %v3549_v10 = vmax.f32 %v7837_v49, 0.0 }
 0x352   :  { %v3550_v27 = vmax.f32 %v7841_v22, 0.0  ;;  %v3551_v37 = vmax.f32 %v7845_v21, 0.0  ;;  %v3552_v15 = vmax.f32 %v7849_v3, 0.0  ;;  %v3553_v61 = vmax.f32 %v7853_v33, 0.0  ;;  %v8321_v21 = vld [vmem:[#allocation20_spill] sm:$0xff]  ;;  %v8322_v33 = vld [vmem:[#allocation21_spill] sm:$0xff] }
 0x353   :  { %v3554_v51 = vmax.f32 %v7857_v4, 0.0  ;;  %v3555_v46 = vmax.f32 %v7861_v60, 0.0  ;;  %v3556_v29 = vmax.f32 %v7865_v54, 0.0  ;;  %v3557_v13 = vmax.f32 %v7869_v63, 0.0  ;;  %v8323_v60 = vld [vmem:[#allocation2_spill] sm:$0xff]  ;;  %v8324_v63 = vld [vmem:[#allocation5_spill] sm:$0xff] }
 0x354   :  { %v3558_v20 = vmax.f32 %v7873_v23, 0.0  ;;  %v3559_v49 = vmax.f32 %v7877_v11, 0.0  ;;  %v3560_v22 = vmax.f32 %v8320_v34, 0.0  ;;  %v3561_v3 = vmax.f32 %v8321_v21, 0.0  ;;  %v8325_v11 = vld [vmem:[#allocation9_spill] sm:$0xff]  ;;  %v8326_v21 = vld [vmem:[#allocation8_spill] sm:$0xff] }
 0x355   :  { %v3562_v4 = vmax.f32 %v8322_v33, 0.0  ;;  %v3563_v54 = vmax.f32 %v8323_v60, 0.0  ;;  %v3564_v23 = vmax.f32 %v8324_v63, 0.0  ;;  %v3565_v34 = vmax.f32 %v8325_v11, 0.0  ;;  %v8328_v60 = vld [vmem:[#allocation10_spill] sm:$0xff] }
 0x356   :  { %v8327_v33 = vmax.f32 %v8326_v21, 0.0  ;;  %v8329_v63 = vmax.f32 %v8328_v60, 0.0  ;;  %v8330_v21 = vld [vmem:[#allocation12_spill] sm:$0xff] }
 0x357   :  { %v8331_v60 = vmax.f32 %v8330_v21, 0.0 }
 0x358   :  { %v4303_v11 = vpack.c.bf16 %v8329_v63, %v8327_v33  ;;  %v8332_v33 = vld [vmem:[#allocation24_spill] sm:$0xff] }
 0x359   :  { %v8333_v63 = vmax.f32 %v8332_v33, 0.0  ;;  %v8334_v33 = vld [vmem:[#allocation25_spill] sm:$0xff] }
 0x35a   :  { %4304 = vst [vmem:[%s8076_s3] sm:$0xff] %v4303_v11  }
 0x35b   :  { %v4308_v21 = vpack.c.bf16 %v8333_v63, %v8331_v60  ;;  %v8335_v60 = vmax.f32 %v8334_v33, 0.0  ;;  %v4318_v33 = vpack.c.bf16 %v3509_v48, %v3508_v53  ;;  %v4333_v48 = vpack.c.bf16 %v3515_v58, %v3514_v41 }
 0x35c   :  { %v4338_v53 = vpack.c.bf16 %v3517_v2, %v3516_v31  ;;  %v4353_v41 = vpack.c.bf16 %v3523_v28, %v3522_v55  ;;  %v4358_v31 = vpack.c.bf16 %v3525_v35, %v3524_v42  ;;  %v4363_v58 = vpack.c.bf16 %v3527_v5, %v3526_v16 }
 0x35d   :  { %v4313_v63 = vpack.c.bf16 %v3507_v45, %v8335_v60  ;;  %v4323_v45 = vpack.c.bf16 %v3511_v38, %v3510_v32  ;;  %v4328_v60 = vpack.c.bf16 %v3513_v62, %v3512_v44  ;;  %4460 = vst [vmem:[%s8076_s3 + $0x8] sm:$0xff] %v4308_v21   ;;  %4462 = vst [vmem:[%s8076_s3 + $0x18] sm:$0xff] %v4318_v33  }
 0x35e   :  { %v4343_v32 = vpack.c.bf16 %v3519_v50, %v3518_v43  ;;  %v4348_v62 = vpack.c.bf16 %v3521_v40, %v3520_v1  ;;  %4465 = vst [vmem:[%s8076_s3 + $0x30] sm:$0xff] %v4333_v48   ;;  %4466 = vst [vmem:[%s8076_s3 + $0x38] sm:$0xff] %v4338_v53   ;;  %v4368_v38 = vpack.c.bf16 %v3529_v39, %v3528_v14 }
 0x35f   :  { %4461 = vst [vmem:[%s8076_s3 + $0x10] sm:$0xff] %v4313_v63   ;;  %4463 = vst [vmem:[%s8076_s3 + $0x20] sm:$0xff] %v4323_v45   ;;  %v4373_v44 = vpack.c.bf16 %v3531_v25, %v3530_v18  ;;  %v4378_v2 = vpack.c.bf16 %v3533_v52, %v3532_v36  ;;  %v4383_v43 = vpack.c.bf16 %v3535_v30, %v3534_v59 }
 0x360   :  { %4464 = vst [vmem:[%s8076_s3 + $0x28] sm:$0xff] %v4328_v60   ;;  %4467 = vst [vmem:[%s8076_s3 + $0x40] sm:$0xff] %v4343_v32   ;;  %v4388_v50 = vpack.c.bf16 %v3537_v6, %v3536_v47  ;;  %v4393_v1 = vpack.c.bf16 %v3539_v17, %v3538_v0  ;;  %v4398_v40 = vpack.c.bf16 %v3541_v9, %v3540_v19 }
 0x361   :  { %4468 = vst [vmem:[%s8076_s3 + $0x48] sm:$0xff] %v4348_v62   ;;  %4469 = vst [vmem:[%s8076_s3 + $0x50] sm:$0xff] %v4353_v41   ;;  %v4403_v55 = vpack.c.bf16 %v3543_v7, %v3542_v8  ;;  %v4408_v28 = vpack.c.bf16 %v3545_v24, %v3544_v12  ;;  %v4413_v42 = vpack.c.bf16 %v3547_v26, %v3546_v57 }
 0x362   :  { %4470 = vst [vmem:[%s8076_s3 + $0x58] sm:$0xff] %v4358_v31   ;;  %4471 = vst [vmem:[%s8076_s3 + $0x60] sm:$0xff] %v4363_v58   ;;  %v4418_v35 = vpack.c.bf16 %v3549_v10, %v3548_v56  ;;  %v4423_v16 = vpack.c.bf16 %v3551_v37, %v3550_v27  ;;  %v4428_v5 = vpack.c.bf16 %v3553_v61, %v3552_v15 }
 0x363   :  { %4472 = vst [vmem:[%s8076_s3 + $0x68] sm:$0xff] %v4368_v38   ;;  %4473 = vst [vmem:[%s8076_s3 + $0x70] sm:$0xff] %v4373_v44   ;;  %v4433_v14 = vpack.c.bf16 %v3555_v46, %v3554_v51  ;;  %v4438_v39 = vpack.c.bf16 %v3557_v13, %v3556_v29  ;;  %v4443_v18 = vpack.c.bf16 %v3559_v49, %v3558_v20 }
 0x364   :  { %4474 = vst [vmem:[%s8076_s3 + $0x78] sm:$0xff] %v4378_v2   ;;  %4475 = vst [vmem:[%s8076_s3 + $0x80] sm:$0xff] %v4383_v43   ;;  %v4448_v25 = vpack.c.bf16 %v3561_v3, %v3560_v22  ;;  %v4453_v36 = vpack.c.bf16 %v3563_v54, %v3562_v4  ;;  %v4458_v52 = vpack.c.bf16 %v3565_v34, %v3564_v23 }
 0x365   :  { %4476 = vst [vmem:[%s8076_s3 + $0x88] sm:$0xff] %v4388_v50   ;;  %4477 = vst [vmem:[%s8076_s3 + $0x90] sm:$0xff] %v4393_v1  }
 0x366   :  { %4478 = vst [vmem:[%s8076_s3 + $0x98] sm:$0xff] %v4398_v40   ;;  %4479 = vst [vmem:[%s8076_s3 + $0xa0] sm:$0xff] %v4403_v55  }
 0x367   :  { %4480 = vst [vmem:[%s8076_s3 + $0xa8] sm:$0xff] %v4408_v28   ;;  %4481 = vst [vmem:[%s8076_s3 + $0xb0] sm:$0xff] %v4413_v42  }
 0x368   :  { %4482 = vst [vmem:[%s8076_s3 + $0xb8] sm:$0xff] %v4418_v35   ;;  %4483 = vst [vmem:[%s8076_s3 + $0xc0] sm:$0xff] %v4423_v16  }
 0x369   :  { %4484 = vst [vmem:[%s8076_s3 + $0xc8] sm:$0xff] %v4428_v5   ;;  %4485 = vst [vmem:[%s8076_s3 + $0xd0] sm:$0xff] %v4433_v14  }
 0x36a   :  { %4486 = vst [vmem:[%s8076_s3 + $0xd8] sm:$0xff] %v4438_v39   ;;  %4487 = vst [vmem:[%s8076_s3 + $0xe0] sm:$0xff] %v4443_v18  }
 0x36b   :  { %4488 = vst [vmem:[%s8076_s3 + $0xe8] sm:$0xff] %v4448_v25   ;;  %4489 = vst [vmem:[%s8076_s3 + $0xf0] sm:$0xff] %v4453_v36  }
 0x36c   :  { %4490 = vst [vmem:[%s8076_s3 + $0xf8] sm:$0xff] %v4458_v52  }

// kernel: inception3_forward.15
= control target key start
LH: loop header
LB: loop body
LE: loop exit
PB: predicated region body
PF: predicated region fallthrough
CT: control target
= control target key end

     0   :  { %s2036_s12 = smov 0   ;;  %s2038_s13 = smov 0   ;;  %s3843_s0 = inlined_call_operand.vmem [shape: bf16[512,4], index: 0, kind: input, shape index: {}]   ;;  %s3844_s1 = inlined_call_operand.vmem [shape: bf16[4,256], index: 1, kind: input, shape index: {}]   ;;  %s3845_s2 = inlined_call_operand.vmem [shape: f32[2,256], index: 2, kind: input, shape index: {}]   ;;  %s3846_s3 = inlined_call_operand.vmem [shape: f32[512,256], index: 3, kind: output, shape index: {}]  }
   0x1   :  { %s2040_s14 = smov 0  }
   0x2 LB: > { %s2049_s15 = sadd.s32 4294967295, %s2014_s14   ;;  %s2051_s16 = sadd.s32 1, %s2014_s14   ;;  %s2014_s14 = sphi %s2040_s14, %s4075_s14   ;;  %s2010_s13 = sphi %s2038_s13, %s4074_s13   ;;  %s2006_s12 = sphi %s2036_s12, %s4073_s12  }
   0x3   : > { %s90_s17 = ssub.s32 %s2014_s14, %s2051_s16  ;;  %s93_s18 = sadd.s32 1, %s2010_s13 }
   0x4   : > { %p91_p0 = scmp.eq.s32.totalorder %s90_s17, 0  ;;  %p103_p1 = scmp.ne.s32.totalorder %s2010_s13, %s2006_s12 }
   0x5   : > { %p104_p2 = scmp.eq.s32.totalorder %s2049_s15, 1  ;;  %p1757_p3 = scmp.ge.s32.totalorder %s2014_s14, 1 }
   0x6   : > { %s2059_s19 = scalar_select %p91_p0, %s2010_s13, %s93_s18  }
   0x7   : > { %p2061_p4 = por %p104_p2, %p103_p1  ;;  %p145_p5 = scmp.lt.s32.totalorder %s2014_s14, 3 }
   0x9   : > { %p146_p6 = pnand %p1757_p3, %p145_p5 }
   0xb   : > { %149 = sbr.rel (%p146_p6) target bundleno = 548 (0x224), region = 32 }
  0x12   : > { %p171_p7 = scmp.lt.s32.totalorder %s2049_s15, 1  ;;  %v1958_v0 = vld [vmem:[%s3843_s0] sm:$0xff]   ;;  %vm405_vm0 = vcmask 31744   ;;  %vm502_vm1 = vcmask 1041408   ;;  %v1959_v3 = vld [vmem:[%s3843_s0 + $0x8] sm:$0xff]   ;;  %v1960_v4 = vld [vmem:[%s3843_s0 + $0x10] sm:$0xff]  }
  0x13   : > { %1866 = vmatprep.mubr.msk.bf16.mxu0 %vm405_vm0, %v1958_v0  ;;  %v1961_v5 = vld [vmem:[%s3843_s0 + $0x18] sm:$0xff]   ;;  %v1962_v6 = vld [vmem:[%s3843_s0 + $0x20] sm:$0xff]   ;;  %v1975_v8 = vld [vmem:[%s3843_s0 + $0x88] sm:$0xff]   ;;  %s1828_s9 = sshll.u32 (%p2061_p4), %s2049_s15, 3 }
  0x14   : > { %s2070_s23 = scalar_select %p171_p7, %s2049_s15, 1  ;;  %v1974_v7 = vld [vmem:[%s3843_s0 + $0x80] sm:$0xff]   ;;  %v1976_v9 = vld [vmem:[%s3843_s0 + $0x90] sm:$0xff]   ;;  %v1963_v10 = vld [vmem:[%s3843_s0 + $0x28] sm:$0xff]  }
  0x15   : > { %1898 = vmatprep.mubr.msk.bf16.mxu1 %vm405_vm0, %v1974_v7  ;;  %v1964_v11 = vld [vmem:[%s3843_s0 + $0x30] sm:$0xff]   ;;  %v1977_v12 = vld [vmem:[%s3843_s0 + $0x98] sm:$0xff]   ;;  %v1978_v13 = vld [vmem:[%s3843_s0 + $0xa0] sm:$0xff]   ;;  %s3706_s14 = scalar_lea.vmem (%p2061_p4), %s3846_s3, %s1828_s9 }
  0x16   : > { %s1759_s24 = sshll.u32 %s2070_s23, 1  ;;  %v1965_v14 = vld [vmem:[%s3843_s0 + $0x38] sm:$0xff]   ;;  %v1966_v15 = vld [vmem:[%s3843_s0 + $0x40] sm:$0xff]   ;;  %v1979_v16 = vld [vmem:[%s3843_s0 + $0xa8] sm:$0xff]   ;;  %s168_s23 = sand.u32 1, %s2006_s12  }
  0x17   : > { %s174_s27 = scalar_lea.vmem %s3844_s1, %s1759_s24  ;;  %v1980_v17 = vld [vmem:[%s3843_s0 + $0xb0] sm:$0xff]   ;;  %v1967_v18 = vld [vmem:[%s3843_s0 + $0x48] sm:$0xff]   ;;  %v1981_v20 = vld [vmem:[%s3843_s0 + $0xb8] sm:$0xff]   ;;  %s2902_s8 = scalar_lea.vmem %s3845_s2, %s1759_s24 }
  0x18   : > { %v244_v1 = vld [vmem:[%s174_s27] sm:$0x3]  ;;  %v1968_v19 = vld [vmem:[%s3843_s0 + $0x50] sm:$0xff]   ;;  %v1969_v22 = vld [vmem:[%s3843_s0 + $0x58] sm:$0xff]   ;;  %s1758_s12 = sshll.u32 %s168_s23, 9 }
  0x19   : > { %1932 = vmatprep.subr.msk.bf16.mxu0 %vm502_vm1, %v244_v1  ;;  %v504_v2 = vsel %vm502_vm1, %v244_v1, 0  ;;  %1933 = vmatprep.subr.msk.bf16.mxu1 %vm502_vm1, %v244_v1  ;;  %v1982_v21 = vld [vmem:[%s3843_s0 + $0xc0] sm:$0xff]   ;;  %v1983_v24 = vld [vmem:[%s3843_s0 + $0xc8] sm:$0xff]   ;;  %v1984_v25 = vld [vmem:[%s3843_s0 + $0xd0] sm:$0xff]   ;;  %s3579_s24 = scalar_lea.vmem [#allocation2], %s1758_s12 }
  0x1a   : > { %1865 = vmatpush3.bf16.msra.mxu0 %v504_v2  ;;  %1931 = vmatpush3.bf16.msra.mxu1 %v504_v2  ;;  %v1970_v23 = vld [vmem:[%s3843_s0 + $0x60] sm:$0xff]   ;;  %v1971_v26 = vld [vmem:[%s3843_s0 + $0x68] sm:$0xff]   ;;  %v1972_v27 = vld [vmem:[%s3843_s0 + $0x70] sm:$0xff]  }
  0x1b   : > { %v1985_v28 = vld [vmem:[%s3843_s0 + $0xd8] sm:$0xff]   ;;  %v1986_v29 = vld [vmem:[%s3843_s0 + $0xe0] sm:$0xff]   ;;  %v1987_v31 = vld [vmem:[%s3843_s0 + $0xe8] sm:$0xff]  }
  0x1c   : > { %v1973_v30 = vld [vmem:[%s3843_s0 + $0x78] sm:$0xff]   ;;  %v1988_v32 = vld [vmem:[%s3843_s0 + $0xf0] sm:$0xff]  }
  0x1d   : > { %1867 = vmatmul.mubr.msk.bf16.vlgmr.msra.gmra.mrb[0].mxu0 %vm405_vm0, %v1959_v3  ;;  %1899 = vmatmul.mubr.msk.bf16.vlgmr.msra.gmra.mrb[0].mxu1 %vm405_vm0, %v1975_v8  ;;  %v1989_v33 = vld [vmem:[%s3843_s0 + $0xf8] sm:$0xff]  }
  0x1e   : > { %1870 = vmatprep.mubr.msk.bf16.mxu0 %vm405_vm0, %v1960_v4  ;;  %1902 = vmatprep.mubr.msk.bf16.mxu1 %vm405_vm0, %v1976_v9 }
  0x25   : > { %1871 = vmatmul.mubr.msk.bf16.gmra.mrb[4].mxu0 %vm405_vm0, %v1961_v5  ;;  %1903 = vmatmul.mubr.msk.bf16.gmra.mrb[4].mxu1 %vm405_vm0, %v1977_v12 }
  0x26   : > { %1874 = vmatprep.mubr.msk.bf16.mxu0 %vm405_vm0, %v1962_v6  ;;  %1906 = vmatprep.mubr.msk.bf16.mxu1 %vm405_vm0, %v1978_v13 }
  0x2d   : > { %1875 = vmatmul.mubr.msk.bf16.gmra.mrb[8].mxu0 %vm405_vm0, %v1963_v10  ;;  %1907 = vmatmul.mubr.msk.bf16.gmra.mrb[8].mxu1 %vm405_vm0, %v1979_v16 }
  0x2e   : > { %1878 = vmatprep.mubr.msk.bf16.mxu0 %vm405_vm0, %v1964_v11  ;;  %1910 = vmatprep.mubr.msk.bf16.mxu1 %vm405_vm0, %v1980_v17 }
  0x35   : > { %1879 = vmatmul.mubr.msk.bf16.gmra.mrb[12].mxu0 %vm405_vm0, %v1965_v14  ;;  %1911 = vmatmul.mubr.msk.bf16.gmra.mrb[12].mxu1 %vm405_vm0, %v1981_v20 }
  0x36   : > { %1882 = vmatprep.mubr.msk.bf16.mxu0 %vm405_vm0, %v1966_v15  ;;  %1914 = vmatprep.mubr.msk.bf16.mxu1 %vm405_vm0, %v1982_v21 }
  0x3d   : > { %1883 = vmatmul.mubr.msk.bf16.gmra.mrb[16].mxu0 %vm405_vm0, %v1967_v18  ;;  %1915 = vmatmul.mubr.msk.bf16.gmra.mrb[16].mxu1 %vm405_vm0, %v1983_v24 }
  0x3e   : > { %1886 = vmatprep.mubr.msk.bf16.mxu0 %vm405_vm0, %v1968_v19  ;;  %1918 = vmatprep.mubr.msk.bf16.mxu1 %vm405_vm0, %v1984_v25 }
  0x45   : > { %1887 = vmatmul.mubr.msk.bf16.gmra.mrb[20].mxu0 %vm405_vm0, %v1969_v22  ;;  %1919 = vmatmul.mubr.msk.bf16.gmra.mrb[20].mxu1 %vm405_vm0, %v1985_v28 }
  0x46   : > { %1890 = vmatprep.mubr.msk.bf16.mxu0 %vm405_vm0, %v1970_v23  ;;  %1922 = vmatprep.mubr.msk.bf16.mxu1 %vm405_vm0, %v1986_v29 }
  0x4d   : > { %1891 = vmatmul.mubr.msk.bf16.gmra.mrb[24].mxu0 %vm405_vm0, %v1971_v26  ;;  %1923 = vmatmul.mubr.msk.bf16.gmra.mrb[24].mxu1 %vm405_vm0, %v1987_v31 }
  0x4e   : > { %1894 = vmatprep.mubr.msk.bf16.mxu0 %vm405_vm0, %v1972_v27  ;;  %1926 = vmatprep.mubr.msk.bf16.mxu1 %vm405_vm0, %v1988_v32 }
  0x55   : > { %1895 = vmatmul.mubr.msk.bf16.gmra.mrb[28].mxu0 %vm405_vm0, %v1973_v30  ;;  %1927 = vmatmul.mubr.msk.bf16.gmra.mrb[28].mxu1 %vm405_vm0, %v1989_v33 }
  0xf0   : > { %v2203_v34 = vpop.f32.mrb[0].mxu0  ;;  %v2232_v53 = vpop.f32.mrb[0].mxu1 }
  0xf1   : > { %v2205_v35 = vpop.f32.mrb[1].mxu0  ;;  %v866_v41 = vmul.f32 %v2203_v34, %v2203_v34  ;;  %v2236_v55 = vpop.f32.mrb[1].mxu1 }
  0xf2   : > { %v2207_v36 = vpop.f32.mrb[2].mxu0  ;;  %v864_v38 = vmul.f32 %v2205_v35, %v2205_v35  ;;  %3896 = vst [vmem:[#allocation3_spill] sm:$0xff] %v2236_v55  ;;  %v2241_v59 = vpop.f32.mrb[2].mxu1 }
  0xf3   : > { %v2209_v37 = vpop.f32.mrb[3].mxu0  ;;  %v867_v44 = vmul.f32 %v2207_v36, %v2207_v36  ;;  %v2243_v60 = vpop.f32.mrb[3].mxu1 }
  0xf4   : > { %v795_v39 = vadd.f32 %v2209_v37, %v2205_v35  ;;  %v865_v40 = vmul.f32 %v2209_v37, %v2209_v37  ;;  %3897 = vst [vmem:[#allocation4_spill] sm:$0xff] %v2243_v60 }
  0xf6   : > { %v796_v42 = vadd.f32 %v2203_v34, %v795_v39  ;;  %v928_v43 = vadd.f32 %v865_v40, %v864_v38 }
  0xf8   : > { %v929_v45 = vadd.f32 %v928_v43, %v866_v41  ;;  %v2222_v46 = vpop.f32.mrb[4].mxu0  ;;  %v797_v47 = vadd.f32 %v2207_v36, %v796_v42  ;;  %v2260_v9 = vpop.f32.mrb[4].mxu1 }
  0xf9   : > { %v2225_v48 = vpop.f32.mrb[5].mxu0  ;;  %v870_v61 = vmul.f32 %v2222_v46, %v2222_v46  ;;  %v2264_v11 = vpop.f32.mrb[5].mxu1 }
  0xfa   : > { %v798_v49 = vadd.f32 %v797_v47, %v2225_v48  ;;  %v868_v50 = vmul.f32 %v2225_v48, %v2225_v48  ;;  %v930_v51 = vadd.f32 %v929_v45, %v867_v44  ;;  %v2230_v52 = vpop.f32.mrb[6].mxu0  ;;  %v2269_v15 = vpop.f32.mrb[6].mxu1 }
  0xfb   : > { %v2234_v54 = vpop.f32.mrb[7].mxu0  ;;  %v871_v0 = vmul.f32 %v2230_v52, %v2230_v52  ;;  %v2271_v16 = vpop.f32.mrb[7].mxu1 }
  0xfc   : > { %v931_v56 = vadd.f32 %v930_v51, %v868_v50  ;;  %v799_v57 = vadd.f32 %v798_v49, %v2234_v54  ;;  %v869_v58 = vmul.f32 %v2234_v54, %v2234_v54 }
  0xfe   : > { %v800_v62 = vadd.f32 %v2222_v46, %v799_v57  ;;  %v932_v63 = vadd.f32 %v931_v56, %v869_v58 }
 0x100   : > { %v933_v1 = vadd.f32 %v932_v63, %v870_v61  ;;  %v2250_v2 = vpop.f32.mrb[8].mxu0  ;;  %v801_v3 = vadd.f32 %v2230_v52, %v800_v62  ;;  %v2288_v29 = vpop.f32.mrb[8].mxu1 }
 0x101   : > { %v2253_v4 = vpop.f32.mrb[9].mxu0  ;;  %v874_v17 = vmul.f32 %v2250_v2, %v2250_v2  ;;  %v2292_v31 = vpop.f32.mrb[9].mxu1 }
 0x102   : > { %v802_v5 = vadd.f32 %v801_v3, %v2253_v4  ;;  %v872_v6 = vmul.f32 %v2253_v4, %v2253_v4  ;;  %v934_v7 = vadd.f32 %v933_v1, %v871_v0  ;;  %v2258_v8 = vpop.f32.mrb[10].mxu0  ;;  %v2297_v39 = vpop.f32.mrb[10].mxu1 }
 0x103   : > { %v2262_v10 = vpop.f32.mrb[11].mxu0  ;;  %v875_v20 = vmul.f32 %v2258_v8, %v2258_v8  ;;  %v2299_v40 = vpop.f32.mrb[11].mxu1 }
 0x104   : > { %v935_v12 = vadd.f32 %v934_v7, %v872_v6  ;;  %v803_v13 = vadd.f32 %v802_v5, %v2262_v10  ;;  %v873_v14 = vmul.f32 %v2262_v10, %v2262_v10 }
 0x106   : > { %v804_v18 = vadd.f32 %v2250_v2, %v803_v13  ;;  %v936_v19 = vadd.f32 %v935_v12, %v873_v14 }
 0x108   : > { %v937_v21 = vadd.f32 %v936_v19, %v874_v17  ;;  %v2278_v22 = vpop.f32.mrb[12].mxu0  ;;  %v805_v23 = vadd.f32 %v2258_v8, %v804_v18  ;;  %v2316_v61 = vpop.f32.mrb[12].mxu1 }
 0x109   : > { %v2281_v24 = vpop.f32.mrb[13].mxu0  ;;  %v878_v41 = vmul.f32 %v2278_v22, %v2278_v22  ;;  %v2320_v63 = vpop.f32.mrb[13].mxu1 }
 0x10a   : > { %v806_v25 = vadd.f32 %v805_v23, %v2281_v24  ;;  %v876_v26 = vmul.f32 %v2281_v24, %v2281_v24  ;;  %v938_v27 = vadd.f32 %v937_v21, %v875_v20  ;;  %v2286_v28 = vpop.f32.mrb[14].mxu0  ;;  %v2325_v5 = vpop.f32.mrb[14].mxu1 }
 0x10b   : > { %v2290_v30 = vpop.f32.mrb[15].mxu0  ;;  %v879_v44 = vmul.f32 %v2286_v28, %v2286_v28  ;;  %v2327_v6 = vpop.f32.mrb[15].mxu1 }
 0x10c   : > { %v939_v32 = vadd.f32 %v938_v27, %v876_v26  ;;  %v807_v33 = vadd.f32 %v806_v25, %v2290_v30  ;;  %v877_v38 = vmul.f32 %v2290_v30, %v2290_v30 }
 0x10e   : > { %v808_v42 = vadd.f32 %v2278_v22, %v807_v33  ;;  %v940_v43 = vadd.f32 %v939_v32, %v877_v38 }
 0x110   : > { %v941_v45 = vadd.f32 %v940_v43, %v878_v41  ;;  %v2306_v47 = vpop.f32.mrb[16].mxu0  ;;  %v809_v49 = vadd.f32 %v2286_v28, %v808_v42  ;;  %v2344_v27 = vpop.f32.mrb[16].mxu1 }
 0x111   : > { %v2309_v50 = vpop.f32.mrb[17].mxu0  ;;  %v882_v7 = vmul.f32 %v2306_v47, %v2306_v47  ;;  %3902 = vst [vmem:[#allocation9_spill] sm:$0xff] %v2344_v27  ;;  %v2348_v33 = vpop.f32.mrb[17].mxu1 }
 0x112   : > { %v810_v51 = vadd.f32 %v809_v49, %v2309_v50  ;;  %v880_v56 = vmul.f32 %v2309_v50, %v2309_v50  ;;  %v942_v57 = vadd.f32 %v941_v45, %v879_v44  ;;  %v2314_v58 = vpop.f32.mrb[18].mxu0  ;;  %v2353_v43 = vpop.f32.mrb[18].mxu1 }
 0x113   : > { %3898 = vst [vmem:[#allocation5_spill] sm:$0xff] %v2314_v58  ;;  %v2318_v62 = vpop.f32.mrb[19].mxu0  ;;  %v883_v14 = vmul.f32 %v2314_v58, %v2314_v58  ;;  %3904 = vst [vmem:[#allocation11_spill] sm:$0xff] %v2353_v43  ;;  %v2355_v44 = vpop.f32.mrb[19].mxu1 }
 0x114   : > { %v943_v0 = vadd.f32 %v942_v57, %v880_v56  ;;  %v811_v1 = vadd.f32 %v810_v51, %v2318_v62  ;;  %v881_v3 = vmul.f32 %v2318_v62, %v2318_v62  ;;  %3905 = vst [vmem:[#allocation12_spill] sm:$0xff] %v2355_v44 }
 0x116   : > { %v812_v12 = vadd.f32 %v2306_v47, %v811_v1  ;;  %v944_v13 = vadd.f32 %v943_v0, %v881_v3 }
 0x118   : > { %v945_v17 = vadd.f32 %v944_v13, %v882_v7  ;;  %v2334_v18 = vpop.f32.mrb[20].mxu0  ;;  %v813_v19 = vadd.f32 %v2314_v58, %v812_v12 }
 0x119   : > { %3899 = vst [vmem:[#allocation6_spill] sm:$0xff] %v2334_v18  ;;  %v2337_v20 = vpop.f32.mrb[21].mxu0  ;;  %v886_v45 = vmul.f32 %v2334_v18, %v2334_v18 }
 0x11a   : > { %3900 = vst [vmem:[#allocation7_spill] sm:$0xff] %v2337_v20  ;;  %v814_v21 = vadd.f32 %v813_v19, %v2337_v20  ;;  %v884_v23 = vmul.f32 %v2337_v20, %v2337_v20  ;;  %v946_v25 = vadd.f32 %v945_v17, %v883_v14  ;;  %v2342_v26 = vpop.f32.mrb[22].mxu0  ;;  %v2372_v17 = vpop.f32.mrb[20].mxu1 }
 0x11b   : > { %3901 = vst [vmem:[#allocation8_spill] sm:$0xff] %v2342_v26  ;;  %v2346_v32 = vpop.f32.mrb[23].mxu0  ;;  %v887_v56 = vmul.f32 %v2342_v26, %v2342_v26  ;;  %3909 = vst [vmem:[#allocation16_spill] sm:$0xff] %v2372_v17 }
 0x11c   : > { %3903 = vst [vmem:[#allocation10_spill] sm:$0xff] %v2346_v32  ;;  %v947_v38 = vadd.f32 %v946_v25, %v884_v23  ;;  %v815_v41 = vadd.f32 %v814_v21, %v2346_v32  ;;  %v885_v42 = vmul.f32 %v2346_v32, %v2346_v32  ;;  %v2376_v21 = vpop.f32.mrb[21].mxu1 }
 0x11d   : > { %3911 = vst [vmem:[#allocation18_spill] sm:$0xff] %v2376_v21 }
 0x11e   : > { %v816_v49 = vadd.f32 %v2334_v18, %v815_v41  ;;  %v948_v51 = vadd.f32 %v947_v38, %v885_v42  ;;  %v2381_v41 = vpop.f32.mrb[22].mxu1 }
 0x11f   : > { %v2383_v42 = vpop.f32.mrb[23].mxu1 }
 0x120   : > { %v949_v57 = vadd.f32 %v948_v51, %v886_v45  ;;  %v2362_v0 = vpop.f32.mrb[24].mxu0  ;;  %v817_v1 = vadd.f32 %v2342_v26, %v816_v49  ;;  %3912 = vst [vmem:[#allocation19_spill] sm:$0xff] %v2383_v42 }
 0x121   : > { %3906 = vst [vmem:[#allocation13_spill] sm:$0xff] %v2362_v0  ;;  %v2365_v3 = vpop.f32.mrb[25].mxu0  ;;  %v890_v45 = vmul.f32 %v2362_v0, %v2362_v0 }
 0x122   : > { %3907 = vst [vmem:[#allocation14_spill] sm:$0xff] %v2365_v3  ;;  %v818_v7 = vadd.f32 %v817_v1, %v2365_v3  ;;  %v888_v12 = vmul.f32 %v2365_v3, %v2365_v3  ;;  %v950_v13 = vadd.f32 %v949_v57, %v887_v56  ;;  %v2370_v14 = vpop.f32.mrb[26].mxu0 }
 0x123   : > { %3908 = vst [vmem:[#allocation15_spill] sm:$0xff] %v2370_v14  ;;  %v2374_v19 = vpop.f32.mrb[27].mxu0  ;;  %v891_v56 = vmul.f32 %v2370_v14, %v2370_v14 }
 0x124   : > { %3910 = vst [vmem:[#allocation17_spill] sm:$0xff] %v2374_v19  ;;  %v951_v23 = vadd.f32 %v950_v13, %v888_v12  ;;  %v819_v25 = vadd.f32 %v818_v7, %v2374_v19  ;;  %v889_v38 = vmul.f32 %v2374_v19, %v2374_v19 }
 0x126   : > { %v820_v49 = vadd.f32 %v2362_v0, %v819_v25  ;;  %v952_v51 = vadd.f32 %v951_v23, %v889_v38  ;;  %v2400_v25 = vpop.f32.mrb[24].mxu1 }
 0x127   : > { %3916 = vst [vmem:[#allocation23_spill] sm:$0xff] %v2400_v25  ;;  %v2404_v38 = vpop.f32.mrb[25].mxu1 }
 0x128   : > { %v953_v57 = vadd.f32 %v952_v51, %v890_v45  ;;  %v2390_v1 = vpop.f32.mrb[28].mxu0  ;;  %v821_v7 = vadd.f32 %v2370_v14, %v820_v49  ;;  %3918 = vst [vmem:[#allocation25_spill] sm:$0xff] %v2404_v38  ;;  %v2409_v14 = vpop.f32.mrb[26].mxu1 }
 0x129   : > { %3913 = vst [vmem:[#allocation20_spill] sm:$0xff] %v2390_v1  ;;  %v2393_v12 = vpop.f32.mrb[29].mxu0  ;;  %3919 = vst [vmem:[#allocation26_spill] sm:$0xff] %v2409_v14 }
 0x12a   : > { %3914 = vst [vmem:[#allocation21_spill] sm:$0xff] %v2393_v12  ;;  %v822_v13 = vadd.f32 %v821_v7, %v2393_v12  ;;  %v892_v19 = vmul.f32 %v2393_v12, %v2393_v12  ;;  %v954_v3 = vadd.f32 %v953_v57, %v891_v56  ;;  %v2398_v26 = vpop.f32.mrb[30].mxu0  ;;  %v2411_v7 = vpop.f32.mrb[27].mxu1  ;;  %v894_v56 = vmul.f32 %v2390_v1, %v2390_v1 }
 0x12b   : > { %3915 = vst [vmem:[#allocation22_spill] sm:$0xff] %v2398_v26  ;;  %v2402_v23 = vpop.f32.mrb[31].mxu0  ;;  %3920 = vst [vmem:[#allocation27_spill] sm:$0xff] %v2411_v7  ;;  %v895_v0 = vmul.f32 %v2398_v26, %v2398_v26  ;;  %v2422_v32 = vpop.f32.mrb[28].mxu1 }
 0x12c   : > { %3917 = vst [vmem:[#allocation24_spill] sm:$0xff] %v2402_v23  ;;  %v955_v45 = vadd.f32 %v954_v3, %v892_v19  ;;  %v823_v51 = vadd.f32 %v822_v13, %v2402_v23  ;;  %v893_v49 = vmul.f32 %v2402_v23, %v2402_v23  ;;  %v896_v19 = vmul.f32 %v2236_v55, %v2236_v55  ;;  %v2424_v20 = vpop.f32.mrb[29].mxu1 }
 0x12d   : > { %3921 = vst [vmem:[#allocation28_spill] sm:$0xff] %v2424_v20 }
 0x12e   : > { %v824_v57 = vadd.f32 %v2390_v1, %v823_v51  ;;  %v956_v12 = vadd.f32 %v955_v45, %v893_v49  ;;  %v897_v45 = vmul.f32 %v2243_v60, %v2243_v60  ;;  %v2429_v49 = vpop.f32.mrb[30].mxu1  ;;  %v901_v1 = vmul.f32 %v2271_v16, %v2271_v16 }
 0x130   : > { %v957_v18 = vadd.f32 %v956_v12, %v894_v56  ;;  %v825_v3 = vadd.f32 %v2398_v26, %v824_v57  ;;  %v2431_v12 = vpop.f32.mrb[31].mxu1  ;;  %v898_v56 = vmul.f32 %v2232_v53, %v2232_v53 }
 0x131   : > { %3922 = vst [vmem:[#allocation29_spill] sm:$0xff] %v2431_v12 }
 0x132   : > { %v826_v13 = vadd.f32 %v825_v3, %v2236_v55  ;;  %v958_v23 = vadd.f32 %v957_v18, %v895_v0  ;;  %v899_v0 = vmul.f32 %v2241_v59, %v2241_v59 }
 0x134   : > { %v959_v58 = vadd.f32 %v958_v23, %v896_v19  ;;  %v827_v51 = vadd.f32 %v826_v13, %v2243_v60  ;;  %v900_v19 = vmul.f32 %v2264_v11, %v2264_v11 }
 0x136   : > { %v828_v57 = vadd.f32 %v2232_v53, %v827_v51  ;;  %v960_v18 = vadd.f32 %v959_v58, %v897_v45  ;;  %v902_v58 = vmul.f32 %v2260_v9, %v2260_v9 }
 0x138   : > { %v961_v3 = vadd.f32 %v960_v18, %v898_v56  ;;  %v829_v23 = vadd.f32 %v2241_v59, %v828_v57  ;;  %v903_v56 = vmul.f32 %v2269_v15, %v2269_v15 }
 0x13a   : > { %v830_v13 = vadd.f32 %v829_v23, %v2264_v11  ;;  %v962_v60 = vadd.f32 %v961_v3, %v899_v0 }
 0x13c   : > { %v963_v55 = vadd.f32 %v962_v60, %v900_v19  ;;  %v831_v26 = vadd.f32 %v830_v13, %v2271_v16  ;;  %v904_v60 = vmul.f32 %v2292_v31, %v2292_v31  ;;  %v905_v13 = vmul.f32 %v2299_v40, %v2299_v40 }
 0x13e   : > { %v832_v51 = vadd.f32 %v2260_v9, %v831_v26  ;;  %v964_v45 = vadd.f32 %v963_v55, %v901_v1  ;;  %v906_v55 = vmul.f32 %v2288_v29, %v2288_v29 }
 0x140   : > { %v965_v57 = vadd.f32 %v964_v45, %v902_v58  ;;  %v833_v18 = vadd.f32 %v2269_v15, %v832_v51  ;;  %v907_v58 = vmul.f32 %v2297_v39, %v2297_v39 }
 0x142   : > { %v834_v0 = vadd.f32 %v833_v18, %v2292_v31  ;;  %v966_v3 = vadd.f32 %v965_v57, %v903_v56  ;;  %v908_v56 = vmul.f32 %v2320_v63, %v2320_v63 }
 0x144   : > { %v967_v23 = vadd.f32 %v966_v3, %v904_v60  ;;  %v835_v19 = vadd.f32 %v834_v0, %v2299_v40  ;;  %v909_v3 = vmul.f32 %v2327_v6, %v2327_v6 }
 0x146   : > { %v836_v26 = vadd.f32 %v2288_v29, %v835_v19  ;;  %v968_v1 = vadd.f32 %v967_v23, %v905_v13  ;;  %v910_v23 = vmul.f32 %v2316_v61, %v2316_v61 }
 0x148   : > { %v969_v51 = vadd.f32 %v968_v1, %v906_v55  ;;  %v837_v45 = vadd.f32 %v2297_v39, %v836_v26  ;;  %v911_v55 = vmul.f32 %v2325_v5, %v2325_v5 }
 0x14a   : > { %v838_v57 = vadd.f32 %v837_v45, %v2320_v63  ;;  %v970_v18 = vadd.f32 %v969_v51, %v907_v58  ;;  %v912_v58 = vmul.f32 %v2348_v33, %v2348_v33 }
 0x14c   : > { %v971_v60 = vadd.f32 %v970_v18, %v908_v56  ;;  %v839_v0 = vadd.f32 %v838_v57, %v2327_v6  ;;  %v913_v18 = vmul.f32 %v2355_v44, %v2355_v44 }
 0x14e   : > { %v840_v19 = vadd.f32 %v2316_v61, %v839_v0  ;;  %v972_v13 = vadd.f32 %v971_v60, %v909_v3  ;;  %v914_v60 = vmul.f32 %v2344_v27, %v2344_v27 }
 0x150   : > { %v973_v26 = vadd.f32 %v972_v13, %v910_v23  ;;  %v841_v1 = vadd.f32 %v2325_v5, %v840_v19  ;;  %v915_v23 = vmul.f32 %v2353_v43, %v2353_v43 }
 0x152   : > { %v842_v51 = vadd.f32 %v841_v1, %v2348_v33  ;;  %v974_v45 = vadd.f32 %v973_v26, %v911_v55  ;;  %v916_v55 = vmul.f32 %v2376_v21, %v2376_v21 }
 0x154   : > { %v975_v56 = vadd.f32 %v974_v45, %v912_v58  ;;  %v843_v57 = vadd.f32 %v842_v51, %v2355_v44  ;;  %v917_v45 = vmul.f32 %v2383_v42, %v2383_v42 }
 0x156   : > { %v844_v0 = vadd.f32 %v2344_v27, %v843_v57  ;;  %v976_v3 = vadd.f32 %v975_v56, %v913_v18  ;;  %v918_v56 = vmul.f32 %v2372_v17, %v2372_v17 }
 0x158   : > { %v977_v19 = vadd.f32 %v976_v3, %v914_v60  ;;  %v845_v13 = vadd.f32 %v2353_v43, %v844_v0  ;;  %v919_v60 = vmul.f32 %v2381_v41, %v2381_v41 }
 0x15a   : > { %v846_v26 = vadd.f32 %v845_v13, %v2376_v21  ;;  %v978_v1 = vadd.f32 %v977_v19, %v915_v23  ;;  %v920_v23 = vmul.f32 %v2404_v38, %v2404_v38 }
 0x15c   : > { %v979_v58 = vadd.f32 %v978_v1, %v916_v55  ;;  %v847_v51 = vadd.f32 %v846_v26, %v2383_v42  ;;  %v921_v1 = vmul.f32 %v2411_v7, %v2411_v7 }
 0x15e   : > { %v848_v57 = vadd.f32 %v2372_v17, %v847_v51  ;;  %v980_v18 = vadd.f32 %v979_v58, %v917_v45  ;;  %v922_v58 = vmul.f32 %v2400_v25, %v2400_v25 }
 0x160   : > { %v981_v0 = vadd.f32 %v980_v18, %v918_v56  ;;  %v849_v3 = vadd.f32 %v2381_v41, %v848_v57  ;;  %v923_v56 = vmul.f32 %v2409_v14, %v2409_v14 }
 0x162   : > { %v850_v19 = vadd.f32 %v849_v3, %v2404_v38  ;;  %v982_v13 = vadd.f32 %v981_v0, %v919_v60  ;;  %v924_v60 = vmul.f32 %v2424_v20, %v2424_v20 }
 0x164   : > { %v983_v55 = vadd.f32 %v982_v13, %v920_v23  ;;  %v851_v26 = vadd.f32 %v850_v19, %v2411_v7  ;;  %v925_v13 = vmul.f32 %v2431_v12, %v2431_v12 }
 0x166   : > { %v852_v51 = vadd.f32 %v2400_v25, %v851_v26  ;;  %v984_v45 = vadd.f32 %v983_v55, %v921_v1  ;;  %v926_v55 = vmul.f32 %v2422_v32, %v2422_v32 }
 0x168   : > { %v985_v57 = vadd.f32 %v984_v45, %v922_v58  ;;  %v853_v18 = vadd.f32 %v2409_v14, %v852_v51  ;;  %v927_v58 = vmul.f32 %v2429_v49, %v2429_v49 }
 0x16a   : > { %v854_v0 = vadd.f32 %v853_v18, %v2424_v20  ;;  %v986_v3 = vadd.f32 %v985_v57, %v923_v56 }
 0x16c   : > { %v987_v23 = vadd.f32 %v986_v3, %v924_v60  ;;  %v855_v19 = vadd.f32 %v854_v0, %v2431_v12 }
 0x16e   : > { %v856_v26 = vadd.f32 %v2422_v32, %v855_v19  ;;  %v988_v1 = vadd.f32 %v987_v23, %v925_v13 }
 0x170   : > { %v857_v51 = vadd.f32 %v2429_v49, %v856_v26  ;;  %v989_v45 = vadd.f32 %v988_v1, %v926_v55  ;;  %v3939_v1 = vld [vmem:[#allocation27_spill] sm:$0xff] }
 0x171   : > { %v3940_v55 = vld [vmem:[#allocation23_spill] sm:$0xff] }
 0x172   : > { %v858_v18 = vrot.slane %v857_v51, 4  ;;  %v990_v56 = vadd.f32 %v989_v45, %v927_v58  ;;  %v3931_v45 = vld [vmem:[#allocation15_spill] sm:$0xff] }
 0x174   : > { %v859_v57 = vadd.f32 %v858_v18, %v857_v51  ;;  %v991_v60 = vrot.slane %v990_v56, 4  ;;  %v3932_v51 = vld [vmem:[#allocation21_spill] sm:$0xff] }
 0x176   : > { %v860_v0 = vrot.slane %v859_v57, 2  ;;  %v992_v3 = vadd.f32 %v991_v60, %v990_v56  ;;  %v3942_v56 = vld [vmem:[#allocation28_spill] sm:$0xff] }
 0x178   : > { %v861_v20 = vadd.f32 %v860_v0, %v859_v57  ;;  %v993_v12 = vrot.slane %v992_v3, 2  ;;  %v3924_v0 = vld [vmem:[#allocation7_spill] sm:$0xff]  ;;  %v3943_v57 = vld [vmem:[#allocation29_spill] sm:$0xff] }
 0x17a   : > { %v862_v14 = vrot.slane %v861_v20, 1  ;;  %v994_v25 = vadd.f32 %v993_v12, %v992_v3  ;;  %v3925_v3 = vld [vmem:[#allocation10_spill] sm:$0xff]  ;;  %v3933_v12 = vld [vmem:[#allocation24_spill] sm:$0xff] }
 0x17c   : > { %v863_v7 = vadd.f32 %v862_v14, %v861_v20  ;;  %v995_v38 = vrot.slane %v994_v25, 1  ;;  %v3936_v14 = vld [vmem:[#allocation3_spill] sm:$0xff] }
 0x17e   : > { %v996_v19 = vadd.f32 %v995_v38, %v994_v25  ;;  %v2523_v23 = vmul.f32 0.001953125, %v863_v7  ;;  %v3934_v7 = vld [vmem:[#allocation20_spill] sm:$0xff]  ;;  %v3935_v25 = vld [vmem:[#allocation22_spill] sm:$0xff] }
 0x180   : > { %v998_v13 = vmul.f32 0.001953125, %v996_v19  ;;  %v999_v26 = vmul.f32 %v2523_v23, %v2523_v23  ;;  %v3926_v19 = vld [vmem:[#allocation6_spill] sm:$0xff]  ;;  %v3944_v43 = vsub.f32 %v2205_v35, %v2523_v23  ;;  %v3945_v42 = vsub.f32 %v2209_v37, %v2523_v23 }
 0x181   : > { %v3946_v20 = vsub.f32 %v2203_v34, %v2523_v23  ;;  %v3947_v44 = vsub.f32 %v2207_v36, %v2523_v23 }
 0x182   : > { %v1000_v38 = vsub.f32 %v998_v13, %v999_v26  ;;  %v3927_v13 = vld [vmem:[#allocation8_spill] sm:$0xff]  ;;  %v3941_v26 = vld [vmem:[#allocation26_spill] sm:$0xff] }
 0x184   : > { %v1001_v60 = vmax.f32 %v1000_v38, 0.0  ;;  %v3923_v38 = vld [vmem:[#allocation5_spill] sm:$0xff] }
 0x186   : > { %v1002_v18 = vadd.f32 0.001, %v1001_v60  ;;  %v3930_v60 = vld [vmem:[#allocation13_spill] sm:$0xff] }
 0x188   : > { %1990 = vrsqrt.f32 %v1002_v18  ;;  %v3937_v18 = vld [vmem:[#allocation4_spill] sm:$0xff] }
 0x192   : > { %v2655_v58 = vpop.eup %1990 }
 0x193   : > { %v2661_v27 = vmul.f32 %v2655_v58, %v3944_v43  ;;  %v2667_v21 = vmul.f32 %v2655_v58, %v3945_v42  ;;  %v2673_v17 = vmul.f32 %v2655_v58, %v3946_v20  ;;  %v2679_v35 = vmul.f32 %v2655_v58, %v3947_v44 }
 0x194   : > { %v3948_v43 = vsub.f32 %v2225_v48, %v2523_v23  ;;  %v3949_v42 = vsub.f32 %v2234_v54, %v2523_v23  ;;  %v3950_v20 = vsub.f32 %v2222_v46, %v2523_v23  ;;  %v3951_v44 = vsub.f32 %v2230_v52, %v2523_v23 }
 0x196   : > { %v2685_v37 = vmul.f32 %v2655_v58, %v3948_v43  ;;  %v2691_v34 = vmul.f32 %v2655_v58, %v3949_v42  ;;  %v2697_v36 = vmul.f32 %v2655_v58, %v3950_v20  ;;  %v2703_v48 = vmul.f32 %v2655_v58, %v3951_v44 }
 0x197   : > { %v3952_v43 = vsub.f32 %v2253_v4, %v2523_v23  ;;  %v3953_v42 = vsub.f32 %v2262_v10, %v2523_v23  ;;  %v3954_v20 = vsub.f32 %v2250_v2, %v2523_v23  ;;  %v3955_v44 = vsub.f32 %v2258_v8, %v2523_v23 }
 0x199   : > { %v2709_v54 = vmul.f32 %v2655_v58, %v3952_v43  ;;  %v2715_v46 = vmul.f32 %v2655_v58, %v3953_v42  ;;  %v2721_v52 = vmul.f32 %v2655_v58, %v3954_v20  ;;  %v2727_v4 = vmul.f32 %v2655_v58, %v3955_v44 }
 0x19a   : > { %v3956_v43 = vsub.f32 %v2281_v24, %v2523_v23  ;;  %v3957_v42 = vsub.f32 %v2290_v30, %v2523_v23  ;;  %v3958_v20 = vsub.f32 %v2278_v22, %v2523_v23  ;;  %v3959_v44 = vsub.f32 %v2286_v28, %v2523_v23 }
 0x19c   : > { %v2733_v10 = vmul.f32 %v2655_v58, %v3956_v43  ;;  %v2739_v2 = vmul.f32 %v2655_v58, %v3957_v42  ;;  %v2745_v8 = vmul.f32 %v2655_v58, %v3958_v20  ;;  %v2751_v24 = vmul.f32 %v2655_v58, %v3959_v44 }
 0x19d   : > { %v3960_v43 = vsub.f32 %v2309_v50, %v2523_v23  ;;  %v3961_v42 = vsub.f32 %v2318_v62, %v2523_v23  ;;  %v3962_v20 = vsub.f32 %v2306_v47, %v2523_v23  ;;  %v3963_v44 = vsub.f32 %v3923_v38, %v2523_v23 }
 0x19f   : > { %v2757_v30 = vmul.f32 %v2655_v58, %v3960_v43  ;;  %v2763_v22 = vmul.f32 %v2655_v58, %v3961_v42  ;;  %v2769_v28 = vmul.f32 %v2655_v58, %v3962_v20  ;;  %v2775_v50 = vmul.f32 %v2655_v58, %v3963_v44 }
 0x1a0   : > { %v3964_v43 = vsub.f32 %v3924_v0, %v2523_v23  ;;  %v3966_v42 = vsub.f32 %v3925_v3, %v2523_v23  ;;  %v3968_v20 = vsub.f32 %v3926_v19, %v2523_v23  ;;  %v3969_v44 = vsub.f32 %v3927_v13, %v2523_v23 }
 0x1a2   : > { %v2781_v62 = vmul.f32 %v2655_v58, %v3964_v43  ;;  %v2787_v47 = vmul.f32 %v2655_v58, %v3966_v42  ;;  %v2793_v38 = vmul.f32 %v2655_v58, %v3968_v20  ;;  %v2799_v0 = vmul.f32 %v2655_v58, %v3969_v44  ;;  %v3970_v43 = vld [vmem:[#allocation14_spill] sm:$0xff]  ;;  %v3972_v42 = vld [vmem:[#allocation17_spill] sm:$0xff] }
 0x1a3   : > { %v3974_v20 = vsub.f32 %v3930_v60, %v2523_v23  ;;  %v3975_v44 = vsub.f32 %v3931_v45, %v2523_v23 }
 0x1a4   : > { %3965 = vst [vmem:[#allocation5_spill] sm:$0xff] %v2781_v62  ;;  %3967 = vst [vmem:[#allocation7_spill] sm:$0xff] %v2787_v47  ;;  %v3971_v62 = vsub.f32 %v3970_v43, %v2523_v23  ;;  %v3973_v47 = vsub.f32 %v3972_v42, %v2523_v23 }
 0x1a5   : > { %v2817_v13 = vmul.f32 %v2655_v58, %v3974_v20  ;;  %v2823_v43 = vmul.f32 %v2655_v58, %v3975_v44  ;;  %v3978_v20 = vsub.f32 %v3934_v7, %v2523_v23  ;;  %v3979_v44 = vsub.f32 %v3935_v25, %v2523_v23 }
 0x1a6   : > { %v2805_v3 = vmul.f32 %v2655_v58, %v3971_v62  ;;  %v2811_v19 = vmul.f32 %v2655_v58, %v3973_v47  ;;  %v3976_v62 = vsub.f32 %v3932_v51, %v2523_v23  ;;  %v3977_v47 = vsub.f32 %v3933_v12, %v2523_v23 }
 0x1a7   : > { %v2841_v45 = vmul.f32 %v2655_v58, %v3978_v20  ;;  %v2847_v51 = vmul.f32 %v2655_v58, %v3979_v44  ;;  %v3982_v20 = vsub.f32 %v2232_v53, %v2523_v23  ;;  %v3983_v44 = vsub.f32 %v2241_v59, %v2523_v23 }
 0x1a8   : > { %v2829_v42 = vmul.f32 %v2655_v58, %v3976_v62  ;;  %v2835_v60 = vmul.f32 %v2655_v58, %v3977_v47  ;;  %v3980_v62 = vsub.f32 %v3936_v14, %v2523_v23  ;;  %v3981_v47 = vsub.f32 %v3937_v18, %v2523_v23 }
 0x1a9   : > { %v2865_v25 = vmul.f32 %v2655_v58, %v3982_v20  ;;  %v2871_v14 = vmul.f32 %v2655_v58, %v3983_v44  ;;  %v3986_v20 = vsub.f32 %v2260_v9, %v2523_v23  ;;  %v3987_v44 = vsub.f32 %v2269_v15, %v2523_v23 }
 0x1aa   : > { %v2853_v12 = vmul.f32 %v2655_v58, %v3980_v62  ;;  %v2859_v7 = vmul.f32 %v2655_v58, %v3981_v47  ;;  %v3984_v62 = vsub.f32 %v2264_v11, %v2523_v23  ;;  %v3985_v47 = vsub.f32 %v2271_v16, %v2523_v23 }
 0x1ab   : > { %v2889_v59 = vmul.f32 %v2655_v58, %v3986_v20  ;;  %v2895_v11 = vmul.f32 %v2655_v58, %v3987_v44  ;;  %v3988_v16 = vsub.f32 %v2292_v31, %v2523_v23  ;;  %v3991_v44 = vsub.f32 %v2297_v39, %v2523_v23 }
 0x1ac   : > { %v2877_v18 = vmul.f32 %v2655_v58, %v3984_v62  ;;  %v2883_v53 = vmul.f32 %v2655_v58, %v3985_v47  ;;  %v3989_v62 = vsub.f32 %v2299_v40, %v2523_v23  ;;  %v3990_v47 = vsub.f32 %v2288_v29, %v2523_v23 }
 0x1ad   : > { %v2908_v9 = vmul.f32 %v2655_v58, %v3988_v16  ;;  %v2926_v31 = vmul.f32 %v2655_v58, %v3991_v44  ;;  %v3992_v16 = vsub.f32 %v2320_v63, %v2523_v23  ;;  %v3997_v44 = vsub.f32 %v2325_v5, %v2523_v23 }
 0x1ae   : > { %v2914_v15 = vmul.f32 %v2655_v58, %v3989_v62  ;;  %v2920_v20 = vmul.f32 %v2655_v58, %v3990_v47  ;;  %v3993_v62 = vsub.f32 %v2327_v6, %v2523_v23  ;;  %v3995_v47 = vsub.f32 %v2316_v61, %v2523_v23 }
 0x1af   : > { %v2932_v40 = vmul.f32 %v2655_v58, %v3992_v16  ;;  %v2950_v63 = vmul.f32 %v2655_v58, %v3997_v44  ;;  %v3999_v16 = vsub.f32 %v2348_v33, %v2523_v23  ;;  %v4007_v44 = vld [vmem:[#allocation11_spill] sm:$0xff] }
 0x1b0   : > { %v2938_v29 = vmul.f32 %v2655_v58, %v3993_v62  ;;  %v2944_v39 = vmul.f32 %v2655_v58, %v3995_v47  ;;  %v4001_v62 = vld [vmem:[#allocation12_spill] sm:$0xff]  ;;  %v4004_v47 = vld [vmem:[#allocation9_spill] sm:$0xff] }
 0x1b1   : > { %3998 = vst [vmem:[#allocation8_spill] sm:$0xff] %v2950_v63  ;;  %v2956_v6 = vmul.f32 %v2655_v58, %v3999_v16  ;;  %v4008_v63 = vsub.f32 %v4007_v44, %v2523_v23  ;;  %v2977_v16 = vld [vmem:[%s2902_s8] ss:$0 sm:$0xff] }
 0x1b2   : > { %3994 = vst [vmem:[#allocation10_spill] sm:$0xff] %v2938_v29  ;;  %3996 = vst [vmem:[#allocation6_spill] sm:$0xff] %v2944_v39  ;;  %v4002_v29 = vsub.f32 %v4001_v62, %v2523_v23  ;;  %v4005_v39 = vsub.f32 %v4004_v47, %v2523_v23 }
 0x1b3   : > { %4000 = vst [vmem:[#allocation13_spill] sm:$0xff] %v2956_v6  ;;  %v2974_v33 = vmul.f32 %v2655_v58, %v4008_v63  ;;  %v4010_v6 = vld [vmem:[#allocation18_spill] sm:$0xff] }
 0x1b4   : > { %v2962_v61 = vmul.f32 %v2655_v58, %v4002_v29  ;;  %v2968_v5 = vmul.f32 %v2655_v58, %v4005_v39  ;;  %v4011_v62 = vsub.f32 %v4010_v6, %v2523_v23 }
 0x1b5   : > { %4009 = vst [vmem:[#allocation24_spill] sm:$0xff] %v2974_v33  ;;  %v4017_v33 = vsub.f32 %v2381_v41, %v2523_v23 }
 0x1b6   : > { %4003 = vst [vmem:[#allocation15_spill] sm:$0xff] %v2962_v61  ;;  %4006 = vst [vmem:[#allocation21_spill] sm:$0xff] %v2968_v5  ;;  %v2983_v29 = vmul.f32 %v2655_v58, %v4011_v62  ;;  %v4013_v61 = vld [vmem:[#allocation19_spill] sm:$0xff]  ;;  %v4015_v5 = vld [vmem:[#allocation16_spill] sm:$0xff] }
 0x1b7   : > { %v4014_v47 = vsub.f32 %v4013_v61, %v2523_v23  ;;  %v4016_v44 = vsub.f32 %v4015_v5, %v2523_v23  ;;  %v3001_v6 = vmul.f32 %v2655_v58, %v4017_v33  ;;  %v4018_v62 = vld [vmem:[#allocation25_spill] sm:$0xff]  ;;  %v4022_v33 = vsub.f32 %v3941_v26, %v2523_v23 }
 0x1b8   : > { %4012 = vst [vmem:[#allocation20_spill] sm:$0xff] %v2983_v29  ;;  %v4019_v29 = vsub.f32 %v4018_v62, %v2523_v23 }
 0x1b9   : > { %v2989_v39 = vmul.f32 %v2655_v58, %v4014_v47  ;;  %v2995_v63 = vmul.f32 %v2655_v58, %v4016_v44  ;;  %v4020_v47 = vsub.f32 %v3939_v1, %v2523_v23  ;;  %v4021_v44 = vsub.f32 %v3940_v55, %v2523_v23 }
 0x1ba   : > { %v3007_v61 = vmul.f32 %v2655_v58, %v4019_v29  ;;  %v3025_v62 = vmul.f32 %v2655_v58, %v4022_v33  ;;  %v4023_v29 = vsub.f32 %v3942_v56, %v2523_v23  ;;  %v4026_v33 = vsub.f32 %v2429_v49, %v2523_v23 }
 0x1bb   : > { %v3013_v5 = vmul.f32 %v2655_v58, %v4020_v47  ;;  %v3019_v41 = vmul.f32 %v2655_v58, %v4021_v44  ;;  %v4024_v47 = vsub.f32 %v3943_v57, %v2523_v23  ;;  %v4025_v44 = vsub.f32 %v2422_v32, %v2523_v23 }
 0x1bc   : > { %v3031_v1 = vmul.f32 %v2655_v58, %v4023_v29  ;;  %v3049_v56 = vmul.f32 %v2655_v58, %v4026_v33  ;;  %v3053_v29 = vmul.f32 %v2977_v16, %v2661_v27  ;;  %v3057_v57 = vmul.f32 %v2977_v16, %v2667_v21 }
 0x1bd   : > { %v3037_v55 = vmul.f32 %v2655_v58, %v4024_v47  ;;  %v3043_v26 = vmul.f32 %v2655_v58, %v4025_v44  ;;  %v3061_v32 = vmul.f32 %v2977_v16, %v2673_v17  ;;  %v3065_v47 = vmul.f32 %v2977_v16, %v2679_v35 }
 0x1be   : > { %v3069_v49 = vmul.f32 %v2977_v16, %v2685_v37  ;;  %v3073_v27 = vmul.f32 %v2977_v16, %v2691_v34  ;;  %v3077_v21 = vmul.f32 %v2977_v16, %v2697_v36  ;;  %v3081_v17 = vmul.f32 %v2977_v16, %v2703_v48 }
 0x1bf   : > { %v3085_v23 = vmul.f32 %v2977_v16, %v2709_v54  ;;  %v3089_v58 = vmul.f32 %v2977_v16, %v2715_v46  ;;  %v3093_v35 = vmul.f32 %v2977_v16, %v2721_v52  ;;  %v3097_v37 = vmul.f32 %v2977_v16, %v2727_v4 }
 0x1c0   : > { %v3101_v34 = vmul.f32 %v2977_v16, %v2733_v10  ;;  %v3105_v36 = vmul.f32 %v2977_v16, %v2739_v2  ;;  %v3109_v48 = vmul.f32 %v2977_v16, %v2745_v8  ;;  %v3113_v54 = vmul.f32 %v2977_v16, %v2751_v24  ;;  %v4027_v2 = vld [vmem:[#allocation5_spill] sm:$0xff]  ;;  %v4028_v24 = vld [vmem:[#allocation7_spill] sm:$0xff] }
 0x1c1   : > { %v3117_v46 = vmul.f32 %v2977_v16, %v2757_v30  ;;  %v3121_v52 = vmul.f32 %v2977_v16, %v2763_v22  ;;  %v3125_v4 = vmul.f32 %v2977_v16, %v2769_v28  ;;  %v3129_v10 = vmul.f32 %v2977_v16, %v2775_v50 }
 0x1c2   : > { %v3133_v8 = vmul.f32 %v2977_v16, %v4027_v2  ;;  %v3137_v30 = vmul.f32 %v2977_v16, %v4028_v24  ;;  %v3141_v22 = vmul.f32 %v2977_v16, %v2793_v38  ;;  %v3145_v28 = vmul.f32 %v2977_v16, %v2799_v0  ;;  %v4033_v2 = vld [vmem:[#allocation10_spill] sm:$0xff] }
 0x1c3   : > { %v3149_v50 = vmul.f32 %v2977_v16, %v2805_v3  ;;  %v3153_v44 = vmul.f32 %v2977_v16, %v2811_v19  ;;  %v3157_v33 = vmul.f32 %v2977_v16, %v2817_v13  ;;  %v3161_v38 = vmul.f32 %v2977_v16, %v2823_v43  ;;  %v4035_v24 = vld [vmem:[#allocation6_spill] sm:$0xff] }
 0x1c4   : > { %v3165_v0 = vmul.f32 %v2977_v16, %v2829_v42  ;;  %v3169_v3 = vmul.f32 %v2977_v16, %v2835_v60  ;;  %v3173_v19 = vmul.f32 %v2977_v16, %v2841_v45  ;;  %v3177_v13 = vmul.f32 %v2977_v16, %v2847_v51 }
 0x1c5   : > { %v3181_v43 = vmul.f32 %v2977_v16, %v2853_v12  ;;  %v3185_v42 = vmul.f32 %v2977_v16, %v2859_v7  ;;  %v3189_v60 = vmul.f32 %v2977_v16, %v2865_v25  ;;  %v3193_v45 = vmul.f32 %v2977_v16, %v2871_v14 }
 0x1c6   : > { %v3197_v51 = vmul.f32 %v2977_v16, %v2877_v18  ;;  %v3201_v12 = vmul.f32 %v2977_v16, %v2883_v53  ;;  %v3205_v7 = vmul.f32 %v2977_v16, %v2889_v59  ;;  %v3209_v25 = vmul.f32 %v2977_v16, %v2895_v11 }
 0x1c7   : > { %v3213_v14 = vmul.f32 %v2977_v16, %v2908_v9  ;;  %v3217_v18 = vmul.f32 %v2977_v16, %v2914_v15  ;;  %v3221_v53 = vmul.f32 %v2977_v16, %v2920_v20  ;;  %v3225_v59 = vmul.f32 %v2977_v16, %v2926_v31 }
 0x1c8   : > { %v3229_v11 = vmul.f32 %v2977_v16, %v2932_v40  ;;  %v3233_v9 = vmul.f32 %v2977_v16, %v4033_v2  ;;  %v3237_v15 = vmul.f32 %v2977_v16, %v4035_v24 }
 0x1c9   : > { %4029 = vst [vmem:[#allocation22_spill] sm:$0xff] %v3217_v18  ;;  %4030 = vst [vmem:[#allocation3_spill] sm:$0xff] %v3221_v53  ;;  %v4037_v18 = vld [vmem:[#allocation8_spill] sm:$0xff]  ;;  %v4039_v53 = vld [vmem:[#allocation13_spill] sm:$0xff] }
 0x1ca   : > { %4031 = vst [vmem:[#allocation4_spill] sm:$0xff] %v3225_v59  ;;  %4032 = vst [vmem:[#allocation27_spill] sm:$0xff] %v3229_v11  ;;  %v3241_v20 = vmul.f32 %v2977_v16, %v4037_v18  ;;  %v3245_v31 = vmul.f32 %v2977_v16, %v4039_v53  ;;  %v4040_v59 = vld [vmem:[#allocation15_spill] sm:$0xff]  ;;  %v4041_v11 = vld [vmem:[#allocation21_spill] sm:$0xff]  ;;  %v3268_v53 = vmul.f32 %v2977_v16, %v2989_v39 }
 0x1cb   : > { %4034 = vst [vmem:[#allocation23_spill] sm:$0xff] %v3233_v9  ;;  %4036 = vst [vmem:[#allocation26_spill] sm:$0xff] %v3237_v15  ;;  %v3249_v40 = vmul.f32 %v2977_v16, %v4040_v59  ;;  %v3253_v2 = vmul.f32 %v2977_v16, %v4041_v11  ;;  %v4042_v9 = vld [vmem:[#allocation24_spill] sm:$0xff]  ;;  %v3260_v15 = vld [vmem:[%s2902_s8 + $0x1] ss:$0 sm:$0xff]  ;;  %v3272_v59 = vmul.f32 %v2977_v16, %v2995_v63 }
 0x1cc   : > { %4038 = vst [vmem:[#allocation28_spill] sm:$0xff] %v3241_v20  ;;  %v3257_v24 = vmul.f32 %v2977_v16, %v4042_v9  ;;  %v4043_v18 = vld [vmem:[#allocation20_spill] sm:$0xff]  ;;  %v3276_v11 = vmul.f32 %v2977_v16, %v3001_v6  ;;  %v3280_v9 = vmul.f32 %v2977_v16, %v3007_v61  ;;  %v3288_v39 = vmul.f32 %v2977_v16, %v3019_v41 }
 0x1cd   : > { %v3264_v20 = vmul.f32 %v2977_v16, %v4043_v18  ;;  %v3284_v18 = vmul.f32 %v2977_v16, %v3013_v5  ;;  %v3292_v63 = vmul.f32 %v2977_v16, %v3025_v62  ;;  %v3296_v6 = vmul.f32 %v2977_v16, %v3031_v1 }
 0x1ce   : > { %v3300_v61 = vmul.f32 %v2977_v16, %v3037_v55  ;;  %v3304_v5 = vmul.f32 %v2977_v16, %v3043_v26  ;;  %v3308_v41 = vmul.f32 %v2977_v16, %v3049_v56  ;;  %v3312_v62 = vadd.f32 %v3260_v15, %v3053_v29 }
 0x1cf   : > { %v3316_v1 = vadd.f32 %v3260_v15, %v3057_v57  ;;  %v3320_v55 = vadd.f32 %v3260_v15, %v3061_v32  ;;  %v3324_v26 = vadd.f32 %v3260_v15, %v3065_v47  ;;  %v3328_v16 = vadd.f32 %v3260_v15, %v3069_v49 }
 0x1d0   : > { %v3332_v56 = vadd.f32 %v3260_v15, %v3073_v27  ;;  %v3336_v29 = vadd.f32 %v3260_v15, %v3077_v21  ;;  %v3340_v57 = vadd.f32 %v3260_v15, %v3081_v17  ;;  %v3344_v32 = vadd.f32 %v3260_v15, %v3085_v23 }
 0x1d1   : > { %v3348_v47 = vadd.f32 %v3260_v15, %v3089_v58  ;;  %v3352_v49 = vadd.f32 %v3260_v15, %v3093_v35  ;;  %v3356_v27 = vadd.f32 %v3260_v15, %v3097_v37  ;;  %v3360_v21 = vadd.f32 %v3260_v15, %v3101_v34 }
 0x1d2   : > { %v3364_v17 = vadd.f32 %v3260_v15, %v3105_v36  ;;  %v3368_v23 = vadd.f32 %v3260_v15, %v3109_v48  ;;  %v3372_v58 = vadd.f32 %v3260_v15, %v3113_v54  ;;  %v3376_v35 = vadd.f32 %v3260_v15, %v3117_v46 }
 0x1d3   : > { %v3380_v37 = vadd.f32 %v3260_v15, %v3121_v52  ;;  %v3384_v34 = vadd.f32 %v3260_v15, %v3125_v4  ;;  %v3388_v36 = vadd.f32 %v3260_v15, %v3129_v10  ;;  %v3392_v48 = vadd.f32 %v3260_v15, %v3133_v8 }
 0x1d4   : > { %v3396_v54 = vadd.f32 %v3260_v15, %v3137_v30  ;;  %v3400_v46 = vadd.f32 %v3260_v15, %v3141_v22  ;;  %v3404_v52 = vadd.f32 %v3260_v15, %v3145_v28  ;;  %v3408_v4 = vadd.f32 %v3260_v15, %v3149_v50 }
 0x1d5   : > { %v3412_v10 = vadd.f32 %v3260_v15, %v3153_v44  ;;  %v3416_v8 = vadd.f32 %v3260_v15, %v3157_v33  ;;  %v3420_v30 = vadd.f32 %v3260_v15, %v3161_v38  ;;  %v3424_v22 = vadd.f32 %v3260_v15, %v3165_v0 }
 0x1d6   : > { %v3428_v28 = vadd.f32 %v3260_v15, %v3169_v3  ;;  %v3432_v50 = vadd.f32 %v3260_v15, %v3173_v19  ;;  %v3436_v44 = vadd.f32 %v3260_v15, %v3177_v13  ;;  %v3440_v33 = vadd.f32 %v3260_v15, %v3181_v43 }
 0x1d7   : > { %v3444_v38 = vadd.f32 %v3260_v15, %v3185_v42  ;;  %v3448_v0 = vadd.f32 %v3260_v15, %v3189_v60  ;;  %v3452_v3 = vadd.f32 %v3260_v15, %v3193_v45  ;;  %v3457_v19 = vadd.f32 %v3260_v15, %v3197_v51  ;;  %v4049_v45 = vld [vmem:[#allocation22_spill] sm:$0xff] }
 0x1d8   : > { %v3461_v13 = vadd.f32 %v3260_v15, %v3201_v12  ;;  %v3465_v43 = vadd.f32 %v3260_v15, %v3205_v7  ;;  %v3469_v42 = vadd.f32 %v3260_v15, %v3209_v25  ;;  %v3473_v60 = vadd.f32 %v3260_v15, %v3213_v14 }
 0x1d9   : > { %4044 = vst [vmem:[#allocation29_spill] sm:$0xff] %v3457_v19  ;;  %v3477_v51 = vadd.f32 %v3260_v15, %v4049_v45  ;;  %v4051_v19 = vld [vmem:[#allocation3_spill] sm:$0xff] }
 0x1da   : > { %4045 = vst [vmem:[#allocation14_spill] sm:$0xff] %v3461_v13  ;;  %4046 = vst [vmem:[#allocation17_spill] sm:$0xff] %v3465_v43  ;;  %v3481_v12 = vadd.f32 %v3260_v15, %v4051_v19  ;;  %v4052_v13 = vld [vmem:[#allocation4_spill] sm:$0xff]  ;;  %v4053_v43 = vld [vmem:[#allocation27_spill] sm:$0xff] }
 0x1db   : > { %4047 = vst [vmem:[#allocation12_spill] sm:$0xff] %v3469_v42  ;;  %4048 = vst [vmem:[#allocation9_spill] sm:$0xff] %v3473_v60  ;;  %v3485_v7 = vadd.f32 %v3260_v15, %v4052_v13  ;;  %v3489_v25 = vadd.f32 %v3260_v15, %v4053_v43  ;;  %v4054_v42 = vld [vmem:[#allocation23_spill] sm:$0xff]  ;;  %v4055_v60 = vld [vmem:[#allocation26_spill] sm:$0xff]  ;;  %v3505_v13 = vadd.f32 %v3260_v15, %v3245_v31 }
 0x1dc   : > { %4050 = vst [vmem:[#allocation11_spill] sm:$0xff] %v3477_v51  ;;  %v3493_v14 = vadd.f32 %v3260_v15, %v4054_v42  ;;  %v3497_v45 = vadd.f32 %v3260_v15, %v4055_v60  ;;  %v4056_v51 = vld [vmem:[#allocation28_spill] sm:$0xff]  ;;  %v3509_v43 = vadd.f32 %v3260_v15, %v3249_v40  ;;  %v3513_v42 = vadd.f32 %v3260_v15, %v3253_v2 }
 0x1dd   : > { %v3501_v19 = vadd.f32 %v3260_v15, %v4056_v51  ;;  %v3517_v60 = vadd.f32 %v3260_v15, %v3257_v24  ;;  %v3521_v51 = vadd.f32 %v3260_v15, %v3264_v20  ;;  %v3525_v31 = vadd.f32 %v3260_v15, %v3268_v53 }
 0x1de   : > { %v3529_v40 = vadd.f32 %v3260_v15, %v3272_v59  ;;  %v3533_v2 = vadd.f32 %v3260_v15, %v3276_v11  ;;  %v3537_v24 = vadd.f32 %v3260_v15, %v3280_v9  ;;  %v3541_v20 = vadd.f32 %v3260_v15, %v3284_v18 }
 0x1df   : > { %v3545_v53 = vadd.f32 %v3260_v15, %v3288_v39  ;;  %v3549_v59 = vadd.f32 %v3260_v15, %v3292_v63  ;;  %v3553_v11 = vadd.f32 %v3260_v15, %v3296_v6  ;;  %v3557_v9 = vadd.f32 %v3260_v15, %v3300_v61 }
 0x1e0   : > { %v3561_v18 = vadd.f32 %v3260_v15, %v3304_v5  ;;  %v3565_v39 = vadd.f32 %v3260_v15, %v3308_v41  ;;  %v1271_v63 = vmax.f32 %v3316_v1, 0.0  ;;  %v1273_v6 = vmax.f32 %v3324_v26, 0.0 }
 0x1e1   : > { %4057 = vst [vmem:[#allocation18_spill] sm:$0xff] %v3545_v53  ;;  %4058 = vst [vmem:[#allocation19_spill] sm:$0xff] %v3549_v59  ;;  %v1270_v53 = vmax.f32 %v3312_v62, 0.0  ;;  %v1272_v59 = vmax.f32 %v3320_v55, 0.0  ;;  %v1275_v61 = vmax.f32 %v3332_v56, 0.0  ;;  %v1277_v5 = vmax.f32 %v3340_v57, 0.0 }
 0x1e2   : > { %4059 = vst [vmem:[#allocation16_spill] sm:$0xff] %v3553_v11  ;;  %4060 = vst [vmem:[#allocation25_spill] sm:$0xff] %v3557_v9  ;;  %v1274_v11 = vmax.f32 %v3328_v16, 0.0  ;;  %v1276_v9 = vmax.f32 %v3336_v29, 0.0  ;;  %v1279_v15 = vmax.f32 %v3348_v47, 0.0  ;;  %v1280_v41 = vmax.f32 %v3352_v49, 0.0 }
 0x1e3   : > { %4061 = vst [vmem:[#allocation5_spill] sm:$0xff] %v3561_v18  ;;  %v1278_v18 = vmax.f32 %v3344_v32, 0.0  ;;  %v1281_v62 = vmax.f32 %v3356_v27, 0.0  ;;  %1334 = vst [vmem:[%s3579_s24] sm:$0xff] %v1270_v53  ;;  %v1282_v1 = vmax.f32 %v3360_v21, 0.0  ;;  %v1283_v55 = vmax.f32 %v3364_v17, 0.0 }
 0x1e4   : > { %1335 = vst [vmem:[%s3579_s24 + $0x8] sm:$0xff] %v1271_v63  ;;  %1336 = vst [vmem:[%s3579_s24 + $0x10] sm:$0xff] %v1272_v59  ;;  %v1284_v26 = vmax.f32 %v3368_v23, 0.0  ;;  %v1285_v16 = vmax.f32 %v3372_v58, 0.0  ;;  %v1286_v56 = vmax.f32 %v3376_v35, 0.0  ;;  %v1287_v29 = vmax.f32 %v3380_v37, 0.0 }
 0x1e5   : > { %1337 = vst [vmem:[%s3579_s24 + $0x18] sm:$0xff] %v1273_v6  ;;  %1338 = vst [vmem:[%s3579_s24 + $0x20] sm:$0xff] %v1274_v11  ;;  %v1288_v57 = vmax.f32 %v3384_v34, 0.0  ;;  %v1289_v32 = vmax.f32 %v3388_v36, 0.0  ;;  %v1290_v47 = vmax.f32 %v3392_v48, 0.0  ;;  %v1291_v49 = vmax.f32 %v3396_v54, 0.0 }
 0x1e6   : > { %1339 = vst [vmem:[%s3579_s24 + $0x28] sm:$0xff] %v1275_v61  ;;  %1340 = vst [vmem:[%s3579_s24 + $0x30] sm:$0xff] %v1276_v9  ;;  %v1292_v27 = vmax.f32 %v3400_v46, 0.0  ;;  %v1293_v21 = vmax.f32 %v3404_v52, 0.0  ;;  %v1294_v17 = vmax.f32 %v3408_v4, 0.0  ;;  %v1295_v23 = vmax.f32 %v3412_v10, 0.0 }
 0x1e7   : > { %1341 = vst [vmem:[%s3579_s24 + $0x38] sm:$0xff] %v1277_v5  ;;  %1342 = vst [vmem:[%s3579_s24 + $0x40] sm:$0xff] %v1278_v18  ;;  %v1296_v58 = vmax.f32 %v3416_v8, 0.0  ;;  %v1297_v35 = vmax.f32 %v3420_v30, 0.0  ;;  %v1298_v37 = vmax.f32 %v3424_v22, 0.0  ;;  %v1299_v34 = vmax.f32 %v3428_v28, 0.0 }
 0x1e8   : > { %1343 = vst [vmem:[%s3579_s24 + $0x48] sm:$0xff] %v1279_v15  ;;  %1344 = vst [vmem:[%s3579_s24 + $0x50] sm:$0xff] %v1280_v41  ;;  %v1300_v36 = vmax.f32 %v3432_v50, 0.0  ;;  %v1301_v48 = vmax.f32 %v3436_v44, 0.0  ;;  %v1302_v54 = vmax.f32 %v3440_v33, 0.0  ;;  %v1303_v46 = vmax.f32 %v3444_v38, 0.0 }
 0x1e9   : > { %1345 = vst [vmem:[%s3579_s24 + $0x58] sm:$0xff] %v1281_v62  ;;  %1346 = vst [vmem:[%s3579_s24 + $0x60] sm:$0xff] %v1282_v1  ;;  %v1304_v52 = vmax.f32 %v3448_v0, 0.0  ;;  %v1305_v4 = vmax.f32 %v3452_v3, 0.0  ;;  %v4062_v10 = vld [vmem:[#allocation29_spill] sm:$0xff]  ;;  %v4063_v30 = vld [vmem:[#allocation14_spill] sm:$0xff] }
 0x1ea   : > { %1347 = vst [vmem:[%s3579_s24 + $0x68] sm:$0xff] %v1283_v55  ;;  %1348 = vst [vmem:[%s3579_s24 + $0x70] sm:$0xff] %v1284_v26  ;;  %v1306_v8 = vmax.f32 %v4062_v10, 0.0  ;;  %v1307_v22 = vmax.f32 %v4063_v30, 0.0  ;;  %v4064_v28 = vld [vmem:[#allocation17_spill] sm:$0xff]  ;;  %v4065_v44 = vld [vmem:[#allocation12_spill] sm:$0xff] }
 0x1eb   : > { %1349 = vst [vmem:[%s3579_s24 + $0x78] sm:$0xff] %v1285_v16  ;;  %1350 = vst [vmem:[%s3579_s24 + $0x80] sm:$0xff] %v1286_v56  ;;  %v1308_v50 = vmax.f32 %v4064_v28, 0.0  ;;  %v1309_v33 = vmax.f32 %v4065_v44, 0.0  ;;  %v4066_v38 = vld [vmem:[#allocation9_spill] sm:$0xff]  ;;  %v4067_v3 = vld [vmem:[#allocation11_spill] sm:$0xff] }
 0x1ec   : > { %1351 = vst [vmem:[%s3579_s24 + $0x88] sm:$0xff] %v1287_v29  ;;  %1352 = vst [vmem:[%s3579_s24 + $0x90] sm:$0xff] %v1288_v57  ;;  %v1310_v0 = vmax.f32 %v4066_v38, 0.0  ;;  %v1311_v53 = vmax.f32 %v4067_v3, 0.0  ;;  %v1312_v59 = vmax.f32 %v3481_v12, 0.0  ;;  %v1313_v11 = vmax.f32 %v3485_v7, 0.0 }
 0x1ed   : > { %1353 = vst [vmem:[%s3579_s24 + $0x98] sm:$0xff] %v1289_v32  ;;  %1354 = vst [vmem:[%s3579_s24 + $0xa0] sm:$0xff] %v1290_v47  ;;  %v1314_v9 = vmax.f32 %v3489_v25, 0.0  ;;  %v1315_v18 = vmax.f32 %v3493_v14, 0.0  ;;  %v1316_v63 = vmax.f32 %v3497_v45, 0.0  ;;  %v1317_v6 = vmax.f32 %v3501_v19, 0.0 }
 0x1ee   : > { %1355 = vst [vmem:[%s3579_s24 + $0xa8] sm:$0xff] %v1291_v49  ;;  %1356 = vst [vmem:[%s3579_s24 + $0xb0] sm:$0xff] %v1292_v27  ;;  %v1318_v12 = vmax.f32 %v3505_v13, 0.0  ;;  %v1319_v7 = vmax.f32 %v3509_v43, 0.0  ;;  %v1320_v25 = vmax.f32 %v3513_v42, 0.0  ;;  %v1321_v14 = vmax.f32 %v3517_v60, 0.0 }
 0x1ef   : > { %1357 = vst [vmem:[%s3579_s24 + $0xb8] sm:$0xff] %v1293_v21  ;;  %1358 = vst [vmem:[%s3579_s24 + $0xc0] sm:$0xff] %v1294_v17  ;;  %v1322_v45 = vmax.f32 %v3521_v51, 0.0  ;;  %v1323_v19 = vmax.f32 %v3525_v31, 0.0  ;;  %v1324_v13 = vmax.f32 %v3529_v40, 0.0  ;;  %v1325_v43 = vmax.f32 %v3533_v2, 0.0 }
 0x1f0   : > { %1359 = vst [vmem:[%s3579_s24 + $0xc8] sm:$0xff] %v1295_v23  ;;  %1360 = vst [vmem:[%s3579_s24 + $0xd0] sm:$0xff] %v1296_v58  ;;  %v1326_v42 = vmax.f32 %v3537_v24, 0.0  ;;  %v1327_v60 = vmax.f32 %v3541_v20, 0.0  ;;  %v4068_v51 = vld [vmem:[#allocation18_spill] sm:$0xff]  ;;  %v4069_v61 = vld [vmem:[#allocation19_spill] sm:$0xff] }
 0x1f1   : > { %1361 = vst [vmem:[%s3579_s24 + $0xd8] sm:$0xff] %v1297_v35  ;;  %1362 = vst [vmem:[%s3579_s24 + $0xe0] sm:$0xff] %v1298_v37  ;;  %v1328_v31 = vmax.f32 %v4068_v51, 0.0  ;;  %v1329_v40 = vmax.f32 %v4069_v61, 0.0  ;;  %v4070_v2 = vld [vmem:[#allocation16_spill] sm:$0xff]  ;;  %v4071_v5 = vld [vmem:[#allocation25_spill] sm:$0xff] }
 0x1f2   : > { %1363 = vst [vmem:[%s3579_s24 + $0xe8] sm:$0xff] %v1299_v34  ;;  %1364 = vst [vmem:[%s3579_s24 + $0xf0] sm:$0xff] %v1300_v36  ;;  %v1330_v24 = vmax.f32 %v4070_v2, 0.0  ;;  %v1331_v15 = vmax.f32 %v4071_v5, 0.0  ;;  %v4072_v20 = vld [vmem:[#allocation5_spill] sm:$0xff]  ;;  %v1333_v62 = vmax.f32 %v3565_v39, 0.0 }
 0x1f3   : > { %1365 = vst [vmem:[%s3579_s24 + $0xf8] sm:$0xff] %v1301_v48  ;;  %1366 = vst [vmem:[%s3579_s24 + $0x100] sm:$0xff] %v1302_v54  ;;  %v1332_v41 = vmax.f32 %v4072_v20, 0.0  ;;  %v1560_v39 = vld [vmem:[%s3579_s24] sm:$0xff] (%p2061_p4)  ;;  %v1562_v1 = vld [vmem:[%s3579_s24 + $0x8] sm:$0xff] (%p2061_p4) }
 0x1f4   : > { %1367 = vst [vmem:[%s3579_s24 + $0x108] sm:$0xff] %v1303_v46  ;;  %1368 = vst [vmem:[%s3579_s24 + $0x110] sm:$0xff] %v1304_v52  ;;  %v1564_v55 = vld [vmem:[%s3579_s24 + $0x10] sm:$0xff] (%p2061_p4)  ;;  %v1566_v26 = vld [vmem:[%s3579_s24 + $0x18] sm:$0xff] (%p2061_p4) }
 0x1f5   : > { %1369 = vst [vmem:[%s3579_s24 + $0x118] sm:$0xff] %v1305_v4  ;;  %1370 = vst [vmem:[%s3579_s24 + $0x120] sm:$0xff] %v1306_v8  ;;  %v1568_v16 = vld [vmem:[%s3579_s24 + $0x20] sm:$0xff] (%p2061_p4)  ;;  %v1570_v56 = vld [vmem:[%s3579_s24 + $0x28] sm:$0xff] (%p2061_p4) }
 0x1f6   : > { %1371 = vst [vmem:[%s3579_s24 + $0x128] sm:$0xff] %v1307_v22  ;;  %1372 = vst [vmem:[%s3579_s24 + $0x130] sm:$0xff] %v1308_v50  ;;  %v1572_v29 = vld [vmem:[%s3579_s24 + $0x30] sm:$0xff] (%p2061_p4)  ;;  %v1574_v57 = vld [vmem:[%s3579_s24 + $0x38] sm:$0xff] (%p2061_p4) }
 0x1f7   : > { %1373 = vst [vmem:[%s3579_s24 + $0x138] sm:$0xff] %v1309_v33  ;;  %1374 = vst [vmem:[%s3579_s24 + $0x140] sm:$0xff] %v1310_v0  ;;  %v1576_v32 = vld [vmem:[%s3579_s24 + $0x40] sm:$0xff] (%p2061_p4)  ;;  %v1578_v47 = vld [vmem:[%s3579_s24 + $0x48] sm:$0xff] (%p2061_p4) }
 0x1f8   : > { %1375 = vst [vmem:[%s3579_s24 + $0x148] sm:$0xff] %v1311_v53  ;;  %1376 = vst [vmem:[%s3579_s24 + $0x150] sm:$0xff] %v1312_v59  ;;  %v1580_v49 = vld [vmem:[%s3579_s24 + $0x50] sm:$0xff] (%p2061_p4)  ;;  %v1582_v27 = vld [vmem:[%s3579_s24 + $0x58] sm:$0xff] (%p2061_p4) }
 0x1f9   : > { %1377 = vst [vmem:[%s3579_s24 + $0x158] sm:$0xff] %v1313_v11  ;;  %1378 = vst [vmem:[%s3579_s24 + $0x160] sm:$0xff] %v1314_v9  ;;  %v1584_v21 = vld [vmem:[%s3579_s24 + $0x60] sm:$0xff] (%p2061_p4)  ;;  %v1586_v17 = vld [vmem:[%s3579_s24 + $0x68] sm:$0xff] (%p2061_p4) }
 0x1fa   : > { %1379 = vst [vmem:[%s3579_s24 + $0x168] sm:$0xff] %v1315_v18  ;;  %1380 = vst [vmem:[%s3579_s24 + $0x170] sm:$0xff] %v1316_v63  ;;  %v1588_v23 = vld [vmem:[%s3579_s24 + $0x70] sm:$0xff] (%p2061_p4)  ;;  %v1590_v58 = vld [vmem:[%s3579_s24 + $0x78] sm:$0xff] (%p2061_p4) }
 0x1fb   : > { %1381 = vst [vmem:[%s3579_s24 + $0x178] sm:$0xff] %v1317_v6  ;;  %1382 = vst [vmem:[%s3579_s24 + $0x180] sm:$0xff] %v1318_v12  ;;  %v1592_v35 = vld [vmem:[%s3579_s24 + $0x80] sm:$0xff] (%p2061_p4)  ;;  %v1594_v37 = vld [vmem:[%s3579_s24 + $0x88] sm:$0xff] (%p2061_p4) }
 0x1fc   : > { %1383 = vst [vmem:[%s3579_s24 + $0x188] sm:$0xff] %v1319_v7  ;;  %1384 = vst [vmem:[%s3579_s24 + $0x190] sm:$0xff] %v1320_v25  ;;  %v1596_v34 = vld [vmem:[%s3579_s24 + $0x90] sm:$0xff] (%p2061_p4)  ;;  %v1598_v36 = vld [vmem:[%s3579_s24 + $0x98] sm:$0xff] (%p2061_p4) }
 0x1fd   : > { %1385 = vst [vmem:[%s3579_s24 + $0x198] sm:$0xff] %v1321_v14  ;;  %1386 = vst [vmem:[%s3579_s24 + $0x1a0] sm:$0xff] %v1322_v45  ;;  %1404 = sbr.rel (!%p2061_p4) target bundleno = 548 (0x224), region = 36  ;;  %v1600_v48 = vld [vmem:[%s3579_s24 + $0xa0] sm:$0xff] (%p2061_p4)  ;;  %v1602_v54 = vld [vmem:[%s3579_s24 + $0xa8] sm:$0xff] (%p2061_p4) }
 0x1fe   : > { %1387 = vst [vmem:[%s3579_s24 + $0x1a8] sm:$0xff] %v1323_v19  ;;  %1388 = vst [vmem:[%s3579_s24 + $0x1b0] sm:$0xff] %v1324_v13  ;;  %v1604_v46 = vld [vmem:[%s3579_s24 + $0xb0] sm:$0xff] (%p2061_p4)  ;;  %v1606_v52 = vld [vmem:[%s3579_s24 + $0xb8] sm:$0xff] (%p2061_p4) }
 0x1ff   : > { %1389 = vst [vmem:[%s3579_s24 + $0x1b8] sm:$0xff] %v1325_v43  ;;  %1390 = vst [vmem:[%s3579_s24 + $0x1c0] sm:$0xff] %v1326_v42  ;;  %v1608_v4 = vld [vmem:[%s3579_s24 + $0xc0] sm:$0xff] (%p2061_p4)  ;;  %v1610_v10 = vld [vmem:[%s3579_s24 + $0xc8] sm:$0xff] (%p2061_p4) }
 0x200   : > { %1391 = vst [vmem:[%s3579_s24 + $0x1c8] sm:$0xff] %v1327_v60  ;;  %1392 = vst [vmem:[%s3579_s24 + $0x1d0] sm:$0xff] %v1328_v31  ;;  %v1612_v8 = vld [vmem:[%s3579_s24 + $0xd0] sm:$0xff] (%p2061_p4)  ;;  %v1614_v30 = vld [vmem:[%s3579_s24 + $0xd8] sm:$0xff] (%p2061_p4) }
 0x201   : > { %1393 = vst [vmem:[%s3579_s24 + $0x1d8] sm:$0xff] %v1329_v40  ;;  %1394 = vst [vmem:[%s3579_s24 + $0x1e0] sm:$0xff] %v1330_v24  ;;  %v1616_v22 = vld [vmem:[%s3579_s24 + $0xe0] sm:$0xff] (%p2061_p4)  ;;  %v1618_v28 = vld [vmem:[%s3579_s24 + $0xe8] sm:$0xff] (%p2061_p4) }
 0x202   : > { %1395 = vst [vmem:[%s3579_s24 + $0x1e8] sm:$0xff] %v1331_v15  ;;  %1396 = vst [vmem:[%s3579_s24 + $0x1f0] sm:$0xff] %v1332_v41  ;;  %v1620_v50 = vld [vmem:[%s3579_s24 + $0xf0] sm:$0xff] (%p2061_p4)  ;;  %v1622_v44 = vld [vmem:[%s3579_s24 + $0xf8] sm:$0xff] (%p2061_p4) }
 0x203   : > { %1397 = vst [vmem:[%s3579_s24 + $0x1f8] sm:$0xff] %v1333_v62  ;;  %1561 = vst [vmem:[%s3706_s14] sm:$0xff] (%p2061_p4), %v1560_v39  ;;  %v1624_v33 = vld [vmem:[%s3579_s24 + $0x100] sm:$0xff] (%p2061_p4)  ;;  %v1626_v38 = vld [vmem:[%s3579_s24 + $0x108] sm:$0xff] (%p2061_p4) }
 0x204   : > { %1563 = vst [vmem:[%s3706_s14 + $0x10] sm:$0xff] %v1562_v1  ;;  %1565 = vst [vmem:[%s3706_s14 + $0x20] sm:$0xff] %v1564_v55  ;;  %v1628_v0 = vld [vmem:[%s3579_s24 + $0x110] sm:$0xff]  ;;  %v1630_v3 = vld [vmem:[%s3579_s24 + $0x118] sm:$0xff] }
 0x205   : > { %1567 = vst [vmem:[%s3706_s14 + $0x30] sm:$0xff] %v1566_v26  ;;  %1569 = vst [vmem:[%s3706_s14 + $0x40] sm:$0xff] %v1568_v16  ;;  %v1632_v53 = vld [vmem:[%s3579_s24 + $0x120] sm:$0xff]  ;;  %v1634_v59 = vld [vmem:[%s3579_s24 + $0x128] sm:$0xff] }
 0x206   : > { %1571 = vst [vmem:[%s3706_s14 + $0x50] sm:$0xff] %v1570_v56  ;;  %1573 = vst [vmem:[%s3706_s14 + $0x60] sm:$0xff] %v1572_v29  ;;  %v1636_v11 = vld [vmem:[%s3579_s24 + $0x130] sm:$0xff]  ;;  %v1638_v9 = vld [vmem:[%s3579_s24 + $0x138] sm:$0xff] }
 0x207   : > { %1575 = vst [vmem:[%s3706_s14 + $0x70] sm:$0xff] %v1574_v57  ;;  %1577 = vst [vmem:[%s3706_s14 + $0x80] sm:$0xff] %v1576_v32  ;;  %v1640_v18 = vld [vmem:[%s3579_s24 + $0x140] sm:$0xff]  ;;  %v1642_v63 = vld [vmem:[%s3579_s24 + $0x148] sm:$0xff] }
 0x208   : > { %1579 = vst [vmem:[%s3706_s14 + $0x90] sm:$0xff] %v1578_v47  ;;  %1581 = vst [vmem:[%s3706_s14 + $0xa0] sm:$0xff] %v1580_v49  ;;  %v1644_v6 = vld [vmem:[%s3579_s24 + $0x150] sm:$0xff]  ;;  %v1646_v12 = vld [vmem:[%s3579_s24 + $0x158] sm:$0xff] }
 0x209   : > { %1583 = vst [vmem:[%s3706_s14 + $0xb0] sm:$0xff] %v1582_v27  ;;  %1585 = vst [vmem:[%s3706_s14 + $0xc0] sm:$0xff] %v1584_v21  ;;  %v1648_v7 = vld [vmem:[%s3579_s24 + $0x160] sm:$0xff]  ;;  %v1650_v25 = vld [vmem:[%s3579_s24 + $0x168] sm:$0xff] }
 0x20a   : > { %1587 = vst [vmem:[%s3706_s14 + $0xd0] sm:$0xff] %v1586_v17  ;;  %1589 = vst [vmem:[%s3706_s14 + $0xe0] sm:$0xff] %v1588_v23  ;;  %v1652_v14 = vld [vmem:[%s3579_s24 + $0x170] sm:$0xff]  ;;  %v1654_v45 = vld [vmem:[%s3579_s24 + $0x178] sm:$0xff] }
 0x20b   : > { %1591 = vst [vmem:[%s3706_s14 + $0xf0] sm:$0xff] %v1590_v58  ;;  %1593 = vst [vmem:[%s3706_s14 + $0x100] sm:$0xff] %v1592_v35  ;;  %v1656_v19 = vld [vmem:[%s3579_s24 + $0x180] sm:$0xff]  ;;  %v1658_v13 = vld [vmem:[%s3579_s24 + $0x188] sm:$0xff] }
 0x20c   : > { %1595 = vst [vmem:[%s3706_s14 + $0x110] sm:$0xff] %v1594_v37  ;;  %1597 = vst [vmem:[%s3706_s14 + $0x120] sm:$0xff] %v1596_v34  ;;  %v1660_v43 = vld [vmem:[%s3579_s24 + $0x190] sm:$0xff]  ;;  %v1662_v42 = vld [vmem:[%s3579_s24 + $0x198] sm:$0xff] }
 0x20d   : > { %1599 = vst [vmem:[%s3706_s14 + $0x130] sm:$0xff] %v1598_v36  ;;  %1601 = vst [vmem:[%s3706_s14 + $0x140] sm:$0xff] %v1600_v48  ;;  %v1664_v60 = vld [vmem:[%s3579_s24 + $0x1a0] sm:$0xff]  ;;  %v1666_v51 = vld [vmem:[%s3579_s24 + $0x1a8] sm:$0xff] }
 0x20e   : > { %1603 = vst [vmem:[%s3706_s14 + $0x150] sm:$0xff] %v1602_v54  ;;  %1605 = vst [vmem:[%s3706_s14 + $0x160] sm:$0xff] %v1604_v46  ;;  %v1668_v31 = vld [vmem:[%s3579_s24 + $0x1b0] sm:$0xff]  ;;  %v1670_v61 = vld [vmem:[%s3579_s24 + $0x1b8] sm:$0xff] }
 0x20f   : > { %1607 = vst [vmem:[%s3706_s14 + $0x170] sm:$0xff] %v1606_v52  ;;  %1609 = vst [vmem:[%s3706_s14 + $0x180] sm:$0xff] %v1608_v4  ;;  %v1672_v40 = vld [vmem:[%s3579_s24 + $0x1c0] sm:$0xff]  ;;  %v1674_v2 = vld [vmem:[%s3579_s24 + $0x1c8] sm:$0xff] }
 0x210   : > { %1611 = vst [vmem:[%s3706_s14 + $0x190] sm:$0xff] %v1610_v10  ;;  %1613 = vst [vmem:[%s3706_s14 + $0x1a0] sm:$0xff] %v1612_v8  ;;  %v1676_v24 = vld [vmem:[%s3579_s24 + $0x1d0] sm:$0xff]  ;;  %v1678_v5 = vld [vmem:[%s3579_s24 + $0x1d8] sm:$0xff] }
 0x211   : > { %1615 = vst [vmem:[%s3706_s14 + $0x1b0] sm:$0xff] %v1614_v30  ;;  %1617 = vst [vmem:[%s3706_s14 + $0x1c0] sm:$0xff] %v1616_v22  ;;  %v1680_v15 = vld [vmem:[%s3579_s24 + $0x1e0] sm:$0xff]  ;;  %v1682_v20 = vld [vmem:[%s3579_s24 + $0x1e8] sm:$0xff] }
 0x212   : > { %1619 = vst [vmem:[%s3706_s14 + $0x1d0] sm:$0xff] %v1618_v28  ;;  %1621 = vst [vmem:[%s3706_s14 + $0x1e0] sm:$0xff] %v1620_v50  ;;  %v1684_v41 = vld [vmem:[%s3579_s24 + $0x1f0] sm:$0xff]  ;;  %v1686_v62 = vld [vmem:[%s3579_s24 + $0x1f8] sm:$0xff] }
 0x213   : > { %1623 = vst [vmem:[%s3706_s14 + $0x1f0] sm:$0xff] %v1622_v44  ;;  %1625 = vst [vmem:[%s3706_s14 + $0x200] sm:$0xff] %v1624_v33 }
 0x214   : > { %1627 = vst [vmem:[%s3706_s14 + $0x210] sm:$0xff] %v1626_v38  ;;  %1629 = vst [vmem:[%s3706_s14 + $0x220] sm:$0xff] %v1628_v0 }
 0x215   : > { %1631 = vst [vmem:[%s3706_s14 + $0x230] sm:$0xff] %v1630_v3  ;;  %1633 = vst [vmem:[%s3706_s14 + $0x240] sm:$0xff] %v1632_v53 }
 0x216   : > { %1635 = vst [vmem:[%s3706_s14 + $0x250] sm:$0xff] %v1634_v59  ;;  %1637 = vst [vmem:[%s3706_s14 + $0x260] sm:$0xff] %v1636_v11 }
 0x217   : > { %1639 = vst [vmem:[%s3706_s14 + $0x270] sm:$0xff] %v1638_v9  ;;  %1641 = vst [vmem:[%s3706_s14 + $0x280] sm:$0xff] %v1640_v18 }
 0x218   : > { %1643 = vst [vmem:[%s3706_s14 + $0x290] sm:$0xff] %v1642_v63  ;;  %1645 = vst [vmem:[%s3706_s14 + $0x2a0] sm:$0xff] %v1644_v6 }
 0x219   : > { %1647 = vst [vmem:[%s3706_s14 + $0x2b0] sm:$0xff] %v1646_v12  ;;  %1649 = vst [vmem:[%s3706_s14 + $0x2c0] sm:$0xff] %v1648_v7 }
 0x21a   : > { %1651 = vst [vmem:[%s3706_s14 + $0x2d0] sm:$0xff] %v1650_v25  ;;  %1653 = vst [vmem:[%s3706_s14 + $0x2e0] sm:$0xff] %v1652_v14 }
 0x21b   : > { %1655 = vst [vmem:[%s3706_s14 + $0x2f0] sm:$0xff] %v1654_v45  ;;  %1657 = vst [vmem:[%s3706_s14 + $0x300] sm:$0xff] %v1656_v19 }
 0x21c   : > { %1659 = vst [vmem:[%s3706_s14 + $0x310] sm:$0xff] %v1658_v13  ;;  %1661 = vst [vmem:[%s3706_s14 + $0x320] sm:$0xff] %v1660_v43 }
 0x21d   : > { %1663 = vst [vmem:[%s3706_s14 + $0x330] sm:$0xff] %v1662_v42  ;;  %1665 = vst [vmem:[%s3706_s14 + $0x340] sm:$0xff] %v1664_v60 }
 0x21e   : > { %1667 = vst [vmem:[%s3706_s14 + $0x350] sm:$0xff] %v1666_v51  ;;  %1669 = vst [vmem:[%s3706_s14 + $0x360] sm:$0xff] %v1668_v31 }
 0x21f   : > { %1671 = vst [vmem:[%s3706_s14 + $0x370] sm:$0xff] %v1670_v61  ;;  %1673 = vst [vmem:[%s3706_s14 + $0x380] sm:$0xff] %v1672_v40 }
 0x220   : > { %1675 = vst [vmem:[%s3706_s14 + $0x390] sm:$0xff] %v1674_v2  ;;  %1677 = vst [vmem:[%s3706_s14 + $0x3a0] sm:$0xff] %v1676_v24 }
 0x221   : > { %1679 = vst [vmem:[%s3706_s14 + $0x3b0] sm:$0xff] %v1678_v5  ;;  %1681 = vst [vmem:[%s3706_s14 + $0x3c0] sm:$0xff] %v1680_v15 }
 0x222   : > { %1683 = vst [vmem:[%s3706_s14 + $0x3d0] sm:$0xff] %v1682_v20  ;;  %1685 = vst [vmem:[%s3706_s14 + $0x3e0] sm:$0xff] %v1684_v41 }
 0x223   : > { %1687 = vst [vmem:[%s3706_s14 + $0x3f0] sm:$0xff] %v1686_v62 }
 0x224 PF: > { %p10_p8 = scmp.ge.s32.totalorder %s2051_s16, 4   ;;  %s4073_s12 = smov %s2010_s13 }
 0x225   : > { %s4074_s13 = smov %s2059_s19  ;;  %s4075_s14 = smov %s2051_s16 }
 0x226   :  { %12 = sbr.rel (!%p10_p8) target bundleno = 2 (0x2), region = 103 }

// kernel: inception3_forward.10
= control target key start
LH: loop header
LB: loop body
LE: loop exit
PB: predicated region body
PF: predicated region fallthrough
CT: control target
= control target key end

     0   :  { %s5732_s12 = smov 0   ;;  %s5734_s13 = smov 0   ;;  %s8850_s0 = inlined_call_operand.vmem [shape: bf16[512,896], index: 0, kind: input, shape index: {}]   ;;  %s8851_s1 = inlined_call_operand.vmem [shape: bf16[896,256], index: 1, kind: input, shape index: {}]   ;;  %s8852_s2 = inlined_call_operand.vmem [shape: f32[2,256], index: 2, kind: input, shape index: {}]   ;;  %s8853_s3 = inlined_call_operand.vmem [shape: f32[512,256], index: 3, kind: output, shape index: {}]  }
   0x1   :  { %s5736_s14 = smov 0  }
   0x2 LB: > { %s5748_s15 = sadd.s32 4294967295, %s5709_s14   ;;  %s5751_s16 = sadd.s32 1, %s5709_s14   ;;  %s5709_s14 = sphi %s5736_s14, %s9096_s14   ;;  %s5705_s13 = sphi %s5734_s13, %s9095_s13   ;;  %s5701_s12 = sphi %s5732_s12, %s9094_s12  }
   0x3   : > { %s38_s17 = ssub.s32 %s5709_s14, %s5751_s16  ;;  %s41_s18 = sadd.s32 1, %s5705_s13 }
   0x4   : > { %p39_p0 = scmp.eq.s32.totalorder %s38_s17, 0  ;;  %p48_p1 = scmp.ne.s32.totalorder %s5705_s13, %s5701_s12 }
   0x5   : > { %p49_p2 = scmp.eq.s32.totalorder %s5709_s14, 0  ;;  %p104_p3 = scmp.eq.s32.totalorder %s5748_s15, 1 }
   0x6   : > { %s5761_s19 = scalar_select %p39_p0, %s5705_s13, %s41_s18  }
   0x7   : > { %p50_p4 = por %p49_p2, %p48_p1  ;;  %p5763_p5 = por %p104_p3, %p48_p1 }
   0x8   : > { %p4647_p6 = scmp.ge.s32.totalorder %s5709_s14, 2 }
   0xa   : > { %129 = sbr.rel (%p4647_p6) target bundleno = 96 (0x60), region = 20 }
  0x11   : > { %132 = sbr.rel (!%p50_p4) target bundleno = 96 (0x60), region = 24  ;;  %s134_s21 = sand.u32 (%p50_p4), 1, %s5705_s13  }
  0x12   : > { %s4648_s22 = sshll.u32 (%p50_p4), %s5709_s14, 2  ;;  %s5282_s23 = smul.u32 (%p50_p4), 448, %s134_s21 }
  0x13   : > { %s5773_s26 = scalar_lea.vmem (%p50_p4), %s8851_s1, %s4648_s22 }
  0x14   : > { %v154_v0 = vld [vmem:[%s5773_s26] sm:$0xf] (%p50_p4)  ;;  %v156_v1 = vld [vmem:[%s5773_s26 + $0x8] sm:$0xf] (%p50_p4)  ;;  %v158_v2 = vld [vmem:[%s5773_s26 + $0x10] sm:$0xf] (%p50_p4) }
  0x15   : > { %v160_v3 = vld [vmem:[%s5773_s26 + $0x18] sm:$0xf] (%p50_p4)  ;;  %v162_v4 = vld [vmem:[%s5773_s26 + $0x20] sm:$0xf] (%p50_p4)  ;;  %s5780_s27 = scalar_lea.vmem (%p50_p4), [#allocation2], %s5282_s23 }
  0x16   : > { %155 = vst [vmem:[%s5780_s27] sm:$0xf] (%p50_p4), %v154_v0  ;;  %157 = vst [vmem:[%s5780_s27 + $0x4] sm:$0xf] (%p50_p4), %v156_v1  ;;  %v164_v5 = vld [vmem:[%s5773_s26 + $0x28] sm:$0xf] (%p50_p4) }
  0x17   : > { %159 = vst [vmem:[%s5780_s27 + $0x8] sm:$0xf] (%p50_p4), %v158_v2  ;;  %161 = vst [vmem:[%s5780_s27 + $0xc] sm:$0xf] (%p50_p4), %v160_v3  ;;  %v166_v6 = vld [vmem:[%s5773_s26 + $0x30] sm:$0xf] (%p50_p4) }
  0x18   : > { %163 = vst [vmem:[%s5780_s27 + $0x10] sm:$0xf] %v162_v4  ;;  %v168_v7 = vld [vmem:[%s5773_s26 + $0x38] sm:$0xf]  ;;  %165 = vst [vmem:[%s5780_s27 + $0x14] sm:$0xf] %v164_v5 }
  0x19   : > { %167 = vst [vmem:[%s5780_s27 + $0x18] sm:$0xf] %v166_v6  ;;  %169 = vst [vmem:[%s5780_s27 + $0x1c] sm:$0xf] %v168_v7  ;;  %v170_v8 = vld [vmem:[%s5773_s26 + $0x40] sm:$0xf] }
  0x1a   : > { %v172_v9 = vld [vmem:[%s5773_s26 + $0x48] sm:$0xf]  ;;  %v174_v10 = vld [vmem:[%s5773_s26 + $0x50] sm:$0xf]  ;;  %171 = vst [vmem:[%s5780_s27 + $0x20] sm:$0xf] %v170_v8 }
  0x1b   : > { %173 = vst [vmem:[%s5780_s27 + $0x24] sm:$0xf] %v172_v9  ;;  %175 = vst [vmem:[%s5780_s27 + $0x28] sm:$0xf] %v174_v10  ;;  %v176_v11 = vld [vmem:[%s5773_s26 + $0x58] sm:$0xf] }
  0x1c   : > { %v178_v12 = vld [vmem:[%s5773_s26 + $0x60] sm:$0xf]  ;;  %v180_v13 = vld [vmem:[%s5773_s26 + $0x68] sm:$0xf]  ;;  %177 = vst [vmem:[%s5780_s27 + $0x2c] sm:$0xf] %v176_v11 }
  0x1d   : > { %179 = vst [vmem:[%s5780_s27 + $0x30] sm:$0xf] %v178_v12  ;;  %181 = vst [vmem:[%s5780_s27 + $0x34] sm:$0xf] %v180_v13  ;;  %v182_v14 = vld [vmem:[%s5773_s26 + $0x70] sm:$0xf] }
  0x1e   : > { %v184_v15 = vld [vmem:[%s5773_s26 + $0x78] sm:$0xf]  ;;  %v186_v16 = vld [vmem:[%s5773_s26 + $0x80] sm:$0xf]  ;;  %183 = vst [vmem:[%s5780_s27 + $0x38] sm:$0xf] %v182_v14 }
  0x1f   : > { %185 = vst [vmem:[%s5780_s27 + $0x3c] sm:$0xf] %v184_v15  ;;  %187 = vst [vmem:[%s5780_s27 + $0x40] sm:$0xf] %v186_v16  ;;  %v188_v17 = vld [vmem:[%s5773_s26 + $0x88] sm:$0xf] }
  0x20   : > { %v190_v18 = vld [vmem:[%s5773_s26 + $0x90] sm:$0xf]  ;;  %v192_v19 = vld [vmem:[%s5773_s26 + $0x98] sm:$0xf]  ;;  %189 = vst [vmem:[%s5780_s27 + $0x44] sm:$0xf] %v188_v17 }
  0x21   : > { %191 = vst [vmem:[%s5780_s27 + $0x48] sm:$0xf] %v190_v18  ;;  %193 = vst [vmem:[%s5780_s27 + $0x4c] sm:$0xf] %v192_v19  ;;  %v194_v20 = vld [vmem:[%s5773_s26 + $0xa0] sm:$0xf] }
  0x22   : > { %v196_v21 = vld [vmem:[%s5773_s26 + $0xa8] sm:$0xf]  ;;  %v198_v22 = vld [vmem:[%s5773_s26 + $0xb0] sm:$0xf]  ;;  %195 = vst [vmem:[%s5780_s27 + $0x50] sm:$0xf] %v194_v20 }
  0x23   : > { %197 = vst [vmem:[%s5780_s27 + $0x54] sm:$0xf] %v196_v21  ;;  %199 = vst [vmem:[%s5780_s27 + $0x58] sm:$0xf] %v198_v22  ;;  %v200_v23 = vld [vmem:[%s5773_s26 + $0xb8] sm:$0xf] }
  0x24   : > { %v202_v24 = vld [vmem:[%s5773_s26 + $0xc0] sm:$0xf]  ;;  %v204_v25 = vld [vmem:[%s5773_s26 + $0xc8] sm:$0xf]  ;;  %201 = vst [vmem:[%s5780_s27 + $0x5c] sm:$0xf] %v200_v23 }
  0x25   : > { %203 = vst [vmem:[%s5780_s27 + $0x60] sm:$0xf] %v202_v24  ;;  %205 = vst [vmem:[%s5780_s27 + $0x64] sm:$0xf] %v204_v25  ;;  %v206_v26 = vld [vmem:[%s5773_s26 + $0xd0] sm:$0xf] }
  0x26   : > { %v208_v27 = vld [vmem:[%s5773_s26 + $0xd8] sm:$0xf]  ;;  %v210_v28 = vld [vmem:[%s5773_s26 + $0xe0] sm:$0xf]  ;;  %207 = vst [vmem:[%s5780_s27 + $0x68] sm:$0xf] %v206_v26 }
  0x27   : > { %209 = vst [vmem:[%s5780_s27 + $0x6c] sm:$0xf] %v208_v27  ;;  %211 = vst [vmem:[%s5780_s27 + $0x70] sm:$0xf] %v210_v28  ;;  %v212_v29 = vld [vmem:[%s5773_s26 + $0xe8] sm:$0xf] }
  0x28   : > { %v214_v30 = vld [vmem:[%s5773_s26 + $0xf0] sm:$0xf]  ;;  %v216_v31 = vld [vmem:[%s5773_s26 + $0xf8] sm:$0xf]  ;;  %213 = vst [vmem:[%s5780_s27 + $0x74] sm:$0xf] %v212_v29 }
  0x29   : > { %215 = vst [vmem:[%s5780_s27 + $0x78] sm:$0xf] %v214_v30  ;;  %217 = vst [vmem:[%s5780_s27 + $0x7c] sm:$0xf] %v216_v31  ;;  %v218_v32 = vld [vmem:[%s5773_s26 + $0x100] sm:$0xf] }
  0x2a   : > { %v220_v33 = vld [vmem:[%s5773_s26 + $0x108] sm:$0xf]  ;;  %v222_v34 = vld [vmem:[%s5773_s26 + $0x110] sm:$0xf]  ;;  %219 = vst [vmem:[%s5780_s27 + $0x80] sm:$0xf] %v218_v32 }
  0x2b   : > { %221 = vst [vmem:[%s5780_s27 + $0x84] sm:$0xf] %v220_v33  ;;  %223 = vst [vmem:[%s5780_s27 + $0x88] sm:$0xf] %v222_v34  ;;  %v224_v35 = vld [vmem:[%s5773_s26 + $0x118] sm:$0xf] }
  0x2c   : > { %v226_v36 = vld [vmem:[%s5773_s26 + $0x120] sm:$0xf]  ;;  %v228_v37 = vld [vmem:[%s5773_s26 + $0x128] sm:$0xf]  ;;  %225 = vst [vmem:[%s5780_s27 + $0x8c] sm:$0xf] %v224_v35 }
  0x2d   : > { %227 = vst [vmem:[%s5780_s27 + $0x90] sm:$0xf] %v226_v36  ;;  %229 = vst [vmem:[%s5780_s27 + $0x94] sm:$0xf] %v228_v37  ;;  %v230_v38 = vld [vmem:[%s5773_s26 + $0x130] sm:$0xf] }
  0x2e   : > { %v232_v39 = vld [vmem:[%s5773_s26 + $0x138] sm:$0xf]  ;;  %v234_v40 = vld [vmem:[%s5773_s26 + $0x140] sm:$0xf]  ;;  %231 = vst [vmem:[%s5780_s27 + $0x98] sm:$0xf] %v230_v38 }
  0x2f   : > { %233 = vst [vmem:[%s5780_s27 + $0x9c] sm:$0xf] %v232_v39  ;;  %235 = vst [vmem:[%s5780_s27 + $0xa0] sm:$0xf] %v234_v40  ;;  %v236_v41 = vld [vmem:[%s5773_s26 + $0x148] sm:$0xf] }
  0x30   : > { %v238_v42 = vld [vmem:[%s5773_s26 + $0x150] sm:$0xf]  ;;  %v240_v43 = vld [vmem:[%s5773_s26 + $0x158] sm:$0xf]  ;;  %237 = vst [vmem:[%s5780_s27 + $0xa4] sm:$0xf] %v236_v41 }
  0x31   : > { %239 = vst [vmem:[%s5780_s27 + $0xa8] sm:$0xf] %v238_v42  ;;  %241 = vst [vmem:[%s5780_s27 + $0xac] sm:$0xf] %v240_v43  ;;  %v242_v44 = vld [vmem:[%s5773_s26 + $0x160] sm:$0xf] }
  0x32   : > { %v244_v45 = vld [vmem:[%s5773_s26 + $0x168] sm:$0xf]  ;;  %v246_v46 = vld [vmem:[%s5773_s26 + $0x170] sm:$0xf]  ;;  %243 = vst [vmem:[%s5780_s27 + $0xb0] sm:$0xf] %v242_v44 }
  0x33   : > { %245 = vst [vmem:[%s5780_s27 + $0xb4] sm:$0xf] %v244_v45  ;;  %247 = vst [vmem:[%s5780_s27 + $0xb8] sm:$0xf] %v246_v46  ;;  %v248_v47 = vld [vmem:[%s5773_s26 + $0x178] sm:$0xf] }
  0x34   : > { %v250_v48 = vld [vmem:[%s5773_s26 + $0x180] sm:$0xf]  ;;  %v252_v49 = vld [vmem:[%s5773_s26 + $0x188] sm:$0xf]  ;;  %249 = vst [vmem:[%s5780_s27 + $0xbc] sm:$0xf] %v248_v47 }
  0x35   : > { %251 = vst [vmem:[%s5780_s27 + $0xc0] sm:$0xf] %v250_v48  ;;  %253 = vst [vmem:[%s5780_s27 + $0xc4] sm:$0xf] %v252_v49  ;;  %v254_v50 = vld [vmem:[%s5773_s26 + $0x190] sm:$0xf] }
  0x36   : > { %v256_v51 = vld [vmem:[%s5773_s26 + $0x198] sm:$0xf]  ;;  %v258_v52 = vld [vmem:[%s5773_s26 + $0x1a0] sm:$0xf]  ;;  %255 = vst [vmem:[%s5780_s27 + $0xc8] sm:$0xf] %v254_v50 }
  0x37   : > { %257 = vst [vmem:[%s5780_s27 + $0xcc] sm:$0xf] %v256_v51  ;;  %259 = vst [vmem:[%s5780_s27 + $0xd0] sm:$0xf] %v258_v52  ;;  %v260_v53 = vld [vmem:[%s5773_s26 + $0x1a8] sm:$0xf] }
  0x38   : > { %v262_v54 = vld [vmem:[%s5773_s26 + $0x1b0] sm:$0xf]  ;;  %v264_v55 = vld [vmem:[%s5773_s26 + $0x1b8] sm:$0xf]  ;;  %261 = vst [vmem:[%s5780_s27 + $0xd4] sm:$0xf] %v260_v53 }
  0x39   : > { %263 = vst [vmem:[%s5780_s27 + $0xd8] sm:$0xf] %v262_v54  ;;  %265 = vst [vmem:[%s5780_s27 + $0xdc] sm:$0xf] %v264_v55  ;;  %v266_v56 = vld [vmem:[%s5773_s26 + $0x1c0] sm:$0xf] }
  0x3a   : > { %v268_v57 = vld [vmem:[%s5773_s26 + $0x1c8] sm:$0xf]  ;;  %v270_v58 = vld [vmem:[%s5773_s26 + $0x1d0] sm:$0xf]  ;;  %267 = vst [vmem:[%s5780_s27 + $0xe0] sm:$0xf] %v266_v56 }
  0x3b   : > { %269 = vst [vmem:[%s5780_s27 + $0xe4] sm:$0xf] %v268_v57  ;;  %271 = vst [vmem:[%s5780_s27 + $0xe8] sm:$0xf] %v270_v58  ;;  %v272_v59 = vld [vmem:[%s5773_s26 + $0x1d8] sm:$0xf] }
  0x3c   : > { %v274_v60 = vld [vmem:[%s5773_s26 + $0x1e0] sm:$0xf]  ;;  %v276_v61 = vld [vmem:[%s5773_s26 + $0x1e8] sm:$0xf]  ;;  %273 = vst [vmem:[%s5780_s27 + $0xec] sm:$0xf] %v272_v59 }
  0x3d   : > { %275 = vst [vmem:[%s5780_s27 + $0xf0] sm:$0xf] %v274_v60  ;;  %277 = vst [vmem:[%s5780_s27 + $0xf4] sm:$0xf] %v276_v61  ;;  %v278_v62 = vld [vmem:[%s5773_s26 + $0x1f0] sm:$0xf] }
  0x3e   : > { %v280_v63 = vld [vmem:[%s5773_s26 + $0x1f8] sm:$0xf]  ;;  %v282_v0 = vld [vmem:[%s5773_s26 + $0x200] sm:$0xf]  ;;  %279 = vst [vmem:[%s5780_s27 + $0xf8] sm:$0xf] %v278_v62 }
  0x3f   : > { %281 = vst [vmem:[%s5780_s27 + $0xfc] sm:$0xf] %v280_v63  ;;  %283 = vst [vmem:[%s5780_s27 + $0x100] sm:$0xf] %v282_v0  ;;  %v284_v1 = vld [vmem:[%s5773_s26 + $0x208] sm:$0xf] }
  0x40   : > { %v286_v2 = vld [vmem:[%s5773_s26 + $0x210] sm:$0xf]  ;;  %v288_v3 = vld [vmem:[%s5773_s26 + $0x218] sm:$0xf]  ;;  %285 = vst [vmem:[%s5780_s27 + $0x104] sm:$0xf] %v284_v1 }
  0x41   : > { %287 = vst [vmem:[%s5780_s27 + $0x108] sm:$0xf] %v286_v2  ;;  %289 = vst [vmem:[%s5780_s27 + $0x10c] sm:$0xf] %v288_v3  ;;  %v290_v4 = vld [vmem:[%s5773_s26 + $0x220] sm:$0xf] }
  0x42   : > { %v292_v5 = vld [vmem:[%s5773_s26 + $0x228] sm:$0xf]  ;;  %v294_v6 = vld [vmem:[%s5773_s26 + $0x230] sm:$0xf]  ;;  %291 = vst [vmem:[%s5780_s27 + $0x110] sm:$0xf] %v290_v4 }
  0x43   : > { %293 = vst [vmem:[%s5780_s27 + $0x114] sm:$0xf] %v292_v5  ;;  %295 = vst [vmem:[%s5780_s27 + $0x118] sm:$0xf] %v294_v6  ;;  %v296_v7 = vld [vmem:[%s5773_s26 + $0x238] sm:$0xf] }
  0x44   : > { %v298_v8 = vld [vmem:[%s5773_s26 + $0x240] sm:$0xf]  ;;  %v300_v9 = vld [vmem:[%s5773_s26 + $0x248] sm:$0xf]  ;;  %297 = vst [vmem:[%s5780_s27 + $0x11c] sm:$0xf] %v296_v7 }
  0x45   : > { %299 = vst [vmem:[%s5780_s27 + $0x120] sm:$0xf] %v298_v8  ;;  %301 = vst [vmem:[%s5780_s27 + $0x124] sm:$0xf] %v300_v9  ;;  %v302_v10 = vld [vmem:[%s5773_s26 + $0x250] sm:$0xf] }
  0x46   : > { %v304_v11 = vld [vmem:[%s5773_s26 + $0x258] sm:$0xf]  ;;  %v306_v12 = vld [vmem:[%s5773_s26 + $0x260] sm:$0xf]  ;;  %303 = vst [vmem:[%s5780_s27 + $0x128] sm:$0xf] %v302_v10 }
  0x47   : > { %305 = vst [vmem:[%s5780_s27 + $0x12c] sm:$0xf] %v304_v11  ;;  %307 = vst [vmem:[%s5780_s27 + $0x130] sm:$0xf] %v306_v12  ;;  %v308_v13 = vld [vmem:[%s5773_s26 + $0x268] sm:$0xf] }
  0x48   : > { %v310_v14 = vld [vmem:[%s5773_s26 + $0x270] sm:$0xf]  ;;  %v312_v15 = vld [vmem:[%s5773_s26 + $0x278] sm:$0xf]  ;;  %309 = vst [vmem:[%s5780_s27 + $0x134] sm:$0xf] %v308_v13 }
  0x49   : > { %311 = vst [vmem:[%s5780_s27 + $0x138] sm:$0xf] %v310_v14  ;;  %313 = vst [vmem:[%s5780_s27 + $0x13c] sm:$0xf] %v312_v15  ;;  %v314_v16 = vld [vmem:[%s5773_s26 + $0x280] sm:$0xf] }
  0x4a   : > { %v316_v17 = vld [vmem:[%s5773_s26 + $0x288] sm:$0xf]  ;;  %v318_v18 = vld [vmem:[%s5773_s26 + $0x290] sm:$0xf]  ;;  %315 = vst [vmem:[%s5780_s27 + $0x140] sm:$0xf] %v314_v16 }
  0x4b   : > { %317 = vst [vmem:[%s5780_s27 + $0x144] sm:$0xf] %v316_v17  ;;  %319 = vst [vmem:[%s5780_s27 + $0x148] sm:$0xf] %v318_v18  ;;  %v320_v19 = vld [vmem:[%s5773_s26 + $0x298] sm:$0xf] }
  0x4c   : > { %v322_v20 = vld [vmem:[%s5773_s26 + $0x2a0] sm:$0xf]  ;;  %v324_v21 = vld [vmem:[%s5773_s26 + $0x2a8] sm:$0xf]  ;;  %321 = vst [vmem:[%s5780_s27 + $0x14c] sm:$0xf] %v320_v19 }
  0x4d   : > { %323 = vst [vmem:[%s5780_s27 + $0x150] sm:$0xf] %v322_v20  ;;  %325 = vst [vmem:[%s5780_s27 + $0x154] sm:$0xf] %v324_v21  ;;  %v326_v22 = vld [vmem:[%s5773_s26 + $0x2b0] sm:$0xf] }
  0x4e   : > { %v328_v23 = vld [vmem:[%s5773_s26 + $0x2b8] sm:$0xf]  ;;  %v330_v24 = vld [vmem:[%s5773_s26 + $0x2c0] sm:$0xf]  ;;  %327 = vst [vmem:[%s5780_s27 + $0x158] sm:$0xf] %v326_v22 }
  0x4f   : > { %329 = vst [vmem:[%s5780_s27 + $0x15c] sm:$0xf] %v328_v23  ;;  %331 = vst [vmem:[%s5780_s27 + $0x160] sm:$0xf] %v330_v24  ;;  %v332_v25 = vld [vmem:[%s5773_s26 + $0x2c8] sm:$0xf] }
  0x50   : > { %v334_v26 = vld [vmem:[%s5773_s26 + $0x2d0] sm:$0xf]  ;;  %v336_v27 = vld [vmem:[%s5773_s26 + $0x2d8] sm:$0xf]  ;;  %333 = vst [vmem:[%s5780_s27 + $0x164] sm:$0xf] %v332_v25 }
  0x51   : > { %335 = vst [vmem:[%s5780_s27 + $0x168] sm:$0xf] %v334_v26  ;;  %337 = vst [vmem:[%s5780_s27 + $0x16c] sm:$0xf] %v336_v27  ;;  %v338_v28 = vld [vmem:[%s5773_s26 + $0x2e0] sm:$0xf] }
  0x52   : > { %v340_v29 = vld [vmem:[%s5773_s26 + $0x2e8] sm:$0xf]  ;;  %v342_v30 = vld [vmem:[%s5773_s26 + $0x2f0] sm:$0xf]  ;;  %339 = vst [vmem:[%s5780_s27 + $0x170] sm:$0xf] %v338_v28 }
  0x53   : > { %341 = vst [vmem:[%s5780_s27 + $0x174] sm:$0xf] %v340_v29  ;;  %343 = vst [vmem:[%s5780_s27 + $0x178] sm:$0xf] %v342_v30  ;;  %v344_v31 = vld [vmem:[%s5773_s26 + $0x2f8] sm:$0xf] }
  0x54   : > { %v346_v32 = vld [vmem:[%s5773_s26 + $0x300] sm:$0xf]  ;;  %v348_v33 = vld [vmem:[%s5773_s26 + $0x308] sm:$0xf]  ;;  %345 = vst [vmem:[%s5780_s27 + $0x17c] sm:$0xf] %v344_v31 }
  0x55   : > { %347 = vst [vmem:[%s5780_s27 + $0x180] sm:$0xf] %v346_v32  ;;  %349 = vst [vmem:[%s5780_s27 + $0x184] sm:$0xf] %v348_v33  ;;  %v350_v34 = vld [vmem:[%s5773_s26 + $0x310] sm:$0xf] }
  0x56   : > { %v352_v35 = vld [vmem:[%s5773_s26 + $0x318] sm:$0xf]  ;;  %v354_v36 = vld [vmem:[%s5773_s26 + $0x320] sm:$0xf]  ;;  %351 = vst [vmem:[%s5780_s27 + $0x188] sm:$0xf] %v350_v34 }
  0x57   : > { %353 = vst [vmem:[%s5780_s27 + $0x18c] sm:$0xf] %v352_v35  ;;  %355 = vst [vmem:[%s5780_s27 + $0x190] sm:$0xf] %v354_v36  ;;  %v356_v37 = vld [vmem:[%s5773_s26 + $0x328] sm:$0xf] }
  0x58   : > { %v358_v38 = vld [vmem:[%s5773_s26 + $0x330] sm:$0xf]  ;;  %v360_v39 = vld [vmem:[%s5773_s26 + $0x338] sm:$0xf]  ;;  %357 = vst [vmem:[%s5780_s27 + $0x194] sm:$0xf] %v356_v37 }
  0x59   : > { %359 = vst [vmem:[%s5780_s27 + $0x198] sm:$0xf] %v358_v38  ;;  %361 = vst [vmem:[%s5780_s27 + $0x19c] sm:$0xf] %v360_v39  ;;  %v362_v40 = vld [vmem:[%s5773_s26 + $0x340] sm:$0xf] }
  0x5a   : > { %v364_v41 = vld [vmem:[%s5773_s26 + $0x348] sm:$0xf]  ;;  %v366_v42 = vld [vmem:[%s5773_s26 + $0x350] sm:$0xf]  ;;  %363 = vst [vmem:[%s5780_s27 + $0x1a0] sm:$0xf] %v362_v40 }
  0x5b   : > { %365 = vst [vmem:[%s5780_s27 + $0x1a4] sm:$0xf] %v364_v41  ;;  %367 = vst [vmem:[%s5780_s27 + $0x1a8] sm:$0xf] %v366_v42  ;;  %v368_v43 = vld [vmem:[%s5773_s26 + $0x358] sm:$0xf] }
  0x5c   : > { %v370_v44 = vld [vmem:[%s5773_s26 + $0x360] sm:$0xf]  ;;  %v372_v45 = vld [vmem:[%s5773_s26 + $0x368] sm:$0xf]  ;;  %369 = vst [vmem:[%s5780_s27 + $0x1ac] sm:$0xf] %v368_v43 }
  0x5d   : > { %371 = vst [vmem:[%s5780_s27 + $0x1b0] sm:$0xf] %v370_v44  ;;  %373 = vst [vmem:[%s5780_s27 + $0x1b4] sm:$0xf] %v372_v45  ;;  %v374_v46 = vld [vmem:[%s5773_s26 + $0x370] sm:$0xf] }
  0x5e   : > { %v376_v47 = vld [vmem:[%s5773_s26 + $0x378] sm:$0xf]  ;;  %375 = vst [vmem:[%s5780_s27 + $0x1b8] sm:$0xf] %v374_v46 }
  0x5f   : > { %377 = vst [vmem:[%s5780_s27 + $0x1bc] sm:$0xf] %v376_v47 }
  0x60 PF: > { %p4649_p7 = scmp.ge.s32.totalorder %s5709_s14, 1  ;;  %p630_p8 = scmp.lt.s32.totalorder %s5709_s14, 3 }
  0x62   : > { %p631_p9 = pnand %p4649_p7, %p630_p8 }
  0x64   : > { %634 = sbr.rel (%p631_p9) target bundleno = 1011 (0x3f3), region = 69 }
  0x6b   : > { %s637_s28 = sand.u32 1, %s5701_s12   ;;  %v5711_v48 = vmov 0   ;;  %v5343_v49 = vld [vmem:[%s8850_s0 + $0x4] ss:$28 sps:$4 sm:$0xff]   ;;  %v5346_v50 = vld [vmem:[%s8850_s0 + $0xc] ss:$28 sps:$4 sm:$0xff]  }
  0x6c   : > { %2524 = vmatprep.subr.bf16.mxu1 %v5711_v48  ;;  %2813 = vmatprep.subr.bf16.mxu0 %v5711_v48  ;;  %s5283_s29 = smul.u32 448, %s637_s28  ;;  %v5341_v19 = vld [vmem:[%s8850_s0] ss:$28 sps:$4 sm:$0xff]   ;;  %v5344_v20 = vld [vmem:[%s8850_s0 + $0x8] ss:$28 sps:$4 sm:$0xff]   ;;  %p663_p10 = scmp.lt.s32.totalorder %s5748_s15, 1 }
  0x6d   : > { %2556 = vmatprep.mubr.bf16.mxu1 %v5343_v49  ;;  %2845 = vmatprep.mubr.bf16.mxu0 %v5346_v50  ;;  %v5348_v22 = vld [vmem:[%s8850_s0 + $0x3c] ss:$28 sps:$4 sm:$0xff]   ;;  %v5350_v23 = vld [vmem:[%s8850_s0 + $0x44] ss:$28 sps:$4 sm:$0xff]   ;;  %v5354_v27 = vld [vmem:[%s8850_s0 + $0x74] ss:$28 sps:$4 sm:$0xff]  }
  0x6e   : > { %s6014_s7 = scalar_lea.vmem [#allocation2], %s5283_s29  ;;  %v5352_v25 = vld [vmem:[%s8850_s0 + $0x38] ss:$28 sps:$4 sm:$0xff]   ;;  %v5353_v26 = vld [vmem:[%s8850_s0 + $0x40] ss:$28 sps:$4 sm:$0xff]   ;;  %s4650_s14 = sshll.u32 %s637_s28, 9 }
  0x6f   : > { %v5309_v51 = vld [vmem:[%s6014_s7] sm:$0xff]   ;;  %v5311_v53 = vld [vmem:[%s6014_s7 + $0x8] sm:$0xff]   ;;  %v5313_v55 = vld [vmem:[%s6014_s7 + $0x10] sm:$0xff]   ;;  %s7752_s6 = scalar_select %p663_p10, %s5748_s15, 1 }
  0x70   : > { %v6018_v52 = vld [vmem:[%s6014_s7 + $0x80] sm:$0xff]   ;;  %2525 = vmatpush1.bf16.msra.mxu1 %v5309_v51  ;;  %v6024_v54 = vld [vmem:[%s6014_s7 + $0x88] sm:$0xff]   ;;  %v6031_v56 = vld [vmem:[%s6014_s7 + $0x90] sm:$0xff]   ;;  %s8586_s12 = scalar_lea.vmem [#allocation3], %s4650_s14  ;;  %s4935_s28 = sshll.u32 (%p5763_p5), %s5748_s15, 3 }
  0x71   : > { %2814 = vmatpush1.bf16.msra.mxu0 %v6018_v52  ;;  %2526 = vmatprep.subr.bf16.mxu1 %v5711_v48  ;;  %v5315_v57 = vld [vmem:[%s6014_s7 + $0x18] sm:$0xff]   ;;  %v5317_v59 = vld [vmem:[%s6014_s7 + $0x20] sm:$0xff]   ;;  %v5319_v61 = vld [vmem:[%s6014_s7 + $0x28] sm:$0xff]   ;;  %s4651_s8 = sshll.u32 %s7752_s6, 1 }
  0x72   : > { %2815 = vmatprep.subr.bf16.mxu0 %v5711_v48  ;;  %v6038_v58 = vld [vmem:[%s6014_s7 + $0x98] sm:$0xff]   ;;  %v6045_v60 = vld [vmem:[%s6014_s7 + $0xa0] sm:$0xff]   ;;  %v6052_v62 = vld [vmem:[%s6014_s7 + $0xa8] sm:$0xff]   ;;  %s7926_s11 = scalar_lea.vmem %s8852_s2, %s4651_s8 }
  0x73   : > { %v5321_v63 = vld [vmem:[%s6014_s7 + $0x30] sm:$0xff]   ;;  %v5323_v1 = vld [vmem:[%s6014_s7 + $0x38] sm:$0xff]   ;;  %v5325_v3 = vld [vmem:[%s6014_s7 + $0x40] sm:$0xff]  }
  0x74   : > { %2527 = vmatpush1.bf16.msra.mxu1 %v5311_v53  ;;  %v6059_v0 = vld [vmem:[%s6014_s7 + $0xb0] sm:$0xff]   ;;  %v6066_v2 = vld [vmem:[%s6014_s7 + $0xb8] sm:$0xff]   ;;  %v6073_v4 = vld [vmem:[%s6014_s7 + $0xc0] sm:$0xff]  }
  0x75   : > { %2816 = vmatpush1.bf16.msra.mxu0 %v6024_v54  ;;  %2528 = vmatprep.subr.bf16.mxu1 %v5711_v48  ;;  %v5327_v5 = vld [vmem:[%s6014_s7 + $0x48] sm:$0xff]   ;;  %v5329_v7 = vld [vmem:[%s6014_s7 + $0x50] sm:$0xff]   ;;  %v5331_v9 = vld [vmem:[%s6014_s7 + $0x58] sm:$0xff]  }
  0x76   : > { %2817 = vmatprep.subr.bf16.mxu0 %v5711_v48  ;;  %v6080_v6 = vld [vmem:[%s6014_s7 + $0xc8] sm:$0xff]   ;;  %v6087_v8 = vld [vmem:[%s6014_s7 + $0xd0] sm:$0xff]   ;;  %v6094_v10 = vld [vmem:[%s6014_s7 + $0xd8] sm:$0xff]  }
  0x77   : > { %v5333_v11 = vld [vmem:[%s6014_s7 + $0x60] sm:$0xff]   ;;  %v5335_v13 = vld [vmem:[%s6014_s7 + $0x68] sm:$0xff]   ;;  %v5337_v15 = vld [vmem:[%s6014_s7 + $0x70] sm:$0xff]  }
  0x78   : > { %2529 = vmatpush1.bf16.msra.mxu1 %v5313_v55  ;;  %v6101_v12 = vld [vmem:[%s6014_s7 + $0xe0] sm:$0xff]   ;;  %v6108_v14 = vld [vmem:[%s6014_s7 + $0xe8] sm:$0xff]   ;;  %v6115_v16 = vld [vmem:[%s6014_s7 + $0xf0] sm:$0xff]  }
  0x79   : > { %2818 = vmatpush1.bf16.msra.mxu0 %v6031_v56  ;;  %2530 = vmatprep.subr.bf16.mxu1 %v5711_v48  ;;  %v5339_v17 = vld [vmem:[%s6014_s7 + $0x78] sm:$0xff]   ;;  %v5347_v21 = vld [vmem:[%s6014_s7 + $0x100] sm:$0xff]   ;;  %v5360_v24 = vld [vmem:[%s6014_s7 + $0x108] sm:$0xff]  }
  0x7a   : > { %2819 = vmatprep.subr.bf16.mxu0 %v5711_v48  ;;  %v6122_v18 = vld [vmem:[%s6014_s7 + $0xf8] sm:$0xff]   ;;  %v5367_v29 = vld [vmem:[%s6014_s7 + $0x110] sm:$0xff]   ;;  %v5361_v33 = vld [vmem:[%s8850_s0 + $0xac] ss:$28 sps:$4 sm:$0xff]  }
  0x7b   : > { %v5356_v28 = vld [vmem:[%s8850_s0 + $0x7c] ss:$28 sps:$4 sm:$0xff]   ;;  %v5358_v31 = vld [vmem:[%s8850_s0 + $0x70] ss:$28 sps:$4 sm:$0xff]   ;;  %v5387_v35 = vld [vmem:[%s6014_s7 + $0x120] sm:$0xff]  }
  0x7c   : > { %2531 = vmatpush1.bf16.msra.mxu1 %v5315_v57  ;;  %v5380_v30 = vld [vmem:[%s6014_s7 + $0x118] sm:$0xff]   ;;  %v5363_v34 = vld [vmem:[%s8850_s0 + $0xb4] ss:$28 sps:$4 sm:$0xff]   ;;  %v5400_v36 = vld [vmem:[%s6014_s7 + $0x128] sm:$0xff]  }
  0x7d   : > { %2820 = vmatpush1.bf16.msra.mxu0 %v6038_v58  ;;  %2532 = vmatprep.subr.bf16.mxu1 %v5711_v48  ;;  %v5359_v32 = vld [vmem:[%s8850_s0 + $0x78] ss:$28 sps:$4 sm:$0xff]   ;;  %v5365_v37 = vld [vmem:[%s8850_s0 + $0xa8] ss:$28 sps:$4 sm:$0xff]   ;;  %v5366_v38 = vld [vmem:[%s8850_s0 + $0xb0] ss:$28 sps:$4 sm:$0xff]  }
  0x7e   : > { %2821 = vmatprep.subr.bf16.mxu0 %v5711_v48  ;;  %v5368_v39 = vld [vmem:[%s8850_s0 + $0xe4] ss:$28 sps:$4 sm:$0xff]   ;;  %v5370_v40 = vld [vmem:[%s8850_s0 + $0xec] ss:$28 sps:$4 sm:$0xff]   ;;  %v5407_v41 = vld [vmem:[%s6014_s7 + $0x130] sm:$0xff]  }
  0x7f   : > { %v5420_v42 = vld [vmem:[%s6014_s7 + $0x138] sm:$0xff]   ;;  %v5373_v44 = vld [vmem:[%s8850_s0 + $0xe8] ss:$28 sps:$4 sm:$0xff]   ;;  %v5385_v55 = vld [vmem:[%s8850_s0 + $0x150] ss:$28 sps:$4 sm:$0xff]  }
  0x80   : > { %2533 = vmatpush1.bf16.msra.mxu1 %v5317_v59  ;;  %v5372_v43 = vld [vmem:[%s8850_s0 + $0xe0] ss:$28 sps:$4 sm:$0xff]   ;;  %v5378_v49 = vld [vmem:[%s8850_s0 + $0x118] ss:$28 sps:$4 sm:$0xff]   ;;  %v5440_v50 = vld [vmem:[%s6014_s7 + $0x148] sm:$0xff]  }
  0x81   : > { %2822 = vmatpush1.bf16.msra.mxu0 %v6045_v60  ;;  %2534 = vmatprep.subr.bf16.mxu1 %v5711_v48  ;;  %v5374_v45 = vld [vmem:[%s8850_s0 + $0x11c] ss:$28 sps:$4 sm:$0xff]   ;;  %v5376_v46 = vld [vmem:[%s8850_s0 + $0x124] ss:$28 sps:$4 sm:$0xff]   ;;  %v5390_v59 = vld [vmem:[%s8850_s0 + $0x194] ss:$28 sps:$4 sm:$0xff]  }
  0x82   : > { %2823 = vmatprep.subr.bf16.mxu0 %v5711_v48  ;;  %v5427_v47 = vld [vmem:[%s6014_s7 + $0x140] sm:$0xff]   ;;  %v5383_v53 = vld [vmem:[%s8850_s0 + $0x15c] ss:$28 sps:$4 sm:$0xff]  }
  0x83   : > { %v5379_v51 = vld [vmem:[%s8850_s0 + $0x120] ss:$28 sps:$4 sm:$0xff]   ;;  %v5386_v57 = vld [vmem:[%s8850_s0 + $0x158] ss:$28 sps:$4 sm:$0xff]  }
  0x84   : > { %2535 = vmatpush1.bf16.msra.mxu1 %v5319_v61  ;;  %v5392_v61 = vld [vmem:[%s8850_s0 + $0x188] ss:$28 sps:$4 sm:$0xff]  }
  0x85   : > { %2824 = vmatpush1.bf16.msra.mxu0 %v6052_v62  ;;  %2536 = vmatprep.subr.bf16.mxu1 %v5711_v48 }
  0x86   : > { %2825 = vmatprep.subr.bf16.mxu0 %v5711_v48 }
  0x88   : > { %2537 = vmatpush1.bf16.msra.mxu1 %v5321_v63  ;;  %v5393_v63 = vld [vmem:[%s8850_s0 + $0x190] ss:$28 sps:$4 sm:$0xff]  }
  0x89   : > { %2826 = vmatpush1.bf16.msra.mxu0 %v6059_v0  ;;  %2538 = vmatprep.subr.bf16.mxu1 %v5711_v48 }
  0x8a   : > { %2827 = vmatprep.subr.bf16.mxu0 %v5711_v48 }
  0x8c   : > { %2539 = vmatpush1.bf16.msra.mxu1 %v5323_v1  ;;  %v5396_v1 = vld [vmem:[%s8850_s0 + $0x1cc] ss:$28 sps:$4 sm:$0xff]  }
  0x8d   : > { %2828 = vmatpush1.bf16.msra.mxu0 %v6066_v2  ;;  %2540 = vmatprep.subr.bf16.mxu1 %v5711_v48 }
  0x8e   : > { %2829 = vmatprep.subr.bf16.mxu0 %v5711_v48 }
  0x90   : > { %2541 = vmatpush1.bf16.msra.mxu1 %v5325_v3  ;;  %v5398_v3 = vld [vmem:[%s8850_s0 + $0x1c0] ss:$28 sps:$4 sm:$0xff]  }
  0x91   : > { %2830 = vmatpush1.bf16.msra.mxu0 %v6073_v4  ;;  %2542 = vmatprep.subr.bf16.mxu1 %v5711_v48 }
  0x92   : > { %2831 = vmatprep.subr.bf16.mxu0 %v5711_v48 }
  0x94   : > { %2543 = vmatpush1.bf16.msra.mxu1 %v5327_v5  ;;  %v5399_v5 = vld [vmem:[%s8850_s0 + $0x1c8] ss:$28 sps:$4 sm:$0xff]  }
  0x95   : > { %2832 = vmatpush1.bf16.msra.mxu0 %v6080_v6  ;;  %2544 = vmatprep.subr.bf16.mxu1 %v5711_v48 }
  0x96   : > { %2833 = vmatprep.subr.bf16.mxu0 %v5711_v48 }
  0x98   : > { %2545 = vmatpush1.bf16.msra.mxu1 %v5329_v7  ;;  %v5403_v7 = vld [vmem:[%s8850_s0 + $0x204] ss:$28 sps:$4 sm:$0xff]  }
  0x99   : > { %2834 = vmatpush1.bf16.msra.mxu0 %v6087_v8  ;;  %2546 = vmatprep.subr.bf16.mxu1 %v5711_v48 }
  0x9a   : > { %2835 = vmatprep.subr.bf16.mxu0 %v5711_v48 }
  0x9c   : > { %2547 = vmatpush1.bf16.msra.mxu1 %v5331_v9  ;;  %v5406_v9 = vld [vmem:[%s8850_s0 + $0x200] ss:$28 sps:$4 sm:$0xff]  }
  0x9d   : > { %2836 = vmatpush1.bf16.msra.mxu0 %v6094_v10  ;;  %2548 = vmatprep.subr.bf16.mxu1 %v5711_v48 }
  0x9e   : > { %2837 = vmatprep.subr.bf16.mxu0 %v5711_v48 }
  0xa0   : > { %2549 = vmatpush1.bf16.msra.mxu1 %v5333_v11  ;;  %v5412_v11 = vld [vmem:[%s8850_s0 + $0x230] ss:$28 sps:$4 sm:$0xff]  }
  0xa1   : > { %2838 = vmatpush1.bf16.msra.mxu0 %v6101_v12  ;;  %2550 = vmatprep.subr.bf16.mxu1 %v5711_v48 }
  0xa2   : > { %2839 = vmatprep.subr.bf16.mxu0 %v5711_v48 }
  0xa4   : > { %2551 = vmatpush1.bf16.msra.mxu1 %v5335_v13  ;;  %v5414_v13 = vld [vmem:[%s8850_s0 + $0x26c] ss:$28 sps:$4 sm:$0xff]  }
  0xa5   : > { %2840 = vmatpush1.bf16.msra.mxu0 %v6108_v14  ;;  %2552 = vmatprep.subr.bf16.mxu1 %v5711_v48 }
  0xa6   : > { %2841 = vmatprep.subr.bf16.mxu0 %v5711_v48 }
  0xa8   : > { %2553 = vmatpush1.bf16.msra.mxu1 %v5337_v15  ;;  %v5418_v15 = vld [vmem:[%s8850_s0 + $0x268] ss:$28 sps:$4 sm:$0xff]  }
  0xa9   : > { %2842 = vmatpush1.bf16.msra.mxu0 %v6115_v16  ;;  %2554 = vmatprep.subr.bf16.mxu1 %v5711_v48 }
  0xaa   : > { %2843 = vmatprep.subr.bf16.mxu0 %v5711_v48 }
  0xac   : > { %2555 = vmatpush1.bf16.msra.mxu1 %v5339_v17  ;;  %v5421_v17 = vld [vmem:[%s8850_s0 + $0x2a4] ss:$28 sps:$4 sm:$0xff]  }
  0xad   : > { %2844 = vmatpush1.bf16.msra.mxu0 %v6122_v18  ;;  %5058 = vmatprep.subr.bf16.mxu1 %v5711_v48 }
  0xae   : > { %3102 = vmatprep.subr.bf16.mxu0 %v5711_v48 }
  0xaf   : > { %2557 = vmatmul.mubr.bf16.vlgmr.msra.gmra.mrb[0].mxu1 %v5341_v19  ;;  %v5425_v19 = vld [vmem:[%s8850_s0 + $0x2a0] ss:$28 sps:$4 sm:$0xff]  }
  0xb0   : > { %2846 = vmatmul.mubr.bf16.vlgmr.msra.gmra.mrb[0].mxu0 %v5344_v20  ;;  %5074 = vmatpush1.bf16.msra.mxu1 %v6018_v52  ;;  %v5381_v52 = vld [vmem:[%s8850_s0 + $0x154] ss:$28 sps:$4 sm:$0xff]   ;;  %v5426_v20 = vld [vmem:[%s8850_s0 + $0x2a8] ss:$28 sps:$4 sm:$0xff]  }
  0xb1   : > { %3103 = vmatpush1.bf16.msra.mxu0 %v5347_v21  ;;  %2564 = vmatprep.mubr.bf16.mxu1 %v5348_v22  ;;  %v5428_v21 = vld [vmem:[%s8850_s0 + $0x2dc] ss:$28 sps:$4 sm:$0xff]   ;;  %v5430_v22 = vld [vmem:[%s8850_s0 + $0x2e4] ss:$28 sps:$4 sm:$0xff]  }
  0xb2   : > { %2853 = vmatprep.mubr.bf16.mxu0 %v5350_v23  ;;  %3104 = vmatprep.subr.bf16.mxu0 %v5711_v48  ;;  %v5432_v23 = vld [vmem:[%s8850_s0 + $0x2d8] ss:$28 sps:$4 sm:$0xff]  }
  0xb3   : > { %5059 = vmatprep.subr.bf16.mxu1 %v5711_v48 }
  0xb4   : > { %5075 = vmatpush1.bf16.msra.mxu1 %v6024_v54  ;;  %v5447_v54 = vld [vmem:[%s6014_s7 + $0x150] sm:$0xff]  }
  0xb5   : > { %3105 = vmatpush1.bf16.msra.mxu0 %v5360_v24  ;;  %5060 = vmatprep.subr.bf16.mxu1 %v5711_v48  ;;  %v5433_v24 = vld [vmem:[%s8850_s0 + $0x2e0] ss:$28 sps:$4 sm:$0xff]  }
  0xb6   : > { %3106 = vmatprep.subr.bf16.mxu0 %v5711_v48 }
  0xb7   : > { %2565 = vmatmul.mubr.bf16.gmra.mrb[4].mxu1 %v5352_v25  ;;  %v5434_v25 = vld [vmem:[%s8850_s0 + $0x314] ss:$28 sps:$4 sm:$0xff]  }
  0xb8   : > { %2854 = vmatmul.mubr.bf16.gmra.mrb[4].mxu0 %v5353_v26  ;;  %2572 = vmatprep.mubr.bf16.mxu1 %v5354_v27  ;;  %v5436_v26 = vld [vmem:[%s8850_s0 + $0x31c] ss:$28 sps:$4 sm:$0xff]   ;;  %v5438_v27 = vld [vmem:[%s8850_s0 + $0x310] ss:$28 sps:$4 sm:$0xff]  }
  0xb9   : > { %2861 = vmatprep.mubr.bf16.mxu0 %v5356_v28  ;;  %3107 = vmatpush1.bf16.msra.mxu0 %v5367_v29  ;;  %v5439_v28 = vld [vmem:[%s8850_s0 + $0x318] ss:$28 sps:$4 sm:$0xff]   ;;  %v5441_v29 = vld [vmem:[%s8850_s0 + $0x34c] ss:$28 sps:$4 sm:$0xff]  }
  0xba   : > { %5076 = vmatpush1.bf16.msra.mxu1 %v6031_v56  ;;  %3108 = vmatprep.subr.bf16.mxu0 %v5711_v48  ;;  %v5460_v56 = vld [vmem:[%s6014_s7 + $0x158] sm:$0xff]  }
  0xbb   : > { %5061 = vmatprep.subr.bf16.mxu1 %v5711_v48 }
  0xbd   : > { %3109 = vmatpush1.bf16.msra.mxu0 %v5380_v30  ;;  %v5443_v30 = vld [vmem:[%s8850_s0 + $0x354] ss:$28 sps:$4 sm:$0xff]  }
  0xbe   : > { %5077 = vmatpush1.bf16.msra.mxu1 %v6038_v58  ;;  %3110 = vmatprep.subr.bf16.mxu0 %v5711_v48  ;;  %v5388_v58 = vld [vmem:[%s8850_s0 + $0x18c] ss:$28 sps:$4 sm:$0xff]  }
  0xbf   : > { %2573 = vmatmul.mubr.bf16.gmra.mrb[8].mxu1 %v5358_v31  ;;  %5062 = vmatprep.subr.bf16.mxu1 %v5711_v48  ;;  %v5445_v31 = vld [vmem:[%s8850_s0 + $0x348] ss:$28 sps:$4 sm:$0xff]  }
  0xc0   : > { %2862 = vmatmul.mubr.bf16.gmra.mrb[8].mxu0 %v5359_v32  ;;  %2580 = vmatprep.mubr.bf16.mxu1 %v5361_v33  ;;  %v5446_v32 = vld [vmem:[%s8850_s0 + $0x350] ss:$28 sps:$4 sm:$0xff]   ;;  %v5448_v33 = vld [vmem:[%s8850_s0 + $0x384] ss:$28 sps:$4 sm:$0xff]  }
  0xc1   : > { %2869 = vmatprep.mubr.bf16.mxu0 %v5363_v34  ;;  %3111 = vmatpush1.bf16.msra.mxu0 %v5387_v35  ;;  %v5450_v34 = vld [vmem:[%s8850_s0 + $0x38c] ss:$28 sps:$4 sm:$0xff]   ;;  %v5452_v35 = vld [vmem:[%s8850_s0 + $0x380] ss:$28 sps:$4 sm:$0xff]  }
  0xc2   : > { %3112 = vmatprep.subr.bf16.mxu0 %v5711_v48  ;;  %5078 = vmatpush1.bf16.msra.mxu1 %v6045_v60  ;;  %v5467_v60 = vld [vmem:[%s6014_s7 + $0x160] sm:$0xff]  }
  0xc3   : > { %5063 = vmatprep.subr.bf16.mxu1 %v5711_v48 }
  0xc5   : > { %3113 = vmatpush1.bf16.msra.mxu0 %v5400_v36  ;;  %v5453_v36 = vld [vmem:[%s8850_s0 + $0x388] ss:$28 sps:$4 sm:$0xff]  }
  0xc6   : > { %3114 = vmatprep.subr.bf16.mxu0 %v5711_v48  ;;  %5079 = vmatpush1.bf16.msra.mxu1 %v6052_v62  ;;  %v5480_v62 = vld [vmem:[%s6014_s7 + $0x168] sm:$0xff]  }
  0xc7   : > { %2581 = vmatmul.mubr.bf16.gmra.mrb[12].mxu1 %v5365_v37  ;;  %5064 = vmatprep.subr.bf16.mxu1 %v5711_v48  ;;  %v5454_v37 = vld [vmem:[%s8850_s0 + $0x3bc] ss:$28 sps:$4 sm:$0xff]  }
  0xc8   : > { %2870 = vmatmul.mubr.bf16.gmra.mrb[12].mxu0 %v5366_v38  ;;  %2588 = vmatprep.mubr.bf16.mxu1 %v5368_v39  ;;  %v5456_v38 = vld [vmem:[%s8850_s0 + $0x3c4] ss:$28 sps:$4 sm:$0xff]  }
  0xc9   : > { %2877 = vmatprep.mubr.bf16.mxu0 %v5370_v40  ;;  %3115 = vmatpush1.bf16.msra.mxu0 %v5407_v41  ;;  %v6395_v39 = vld [vmem:[%s6014_s7 + $0x180] sm:$0xff]   ;;  %v5458_v40 = vld [vmem:[%s8850_s0 + $0x3b8] ss:$28 sps:$4 sm:$0xff]  }
  0xca   : > { %3116 = vmatprep.subr.bf16.mxu0 %v5711_v48  ;;  %5080 = vmatpush1.bf16.msra.mxu1 %v6059_v0  ;;  %v5394_v0 = vld [vmem:[%s8850_s0 + $0x1c4] ss:$28 sps:$4 sm:$0xff]  }
  0xcb   : > { %5065 = vmatprep.subr.bf16.mxu1 %v5711_v48  ;;  %v5459_v41 = vld [vmem:[%s8850_s0 + $0x3c0] ss:$28 sps:$4 sm:$0xff]  }
  0xcd   : > { %3117 = vmatpush1.bf16.msra.mxu0 %v5420_v42  ;;  %v5461_v42 = vld [vmem:[%s8850_s0 + $0x3f4] ss:$28 sps:$4 sm:$0xff]  }
  0xce   : > { %3118 = vmatprep.subr.bf16.mxu0 %v5711_v48  ;;  %5081 = vmatpush1.bf16.msra.mxu1 %v6066_v2  ;;  %v5487_v2 = vld [vmem:[%s6014_s7 + $0x170] sm:$0xff]  }
  0xcf   : > { %2589 = vmatmul.mubr.bf16.gmra.mrb[16].mxu1 %v5372_v43  ;;  %5066 = vmatprep.subr.bf16.mxu1 %v5711_v48  ;;  %v5463_v43 = vld [vmem:[%s8850_s0 + $0x3fc] ss:$28 sps:$4 sm:$0xff]  }
  0xd0   : > { %2878 = vmatmul.mubr.bf16.gmra.mrb[16].mxu0 %v5373_v44  ;;  %2596 = vmatprep.mubr.bf16.mxu1 %v5374_v45  ;;  %v5465_v44 = vld [vmem:[%s8850_s0 + $0x3f0] ss:$28 sps:$4 sm:$0xff]   ;;  %v5466_v45 = vld [vmem:[%s8850_s0 + $0x3f8] ss:$28 sps:$4 sm:$0xff]  }
  0xd1   : > { %2885 = vmatprep.mubr.bf16.mxu0 %v5376_v46  ;;  %3119 = vmatpush1.bf16.msra.mxu0 %v5427_v47  ;;  %v5468_v46 = vld [vmem:[%s8850_s0 + $0x42c] ss:$28 sps:$4 sm:$0xff]   ;;  %v5470_v47 = vld [vmem:[%s8850_s0 + $0x434] ss:$28 sps:$4 sm:$0xff]  }
  0xd2   : > { %3120 = vmatprep.subr.bf16.mxu0 %v5711_v48  ;;  %5082 = vmatpush1.bf16.msra.mxu1 %v6073_v4  ;;  %v5500_v4 = vld [vmem:[%s6014_s7 + $0x178] sm:$0xff]  }
  0xd3   : > { %5067 = vmatprep.subr.bf16.mxu1 %v5711_v48 }
  0xd5   : > { %3121 = vmatpush1.bf16.msra.mxu0 %v5440_v50  ;;  %v5473_v50 = vld [vmem:[%s8850_s0 + $0x430] ss:$28 sps:$4 sm:$0xff]  }
  0xd6   : > { %3122 = vmatprep.subr.bf16.mxu0 %v5711_v48  ;;  %5083 = vmatpush1.bf16.msra.mxu1 %v6080_v6  ;;  %v5401_v6 = vld [vmem:[%s8850_s0 + $0x1fc] ss:$28 sps:$4 sm:$0xff]  }
  0xd7   : > { %2597 = vmatmul.mubr.bf16.gmra.mrb[20].mxu1 %v5378_v49  ;;  %5068 = vmatprep.subr.bf16.mxu1 %v5711_v48  ;;  %v5472_v49 = vld [vmem:[%s8850_s0 + $0x428] ss:$28 sps:$4 sm:$0xff]  }
  0xd8   : > { %2886 = vmatmul.mubr.bf16.gmra.mrb[20].mxu0 %v5379_v51  ;;  %2604 = vmatprep.mubr.bf16.mxu1 %v5381_v52  ;;  %v5474_v51 = vld [vmem:[%s8850_s0 + $0x464] ss:$28 sps:$4 sm:$0xff]   ;;  %v5476_v52 = vld [vmem:[%s8850_s0 + $0x46c] ss:$28 sps:$4 sm:$0xff]  }
  0xd9   : > { %2893 = vmatprep.mubr.bf16.mxu0 %v5383_v53  ;;  %3123 = vmatpush1.bf16.msra.mxu0 %v5447_v54  ;;  %v5478_v53 = vld [vmem:[%s8850_s0 + $0x460] ss:$28 sps:$4 sm:$0xff]   ;;  %v5479_v54 = vld [vmem:[%s8850_s0 + $0x468] ss:$28 sps:$4 sm:$0xff]  }
  0xda   : > { %3124 = vmatprep.subr.bf16.mxu0 %v5711_v48  ;;  %5084 = vmatpush1.bf16.msra.mxu1 %v6087_v8  ;;  %v5405_v8 = vld [vmem:[%s8850_s0 + $0x1f8] ss:$28 sps:$4 sm:$0xff]  }
  0xdb   : > { %5069 = vmatprep.subr.bf16.mxu1 %v5711_v48 }
  0xdd   : > { %3125 = vmatpush1.bf16.msra.mxu0 %v5460_v56  ;;  %v5483_v56 = vld [vmem:[%s8850_s0 + $0x4a4] ss:$28 sps:$4 sm:$0xff]  }
  0xde   : > { %3126 = vmatprep.subr.bf16.mxu0 %v5711_v48  ;;  %5085 = vmatpush1.bf16.msra.mxu1 %v6094_v10  ;;  %v5408_v10 = vld [vmem:[%s8850_s0 + $0x234] ss:$28 sps:$4 sm:$0xff]  }
  0xdf   : > { %2605 = vmatmul.mubr.bf16.gmra.mrb[24].mxu1 %v5385_v55  ;;  %5070 = vmatprep.subr.bf16.mxu1 %v5711_v48  ;;  %v5481_v55 = vld [vmem:[%s8850_s0 + $0x49c] ss:$28 sps:$4 sm:$0xff]  }
  0xe0   : > { %2894 = vmatmul.mubr.bf16.gmra.mrb[24].mxu0 %v5386_v57  ;;  %2612 = vmatprep.mubr.bf16.mxu1 %v5388_v58  ;;  %v5485_v57 = vld [vmem:[%s8850_s0 + $0x498] ss:$28 sps:$4 sm:$0xff]   ;;  %v5486_v58 = vld [vmem:[%s8850_s0 + $0x4a0] ss:$28 sps:$4 sm:$0xff]  }
  0xe1   : > { %2901 = vmatprep.mubr.bf16.mxu0 %v5390_v59  ;;  %3127 = vmatpush1.bf16.msra.mxu0 %v5467_v60  ;;  %v5488_v59 = vld [vmem:[%s8850_s0 + $0x4d4] ss:$28 sps:$4 sm:$0xff]   ;;  %v5490_v60 = vld [vmem:[%s8850_s0 + $0x4dc] ss:$28 sps:$4 sm:$0xff]  }
  0xe2   : > { %3128 = vmatprep.subr.bf16.mxu0 %v5711_v48  ;;  %5086 = vmatpush1.bf16.msra.mxu1 %v6101_v12  ;;  %v5413_v12 = vld [vmem:[%s8850_s0 + $0x238] ss:$28 sps:$4 sm:$0xff]  }
  0xe3   : > { %5071 = vmatprep.subr.bf16.mxu1 %v5711_v48 }
  0xe5   : > { %3129 = vmatpush1.bf16.msra.mxu0 %v5480_v62  ;;  %v5493_v62 = vld [vmem:[%s8850_s0 + $0x4d8] ss:$28 sps:$4 sm:$0xff]  }
  0xe6   : > { %3130 = vmatprep.subr.bf16.mxu0 %v5711_v48  ;;  %5087 = vmatpush1.bf16.msra.mxu1 %v6108_v14  ;;  %v5416_v14 = vld [vmem:[%s8850_s0 + $0x274] ss:$28 sps:$4 sm:$0xff]  }
  0xe7   : > { %2613 = vmatmul.mubr.bf16.gmra.mrb[28].mxu1 %v5392_v61  ;;  %5072 = vmatprep.subr.bf16.mxu1 %v5711_v48  ;;  %v5492_v61 = vld [vmem:[%s8850_s0 + $0x4d0] ss:$28 sps:$4 sm:$0xff]  }
  0xe8   : > { %2902 = vmatmul.mubr.bf16.gmra.mrb[28].mxu0 %v5393_v63  ;;  %2620 = vmatprep.mubr.bf16.mxu1 %v5394_v0  ;;  %v5494_v63 = vld [vmem:[%s8850_s0 + $0x50c] ss:$28 sps:$4 sm:$0xff]   ;;  %v5496_v0 = vld [vmem:[%s8850_s0 + $0x514] ss:$28 sps:$4 sm:$0xff]  }
  0xe9   : > { %2909 = vmatprep.mubr.bf16.mxu0 %v5396_v1  ;;  %3131 = vmatpush1.bf16.msra.mxu0 %v5487_v2  ;;  %v5498_v1 = vld [vmem:[%s8850_s0 + $0x508] ss:$28 sps:$4 sm:$0xff]   ;;  %v5499_v2 = vld [vmem:[%s8850_s0 + $0x510] ss:$28 sps:$4 sm:$0xff]  }
  0xea   : > { %3132 = vmatprep.subr.bf16.mxu0 %v5711_v48  ;;  %5088 = vmatpush1.bf16.msra.mxu1 %v6115_v16  ;;  %v5419_v16 = vld [vmem:[%s8850_s0 + $0x270] ss:$28 sps:$4 sm:$0xff]  }
  0xeb   : > { %5073 = vmatprep.subr.bf16.mxu1 %v5711_v48  ;;  %v5410_v48 = vld [vmem:[%s8850_s0 + $0x23c] ss:$28 sps:$4 sm:$0xff]  }
  0xed   : > { %3133 = vmatpush1.bf16.msra.mxu0 %v5500_v4  ;;  %v5505_v4 = vld [vmem:[%s8850_s0 + $0x14] ss:$28 sps:$4 sm:$0xff]  }
  0xee   : > { %5089 = vmatpush1.bf16.msra.mxu1 %v6122_v18  ;;  %v5423_v18 = vld [vmem:[%s8850_s0 + $0x2ac] ss:$28 sps:$4 sm:$0xff]  }
  0xef   : > { %2621 = vmatmul.mubr.bf16.gmra.mrb[32].mxu1 %v5398_v3  ;;  %4978 = vmatprep.subr.bf16.mxu1 %v6395_v39  ;;  %v5501_v3 = vld [vmem:[%s8850_s0 + $0x544] ss:$28 sps:$4 sm:$0xff]  }
  0xf0   : > { %2910 = vmatmul.mubr.bf16.gmra.mrb[32].mxu0 %v5399_v5  ;;  %2628 = vmatprep.mubr.bf16.mxu1 %v5401_v6  ;;  %v5506_v5 = vld [vmem:[%s8850_s0 + $0x540] ss:$28 sps:$4 sm:$0xff]   ;;  %v5503_v6 = vld [vmem:[%s8850_s0 + $0x10] ss:$28 sps:$4 sm:$0xff]  }
  0xf1   : > { %2917 = vmatprep.mubr.bf16.mxu0 %v5403_v7  ;;  %v5507_v7 = vld [vmem:[%s8850_s0 + $0x57c] ss:$28 sps:$4 sm:$0xff]  }
  0xf7   : > { %2629 = vmatmul.mubr.bf16.gmra.mrb[36].mxu1 %v5405_v8  ;;  %v5509_v8 = vld [vmem:[%s8850_s0 + $0x4c] ss:$28 sps:$4 sm:$0xff]  }
  0xf8   : > { %2918 = vmatmul.mubr.bf16.gmra.mrb[36].mxu0 %v5406_v9  ;;  %2636 = vmatprep.mubr.bf16.mxu1 %v5408_v10  ;;  %v5511_v9 = vld [vmem:[%s8850_s0 + $0x578] ss:$28 sps:$4 sm:$0xff]   ;;  %v5512_v10 = vld [vmem:[%s8850_s0 + $0x48] ss:$28 sps:$4 sm:$0xff]  }
  0xf9   : > { %2925 = vmatprep.mubr.bf16.mxu0 %v5410_v48  ;;  %v5513_v48 = vld [vmem:[%s8850_s0 + $0x5b4] ss:$28 sps:$4 sm:$0xff]  }
  0xff   : > { %2637 = vmatmul.mubr.bf16.gmra.mrb[40].mxu1 %v5412_v11  ;;  %v5515_v11 = vld [vmem:[%s8850_s0 + $0x84] ss:$28 sps:$4 sm:$0xff]  }
 0x100   : > { %2926 = vmatmul.mubr.bf16.gmra.mrb[40].mxu0 %v5413_v12  ;;  %2644 = vmatprep.mubr.bf16.mxu1 %v5414_v13  ;;  %v5517_v12 = vld [vmem:[%s8850_s0 + $0x5b0] ss:$28 sps:$4 sm:$0xff]   ;;  %v5518_v13 = vld [vmem:[%s8850_s0 + $0x80] ss:$28 sps:$4 sm:$0xff]  }
 0x101   : > { %2933 = vmatprep.mubr.bf16.mxu0 %v5416_v14  ;;  %v5519_v14 = vld [vmem:[%s8850_s0 + $0x5ec] ss:$28 sps:$4 sm:$0xff]  }
 0x107   : > { %2645 = vmatmul.mubr.bf16.gmra.mrb[44].mxu1 %v5418_v15  ;;  %v5521_v15 = vld [vmem:[%s8850_s0 + $0xbc] ss:$28 sps:$4 sm:$0xff]  }
 0x108   : > { %2934 = vmatmul.mubr.bf16.gmra.mrb[44].mxu0 %v5419_v16  ;;  %2652 = vmatprep.mubr.bf16.mxu1 %v5421_v17 }
 0x109   : > { %2941 = vmatprep.mubr.bf16.mxu0 %v5423_v18  ;;  %v5523_v18 = vld [vmem:[%s8850_s0 + $0x5e8] ss:$28 sps:$4 sm:$0xff]  }
 0x10f   : > { %2653 = vmatmul.mubr.bf16.gmra.mrb[48].mxu1 %v5425_v19 }
 0x110   : > { %2942 = vmatmul.mubr.bf16.gmra.mrb[48].mxu0 %v5426_v20  ;;  %2660 = vmatprep.mubr.bf16.mxu1 %v5428_v21  ;;  %v5524_v20 = vld [vmem:[%s8850_s0 + $0xb8] ss:$28 sps:$4 sm:$0xff]   ;;  %v5525_v21 = vld [vmem:[%s8850_s0 + $0x624] ss:$28 sps:$4 sm:$0xff]  }
 0x111   : > { %2949 = vmatprep.mubr.bf16.mxu0 %v5430_v22 }
 0x117   : > { %2661 = vmatmul.mubr.bf16.gmra.mrb[52].mxu1 %v5432_v23  ;;  %v5527_v23 = vld [vmem:[%s8850_s0 + $0xf4] ss:$28 sps:$4 sm:$0xff]  }
 0x118   : > { %2950 = vmatmul.mubr.bf16.gmra.mrb[52].mxu0 %v5433_v24  ;;  %2668 = vmatprep.mubr.bf16.mxu1 %v5434_v25 }
 0x119   : > { %2957 = vmatprep.mubr.bf16.mxu0 %v5436_v26  ;;  %v5529_v26 = vld [vmem:[%s8850_s0 + $0x620] ss:$28 sps:$4 sm:$0xff]  }
 0x11f   : > { %2669 = vmatmul.mubr.bf16.gmra.mrb[56].mxu1 %v5438_v27 }
 0x120   : > { %2958 = vmatmul.mubr.bf16.gmra.mrb[56].mxu0 %v5439_v28  ;;  %2676 = vmatprep.mubr.bf16.mxu1 %v5441_v29  ;;  %v5530_v28 = vld [vmem:[%s8850_s0 + $0xf0] ss:$28 sps:$4 sm:$0xff]   ;;  %v5531_v29 = vld [vmem:[%s8850_s0 + $0x65c] ss:$28 sps:$4 sm:$0xff]  }
 0x121   : > { %2965 = vmatprep.mubr.bf16.mxu0 %v5443_v30 }
 0x127   : > { %2677 = vmatmul.mubr.bf16.gmra.mrb[60].mxu1 %v5445_v31  ;;  %v5533_v31 = vld [vmem:[%s8850_s0 + $0x12c] ss:$28 sps:$4 sm:$0xff]  }
 0x128   : > { %2966 = vmatmul.mubr.bf16.gmra.mrb[60].mxu0 %v5446_v32  ;;  %2684 = vmatprep.mubr.bf16.mxu1 %v5448_v33 }
 0x129   : > { %2973 = vmatprep.mubr.bf16.mxu0 %v5450_v34  ;;  %v5535_v34 = vld [vmem:[%s8850_s0 + $0x658] ss:$28 sps:$4 sm:$0xff]  }
 0x12f   : > { %2685 = vmatmul.mubr.bf16.gmra.mrb[64].mxu1 %v5452_v35 }
 0x130   : > { %2974 = vmatmul.mubr.bf16.gmra.mrb[64].mxu0 %v5453_v36  ;;  %2692 = vmatprep.mubr.bf16.mxu1 %v5454_v37  ;;  %v5536_v36 = vld [vmem:[%s8850_s0 + $0x128] ss:$28 sps:$4 sm:$0xff]   ;;  %v5537_v37 = vld [vmem:[%s8850_s0 + $0x694] ss:$28 sps:$4 sm:$0xff]  }
 0x131   : > { %2981 = vmatprep.mubr.bf16.mxu0 %v5456_v38 }
 0x137   : > { %2693 = vmatmul.mubr.bf16.gmra.mrb[68].mxu1 %v5458_v40  ;;  %v5539_v40 = vld [vmem:[%s8850_s0 + $0x164] ss:$28 sps:$4 sm:$0xff]  }
 0x138   : > { %2982 = vmatmul.mubr.bf16.gmra.mrb[68].mxu0 %v5459_v41  ;;  %2700 = vmatprep.mubr.bf16.mxu1 %v5461_v42 }
 0x139   : > { %2989 = vmatprep.mubr.bf16.mxu0 %v5463_v43  ;;  %v5541_v43 = vld [vmem:[%s8850_s0 + $0x690] ss:$28 sps:$4 sm:$0xff]  }
 0x13f   : > { %2701 = vmatmul.mubr.bf16.gmra.mrb[72].mxu1 %v5465_v44 }
 0x140   : > { %2990 = vmatmul.mubr.bf16.gmra.mrb[72].mxu0 %v5466_v45  ;;  %2708 = vmatprep.mubr.bf16.mxu1 %v5468_v46  ;;  %v5542_v45 = vld [vmem:[%s8850_s0 + $0x160] ss:$28 sps:$4 sm:$0xff]   ;;  %v5543_v46 = vld [vmem:[%s8850_s0 + $0x6cc] ss:$28 sps:$4 sm:$0xff]  }
 0x141   : > { %2997 = vmatprep.mubr.bf16.mxu0 %v5470_v47 }
 0x147   : > { %2709 = vmatmul.mubr.bf16.gmra.mrb[76].mxu1 %v5472_v49  ;;  %v5545_v49 = vld [vmem:[%s8850_s0 + $0x19c] ss:$28 sps:$4 sm:$0xff]  }
 0x148   : > { %2998 = vmatmul.mubr.bf16.gmra.mrb[76].mxu0 %v5473_v50  ;;  %2716 = vmatprep.mubr.bf16.mxu1 %v5474_v51 }
 0x149   : > { %3005 = vmatprep.mubr.bf16.mxu0 %v5476_v52  ;;  %v5547_v52 = vld [vmem:[%s8850_s0 + $0x6c8] ss:$28 sps:$4 sm:$0xff]  }
 0x14f   : > { %2717 = vmatmul.mubr.bf16.gmra.mrb[80].mxu1 %v5478_v53 }
 0x150   : > { %3006 = vmatmul.mubr.bf16.gmra.mrb[80].mxu0 %v5479_v54  ;;  %2724 = vmatprep.mubr.bf16.mxu1 %v5481_v55  ;;  %v5548_v54 = vld [vmem:[%s8850_s0 + $0x198] ss:$28 sps:$4 sm:$0xff]   ;;  %v5551_v55 = vld [vmem:[%s8850_s0 + $0x54c] ss:$28 sps:$4 sm:$0xff]  }
 0x151   : > { %3013 = vmatprep.mubr.bf16.mxu0 %v5483_v56 }
 0x157   : > { %2725 = vmatmul.mubr.bf16.gmra.mrb[84].mxu1 %v5485_v57  ;;  %v5552_v57 = vld [vmem:[%s8850_s0 + $0x1d4] ss:$28 sps:$4 sm:$0xff]  }
 0x158   : > { %3014 = vmatmul.mubr.bf16.gmra.mrb[84].mxu0 %v5486_v58  ;;  %2732 = vmatprep.mubr.bf16.mxu1 %v5488_v59 }
 0x159   : > { %3021 = vmatprep.mubr.bf16.mxu0 %v5490_v60  ;;  %v5549_v60 = vld [vmem:[%s8850_s0 + $0x548] ss:$28 sps:$4 sm:$0xff]  }
 0x15f   : > { %2733 = vmatmul.mubr.bf16.gmra.mrb[88].mxu1 %v5492_v61 }
 0x160   : > { %3022 = vmatmul.mubr.bf16.gmra.mrb[88].mxu0 %v5493_v62  ;;  %2740 = vmatprep.mubr.bf16.mxu1 %v5494_v63  ;;  %v5554_v62 = vld [vmem:[%s8850_s0 + $0x1d0] ss:$28 sps:$4 sm:$0xff]  }
 0x161   : > { %3029 = vmatprep.mubr.bf16.mxu0 %v5496_v0  ;;  %v5556_v0 = vld [vmem:[%s8850_s0 + $0x584] ss:$28 sps:$4 sm:$0xff]  }
 0x167   : > { %2741 = vmatmul.mubr.bf16.gmra.mrb[92].mxu1 %v5498_v1  ;;  %v5558_v1 = vld [vmem:[%s8850_s0 + $0x20c] ss:$28 sps:$4 sm:$0xff]  }
 0x168   : > { %3030 = vmatmul.mubr.bf16.gmra.mrb[92].mxu0 %v5499_v2  ;;  %2748 = vmatprep.mubr.bf16.mxu1 %v5501_v3  ;;  %v5562_v2 = vld [vmem:[%s6014_s7 + $0x188] sm:$0xff]   ;;  %v5569_v3 = vld [vmem:[%s6014_s7 + $0x190] sm:$0xff]  }
 0x169   : > { %3134 = vmatprep.mubr.bf16.mxu0 %v5505_v4 }
 0x16f   : > { %2749 = vmatmul.mubr.bf16.gmra.mrb[96].mxu1 %v5506_v5 }
 0x170   : > { %3135 = vmatmul.mubr.bf16.vlgmr.msra.gmra.mrb[0].mxu0 %v5503_v6  ;;  %2756 = vmatprep.mubr.bf16.mxu1 %v5507_v7  ;;  %v5560_v6 = vld [vmem:[%s8850_s0 + $0x580] ss:$28 sps:$4 sm:$0xff]  }
 0x171   : > { %3142 = vmatprep.mubr.bf16.mxu0 %v5509_v8  ;;  %v5561_v8 = vld [vmem:[%s8850_s0 + $0x208] ss:$28 sps:$4 sm:$0xff]  }
 0x177   : > { %2757 = vmatmul.mubr.bf16.gmra.mrb[100].mxu1 %v5511_v9 }
 0x178   : > { %3143 = vmatmul.mubr.bf16.gmra.mrb[4].mxu0 %v5512_v10  ;;  %2764 = vmatprep.mubr.bf16.mxu1 %v5513_v48  ;;  %v5565_v10 = vld [vmem:[%s8850_s0 + $0x244] ss:$28 sps:$4 sm:$0xff]   ;;  %v5576_v48 = vld [vmem:[%s6014_s7 + $0x198] sm:$0xff]  }
 0x179   : > { %3150 = vmatprep.mubr.bf16.mxu0 %v5515_v11 }
 0x17f   : > { %2765 = vmatmul.mubr.bf16.gmra.mrb[104].mxu1 %v5517_v12  ;;  %v5583_v12 = vld [vmem:[%s6014_s7 + $0x1a0] sm:$0xff]  }
 0x180   : > { %3151 = vmatmul.mubr.bf16.gmra.mrb[8].mxu0 %v5518_v13  ;;  %2772 = vmatprep.mubr.bf16.mxu1 %v5519_v14  ;;  %v5567_v14 = vld [vmem:[%s8850_s0 + $0x5b8] ss:$28 sps:$4 sm:$0xff]  }
 0x181   : > { %3158 = vmatprep.mubr.bf16.mxu0 %v5521_v15 }
 0x182   : > { %v6518_v16 = vpop.f32.mrb[0].mxu1 }
 0x183   : > { %v2560_v17 = vpop.f32.mrb[1].mxu1 }
 0x184   : > { %v6523_v19 = vpop.f32.mrb[2].mxu1  ;;  %v5568_v17 = vld [vmem:[%s8850_s0 + $0x240] ss:$28 sps:$4 sm:$0xff]  }
 0x185   : > { %v2563_v22 = vpop.f32.mrb[3].mxu1 }
 0x186   : > { %v5590_v22 = vld [vmem:[%s6014_s7 + $0x1a8] sm:$0xff]  }
 0x187   : > { %2773 = vmatmul.mubr.bf16.gmra.mrb[108].mxu1 %v5523_v18  ;;  %v5570_v18 = vld [vmem:[%s8850_s0 + $0x5f4] ss:$28 sps:$4 sm:$0xff]  }
 0x188   : > { %3159 = vmatmul.mubr.bf16.gmra.mrb[12].mxu0 %v5524_v20  ;;  %2780 = vmatprep.mubr.bf16.mxu1 %v5525_v21  ;;  %v5572_v21 = vld [vmem:[%s8850_s0 + $0x27c] ss:$28 sps:$4 sm:$0xff]  }
 0x189   : > { %3166 = vmatprep.mubr.bf16.mxu0 %v5527_v23 }
 0x18a   : > { %v6534_v24 = vpop.f32.mrb[4].mxu1 }
 0x18b   : > { %v2568_v25 = vpop.f32.mrb[5].mxu1 }
 0x18c   : > { %v6539_v27 = vpop.f32.mrb[6].mxu1  ;;  %v5597_v25 = vld [vmem:[%s6014_s7 + $0x1b0] sm:$0xff]  }
 0x18d   : > { %v2571_v30 = vpop.f32.mrb[7].mxu1 }
 0x18e   : > { %v5575_v30 = vld [vmem:[%s8850_s0 + $0x278] ss:$28 sps:$4 sm:$0xff]  }
 0x18f   : > { %2781 = vmatmul.mubr.bf16.gmra.mrb[112].mxu1 %v5529_v26 }
 0x190   : > { %3167 = vmatmul.mubr.bf16.gmra.mrb[16].mxu0 %v5530_v28  ;;  %2788 = vmatprep.mubr.bf16.mxu1 %v5531_v29  ;;  %v5574_v28 = vld [vmem:[%s8850_s0 + $0x5f0] ss:$28 sps:$4 sm:$0xff]  }
 0x191   : > { %3174 = vmatprep.mubr.bf16.mxu0 %v5533_v31  ;;  %v5577_v31 = vld [vmem:[%s8850_s0 + $0x62c] ss:$28 sps:$4 sm:$0xff]  }
 0x192   : > { %v6550_v32 = vpop.f32.mrb[8].mxu1 }
 0x193   : > { %v2576_v33 = vpop.f32.mrb[9].mxu1 }
 0x194   : > { %v6555_v35 = vpop.f32.mrb[10].mxu1 }
 0x195   : > { %v2579_v38 = vpop.f32.mrb[11].mxu1 }
 0x197   : > { %2789 = vmatmul.mubr.bf16.gmra.mrb[116].mxu1 %v5535_v34  ;;  %v5579_v34 = vld [vmem:[%s8850_s0 + $0x2b4] ss:$28 sps:$4 sm:$0xff]  }
 0x198   : > { %3175 = vmatmul.mubr.bf16.gmra.mrb[20].mxu0 %v5536_v36  ;;  %2796 = vmatprep.mubr.bf16.mxu1 %v5537_v37  ;;  %v5604_v36 = vld [vmem:[%s6014_s7 + $0x1b8] sm:$0xff]   ;;  %s8713_s7 = scalar_lea.vmem (%p5763_p5), %s8853_s3, %s4935_s28 }
 0x199   : > { %3182 = vmatprep.mubr.bf16.mxu0 %v5539_v40  ;;  %v5581_v40 = vld [vmem:[%s8850_s0 + $0x628] ss:$28 sps:$4 sm:$0xff]  }
 0x19a   : > { %v6566_v41 = vpop.f32.mrb[12].mxu1 }
 0x19b   : > { %v2584_v42 = vpop.f32.mrb[13].mxu1 }
 0x19c   : > { %v6571_v44 = vpop.f32.mrb[14].mxu1 }
 0x19d   : > { %v2587_v47 = vpop.f32.mrb[15].mxu1 }
 0x19e   : > { %v5586_v47 = vld [vmem:[%s8850_s0 + $0x2ec] ss:$28 sps:$4 sm:$0xff]  }
 0x19f   : > { %2797 = vmatmul.mubr.bf16.gmra.mrb[120].mxu1 %v5541_v43  ;;  %v5582_v43 = vld [vmem:[%s8850_s0 + $0x2b0] ss:$28 sps:$4 sm:$0xff]  }
 0x1a0   : > { %3183 = vmatmul.mubr.bf16.gmra.mrb[24].mxu0 %v5542_v45  ;;  %2804 = vmatprep.mubr.bf16.mxu1 %v5543_v46  ;;  %v5584_v45 = vld [vmem:[%s8850_s0 + $0x664] ss:$28 sps:$4 sm:$0xff]  }
 0x1a1   : > { %3190 = vmatprep.mubr.bf16.mxu0 %v5545_v49 }
 0x1a2   : > { %v6582_v50 = vpop.f32.mrb[16].mxu1 }
 0x1a3   : > { %v2592_v51 = vpop.f32.mrb[17].mxu1 }
 0x1a4   : > { %v6587_v53 = vpop.f32.mrb[18].mxu1 }
 0x1a5   : > { %v2595_v56 = vpop.f32.mrb[19].mxu1 }
 0x1a6   : > { %v5591_v56 = vld [vmem:[%s8850_s0 + $0x69c] ss:$28 sps:$4 sm:$0xff]  }
 0x1a7   : > { %2805 = vmatmul.mubr.bf16.gmra.mrb[124].mxu1 %v5547_v52  ;;  %v5588_v52 = vld [vmem:[%s8850_s0 + $0x660] ss:$28 sps:$4 sm:$0xff]  }
 0x1a8   : > { %3191 = vmatmul.mubr.bf16.gmra.mrb[28].mxu0 %v5548_v54  ;;  %3037 = vmatprep.mubr.bf16.mxu1 %v5551_v55  ;;  %v5589_v55 = vld [vmem:[%s8850_s0 + $0x2e8] ss:$28 sps:$4 sm:$0xff]  }
 0x1a9   : > { %3198 = vmatprep.mubr.bf16.mxu0 %v5552_v57 }
 0x1aa   : > { %v6598_v58 = vpop.f32.mrb[20].mxu1 }
 0x1ab   : > { %v2600_v59 = vpop.f32.mrb[21].mxu1 }
 0x1ac   : > { %v6603_v61 = vpop.f32.mrb[22].mxu1  ;;  %v5593_v59 = vld [vmem:[%s8850_s0 + $0x324] ss:$28 sps:$4 sm:$0xff]  }
 0x1ad   : > { %v2603_v63 = vpop.f32.mrb[23].mxu1 }
 0x1ae   : > { %v5595_v63 = vld [vmem:[%s8850_s0 + $0x698] ss:$28 sps:$4 sm:$0xff]  }
 0x1af   : > { %3038 = vmatmul.mubr.bf16.vlgmr.msra.gmra.mrb[96].mxu1 %v5549_v60 }
 0x1b0   : > { %3199 = vmatmul.mubr.bf16.gmra.mrb[32].mxu0 %v5554_v62  ;;  %4979 = vmatpush3.bf16.msra.mxu1 %v6395_v39  ;;  %v5563_v39 = vld [vmem:[%s8850_s0 + $0x5bc] ss:$28 sps:$4 sm:$0xff]  }
 0x1b1   : > { %3045 = vmatprep.mubr.bf16.mxu1 %v5556_v0  ;;  %3206 = vmatprep.mubr.bf16.mxu0 %v5558_v1  ;;  %v5596_v1 = vld [vmem:[%s8850_s0 + $0x320] ss:$28 sps:$4 sm:$0xff]  }
 0x1b2   : > { %v6617_v4 = vpop.f32.mrb[24].mxu1  ;;  %4980 = vmatprep.subr.bf16.mxu1 %v5562_v2 }
 0x1b3   : > { %v2608_v5 = vpop.f32.mrb[25].mxu1 }
 0x1b4   : > { %v6622_v7 = vpop.f32.mrb[26].mxu1  ;;  %4981 = vmatpush3.bf16.msra.mxu1 %v5562_v2  ;;  %v5598_v2 = vld [vmem:[%s8850_s0 + $0x6d4] ss:$28 sps:$4 sm:$0xff]   ;;  %v5600_v5 = vld [vmem:[%s8850_s0 + $0x35c] ss:$28 sps:$4 sm:$0xff]  }
 0x1b5   : > { %v2611_v9 = vpop.f32.mrb[27].mxu1  ;;  %4982 = vmatprep.subr.bf16.mxu1 %v5569_v3 }
 0x1b7   : > { %3046 = vmatmul.mubr.bf16.gmra.mrb[100].mxu1 %v5560_v6 }
 0x1b8   : > { %3207 = vmatmul.mubr.bf16.gmra.mrb[36].mxu0 %v5561_v8  ;;  %3053 = vmatprep.mubr.bf16.mxu1 %v5563_v39  ;;  %v5602_v39 = vld [vmem:[%s8850_s0 + $0x6d0] ss:$28 sps:$4 sm:$0xff]  }
 0x1b9   : > { %3214 = vmatprep.mubr.bf16.mxu0 %v5565_v10  ;;  %4983 = vmatpush3.bf16.msra.mxu1 %v5569_v3  ;;  %v5603_v10 = vld [vmem:[%s8850_s0 + $0x358] ss:$28 sps:$4 sm:$0xff]  }
 0x1ba   : > { %v6634_v11 = vpop.f32.mrb[28].mxu1  ;;  %4984 = vmatprep.subr.bf16.mxu1 %v5576_v48 }
 0x1bb   : > { %v2616_v13 = vpop.f32.mrb[29].mxu1 }
 0x1bc   : > { %v6640_v15 = vpop.f32.mrb[30].mxu1  ;;  %v5605_v13 = vld [vmem:[%s8850_s0 + $0x394] ss:$28 sps:$4 sm:$0xff]  }
 0x1bd   : > { %v2619_v20 = vpop.f32.mrb[31].mxu1  ;;  %4985 = vmatpush3.bf16.msra.mxu1 %v5576_v48  ;;  %v5607_v48 = vld [vmem:[%s8850_s0 + $0x18] ss:$28 sps:$4 sm:$0xff]  }
 0x1be   : > { %4986 = vmatprep.subr.bf16.mxu1 %v5583_v12 }
 0x1bf   : > { %3054 = vmatmul.mubr.bf16.gmra.mrb[104].mxu1 %v5567_v14 }
 0x1c0   : > { %3215 = vmatmul.mubr.bf16.gmra.mrb[40].mxu0 %v5568_v17  ;;  %3061 = vmatprep.mubr.bf16.mxu1 %v5570_v18  ;;  %v5609_v18 = vld [vmem:[%s8850_s0 + $0x50] ss:$28 sps:$4 sm:$0xff]  }
 0x1c1   : > { %3222 = vmatprep.mubr.bf16.mxu0 %v5572_v21  ;;  %4987 = vmatpush3.bf16.msra.mxu1 %v5583_v12  ;;  %v5608_v21 = vld [vmem:[%s8850_s0 + $0x390] ss:$28 sps:$4 sm:$0xff]  }
 0x1c2   : > { %v6652_v23 = vpop.f32.mrb[32].mxu1  ;;  %4988 = vmatprep.subr.bf16.mxu1 %v5590_v22 }
 0x1c3   : > { %v2624_v26 = vpop.f32.mrb[33].mxu1 }
 0x1c4   : > { %v6658_v29 = vpop.f32.mrb[34].mxu1  ;;  %v5610_v26 = vld [vmem:[%s8850_s0 + $0x3cc] ss:$28 sps:$4 sm:$0xff]  }
 0x1c5   : > { %v2627_v33 = vpop.f32.mrb[35].mxu1  ;;  %4989 = vmatpush3.bf16.msra.mxu1 %v5590_v22  ;;  %v5612_v22 = vld [vmem:[%s8850_s0 + $0x88] ss:$28 sps:$4 sm:$0xff]  }
 0x1c6   : > { %4990 = vmatprep.subr.bf16.mxu1 %v5597_v25 }
 0x1c7   : > { %3062 = vmatmul.mubr.bf16.gmra.mrb[108].mxu1 %v5574_v28 }
 0x1c8   : > { %3223 = vmatmul.mubr.bf16.gmra.mrb[44].mxu0 %v5575_v30  ;;  %3069 = vmatprep.mubr.bf16.mxu1 %v5577_v31  ;;  %v5614_v31 = vld [vmem:[%s8850_s0 + $0xc0] ss:$28 sps:$4 sm:$0xff]  }
 0x1c9   : > { %3230 = vmatprep.mubr.bf16.mxu0 %v5579_v34  ;;  %4991 = vmatpush3.bf16.msra.mxu1 %v5597_v25  ;;  %v5613_v34 = vld [vmem:[%s8850_s0 + $0x3c8] ss:$28 sps:$4 sm:$0xff]  }
 0x1ca   : > { %v6670_v37 = vpop.f32.mrb[36].mxu1  ;;  %4992 = vmatprep.subr.bf16.mxu1 %v5604_v36 }
 0x1cb   : > { %v2632_v38 = vpop.f32.mrb[37].mxu1 }
 0x1cc   : > { %v6675_v42 = vpop.f32.mrb[38].mxu1 }
 0x1cd   : > { %v2635_v46 = vpop.f32.mrb[39].mxu1  ;;  %4993 = vmatpush3.bf16.msra.mxu1 %v5604_v36  ;;  %v5617_v36 = vld [vmem:[%s8850_s0 + $0xf8] ss:$28 sps:$4 sm:$0xff]  }
 0x1ce   : > { %v5619_v46 = vld [vmem:[%s8850_s0 + $0x130] ss:$28 sps:$4 sm:$0xff]  }
 0x1cf   : > { %3070 = vmatmul.mubr.bf16.gmra.mrb[112].mxu1 %v5581_v40  ;;  %v5615_v40 = vld [vmem:[%s8850_s0 + $0x404] ss:$28 sps:$4 sm:$0xff]  }
 0x1d0   : > { %3231 = vmatmul.mubr.bf16.gmra.mrb[48].mxu0 %v5582_v43  ;;  %3077 = vmatprep.mubr.bf16.mxu1 %v5584_v45 }
 0x1d1   : > { %3238 = vmatprep.mubr.bf16.mxu0 %v5586_v47 }
 0x1d2   : > { %v6686_v49 = vpop.f32.mrb[40].mxu1 }
 0x1d3   : > { %v2640_v51 = vpop.f32.mrb[41].mxu1 }
 0x1d4   : > { %v6691_v54 = vpop.f32.mrb[42].mxu1  ;;  %v5618_v51 = vld [vmem:[%s8850_s0 + $0x400] ss:$28 sps:$4 sm:$0xff]  }
 0x1d5   : > { %v2643_v57 = vpop.f32.mrb[43].mxu1 }
 0x1d7   : > { %3078 = vmatmul.mubr.bf16.gmra.mrb[116].mxu1 %v5588_v52  ;;  %v5622_v52 = vld [vmem:[%s8850_s0 + $0x168] ss:$28 sps:$4 sm:$0xff]  }
 0x1d8   : > { %3239 = vmatmul.mubr.bf16.gmra.mrb[52].mxu0 %v5589_v55  ;;  %3085 = vmatprep.mubr.bf16.mxu1 %v5591_v56  ;;  %v5620_v56 = vld [vmem:[%s8850_s0 + $0x43c] ss:$28 sps:$4 sm:$0xff]  }
 0x1d9   : > { %3246 = vmatprep.mubr.bf16.mxu0 %v5593_v59 }
 0x1da   : > { %v6702_v60 = vpop.f32.mrb[44].mxu1 }
 0x1db   : > { %v2648_v62 = vpop.f32.mrb[45].mxu1 }
 0x1dc   : > { %v6707_v0 = vpop.f32.mrb[46].mxu1  ;;  %v5624_v62 = vld [vmem:[%s8850_s0 + $0x1a0] ss:$28 sps:$4 sm:$0xff]  }
 0x1dd   : > { %v2651_v3 = vpop.f32.mrb[47].mxu1 }
 0x1df   : > { %3086 = vmatmul.mubr.bf16.gmra.mrb[120].mxu1 %v5595_v63 }
 0x1e0   : > { %3247 = vmatmul.mubr.bf16.gmra.mrb[56].mxu0 %v5596_v1  ;;  %3093 = vmatprep.mubr.bf16.mxu1 %v5598_v2  ;;  %v5623_v1 = vld [vmem:[%s8850_s0 + $0x438] ss:$28 sps:$4 sm:$0xff]  }
 0x1e1   : > { %3254 = vmatprep.mubr.bf16.mxu0 %v5600_v5  ;;  %v5627_v2 = vld [vmem:[%s8850_s0 + $0x1d8] ss:$28 sps:$4 sm:$0xff]  }
 0x1e2   : > { %v6718_v6 = vpop.f32.mrb[48].mxu1  ;;  %v5625_v5 = vld [vmem:[%s8850_s0 + $0x474] ss:$28 sps:$4 sm:$0xff]  }
 0x1e3   : > { %v2656_v8 = vpop.f32.mrb[49].mxu1 }
 0x1e4   : > { %v6723_v9 = vpop.f32.mrb[50].mxu1 }
 0x1e5   : > { %v2659_v12 = vpop.f32.mrb[51].mxu1 }
 0x1e6   : > { %v5628_v12 = vld [vmem:[%s8850_s0 + $0x470] ss:$28 sps:$4 sm:$0xff]  }
 0x1e7   : > { %3094 = vmatmul.mubr.bf16.gmra.mrb[124].mxu1 %v5602_v39 }
 0x1e8   : > { %3255 = vmatmul.mubr.bf16.gmra.mrb[60].mxu0 %v5603_v10  ;;  %4994 = vmatprep.mubr.bf16.mxu1 %v5607_v48  ;;  %v5629_v10 = vld [vmem:[%s8850_s0 + $0x210] ss:$28 sps:$4 sm:$0xff]  }
 0x1e9   : > { %3262 = vmatprep.mubr.bf16.mxu0 %v5605_v13  ;;  %v5632_v13 = vld [vmem:[%s8850_s0 + $0x248] ss:$28 sps:$4 sm:$0xff]  }
 0x1ea   : > { %v6734_v14 = vpop.f32.mrb[52].mxu1 }
 0x1eb   : > { %v2664_v17 = vpop.f32.mrb[53].mxu1 }
 0x1ec   : > { %v6739_v20 = vpop.f32.mrb[54].mxu1 }
 0x1ed   : > { %v2667_v25 = vpop.f32.mrb[55].mxu1 }
 0x1ee   : > { %v5634_v25 = vld [vmem:[%s8850_s0 + $0x280] ss:$28 sps:$4 sm:$0xff]  }
 0x1ef   : > { %4995 = vmatmul.mubr.bf16.vlgmr.msra.gmra.mrb[128].mxu1 %v5609_v18  ;;  %v5630_v18 = vld [vmem:[%s8850_s0 + $0x4ac] ss:$28 sps:$4 sm:$0xff]  }
 0x1f0   : > { %3263 = vmatmul.mubr.bf16.gmra.mrb[64].mxu0 %v5608_v21  ;;  %4998 = vmatprep.mubr.bf16.mxu1 %v5612_v22 }
 0x1f1   : > { %3270 = vmatprep.mubr.bf16.mxu0 %v5610_v26 }
 0x1f2   : > { %v6750_v28 = vpop.f32.mrb[56].mxu1 }
 0x1f3   : > { %v2672_v30 = vpop.f32.mrb[57].mxu1 }
 0x1f4   : > { %v6755_v33 = vpop.f32.mrb[58].mxu1  ;;  %v5633_v30 = vld [vmem:[%s8850_s0 + $0x4a8] ss:$28 sps:$4 sm:$0xff]  }
 0x1f5   : > { %v2675_v38 = vpop.f32.mrb[59].mxu1 }
 0x1f7   : > { %4999 = vmatmul.mubr.bf16.gmra.mrb[132].mxu1 %v5614_v31  ;;  %v5637_v31 = vld [vmem:[%s8850_s0 + $0x2b8] ss:$28 sps:$4 sm:$0xff]  }
 0x1f8   : > { %3271 = vmatmul.mubr.bf16.gmra.mrb[68].mxu0 %v5613_v34  ;;  %5002 = vmatprep.mubr.bf16.mxu1 %v5617_v36  ;;  %v5635_v36 = vld [vmem:[%s8850_s0 + $0x4e4] ss:$28 sps:$4 sm:$0xff]  }
 0x1f9   : > { %3278 = vmatprep.mubr.bf16.mxu0 %v5615_v40 }
 0x1fa   : > { %v6766_v43 = vpop.f32.mrb[60].mxu1 }
 0x1fb   : > { %v2680_v45 = vpop.f32.mrb[61].mxu1 }
 0x1fc   : > { %v6771_v47 = vpop.f32.mrb[62].mxu1  ;;  %v5639_v45 = vld [vmem:[%s8850_s0 + $0x2f0] ss:$28 sps:$4 sm:$0xff]  }
 0x1fd   : > { %v2683_v55 = vpop.f32.mrb[63].mxu1 }
 0x1ff   : > { %5003 = vmatmul.mubr.bf16.gmra.mrb[136].mxu1 %v5619_v46 }
 0x200   : > { %3279 = vmatmul.mubr.bf16.gmra.mrb[72].mxu0 %v5618_v51  ;;  %5006 = vmatprep.mubr.bf16.mxu1 %v5622_v52  ;;  %v5638_v51 = vld [vmem:[%s8850_s0 + $0x4e0] ss:$28 sps:$4 sm:$0xff]   ;;  %v5642_v52 = vld [vmem:[%s8850_s0 + $0x328] ss:$28 sps:$4 sm:$0xff]  }
 0x201   : > { %3286 = vmatprep.mubr.bf16.mxu0 %v5620_v56  ;;  %v5640_v56 = vld [vmem:[%s8850_s0 + $0x51c] ss:$28 sps:$4 sm:$0xff]  }
 0x202   : > { %v6782_v57 = vpop.f32.mrb[64].mxu1 }
 0x203   : > { %v2688_v59 = vpop.f32.mrb[65].mxu1 }
 0x204   : > { %v6787_v63 = vpop.f32.mrb[66].mxu1 }
 0x205   : > { %v2691_v3 = vpop.f32.mrb[67].mxu1 }
 0x206   : > { %v5643_v3 = vld [vmem:[%s8850_s0 + $0x518] ss:$28 sps:$4 sm:$0xff]  }
 0x207   : > { %5007 = vmatmul.mubr.bf16.gmra.mrb[140].mxu1 %v5624_v62 }
 0x208   : > { %3287 = vmatmul.mubr.bf16.gmra.mrb[76].mxu0 %v5623_v1  ;;  %5010 = vmatprep.mubr.bf16.mxu1 %v5627_v2  ;;  %v5644_v1 = vld [vmem:[%s8850_s0 + $0x360] ss:$28 sps:$4 sm:$0xff]  }
 0x209   : > { %3294 = vmatprep.mubr.bf16.mxu0 %v5625_v5  ;;  %v5647_v5 = vld [vmem:[%s8850_s0 + $0x398] ss:$28 sps:$4 sm:$0xff]  }
 0x20a   : > { %v6798_v8 = vpop.f32.mrb[68].mxu1 }
 0x20b   : > { %v2696_v39 = vpop.f32.mrb[69].mxu1 }
 0x20c   : > { %v6803_v48 = vpop.f32.mrb[70].mxu1 }
 0x20d   : > { %v2699_v17 = vpop.f32.mrb[71].mxu1 }
 0x20e   : > { %v5649_v17 = vld [vmem:[%s8850_s0 + $0x3d0] ss:$28 sps:$4 sm:$0xff]  }
 0x20f   : > { %5011 = vmatmul.mubr.bf16.gmra.mrb[144].mxu1 %v5629_v10  ;;  %v5645_v10 = vld [vmem:[%s8850_s0 + $0x554] ss:$28 sps:$4 sm:$0xff]  }
 0x210   : > { %3295 = vmatmul.mubr.bf16.gmra.mrb[80].mxu0 %v5628_v12  ;;  %5014 = vmatprep.mubr.bf16.mxu1 %v5632_v13 }
 0x211   : > { %3302 = vmatprep.mubr.bf16.mxu0 %v5630_v18 }
 0x212   : > { %v6814_v21 = vpop.f32.mrb[72].mxu1 }
 0x213   : > { %v2704_v22 = vpop.f32.mrb[73].mxu1 }
 0x214   : > { %v6819_v26 = vpop.f32.mrb[74].mxu1  ;;  %v5648_v22 = vld [vmem:[%s8850_s0 + $0x550] ss:$28 sps:$4 sm:$0xff]  }
 0x215   : > { %v2707_v34 = vpop.f32.mrb[75].mxu1 }
 0x217   : > { %5015 = vmatmul.mubr.bf16.gmra.mrb[148].mxu1 %v5634_v25  ;;  %v5652_v25 = vld [vmem:[%s8850_s0 + $0x408] ss:$28 sps:$4 sm:$0xff]  }
 0x218   : > { %3303 = vmatmul.mubr.bf16.gmra.mrb[84].mxu0 %v5633_v30  ;;  %5018 = vmatprep.mubr.bf16.mxu1 %v5637_v31  ;;  %v5650_v31 = vld [vmem:[%s8850_s0 + $0x58c] ss:$28 sps:$4 sm:$0xff]  }
 0x219   : > { %3310 = vmatprep.mubr.bf16.mxu0 %v5635_v36 }
 0x21a   : > { %v6830_v38 = vpop.f32.mrb[76].mxu1 }
 0x21b   : > { %v2712_v40 = vpop.f32.mrb[77].mxu1 }
 0x21c   : > { %v6835_v46 = vpop.f32.mrb[78].mxu1  ;;  %v5654_v40 = vld [vmem:[%s8850_s0 + $0x440] ss:$28 sps:$4 sm:$0xff]  }
 0x21d   : > { %v2715_v55 = vpop.f32.mrb[79].mxu1 }
 0x21f   : > { %5019 = vmatmul.mubr.bf16.gmra.mrb[152].mxu1 %v5639_v45 }
 0x220   : > { %3311 = vmatmul.mubr.bf16.gmra.mrb[88].mxu0 %v5638_v51  ;;  %5022 = vmatprep.mubr.bf16.mxu1 %v5642_v52  ;;  %v5653_v51 = vld [vmem:[%s8850_s0 + $0x588] ss:$28 sps:$4 sm:$0xff]   ;;  %v5657_v52 = vld [vmem:[%s8850_s0 + $0x478] ss:$28 sps:$4 sm:$0xff]  }
 0x221   : > { %3318 = vmatprep.mubr.bf16.mxu0 %v5640_v56  ;;  %v5655_v56 = vld [vmem:[%s8850_s0 + $0x5c4] ss:$28 sps:$4 sm:$0xff]  }
 0x222   : > { %v6846_v59 = vpop.f32.mrb[80].mxu1 }
 0x223   : > { %v2720_v62 = vpop.f32.mrb[81].mxu1 }
 0x224   : > { %v6851_v2 = vpop.f32.mrb[82].mxu1 }
 0x225   : > { %v2723_v39 = vpop.f32.mrb[83].mxu1 }
 0x226   : > { %v5658_v39 = vld [vmem:[%s8850_s0 + $0x5c0] ss:$28 sps:$4 sm:$0xff]  }
 0x227   : > { %5023 = vmatmul.mubr.bf16.gmra.mrb[156].mxu1 %v5644_v1 }
 0x228   : > { %3319 = vmatmul.mubr.bf16.gmra.mrb[92].mxu0 %v5643_v3  ;;  %5026 = vmatprep.mubr.bf16.mxu1 %v5647_v5  ;;  %v5659_v3 = vld [vmem:[%s8850_s0 + $0x4b0] ss:$28 sps:$4 sm:$0xff]  }
 0x229   : > { %3326 = vmatprep.mubr.bf16.mxu0 %v5645_v10  ;;  %v5662_v10 = vld [vmem:[%s8850_s0 + $0x4e8] ss:$28 sps:$4 sm:$0xff]  }
 0x22a   : > { %v6862_v12 = vpop.f32.mrb[84].mxu1 }
 0x22b   : > { %v2728_v13 = vpop.f32.mrb[85].mxu1 }
 0x22c   : > { %v6867_v18 = vpop.f32.mrb[86].mxu1 }
 0x22d   : > { %v2731_v30 = vpop.f32.mrb[87].mxu1 }
 0x22f   : > { %5027 = vmatmul.mubr.bf16.gmra.mrb[160].mxu1 %v5649_v17  ;;  %v5660_v17 = vld [vmem:[%s8850_s0 + $0x5fc] ss:$28 sps:$4 sm:$0xff]  }
 0x230   : > { %3327 = vmatmul.mubr.bf16.gmra.mrb[96].mxu0 %v5648_v22  ;;  %5030 = vmatprep.mubr.bf16.mxu1 %v5652_v25  ;;  %v5664_v25 = vld [vmem:[%s8850_s0 + $0x520] ss:$28 sps:$4 sm:$0xff]  }
 0x231   : > { %3334 = vmatprep.mubr.bf16.mxu0 %v5650_v31 }
 0x232   : > { %v6878_v34 = vpop.f32.mrb[88].mxu1 }
 0x233   : > { %v2736_v36 = vpop.f32.mrb[89].mxu1 }
 0x234   : > { %v6883_v45 = vpop.f32.mrb[90].mxu1  ;;  %v5663_v36 = vld [vmem:[%s8850_s0 + $0x5f8] ss:$28 sps:$4 sm:$0xff]  }
 0x235   : > { %v2739_v55 = vpop.f32.mrb[91].mxu1 }
 0x237   : > { %5031 = vmatmul.mubr.bf16.gmra.mrb[164].mxu1 %v5654_v40  ;;  %v5667_v40 = vld [vmem:[%s8850_s0 + $0x558] ss:$28 sps:$4 sm:$0xff]  }
 0x238   : > { %3335 = vmatmul.mubr.bf16.gmra.mrb[100].mxu0 %v5653_v51  ;;  %5034 = vmatprep.mubr.bf16.mxu1 %v5657_v52  ;;  %v5665_v52 = vld [vmem:[%s8850_s0 + $0x634] ss:$28 sps:$4 sm:$0xff]  }
 0x239   : > { %3342 = vmatprep.mubr.bf16.mxu0 %v5655_v56 }
 0x23a   : > { %v6894_v62 = vpop.f32.mrb[92].mxu1 }
 0x23b   : > { %v2744_v1 = vpop.f32.mrb[93].mxu1 }
 0x23c   : > { %v6899_v5 = vpop.f32.mrb[94].mxu1  ;;  %v5669_v1 = vld [vmem:[%s8850_s0 + $0x590] ss:$28 sps:$4 sm:$0xff]  }
 0x23d   : > { %v2747_v13 = vpop.f32.mrb[95].mxu1 }
 0x23f   : > { %5035 = vmatmul.mubr.bf16.gmra.mrb[168].mxu1 %v5659_v3 }
 0x240   : > { %3343 = vmatmul.mubr.bf16.gmra.mrb[104].mxu0 %v5658_v39  ;;  %5038 = vmatprep.mubr.bf16.mxu1 %v5662_v10  ;;  %v5668_v10 = vld [vmem:[%s8850_s0 + $0x630] ss:$28 sps:$4 sm:$0xff]  }
 0x241   : > { %3350 = vmatprep.mubr.bf16.mxu0 %v5660_v17  ;;  %v5670_v17 = vld [vmem:[%s8850_s0 + $0x66c] ss:$28 sps:$4 sm:$0xff]  }
 0x243   : > { %v3136_v22 = vpop.f32.mrb[0].mxu0 }
 0x244   : > { %v6914_v30 = vadd.f32 %v3136_v22, %v6518_v16  ;;  %v3138_v31 = vpop.f32.mrb[1].mxu0 }
 0x245   : > { %v3139_v51 = vpop.f32.mrb[2].mxu0  ;;  %v5674_v31 = vld [vmem:[%s8850_s0 + $0x600] ss:$28 sps:$4 sm:$0xff]  }
 0x246   : > { %v6926_v55 = vadd.f32 %v3139_v51, %v6523_v19  ;;  %v3141_v56 = vpop.f32.mrb[3].mxu0  ;;  %v5672_v19 = vld [vmem:[%s8850_s0 + $0x5c8] ss:$28 sps:$4 sm:$0xff]  }
 0x247   : > { %5039 = vmatmul.mubr.bf16.gmra.mrb[172].mxu1 %v5664_v25  ;;  %v5673_v51 = vld [vmem:[%s8850_s0 + $0x668] ss:$28 sps:$4 sm:$0xff]  }
 0x248   : > { %3351 = vmatmul.mubr.bf16.gmra.mrb[108].mxu0 %v5663_v36  ;;  %5042 = vmatprep.mubr.bf16.mxu1 %v5667_v40  ;;  %v5675_v56 = vld [vmem:[%s8850_s0 + $0x6a4] ss:$28 sps:$4 sm:$0xff]  }
 0x249   : > { %3358 = vmatprep.mubr.bf16.mxu0 %v5665_v52 }
 0x24b   : > { %v3144_v16 = vpop.f32.mrb[4].mxu0 }
 0x24c   : > { %v6932_v3 = vadd.f32 %v3144_v16, %v6534_v24  ;;  %v3146_v39 = vpop.f32.mrb[5].mxu0 }
 0x24d   : > { %v3147_v13 = vpop.f32.mrb[6].mxu0  ;;  %v5679_v39 = vld [vmem:[%s8850_s0 + $0x670] ss:$28 sps:$4 sm:$0xff]  }
 0x24e   : > { %v6944_v22 = vadd.f32 %v3147_v13, %v6539_v27  ;;  %v3149_v25 = vpop.f32.mrb[7].mxu0  ;;  %v5677_v27 = vld [vmem:[%s8850_s0 + $0x638] ss:$28 sps:$4 sm:$0xff]   ;;  %v5678_v13 = vld [vmem:[%s8850_s0 + $0x6a0] ss:$28 sps:$4 sm:$0xff]  }
 0x24f   : > { %5043 = vmatmul.mubr.bf16.gmra.mrb[176].mxu1 %v5669_v1  ;;  %v5680_v25 = vld [vmem:[%s8850_s0 + $0x6dc] ss:$28 sps:$4 sm:$0xff]  }
 0x250   : > { %3359 = vmatmul.mubr.bf16.gmra.mrb[112].mxu0 %v5668_v10  ;;  %5046 = vmatprep.mubr.bf16.mxu1 %v5672_v19 }
 0x251   : > { %3366 = vmatprep.mubr.bf16.mxu0 %v5670_v17 }
 0x253   : > { %v3152_v24 = vpop.f32.mrb[8].mxu0 }
 0x254   : > { %v6950_v36 = vadd.f32 %v3152_v24, %v6550_v32  ;;  %v3154_v40 = vpop.f32.mrb[9].mxu0 }
 0x255   : > { %v3155_v52 = vpop.f32.mrb[10].mxu0  ;;  %v5684_v40 = vld [vmem:[%s8850_s0 + $0x6e0] ss:$28 sps:$4 sm:$0xff]  }
 0x256   : > { %v6962_v16 = vadd.f32 %v3155_v52, %v6555_v35  ;;  %v3157_v1 = vpop.f32.mrb[11].mxu0  ;;  %v5682_v35 = vld [vmem:[%s8850_s0 + $0x6a8] ss:$28 sps:$4 sm:$0xff]   ;;  %v5683_v52 = vld [vmem:[%s8850_s0 + $0x6d8] ss:$28 sps:$4 sm:$0xff]  }
 0x257   : > { %5047 = vmatmul.mubr.bf16.gmra.mrb[180].mxu1 %v5674_v31 }
 0x258   : > { %3367 = vmatmul.mubr.bf16.gmra.mrb[116].mxu0 %v5673_v51  ;;  %5050 = vmatprep.mubr.bf16.mxu1 %v5677_v27 }
 0x259   : > { %3374 = vmatprep.mubr.bf16.mxu0 %v5675_v56 }
 0x25b   : > { %v3160_v32 = vpop.f32.mrb[12].mxu0 }
 0x25c   : > { %v6968_v10 = vadd.f32 %v3160_v32, %v6566_v41  ;;  %v3162_v19 = vpop.f32.mrb[13].mxu0 }
 0x25d   : > { %v3163_v17 = vpop.f32.mrb[14].mxu0 }
 0x25e   : > { %v6980_v24 = vadd.f32 %v3163_v17, %v6571_v44  ;;  %v3165_v31 = vpop.f32.mrb[15].mxu0 }
 0x25f   : > { %5051 = vmatmul.mubr.bf16.gmra.mrb[184].mxu1 %v5679_v39 }
 0x260   : > { %3375 = vmatmul.mubr.bf16.gmra.mrb[120].mxu0 %v5678_v13  ;;  %5054 = vmatprep.mubr.bf16.mxu1 %v5682_v35 }
 0x261   : > { %3382 = vmatprep.mubr.bf16.mxu0 %v5680_v25 }
 0x263   : > { %v3168_v41 = vpop.f32.mrb[16].mxu0 }
 0x264   : > { %v6986_v51 = vadd.f32 %v3168_v41, %v6582_v50  ;;  %v3170_v27 = vpop.f32.mrb[17].mxu0 }
 0x265   : > { %v3171_v44 = vpop.f32.mrb[18].mxu0 }
 0x266   : > { %v6992_v56 = vadd.f32 %v3171_v44, %v6587_v53  ;;  %v3173_v1 = vpop.f32.mrb[19].mxu0 }
 0x267   : > { %5055 = vmatmul.mubr.bf16.gmra.mrb[188].mxu1 %v5684_v40 }
 0x268   : > { %3383 = vmatmul.mubr.bf16.gmra.mrb[124].mxu0 %v5683_v52 }
 0x26b   : > { %v3176_v32 = vpop.f32.mrb[20].mxu0 }
 0x26c   : > { %v6995_v39 = vadd.f32 %v3176_v32, %v6598_v58  ;;  %v3178_v19 = vpop.f32.mrb[21].mxu0 }
 0x26d   : > { %v3179_v13 = vpop.f32.mrb[22].mxu0 }
 0x26e   : > { %v6998_v50 = vadd.f32 %v3179_v13, %v6603_v61  ;;  %v3181_v35 = vpop.f32.mrb[23].mxu0 }
 0x273   : > { %v3184_v17 = vpop.f32.mrb[24].mxu0 }
 0x274   : > { %v7001_v25 = vadd.f32 %v3184_v17, %v6617_v4  ;;  %v3186_v31 = vpop.f32.mrb[25].mxu0 }
 0x275   : > { %v3187_v53 = vpop.f32.mrb[26].mxu0 }
 0x276   : > { %v7004_v41 = vadd.f32 %v3187_v53, %v6622_v7  ;;  %v3189_v40 = vpop.f32.mrb[27].mxu0 }
 0x27b   : > { %v3192_v27 = vpop.f32.mrb[28].mxu0 }
 0x27c   : > { %v7007_v58 = vadd.f32 %v3192_v27, %v6634_v11  ;;  %v3194_v52 = vpop.f32.mrb[29].mxu0 }
 0x27d   : > { %v3195_v44 = vpop.f32.mrb[30].mxu0 }
 0x27e   : > { %v7010_v61 = vadd.f32 %v3195_v44, %v6640_v15  ;;  %v3197_v1 = vpop.f32.mrb[31].mxu0 }
 0x282   : > { %v7012_v32 = vpop.f32.mrb[96].mxu1 }
 0x283   : > { %v3200_v4 = vpop.f32.mrb[32].mxu0  ;;  %v3041_v19 = vpop.f32.mrb[97].mxu1 }
 0x284   : > { %v7015_v13 = vadd.f32 %v3200_v4, %v6652_v23  ;;  %v3202_v7 = vpop.f32.mrb[33].mxu0  ;;  %v7017_v35 = vpop.f32.mrb[98].mxu1 }
 0x285   : > { %v3203_v17 = vpop.f32.mrb[34].mxu0  ;;  %v3044_v31 = vpop.f32.mrb[99].mxu1 }
 0x286   : > { %v7020_v11 = vadd.f32 %v3203_v17, %v6658_v29  ;;  %v3205_v53 = vpop.f32.mrb[35].mxu0 }
 0x28a   : > { %v7022_v40 = vpop.f32.mrb[100].mxu1 }
 0x28b   : > { %8896 = vst [vmem:[#allocation4_spill] sm:$0xff] %v7022_v40  ;;  %v3208_v15 = vpop.f32.mrb[36].mxu0  ;;  %v3049_v27 = vpop.f32.mrb[101].mxu1 }
 0x28c   : > { %v7025_v52 = vadd.f32 %v3208_v15, %v6670_v37  ;;  %v3210_v44 = vpop.f32.mrb[37].mxu0  ;;  %v7027_v1 = vpop.f32.mrb[102].mxu1 }
 0x28d   : > { %8897 = vst [vmem:[#allocation5_spill] sm:$0xff] %v7027_v1  ;;  %v3211_v23 = vpop.f32.mrb[38].mxu0  ;;  %v3052_v4 = vpop.f32.mrb[103].mxu1 }
 0x28e   : > { %v7030_v19 = vadd.f32 %v3211_v23, %v6675_v42  ;;  %v3213_v7 = vpop.f32.mrb[39].mxu0 }
 0x292   : > { %v7032_v31 = vpop.f32.mrb[104].mxu1 }
 0x293   : > { %8898 = vst [vmem:[#allocation6_spill] sm:$0xff] %v7032_v31  ;;  %v3216_v29 = vpop.f32.mrb[40].mxu0  ;;  %v3057_v17 = vpop.f32.mrb[105].mxu1 }
 0x294   : > { %v7035_v53 = vadd.f32 %v3216_v29, %v6686_v49  ;;  %v3218_v27 = vpop.f32.mrb[41].mxu0  ;;  %v7037_v40 = vpop.f32.mrb[106].mxu1 }
 0x295   : > { %8899 = vst [vmem:[#allocation7_spill] sm:$0xff] %v7037_v40  ;;  %v3219_v37 = vpop.f32.mrb[42].mxu0  ;;  %v3060_v15 = vpop.f32.mrb[107].mxu1 }
 0x296   : > { %v7040_v44 = vadd.f32 %v3219_v37, %v6691_v54  ;;  %v3221_v4 = vpop.f32.mrb[43].mxu0 }
 0x29a   : > { %v7042_v1 = vpop.f32.mrb[108].mxu1 }
 0x29b   : > { %8900 = vst [vmem:[#allocation8_spill] sm:$0xff] %v7042_v1  ;;  %v3224_v42 = vpop.f32.mrb[44].mxu0  ;;  %v3065_v23 = vpop.f32.mrb[109].mxu1 }
 0x29c   : > { %v7045_v7 = vadd.f32 %v3224_v42, %v6702_v60  ;;  %v3226_v17 = vpop.f32.mrb[45].mxu0  ;;  %v7047_v31 = vpop.f32.mrb[110].mxu1 }
 0x29d   : > { %8901 = vst [vmem:[#allocation9_spill] sm:$0xff] %v7047_v31  ;;  %v3227_v49 = vpop.f32.mrb[46].mxu0  ;;  %v3068_v29 = vpop.f32.mrb[111].mxu1 }
 0x29e   : > { %v7050_v27 = vadd.f32 %v3227_v49, %v6707_v0  ;;  %v3229_v15 = vpop.f32.mrb[47].mxu0 }
 0x2a2   : > { %v7052_v40 = vpop.f32.mrb[112].mxu1 }
 0x2a3   : > { %8902 = vst [vmem:[#allocation10_spill] sm:$0xff] %v7052_v40  ;;  %v3232_v54 = vpop.f32.mrb[48].mxu0  ;;  %v3073_v37 = vpop.f32.mrb[113].mxu1 }
 0x2a4   : > { %v7055_v4 = vadd.f32 %v3232_v54, %v6718_v6  ;;  %v3234_v23 = vpop.f32.mrb[49].mxu0  ;;  %v7057_v1 = vpop.f32.mrb[114].mxu1 }
 0x2a5   : > { %8903 = vst [vmem:[#allocation11_spill] sm:$0xff] %v7057_v1  ;;  %v3235_v60 = vpop.f32.mrb[50].mxu0  ;;  %v3076_v42 = vpop.f32.mrb[115].mxu1 }
 0x2a6   : > { %v7060_v17 = vadd.f32 %v3235_v60, %v6723_v9  ;;  %v3237_v29 = vpop.f32.mrb[51].mxu0 }
 0x2aa   : > { %v7062_v31 = vpop.f32.mrb[116].mxu1 }
 0x2ab   : > { %8904 = vst [vmem:[#allocation12_spill] sm:$0xff] %v7062_v31  ;;  %v3240_v0 = vpop.f32.mrb[52].mxu0  ;;  %v3081_v49 = vpop.f32.mrb[117].mxu1 }
 0x2ac   : > { %v7065_v15 = vadd.f32 %v3240_v0, %v6734_v14  ;;  %v3242_v37 = vpop.f32.mrb[53].mxu0  ;;  %v7067_v40 = vpop.f32.mrb[118].mxu1 }
 0x2ad   : > { %8905 = vst [vmem:[#allocation13_spill] sm:$0xff] %v7067_v40  ;;  %v3243_v6 = vpop.f32.mrb[54].mxu0  ;;  %v3084_v54 = vpop.f32.mrb[119].mxu1 }
 0x2ae   : > { %v7070_v23 = vadd.f32 %v3243_v6, %v6739_v20  ;;  %v3245_v42 = vpop.f32.mrb[55].mxu0 }
 0x2b2   : > { %v7072_v1 = vpop.f32.mrb[120].mxu1 }
 0x2b3   : > { %8906 = vst [vmem:[#allocation14_spill] sm:$0xff] %v7072_v1  ;;  %v3248_v9 = vpop.f32.mrb[56].mxu0  ;;  %v3089_v60 = vpop.f32.mrb[121].mxu1 }
 0x2b4   : > { %v7075_v29 = vadd.f32 %v3248_v9, %v6750_v28  ;;  %v3250_v49 = vpop.f32.mrb[57].mxu0  ;;  %v7077_v31 = vpop.f32.mrb[122].mxu1 }
 0x2b5   : > { %8907 = vst [vmem:[#allocation15_spill] sm:$0xff] %v7077_v31  ;;  %v3251_v14 = vpop.f32.mrb[58].mxu0  ;;  %v3092_v0 = vpop.f32.mrb[123].mxu1 }
 0x2b6   : > { %v7080_v37 = vadd.f32 %v3251_v14, %v6755_v33  ;;  %v3253_v54 = vpop.f32.mrb[59].mxu0 }
 0x2ba   : > { %v7082_v40 = vpop.f32.mrb[124].mxu1 }
 0x2bb   : > { %8908 = vst [vmem:[#allocation16_spill] sm:$0xff] %v7082_v40  ;;  %v3256_v20 = vpop.f32.mrb[60].mxu0  ;;  %v3097_v6 = vpop.f32.mrb[125].mxu1 }
 0x2bc   : > { %v7085_v42 = vadd.f32 %v3256_v20, %v6766_v43  ;;  %v3258_v60 = vpop.f32.mrb[61].mxu0  ;;  %v7087_v1 = vpop.f32.mrb[126].mxu1 }
 0x2bd   : > { %8909 = vst [vmem:[#allocation17_spill] sm:$0xff] %v7087_v1  ;;  %v3259_v28 = vpop.f32.mrb[62].mxu0  ;;  %v3100_v9 = vpop.f32.mrb[127].mxu1 }
 0x2be   : > { %v7090_v49 = vadd.f32 %v3259_v28, %v6771_v47  ;;  %v3261_v0 = vpop.f32.mrb[63].mxu0 }
 0x2c2   : > { %v4996_v31 = vpop.f32.mrb[128].mxu1 }
 0x2c3   : > { %v3264_v33 = vpop.f32.mrb[64].mxu0  ;;  %v7093_v14 = vadd.f32 %v6932_v3, %v4996_v31  ;;  %v3425_v54 = vpop.f32.mrb[129].mxu1 }
 0x2c4   : > { %v7096_v6 = vadd.f32 %v3264_v33, %v6782_v57  ;;  %v3266_v43 = vpop.f32.mrb[65].mxu0  ;;  %v7099_v20 = vadd.f32 %v6914_v30, %v3425_v54  ;;  %v4997_v60 = vpop.f32.mrb[130].mxu1 }
 0x2c5   : > { %8910 = vst [vmem:[#allocation18_spill] sm:$0xff] %v7093_v14  ;;  %v3267_v1 = vpop.f32.mrb[66].mxu0  ;;  %v7102_v9 = vadd.f32 %v6944_v22, %v4997_v60  ;;  %v3428_v47 = vpop.f32.mrb[131].mxu1  ;;  %v3751_v22 = vmul.f32 %v7093_v14, %v7093_v14 }
 0x2c6   : > { %8911 = vst [vmem:[#allocation19_spill] sm:$0xff] %v7099_v20  ;;  %v7105_v28 = vadd.f32 %v3267_v1, %v6787_v63  ;;  %v3269_v0 = vpop.f32.mrb[67].mxu0  ;;  %v7108_v3 = vadd.f32 %v6926_v55, %v3428_v47  ;;  %v3749_v57 = vmul.f32 %v7099_v20, %v7099_v20 }
 0x2c7   : > { %v3752_v55 = vmul.f32 %v7102_v9, %v7102_v9 }
 0x2c8   : > { %8912 = vst [vmem:[#allocation20_spill] sm:$0xff] %v7108_v3  ;;  %v3680_v30 = vadd.f32 %v7108_v3, %v7099_v20  ;;  %v3750_v31 = vmul.f32 %v7108_v3, %v7108_v3 }
 0x2ca   : > { %v3681_v33 = vadd.f32 %v3680_v30, %v7093_v14  ;;  %v3813_v63 = vadd.f32 %v3750_v31, %v3749_v57  ;;  %v5000_v1 = vpop.f32.mrb[132].mxu1 }
 0x2cb   : > { %v3272_v54 = vpop.f32.mrb[68].mxu0  ;;  %v7122_v43 = vadd.f32 %v6968_v10, %v5000_v1  ;;  %v3441_v60 = vpop.f32.mrb[133].mxu1 }
 0x2cc   : > { %v3814_v47 = vadd.f32 %v3813_v63, %v3751_v22  ;;  %v7125_v0 = vadd.f32 %v3272_v54, %v6798_v8  ;;  %v3274_v3 = vpop.f32.mrb[69].mxu0  ;;  %v7128_v20 = vadd.f32 %v6950_v36, %v3441_v60  ;;  %v3682_v30 = vadd.f32 %v3681_v33, %v7102_v9  ;;  %v5001_v57 = vpop.f32.mrb[134].mxu1 }
 0x2cd   : > { %v3275_v31 = vpop.f32.mrb[70].mxu0  ;;  %v7132_v14 = vadd.f32 %v6980_v24, %v5001_v57  ;;  %v3444_v40 = vpop.f32.mrb[135].mxu1  ;;  %v3755_v60 = vmul.f32 %v7122_v43, %v7122_v43 }
 0x2ce   : > { %v3683_v10 = vadd.f32 %v3682_v30, %v7128_v20  ;;  %v3753_v22 = vmul.f32 %v7128_v20, %v7128_v20  ;;  %v3815_v63 = vadd.f32 %v3814_v47, %v3752_v55  ;;  %v7138_v8 = vadd.f32 %v3275_v31, %v6803_v48  ;;  %v3277_v3 = vpop.f32.mrb[71].mxu0 }
 0x2cf   : > { %v7141_v36 = vadd.f32 %v6962_v16, %v3444_v40 }
 0x2d0   : > { %v3816_v33 = vadd.f32 %v3815_v63, %v3753_v22  ;;  %v3756_v22 = vmul.f32 %v7132_v14, %v7132_v14 }
 0x2d1   : > { %v3684_v1 = vadd.f32 %v3683_v10, %v7141_v36  ;;  %v3754_v24 = vmul.f32 %v7141_v36, %v7141_v36 }
 0x2d2   : > { %v5004_v54 = vpop.f32.mrb[136].mxu1 }
 0x2d3   : > { %v3685_v30 = vadd.f32 %v3684_v1, %v7122_v43  ;;  %v3817_v55 = vadd.f32 %v3816_v33, %v3754_v24  ;;  %v3280_v47 = vpop.f32.mrb[72].mxu0  ;;  %v7150_v48 = vadd.f32 %v6995_v39, %v5004_v54  ;;  %v3457_v57 = vpop.f32.mrb[137].mxu1 }
 0x2d4   : > { %v7153_v16 = vadd.f32 %v3280_v47, %v6814_v21  ;;  %v3282_v40 = vpop.f32.mrb[73].mxu0  ;;  %v7156_v31 = vadd.f32 %v6986_v51, %v3457_v57  ;;  %v5005_v10 = vpop.f32.mrb[138].mxu1 }
 0x2d5   : > { %v3818_v63 = vadd.f32 %v3817_v55, %v3755_v60  ;;  %v3686_v3 = vadd.f32 %v3685_v30, %v7132_v14  ;;  %v3283_v33 = vpop.f32.mrb[74].mxu0  ;;  %v7162_v1 = vadd.f32 %v6998_v50, %v5005_v10  ;;  %v3460_v39 = vpop.f32.mrb[139].mxu1  ;;  %v3759_v40 = vmul.f32 %v7150_v48, %v7150_v48 }
 0x2d6   : > { %v3757_v21 = vmul.f32 %v7156_v31, %v7156_v31  ;;  %v7167_v24 = vadd.f32 %v3283_v33, %v6819_v26  ;;  %v3285_v51 = vpop.f32.mrb[75].mxu0  ;;  %v7170_v54 = vadd.f32 %v6992_v56, %v3460_v39 }
 0x2d7   : > { %v3687_v47 = vadd.f32 %v3686_v3, %v7156_v31  ;;  %v3819_v60 = vadd.f32 %v3818_v63, %v3756_v22  ;;  %v3760_v51 = vmul.f32 %v7162_v1, %v7162_v1 }
 0x2d8   : > { %v3758_v30 = vmul.f32 %v7170_v54, %v7170_v54 }
 0x2d9   : > { %v3820_v55 = vadd.f32 %v3819_v60, %v3757_v21  ;;  %v3688_v50 = vadd.f32 %v3687_v47, %v7170_v54 }
 0x2da   : > { %v5008_v57 = vpop.f32.mrb[140].mxu1 }
 0x2db   : > { %v3689_v26 = vadd.f32 %v3688_v50, %v7150_v48  ;;  %v3821_v10 = vadd.f32 %v3820_v55, %v3758_v30  ;;  %v3288_v33 = vpop.f32.mrb[76].mxu0  ;;  %v7180_v56 = vadd.f32 %v7007_v58, %v5008_v57  ;;  %v3473_v39 = vpop.f32.mrb[141].mxu1 }
 0x2dc   : > { %v7183_v22 = vadd.f32 %v3288_v33, %v6830_v38  ;;  %v3290_v63 = vpop.f32.mrb[77].mxu0  ;;  %v7186_v3 = vadd.f32 %v7001_v25, %v3473_v39  ;;  %v5009_v21 = vpop.f32.mrb[142].mxu1 }
 0x2dd   : > { %v3822_v47 = vadd.f32 %v3821_v10, %v3759_v40  ;;  %v3690_v60 = vadd.f32 %v3689_v26, %v7162_v1  ;;  %v3291_v30 = vpop.f32.mrb[78].mxu0  ;;  %v7192_v55 = vadd.f32 %v7010_v61, %v5009_v21  ;;  %v3476_v58 = vpop.f32.mrb[143].mxu1  ;;  %v3763_v63 = vmul.f32 %v7180_v56, %v7180_v56 }
 0x2de   : > { %v3761_v38 = vmul.f32 %v7186_v3, %v7186_v3  ;;  %v7197_v50 = vadd.f32 %v3291_v30, %v6835_v46  ;;  %v3293_v25 = vpop.f32.mrb[79].mxu0  ;;  %v7200_v57 = vadd.f32 %v7004_v41, %v3476_v58 }
 0x2df   : > { %v3691_v33 = vadd.f32 %v3690_v60, %v7186_v3  ;;  %v3823_v40 = vadd.f32 %v3822_v47, %v3760_v51  ;;  %v3764_v25 = vmul.f32 %v7192_v55, %v7192_v55 }
 0x2e0   : > { %v3762_v26 = vmul.f32 %v7200_v57, %v7200_v57 }
 0x2e1   : > { %v3824_v10 = vadd.f32 %v3823_v40, %v3761_v38  ;;  %v3692_v61 = vadd.f32 %v3691_v33, %v7200_v57 }
 0x2e2   : > { %v5012_v39 = vpop.f32.mrb[144].mxu1 }
 0x2e3   : > { %v3693_v46 = vadd.f32 %v3692_v61, %v7180_v56  ;;  %v3825_v21 = vadd.f32 %v3824_v10, %v3762_v26  ;;  %v3296_v30 = vpop.f32.mrb[80].mxu0  ;;  %v7210_v41 = vadd.f32 %v7025_v52, %v5012_v39  ;;  %v3489_v58 = vpop.f32.mrb[145].mxu1 }
 0x2e4   : > { %v7213_v51 = vadd.f32 %v3296_v30, %v6846_v59  ;;  %v3298_v47 = vpop.f32.mrb[81].mxu0  ;;  %v7216_v60 = vadd.f32 %v7015_v13, %v3489_v58  ;;  %v5013_v38 = vpop.f32.mrb[146].mxu1 }
 0x2e5   : > { %v3826_v33 = vadd.f32 %v3825_v21, %v3763_v63  ;;  %v3694_v40 = vadd.f32 %v3693_v46, %v7192_v55  ;;  %v3299_v26 = vpop.f32.mrb[82].mxu0  ;;  %v7222_v10 = vadd.f32 %v7030_v19, %v5013_v38  ;;  %v3492_v52 = vpop.f32.mrb[147].mxu1  ;;  %v3767_v47 = vmul.f32 %v7210_v41, %v7210_v41 }
 0x2e6   : > { %v3765_v59 = vmul.f32 %v7216_v60, %v7216_v60  ;;  %v7227_v61 = vadd.f32 %v3299_v26, %v6851_v2  ;;  %v3301_v13 = vpop.f32.mrb[83].mxu0  ;;  %v7230_v39 = vadd.f32 %v7020_v11, %v3492_v52 }
 0x2e7   : > { %v3695_v30 = vadd.f32 %v3694_v40, %v7216_v60  ;;  %v3827_v63 = vadd.f32 %v3826_v33, %v3764_v25  ;;  %v3768_v13 = vmul.f32 %v7222_v10, %v7222_v10 }
 0x2e8   : > { %v3766_v46 = vmul.f32 %v7230_v39, %v7230_v39 }
 0x2e9   : > { %v3828_v21 = vadd.f32 %v3827_v63, %v3765_v59  ;;  %v3696_v19 = vadd.f32 %v3695_v30, %v7230_v39 }
 0x2ea   : > { %v5016_v58 = vpop.f32.mrb[148].mxu1 }
 0x2eb   : > { %v3697_v2 = vadd.f32 %v3696_v19, %v7210_v41  ;;  %v3829_v38 = vadd.f32 %v3828_v21, %v3766_v46  ;;  %v3304_v26 = vpop.f32.mrb[84].mxu0  ;;  %v7240_v11 = vadd.f32 %v7045_v7, %v5016_v58  ;;  %v3505_v52 = vpop.f32.mrb[149].mxu1 }
 0x2ec   : > { %v7243_v25 = vadd.f32 %v3304_v26, %v6862_v12  ;;  %v3306_v33 = vpop.f32.mrb[85].mxu0  ;;  %v7246_v40 = vadd.f32 %v7035_v53, %v3505_v52  ;;  %v5017_v59 = vpop.f32.mrb[150].mxu1 }
 0x2ed   : > { %v3830_v30 = vadd.f32 %v3829_v38, %v3767_v47  ;;  %v3698_v63 = vadd.f32 %v3697_v2, %v7222_v10  ;;  %v3307_v46 = vpop.f32.mrb[86].mxu0  ;;  %v7252_v21 = vadd.f32 %v7050_v27, %v5017_v59  ;;  %v3508_v7 = vpop.f32.mrb[151].mxu1  ;;  %v3771_v33 = vmul.f32 %v7240_v11, %v7240_v11 }
 0x2ee   : > { %v3769_v12 = vmul.f32 %v7246_v40, %v7246_v40  ;;  %v7257_v19 = vadd.f32 %v3307_v46, %v6867_v18  ;;  %v3309_v53 = vpop.f32.mrb[87].mxu0  ;;  %v7260_v58 = vadd.f32 %v7040_v44, %v3508_v7 }
 0x2ef   : > { %v3699_v26 = vadd.f32 %v3698_v63, %v7246_v40  ;;  %v3831_v47 = vadd.f32 %v3830_v30, %v3768_v13  ;;  %v3772_v53 = vmul.f32 %v7252_v21, %v7252_v21 }
 0x2f0   : > { %v3770_v2 = vmul.f32 %v7260_v58, %v7260_v58 }
 0x2f1   : > { %v3832_v38 = vadd.f32 %v3831_v47, %v3769_v12  ;;  %v3700_v27 = vadd.f32 %v3699_v26, %v7260_v58 }
 0x2f2   : > { %v5020_v52 = vpop.f32.mrb[152].mxu1 }
 0x2f3   : > { %v3701_v18 = vadd.f32 %v3700_v27, %v7240_v11  ;;  %v3833_v59 = vadd.f32 %v3832_v38, %v3770_v2  ;;  %v3312_v46 = vpop.f32.mrb[88].mxu0  ;;  %v7270_v44 = vadd.f32 %v7065_v15, %v5020_v52  ;;  %v3521_v7 = vpop.f32.mrb[153].mxu1 }
 0x2f4   : > { %v7273_v13 = vadd.f32 %v3312_v46, %v6878_v34  ;;  %v3314_v30 = vpop.f32.mrb[89].mxu0  ;;  %v7276_v63 = vadd.f32 %v7055_v4, %v3521_v7  ;;  %v5021_v12 = vpop.f32.mrb[154].mxu1 }
 0x2f5   : > { %v3834_v26 = vadd.f32 %v3833_v59, %v3771_v33  ;;  %v3702_v47 = vadd.f32 %v3701_v18, %v7252_v21  ;;  %v3315_v2 = vpop.f32.mrb[90].mxu0  ;;  %v7282_v38 = vadd.f32 %v7070_v23, %v5021_v12  ;;  %v3524_v15 = vpop.f32.mrb[155].mxu1  ;;  %v3775_v30 = vmul.f32 %v7270_v44, %v7270_v44 }
 0x2f6   : > { %v3773_v34 = vmul.f32 %v7276_v63, %v7276_v63  ;;  %v7287_v27 = vadd.f32 %v3315_v2, %v6883_v45  ;;  %v3317_v4 = vpop.f32.mrb[91].mxu0  ;;  %v7290_v52 = vadd.f32 %v7060_v17, %v3524_v15 }
 0x2f7   : > { %v3703_v46 = vadd.f32 %v3702_v47, %v7276_v63  ;;  %v3835_v33 = vadd.f32 %v3834_v26, %v3772_v53  ;;  %v3776_v4 = vmul.f32 %v7282_v38, %v7282_v38 }
 0x2f8   : > { %v3774_v18 = vmul.f32 %v7290_v52, %v7290_v52 }
 0x2f9   : > { %v3836_v59 = vadd.f32 %v3835_v33, %v3773_v34  ;;  %v3704_v23 = vadd.f32 %v3703_v46, %v7290_v52 }
 0x2fa   : > { %v5024_v7 = vpop.f32.mrb[156].mxu1 }
 0x2fb   : > { %v3705_v45 = vadd.f32 %v3704_v23, %v7270_v44  ;;  %v3837_v12 = vadd.f32 %v3836_v59, %v3774_v18  ;;  %v3320_v2 = vpop.f32.mrb[92].mxu0  ;;  %v7300_v17 = vadd.f32 %v7085_v42, %v5024_v7  ;;  %v3537_v15 = vpop.f32.mrb[157].mxu1 }
 0x2fc   : > { %v7303_v53 = vadd.f32 %v3320_v2, %v6894_v62  ;;  %v3322_v26 = vpop.f32.mrb[93].mxu0  ;;  %v7306_v47 = vadd.f32 %v7075_v29, %v3537_v15  ;;  %v5025_v34 = vpop.f32.mrb[158].mxu1 }
 0x2fd   : > { %v3838_v46 = vadd.f32 %v3837_v12, %v3775_v30  ;;  %v3706_v33 = vadd.f32 %v3705_v45, %v7282_v38  ;;  %v3323_v18 = vpop.f32.mrb[94].mxu0  ;;  %v7312_v59 = vadd.f32 %v7090_v49, %v5025_v34  ;;  %v3540_v42 = vpop.f32.mrb[159].mxu1  ;;  %v3779_v26 = vmul.f32 %v7300_v17, %v7300_v17 }
 0x2fe   : > { %v3777_v62 = vmul.f32 %v7306_v47, %v7306_v47  ;;  %v7317_v23 = vadd.f32 %v3323_v18, %v6899_v5  ;;  %v3325_v29 = vpop.f32.mrb[95].mxu0  ;;  %v7320_v7 = vadd.f32 %v7080_v37, %v3540_v42 }
 0x2ff   : > { %v3707_v2 = vadd.f32 %v3706_v33, %v7306_v47  ;;  %v3839_v30 = vadd.f32 %v3838_v46, %v3776_v4  ;;  %v3780_v29 = vmul.f32 %v7312_v59, %v7312_v59 }
 0x300   : > { %v3778_v45 = vmul.f32 %v7320_v7, %v7320_v7 }
 0x301   : > { %v3840_v12 = vadd.f32 %v3839_v30, %v3777_v62  ;;  %v3708_v49 = vadd.f32 %v3707_v2, %v7320_v7 }
 0x302   : > { %v5028_v15 = vpop.f32.mrb[160].mxu1 }
 0x303   : > { %v3709_v5 = vadd.f32 %v3708_v49, %v7300_v17  ;;  %v3841_v34 = vadd.f32 %v3840_v12, %v3778_v45  ;;  %v3328_v18 = vpop.f32.mrb[96].mxu0  ;;  %v7330_v37 = vadd.f32 %v7125_v0, %v5028_v15  ;;  %v3553_v42 = vpop.f32.mrb[161].mxu1 }
 0x304   : > { %v7333_v4 = vadd.f32 %v3328_v18, %v7012_v32  ;;  %v3330_v46 = vpop.f32.mrb[97].mxu0  ;;  %v7336_v33 = vadd.f32 %v7096_v6, %v3553_v42  ;;  %v5029_v62 = vpop.f32.mrb[162].mxu1 }
 0x305   : > { %8913 = vst [vmem:[#allocation21_spill] sm:$0xff] %v7330_v37  ;;  %v3842_v2 = vadd.f32 %v3841_v34, %v3779_v26  ;;  %v3710_v30 = vadd.f32 %v3709_v5, %v7312_v59  ;;  %v3331_v45 = vpop.f32.mrb[98].mxu0  ;;  %v7342_v12 = vadd.f32 %v7138_v8, %v5029_v62  ;;  %v3556_v0 = vpop.f32.mrb[163].mxu1  ;;  %v3783_v46 = vmul.f32 %v7330_v37, %v7330_v37 }
 0x306   : > { %v3781_v32 = vmul.f32 %v7336_v33, %v7336_v33  ;;  %v7347_v49 = vadd.f32 %v3331_v45, %v7017_v35  ;;  %v7350_v6 = vadd.f32 %v7105_v28, %v3556_v0  ;;  %v3333_v15 = vpop.f32.mrb[99].mxu0 }
 0x307   : > { %8914 = vst [vmem:[#allocation22_spill] sm:$0xff] %v7342_v12  ;;  %v3711_v18 = vadd.f32 %v3710_v30, %v7336_v33  ;;  %v3843_v26 = vadd.f32 %v3842_v2, %v3780_v29  ;;  %v8916_v30 = vld [vmem:[#allocation4_spill] sm:$0xff] }
 0x308   : > { %v3782_v5 = vmul.f32 %v7350_v6, %v7350_v6 }
 0x309   : > { %v3844_v34 = vadd.f32 %v3843_v26, %v3781_v32  ;;  %v3712_v8 = vadd.f32 %v3711_v18, %v7350_v6  ;;  %v3784_v18 = vmul.f32 %v7342_v12, %v7342_v12 }
 0x30a   : > { %v5032_v42 = vpop.f32.mrb[164].mxu1 }
 0x30b   : > { %v3713_v35 = vadd.f32 %v3712_v8, %v7330_v37  ;;  %v3845_v62 = vadd.f32 %v3844_v34, %v3782_v5  ;;  %v3336_v45 = vpop.f32.mrb[100].mxu0  ;;  %v7360_v28 = vadd.f32 %v7183_v22, %v5032_v42  ;;  %v3569_v0 = vpop.f32.mrb[165].mxu1 }
 0x30c   : > { %v7363_v29 = vadd.f32 %v3336_v45, %v8916_v30  ;;  %v3338_v2 = vpop.f32.mrb[101].mxu0  ;;  %v7366_v32 = vadd.f32 %v7153_v16, %v3569_v0  ;;  %v5033_v15 = vpop.f32.mrb[166].mxu1  ;;  %v8918_v45 = vld [vmem:[#allocation5_spill] sm:$0xff] }
 0x30d   : > { %8915 = vst [vmem:[#allocation23_spill] sm:$0xff] %v7360_v28  ;;  %v3846_v26 = vadd.f32 %v3845_v62, %v3783_v46  ;;  %v3714_v8 = vadd.f32 %v3713_v35, %v7342_v12  ;;  %v3339_v5 = vpop.f32.mrb[102].mxu0  ;;  %v7372_v34 = vadd.f32 %v7197_v50, %v5033_v15  ;;  %v3572_v22 = vpop.f32.mrb[167].mxu1  ;;  %v3787_v12 = vmul.f32 %v7360_v28, %v7360_v28 }
 0x30e   : > { %v3785_v42 = vmul.f32 %v7366_v32, %v7366_v32  ;;  %v7377_v30 = vadd.f32 %v3339_v5, %v8918_v45  ;;  %v7380_v16 = vadd.f32 %v7167_v24, %v3572_v22  ;;  %v3341_v0 = vpop.f32.mrb[103].mxu0 }
 0x30f   : > { %8917 = vst [vmem:[#allocation4_spill] sm:$0xff] %v7372_v34  ;;  %v3715_v2 = vadd.f32 %v3714_v8, %v7366_v32  ;;  %v3847_v46 = vadd.f32 %v3846_v26, %v3784_v18  ;;  %v8920_v8 = vld [vmem:[#allocation6_spill] sm:$0xff] }
 0x310   : > { %v3786_v35 = vmul.f32 %v7380_v16, %v7380_v16 }
 0x311   : > { %v3848_v62 = vadd.f32 %v3847_v46, %v3785_v42  ;;  %v3716_v50 = vadd.f32 %v3715_v2, %v7380_v16  ;;  %v3788_v2 = vmul.f32 %v7372_v34, %v7372_v34 }
 0x312   : > { %v5036_v15 = vpop.f32.mrb[168].mxu1 }
 0x313   : > { %v3717_v5 = vadd.f32 %v3716_v50, %v7360_v28  ;;  %v3849_v45 = vadd.f32 %v3848_v62, %v3786_v35  ;;  %v3344_v37 = vpop.f32.mrb[104].mxu0  ;;  %v7390_v24 = vadd.f32 %v7243_v25, %v5036_v15  ;;  %v3585_v22 = vpop.f32.mrb[169].mxu1  ;;  %v8922_v15 = vld [vmem:[#allocation7_spill] sm:$0xff] }
 0x314   : > { %v7393_v18 = vadd.f32 %v3344_v37, %v8920_v8  ;;  %v3346_v26 = vpop.f32.mrb[105].mxu0  ;;  %v7396_v42 = vadd.f32 %v7213_v51, %v3585_v22  ;;  %v5037_v0 = vpop.f32.mrb[170].mxu1 }
 0x315   : > { %8919 = vst [vmem:[#allocation5_spill] sm:$0xff] %v7390_v24  ;;  %v3850_v46 = vadd.f32 %v3849_v45, %v3787_v12  ;;  %v3718_v50 = vadd.f32 %v3717_v5, %v7372_v34  ;;  %v3347_v35 = vpop.f32.mrb[106].mxu0  ;;  %v7402_v62 = vadd.f32 %v7257_v19, %v5037_v0  ;;  %v3588_v25 = vpop.f32.mrb[171].mxu1  ;;  %v3791_v34 = vmul.f32 %v7390_v24, %v7390_v24 }
 0x316   : > { %v3789_v37 = vmul.f32 %v7396_v42, %v7396_v42  ;;  %v7407_v8 = vadd.f32 %v3347_v35, %v8922_v15  ;;  %v7410_v51 = vadd.f32 %v7227_v61, %v3588_v25  ;;  %v3349_v22 = vpop.f32.mrb[107].mxu0 }
 0x317   : > { %8921 = vst [vmem:[#allocation6_spill] sm:$0xff] %v7402_v62  ;;  %v3719_v26 = vadd.f32 %v3718_v50, %v7396_v42  ;;  %v3851_v12 = vadd.f32 %v3850_v46, %v3788_v2  ;;  %v8925_v50 = vld [vmem:[#allocation8_spill] sm:$0xff] }
 0x318   : > { %8923 = vst [vmem:[#allocation7_spill] sm:$0xff] %v7410_v51  ;;  %v3790_v5 = vmul.f32 %v7410_v51, %v7410_v51 }
 0x319   : > { %v3852_v45 = vadd.f32 %v3851_v12, %v3789_v37  ;;  %v3720_v19 = vadd.f32 %v3719_v26, %v7410_v51  ;;  %v3792_v26 = vmul.f32 %v7402_v62, %v7402_v62 }
 0x31a   : > { %v5040_v0 = vpop.f32.mrb[172].mxu1 }
 0x31b   : > { %v3721_v35 = vadd.f32 %v3720_v19, %v7390_v24  ;;  %v3853_v15 = vadd.f32 %v3852_v45, %v3790_v5  ;;  %v3352_v28 = vpop.f32.mrb[108].mxu0  ;;  %v7420_v61 = vadd.f32 %v7303_v53, %v5040_v0  ;;  %v3601_v25 = vpop.f32.mrb[173].mxu1 }
 0x31c   : > { %v5144_v2 = vadd.f32 %v3352_v28, %v8925_v50  ;;  %v3354_v46 = vpop.f32.mrb[109].mxu0  ;;  %v7424_v22 = vadd.f32 %v7273_v13, %v3601_v25  ;;  %v5041_v37 = vpop.f32.mrb[174].mxu1  ;;  %v8928_v28 = vld [vmem:[#allocation9_spill] sm:$0xff] }
 0x31d   : > { %8924 = vst [vmem:[#allocation24_spill] sm:$0xff] %v7420_v61  ;;  %v3854_v12 = vadd.f32 %v3853_v15, %v3791_v34  ;;  %v3722_v51 = vadd.f32 %v3721_v35, %v7402_v62  ;;  %v3355_v19 = vpop.f32.mrb[110].mxu0  ;;  %v7430_v5 = vadd.f32 %v7317_v23, %v5041_v37  ;;  %v3604_v53 = vpop.f32.mrb[175].mxu1  ;;  %v3795_v37 = vmul.f32 %v7420_v61, %v7420_v61 }
 0x31e   : > { %8926 = vst [vmem:[#allocation8_spill] sm:$0xff] %v7424_v22  ;;  %v3793_v45 = vmul.f32 %v7424_v22, %v7424_v22  ;;  %v5145_v0 = vadd.f32 %v3355_v19, %v8928_v28  ;;  %v7436_v13 = vadd.f32 %v7287_v27, %v3604_v53  ;;  %v3357_v25 = vpop.f32.mrb[111].mxu0 }
 0x31f   : > { %8927 = vst [vmem:[#allocation25_spill] sm:$0xff] %v7430_v5  ;;  %v3723_v50 = vadd.f32 %v3722_v51, %v7424_v22  ;;  %v3855_v46 = vadd.f32 %v3854_v12, %v3792_v26  ;;  %v8930_v51 = vld [vmem:[#allocation10_spill] sm:$0xff] }
 0x320   : > { %8929 = vst [vmem:[#allocation9_spill] sm:$0xff] %v7436_v13  ;;  %v3794_v34 = vmul.f32 %v7436_v13, %v7436_v13 }
 0x321   : > { %v3856_v35 = vadd.f32 %v3855_v46, %v3793_v45  ;;  %v3724_v23 = vadd.f32 %v3723_v50, %v7436_v13  ;;  %v3796_v50 = vmul.f32 %v7430_v5, %v7430_v5 }
 0x322   : > { %v5044_v15 = vpop.f32.mrb[176].mxu1 }
 0x323   : > { %v3725_v62 = vadd.f32 %v3724_v23, %v7420_v61  ;;  %v3857_v19 = vadd.f32 %v3856_v35, %v3794_v34  ;;  %v3360_v28 = vpop.f32.mrb[112].mxu0  ;;  %v7446_v27 = vadd.f32 %v7363_v29, %v5044_v15  ;;  %v3617_v53 = vpop.f32.mrb[177].mxu1  ;;  %v8931_v15 = vld [vmem:[#allocation11_spill] sm:$0xff] }
 0x324   : > { %v5146_v26 = vadd.f32 %v3360_v28, %v8930_v51  ;;  %v3362_v12 = vpop.f32.mrb[113].mxu0  ;;  %v7450_v25 = vadd.f32 %v7333_v4, %v3617_v53  ;;  %v5045_v45 = vpop.f32.mrb[178].mxu1 }
 0x325   : > { %v3858_v46 = vadd.f32 %v3857_v19, %v3795_v37  ;;  %v3726_v13 = vadd.f32 %v3725_v62, %v7430_v5  ;;  %v3363_v23 = vpop.f32.mrb[114].mxu0  ;;  %v7456_v34 = vadd.f32 %v7377_v30, %v5045_v45  ;;  %v3620_v29 = vpop.f32.mrb[179].mxu1  ;;  %v3799_v45 = vmul.f32 %v7446_v27, %v7446_v27 }
 0x326   : > { %v3797_v35 = vmul.f32 %v7450_v25, %v7450_v25  ;;  %v5147_v28 = vadd.f32 %v3363_v23, %v8931_v15  ;;  %v7462_v4 = vadd.f32 %v7347_v49, %v3620_v29  ;;  %v3365_v53 = vpop.f32.mrb[115].mxu0 }
 0x327   : > { %v3727_v51 = vadd.f32 %v3726_v13, %v7450_v25  ;;  %v3859_v12 = vadd.f32 %v3858_v46, %v3796_v50  ;;  %v8933_v53 = vld [vmem:[#allocation12_spill] sm:$0xff] }
 0x328   : > { %v3798_v62 = vmul.f32 %v7462_v4, %v7462_v4 }
 0x329   : > { %v3860_v37 = vadd.f32 %v3859_v12, %v3797_v35  ;;  %v3728_v30 = vadd.f32 %v3727_v51, %v7462_v4  ;;  %v3800_v51 = vmul.f32 %v7456_v34, %v7456_v34 }
 0x32a   : > { %v5048_v19 = vpop.f32.mrb[180].mxu1 }
 0x32b   : > { %v3729_v5 = vadd.f32 %v3728_v30, %v7446_v27  ;;  %v3861_v23 = vadd.f32 %v3860_v37, %v3798_v62  ;;  %v3368_v15 = vpop.f32.mrb[116].mxu0  ;;  %v7471_v49 = vadd.f32 %v5144_v2, %v5048_v19  ;;  %v3633_v29 = vpop.f32.mrb[181].mxu1  ;;  %v8936_v37 = vld [vmem:[#allocation13_spill] sm:$0xff] }
 0x32c   : > { %v5148_v13 = vadd.f32 %v3368_v15, %v8933_v53  ;;  %v3370_v50 = vpop.f32.mrb[117].mxu0  ;;  %v7475_v46 = vadd.f32 %v7393_v18, %v3633_v29  ;;  %v5049_v35 = vpop.f32.mrb[182].mxu1 }
 0x32d   : > { %8932 = vst [vmem:[#allocation10_spill] sm:$0xff] %v7471_v49  ;;  %v3862_v12 = vadd.f32 %v3861_v23, %v3799_v45  ;;  %v3730_v61 = vadd.f32 %v3729_v5, %v7456_v34  ;;  %v3371_v22 = vpop.f32.mrb[118].mxu0  ;;  %v7480_v30 = vadd.f32 %v5145_v0, %v5049_v35  ;;  %v3636_v62 = vpop.f32.mrb[183].mxu1  ;;  %v3803_v50 = vmul.f32 %v7471_v49, %v7471_v49 }
 0x32e   : > { %8934 = vst [vmem:[#allocation11_spill] sm:$0xff] %v7475_v46  ;;  %v3801_v2 = vmul.f32 %v7475_v46, %v7475_v46  ;;  %v5149_v19 = vadd.f32 %v3371_v22, %v8936_v37  ;;  %v7486_v15 = vadd.f32 %v7407_v8, %v3636_v62  ;;  %v3373_v18 = vpop.f32.mrb[119].mxu0 }
 0x32f   : > { %8935 = vst [vmem:[#allocation12_spill] sm:$0xff] %v7480_v30  ;;  %v3731_v29 = vadd.f32 %v3730_v61, %v7475_v46  ;;  %v3863_v53 = vadd.f32 %v3862_v12, %v3800_v51  ;;  %v8939_v18 = vld [vmem:[#allocation14_spill] sm:$0xff] }
 0x330   : > { %8937 = vst [vmem:[#allocation13_spill] sm:$0xff] %v7486_v15  ;;  %v3802_v45 = vmul.f32 %v7486_v15, %v7486_v15 }
 0x331   : > { %v3864_v5 = vadd.f32 %v3863_v53, %v3801_v2  ;;  %v3732_v0 = vadd.f32 %v3731_v29, %v7486_v15  ;;  %v3804_v2 = vmul.f32 %v7480_v30, %v7480_v30 }
 0x332   : > { %v5052_v23 = vpop.f32.mrb[184].mxu1 }
 0x333   : > { %v3733_v35 = vadd.f32 %v3732_v0, %v7471_v49  ;;  %v3865_v22 = vadd.f32 %v3864_v5, %v3802_v45  ;;  %v3376_v37 = vpop.f32.mrb[120].mxu0  ;;  %v7495_v8 = vadd.f32 %v5148_v13, %v5052_v23  ;;  %v3649_v62 = vpop.f32.mrb[185].mxu1  ;;  %v8942_v5 = vld [vmem:[#allocation15_spill] sm:$0xff]  ;;  %v8968_v49 = vld [vmem:[#allocation9_spill] sm:$0xff] }
 0x334   : > { %v5150_v61 = vadd.f32 %v3376_v37, %v8939_v18  ;;  %v3378_v51 = vpop.f32.mrb[121].mxu0  ;;  %v7498_v12 = vadd.f32 %v5146_v26, %v3649_v62  ;;  %v5053_v24 = vpop.f32.mrb[186].mxu1 }
 0x335   : > { %8938 = vst [vmem:[#allocation26_spill] sm:$0xff] %v7495_v8  ;;  %v3866_v29 = vadd.f32 %v3865_v22, %v3803_v50  ;;  %v3734_v53 = vadd.f32 %v3733_v35, %v7480_v30  ;;  %v3379_v15 = vpop.f32.mrb[122].mxu0  ;;  %v7503_v46 = vadd.f32 %v5149_v19, %v5053_v24  ;;  %v3652_v45 = vpop.f32.mrb[187].mxu1  ;;  %v3807_v19 = vmul.f32 %v7495_v8, %v7495_v8 }
 0x336   : > { %8940 = vst [vmem:[#allocation14_spill] sm:$0xff] %v7498_v12  ;;  %v3805_v13 = vmul.f32 %v7498_v12, %v7498_v12  ;;  %v5151_v0 = vadd.f32 %v3379_v15, %v8942_v5  ;;  %v7508_v23 = vadd.f32 %v5147_v28, %v3652_v45  ;;  %v3381_v26 = vpop.f32.mrb[123].mxu0  ;;  %v8944_v45 = vld [vmem:[#allocation16_spill] sm:$0xff] }
 0x337   : > { %8941 = vst [vmem:[#allocation27_spill] sm:$0xff] %v7503_v46  ;;  %v3735_v37 = vadd.f32 %v3734_v53, %v7498_v12  ;;  %v3867_v62 = vadd.f32 %v3866_v29, %v3804_v2  ;;  %v3808_v29 = vmul.f32 %v7503_v46, %v7503_v46 }
 0x338   : > { %8943 = vst [vmem:[#allocation15_spill] sm:$0xff] %v7508_v23  ;;  %v3806_v50 = vmul.f32 %v7508_v23, %v7508_v23 }
 0x339   : > { %v3868_v22 = vadd.f32 %v3867_v62, %v3805_v13  ;;  %v3736_v35 = vadd.f32 %v3735_v37, %v7508_v23 }
 0x33a   : > { %v5056_v24 = vpop.f32.mrb[188].mxu1 }
 0x33b   : > { %v3737_v18 = vadd.f32 %v3736_v35, %v7495_v8  ;;  %v3869_v51 = vadd.f32 %v3868_v22, %v3806_v50  ;;  %v3384_v15 = vpop.f32.mrb[124].mxu0  ;;  %v3665_v28 = vpop.f32.mrb[189].mxu1  ;;  %v8947_v22 = vld [vmem:[#allocation17_spill] sm:$0xff] }
 0x33c   : > { %v5152_v5 = vadd.f32 %v3384_v15, %v8944_v45  ;;  %v3386_v26 = vpop.f32.mrb[125].mxu0  ;;  %v7518_v53 = vadd.f32 %v5150_v61, %v3665_v28  ;;  %v5057_v2 = vpop.f32.mrb[190].mxu1 }
 0x33d   : > { %v3870_v13 = vadd.f32 %v3869_v51, %v3807_v19  ;;  %v3738_v37 = vadd.f32 %v3737_v18, %v7503_v46  ;;  %v3387_v62 = vpop.f32.mrb[126].mxu0  ;;  %v3668_v23 = vpop.f32.mrb[191].mxu1 }
 0x33e   : > { %8945 = vst [vmem:[#allocation16_spill] sm:$0xff] %v7518_v53  ;;  %v7523_v12 = vadd.f32 %v5152_v5, %v5056_v24  ;;  %v3809_v50 = vmul.f32 %v7518_v53, %v7518_v53  ;;  %v5153_v35 = vadd.f32 %v3387_v62, %v8947_v22  ;;  %v7528_v15 = vadd.f32 %v5151_v0, %v3668_v23  ;;  %v3389_v61 = vpop.f32.mrb[127].mxu0 }
 0x33f   : > { %v3739_v28 = vadd.f32 %v3738_v37, %v7518_v53  ;;  %v3871_v45 = vadd.f32 %v3870_v13, %v3808_v29 }
 0x340   : > { %8946 = vst [vmem:[#allocation28_spill] sm:$0xff] %v7523_v12  ;;  %8948 = vst [vmem:[#allocation17_spill] sm:$0xff] %v7528_v15  ;;  %v7531_v26 = vadd.f32 %v5153_v35, %v5057_v2  ;;  %v3810_v19 = vmul.f32 %v7528_v15, %v7528_v15  ;;  %v3811_v51 = vmul.f32 %v7523_v12, %v7523_v12 }
 0x341   : > { %v3872_v18 = vadd.f32 %v3871_v45, %v3809_v50  ;;  %v3740_v24 = vadd.f32 %v3739_v28, %v7528_v15 }
 0x342   : > { %8949 = vst [vmem:[#allocation29_spill] sm:$0xff] %v7531_v26  ;;  %v3812_v0 = vmul.f32 %v7531_v26, %v7531_v26 }
 0x343   : > { %v3741_v5 = vadd.f32 %v3740_v24, %v7523_v12  ;;  %v3873_v62 = vadd.f32 %v3872_v18, %v3810_v19 }
 0x345   : > { %v3742_v23 = vadd.f32 %v3741_v5, %v7531_v26  ;;  %v3874_v29 = vadd.f32 %v3873_v62, %v3811_v51  ;;  %v8950_v62 = vld [vmem:[#allocation19_spill] sm:$0xff] }
 0x347   : > { %v3743_v2 = vrot.slane %v3742_v23, 4  ;;  %v3875_v13 = vadd.f32 %v3874_v29, %v3812_v0 }
 0x349   : > { %v3744_v37 = vadd.f32 %v3743_v2, %v3742_v23  ;;  %v3876_v22 = vrot.slane %v3875_v13, 4  ;;  %v8951_v23 = vld [vmem:[#allocation20_spill] sm:$0xff]  ;;  %v8952_v2 = vld [vmem:[#allocation18_spill] sm:$0xff] }
 0x34b   : > { %v3745_v35 = vrot.slane %v3744_v37, 2  ;;  %v3877_v50 = vadd.f32 %v3876_v22, %v3875_v13  ;;  %v8966_v13 = vld [vmem:[#allocation6_spill] sm:$0xff] }
 0x34d   : > { %v3746_v61 = vadd.f32 %v3745_v35, %v3744_v37  ;;  %v3878_v28 = vrot.slane %v3877_v50, 2  ;;  %v8970_v37 = vld [vmem:[#allocation25_spill] sm:$0xff] }
 0x34f   : > { %v3747_v45 = vrot.slane %v3746_v61, 1  ;;  %v3879_v15 = vadd.f32 %v3878_v28, %v3877_v50  ;;  %v8955_v28 = vld [vmem:[#allocation23_spill] sm:$0xff] }
 0x351   : > { %v3748_v53 = vadd.f32 %v3747_v45, %v3746_v61  ;;  %v3880_v46 = vrot.slane %v3879_v15, 1  ;;  %v8956_v45 = vld [vmem:[#allocation4_spill] sm:$0xff]  ;;  %v8961_v61 = vld [vmem:[#allocation15_spill] sm:$0xff] }
 0x353   : > { %v3881_v24 = vadd.f32 %v3880_v46, %v3879_v15  ;;  %v7542_v19 = vmul.f32 0.001953125, %v3748_v53  ;;  %v8958_v15 = vld [vmem:[#allocation11_spill] sm:$0xff]  ;;  %v8969_v53 = vld [vmem:[#allocation24_spill] sm:$0xff] }
 0x354   : > { %v8962_v46 = vld [vmem:[#allocation27_spill] sm:$0xff] }
 0x355   : > { %v3883_v18 = vmul.f32 0.001953125, %v3881_v24  ;;  %v3884_v5 = vmul.f32 %v7542_v19, %v7542_v19  ;;  %v3934_v50 = vsub.f32 %v8966_v13, %v7542_v19  ;;  %v8967_v24 = vld [vmem:[#allocation8_spill] sm:$0xff]  ;;  %v3937_v13 = vsub.f32 %v8969_v53, %v7542_v19 }
 0x356   : > { %v3935_v0 = vsub.f32 %v8967_v24, %v7542_v19  ;;  %v3938_v29 = vsub.f32 %v8970_v37, %v7542_v19  ;;  %v8971_v35 = vsub.f32 %v8950_v62, %v7542_v19  ;;  %v8972_v24 = vsub.f32 %v8951_v23, %v7542_v19 }
 0x357   : > { %v3885_v51 = vsub.f32 %v3883_v18, %v3884_v5  ;;  %v8965_v18 = vld [vmem:[#allocation5_spill] sm:$0xff]  ;;  %v8974_v37 = vsub.f32 %v7102_v9, %v7542_v19 }
 0x358   : > { %v3933_v30 = vsub.f32 %v8965_v18, %v7542_v19  ;;  %v3936_v18 = vsub.f32 %v8968_v49, %v7542_v19  ;;  %v8973_v49 = vsub.f32 %v8952_v2, %v7542_v19 }
 0x359   : > { %v3886_v22 = vmax.f32 %v3885_v51, 0.0  ;;  %v8954_v51 = vld [vmem:[#allocation22_spill] sm:$0xff] }
 0x35b   : > { %v3887_v5 = vadd.f32 0.001, %v3886_v22  ;;  %v8957_v22 = vld [vmem:[#allocation7_spill] sm:$0xff] }
 0x35d   : > { %5685 = vrsqrt.f32 %v3887_v5  ;;  %v8953_v5 = vld [vmem:[#allocation21_spill] sm:$0xff] }
 0x367   : > { %v7666_v8 = vpop.eup %5685 }
 0x368   : > { %v7681_v26 = vmul.f32 %v7666_v8, %v8971_v35  ;;  %v7687_v12 = vmul.f32 %v7666_v8, %v8972_v24  ;;  %v7693_v53 = vmul.f32 %v7666_v8, %v8973_v49  ;;  %v7699_v62 = vmul.f32 %v7666_v8, %v8974_v37 }
 0x369   : > { %v8975_v35 = vsub.f32 %v7128_v20, %v7542_v19  ;;  %v8976_v24 = vsub.f32 %v7141_v36, %v7542_v19  ;;  %v8977_v49 = vsub.f32 %v7122_v43, %v7542_v19  ;;  %v8978_v37 = vsub.f32 %v7132_v14, %v7542_v19 }
 0x36b   : > { %v7705_v23 = vmul.f32 %v7666_v8, %v8975_v35  ;;  %v7711_v2 = vmul.f32 %v7666_v8, %v8976_v24  ;;  %v7717_v9 = vmul.f32 %v7666_v8, %v8977_v49  ;;  %v7723_v20 = vmul.f32 %v7666_v8, %v8978_v37 }
 0x36c   : > { %v8979_v35 = vsub.f32 %v7156_v31, %v7542_v19  ;;  %v8980_v24 = vsub.f32 %v7170_v54, %v7542_v19  ;;  %v8981_v49 = vsub.f32 %v7150_v48, %v7542_v19  ;;  %v8982_v37 = vsub.f32 %v7162_v1, %v7542_v19 }
 0x36d   : > { %v8983_v54 = vsub.f32 %v7186_v3, %v7542_v19  ;;  %v8984_v48 = vsub.f32 %v7200_v57, %v7542_v19  ;;  %v8985_v1 = vsub.f32 %v7180_v56, %v7542_v19 }
 0x36e   : > { %v7729_v36 = vmul.f32 %v7666_v8, %v8979_v35  ;;  %v7735_v43 = vmul.f32 %v7666_v8, %v8980_v24  ;;  %v7741_v14 = vmul.f32 %v7666_v8, %v8981_v49  ;;  %v7747_v31 = vmul.f32 %v7666_v8, %v8982_v37 }
 0x36f   : > { %v7758_v35 = vmul.f32 %v7666_v8, %v8983_v54  ;;  %v7764_v24 = vmul.f32 %v7666_v8, %v8984_v48  ;;  %v7770_v49 = vmul.f32 %v7666_v8, %v8985_v1  ;;  %v8986_v37 = vsub.f32 %v7192_v55, %v7542_v19 }
 0x370   : > { %v8987_v54 = vsub.f32 %v7216_v60, %v7542_v19  ;;  %v8988_v48 = vsub.f32 %v7230_v39, %v7542_v19  ;;  %v8989_v1 = vsub.f32 %v7210_v41, %v7542_v19 }
 0x371   : > { %v7776_v3 = vmul.f32 %v7666_v8, %v8986_v37  ;;  %v8990_v37 = vsub.f32 %v7222_v10, %v7542_v19 }
 0x372   : > { %v7782_v57 = vmul.f32 %v7666_v8, %v8987_v54  ;;  %v7788_v56 = vmul.f32 %v7666_v8, %v8988_v48  ;;  %v7794_v55 = vmul.f32 %v7666_v8, %v8989_v1  ;;  %v8991_v54 = vsub.f32 %v7246_v40, %v7542_v19 }
 0x373   : > { %v7800_v60 = vmul.f32 %v7666_v8, %v8990_v37  ;;  %v8992_v48 = vsub.f32 %v7260_v58, %v7542_v19  ;;  %v8993_v1 = vsub.f32 %v7240_v11, %v7542_v19  ;;  %v8994_v37 = vsub.f32 %v7252_v21, %v7542_v19 }
 0x374   : > { %v7806_v39 = vmul.f32 %v7666_v8, %v8991_v54  ;;  %v8995_v54 = vsub.f32 %v7276_v63, %v7542_v19 }
 0x375   : > { %v7812_v41 = vmul.f32 %v7666_v8, %v8992_v48  ;;  %v7818_v10 = vmul.f32 %v7666_v8, %v8993_v1  ;;  %v7824_v40 = vmul.f32 %v7666_v8, %v8994_v37  ;;  %v8996_v48 = vsub.f32 %v7290_v52, %v7542_v19 }
 0x376   : > { %v7830_v58 = vmul.f32 %v7666_v8, %v8995_v54  ;;  %v8997_v1 = vsub.f32 %v7270_v44, %v7542_v19  ;;  %v8998_v37 = vsub.f32 %v7282_v38, %v7542_v19  ;;  %v8999_v54 = vsub.f32 %v7306_v47, %v7542_v19 }
 0x377   : > { %v7836_v11 = vmul.f32 %v7666_v8, %v8996_v48  ;;  %v9000_v48 = vsub.f32 %v7320_v7, %v7542_v19 }
 0x378   : > { %v7842_v21 = vmul.f32 %v7666_v8, %v8997_v1  ;;  %v7848_v63 = vmul.f32 %v7666_v8, %v8998_v37  ;;  %v7855_v52 = vmul.f32 %v7666_v8, %v8999_v54  ;;  %v9001_v1 = vsub.f32 %v7300_v17, %v7542_v19 }
 0x379   : > { %v7861_v44 = vmul.f32 %v7666_v8, %v9000_v48  ;;  %v9002_v37 = vsub.f32 %v7312_v59, %v7542_v19  ;;  %v9003_v54 = vsub.f32 %v7336_v33, %v7542_v19  ;;  %v9004_v48 = vsub.f32 %v7350_v6, %v7542_v19 }
 0x37a   : > { %v7867_v38 = vmul.f32 %v7666_v8, %v9001_v1  ;;  %v9005_v1 = vsub.f32 %v8953_v5, %v7542_v19 }
 0x37b   : > { %v7873_v47 = vmul.f32 %v7666_v8, %v9002_v37  ;;  %v7879_v7 = vmul.f32 %v7666_v8, %v9003_v54  ;;  %v7885_v17 = vmul.f32 %v7666_v8, %v9004_v48  ;;  %v9006_v37 = vsub.f32 %v8954_v51, %v7542_v19 }
 0x37c   : > { %v7891_v59 = vmul.f32 %v7666_v8, %v9005_v1  ;;  %v9007_v54 = vsub.f32 %v7366_v32, %v7542_v19  ;;  %v9008_v48 = vsub.f32 %v7380_v16, %v7542_v19  ;;  %v9009_v1 = vsub.f32 %v8955_v28, %v7542_v19 }
 0x37d   : > { %v7897_v33 = vmul.f32 %v7666_v8, %v9006_v37  ;;  %v9010_v37 = vsub.f32 %v8956_v45, %v7542_v19  ;;  %v9011_v16 = vsub.f32 %v7396_v42, %v7542_v19  ;;  %v7950_v42 = vmul.f32 %v7666_v8, %v3936_v18 }
 0x37e   : > { %v7903_v6 = vmul.f32 %v7666_v8, %v9007_v54  ;;  %v7909_v5 = vmul.f32 %v7666_v8, %v9008_v48  ;;  %v7915_v51 = vmul.f32 %v7666_v8, %v9009_v1  ;;  %v9012_v54 = vsub.f32 %v8957_v22, %v7542_v19 }
 0x37f   : > { %v7921_v32 = vmul.f32 %v7666_v8, %v9010_v37  ;;  %v7932_v28 = vmul.f32 %v7666_v8, %v9011_v16  ;;  %v7941_v48 = vmul.f32 %v7666_v8, %v3933_v30  ;;  %v7944_v1 = vmul.f32 %v7666_v8, %v3934_v50 }
 0x380   : > { %v7938_v45 = vmul.f32 %v7666_v8, %v9012_v54  ;;  %v7947_v37 = vmul.f32 %v7666_v8, %v3935_v0  ;;  %v7953_v16 = vmul.f32 %v7666_v8, %v3937_v13  ;;  %v7956_v22 = vmul.f32 %v7666_v8, %v3938_v29 }
 0x381   : > { %v9013_v54 = vsub.f32 %v7450_v25, %v7542_v19  ;;  %v9015_v50 = vsub.f32 %v7462_v4, %v7542_v19  ;;  %v9017_v18 = vsub.f32 %v7446_v27, %v7542_v19  ;;  %v9019_v29 = vsub.f32 %v7456_v34, %v7542_v19 }
 0x382   : > { %v9021_v4 = vsub.f32 %v8958_v15, %v7542_v19 }
 0x383   : > { %v7962_v30 = vmul.f32 %v7666_v8, %v9013_v54  ;;  %v7968_v0 = vmul.f32 %v7666_v8, %v9015_v50  ;;  %v7974_v13 = vmul.f32 %v7666_v8, %v9017_v18  ;;  %v7980_v25 = vmul.f32 %v7666_v8, %v9019_v29  ;;  %v7983_v54 = vld [vmem:[%s7926_s11] ss:$0 sm:$0xff] }
 0x384   : > { %v7989_v50 = vmul.f32 %v7666_v8, %v9021_v4  ;;  %v9030_v4 = vld [vmem:[#allocation14_spill] sm:$0xff] }
 0x385   : > { %9014 = vst [vmem:[#allocation19_spill] sm:$0xff] %v7962_v30  ;;  %9016 = vst [vmem:[#allocation20_spill] sm:$0xff] %v7968_v0  ;;  %v9023_v0 = vld [vmem:[#allocation13_spill] sm:$0xff] }
 0x386   : > { %9018 = vst [vmem:[#allocation18_spill] sm:$0xff] %v7974_v13  ;;  %9020 = vst [vmem:[#allocation21_spill] sm:$0xff] %v7980_v25  ;;  %v9024_v27 = vsub.f32 %v9023_v0, %v7542_v19  ;;  %v9025_v13 = vld [vmem:[#allocation10_spill] sm:$0xff]  ;;  %v9028_v25 = vld [vmem:[#allocation12_spill] sm:$0xff] }
 0x387   : > { %9022 = vst [vmem:[#allocation22_spill] sm:$0xff] %v7989_v50  ;;  %v9026_v34 = vsub.f32 %v9025_v13, %v7542_v19  ;;  %v9029_v30 = vsub.f32 %v9028_v25, %v7542_v19  ;;  %v9031_v50 = vsub.f32 %v9030_v4, %v7542_v19 }
 0x388   : > { %v7995_v18 = vmul.f32 %v7666_v8, %v9024_v27  ;;  %v9033_v27 = vsub.f32 %v8961_v61, %v7542_v19 }
 0x389   : > { %v8001_v29 = vmul.f32 %v7666_v8, %v9026_v34  ;;  %v8007_v15 = vmul.f32 %v7666_v8, %v9029_v30  ;;  %v8013_v0 = vmul.f32 %v7666_v8, %v9031_v50  ;;  %v9035_v34 = vld [vmem:[#allocation26_spill] sm:$0xff]  ;;  %v9038_v30 = vsub.f32 %v8962_v46, %v7542_v19  ;;  %v9040_v50 = vld [vmem:[#allocation16_spill] sm:$0xff] }
 0x38a   : > { %v8019_v13 = vmul.f32 %v7666_v8, %v9033_v27  ;;  %v9042_v27 = vld [vmem:[#allocation17_spill] sm:$0xff] }
 0x38b   : > { %9027 = vst [vmem:[#allocation23_spill] sm:$0xff] %v8001_v29  ;;  %9032 = vst [vmem:[#allocation4_spill] sm:$0xff] %v8013_v0  ;;  %v9036_v29 = vsub.f32 %v9035_v34, %v7542_v19  ;;  %v8031_v4 = vmul.f32 %v7666_v8, %v9038_v30  ;;  %v9041_v0 = vsub.f32 %v9040_v50, %v7542_v19  ;;  %v9046_v30 = vld [vmem:[#allocation29_spill] sm:$0xff] }
 0x38c   : > { %9034 = vst [vmem:[#allocation7_spill] sm:$0xff] %v8019_v13  ;;  %v9043_v13 = vsub.f32 %v9042_v27, %v7542_v19  ;;  %v8067_v27 = vmul.f32 %v7983_v54, %v7693_v53  ;;  %v8091_v53 = vmul.f32 %v7983_v54, %v7729_v36  ;;  %v8115_v36 = vmul.f32 %v7983_v54, %v7770_v49 }
 0x38d   : > { %v8025_v25 = vmul.f32 %v7666_v8, %v9036_v29  ;;  %9039 = vst [vmem:[#allocation15_spill] sm:$0xff] %v8031_v4  ;;  %v8037_v61 = vmul.f32 %v7666_v8, %v9041_v0  ;;  %v9044_v29 = vld [vmem:[#allocation28_spill] sm:$0xff]  ;;  %v9047_v4 = vsub.f32 %v9046_v30, %v7542_v19  ;;  %v8059_v0 = vmul.f32 %v7983_v54, %v7681_v26  ;;  %v9055_v30 = vld [vmem:[#allocation21_spill] sm:$0xff] }
 0x38e   : > { %v8043_v34 = vmul.f32 %v7666_v8, %v9043_v13  ;;  %v8063_v13 = vmul.f32 %v7983_v54, %v7687_v12  ;;  %v8079_v26 = vmul.f32 %v7983_v54, %v7711_v2  ;;  %v8083_v12 = vmul.f32 %v7983_v54, %v7717_v9 }
 0x38f   : > { %9037 = vst [vmem:[#allocation11_spill] sm:$0xff] %v8025_v25  ;;  %v9045_v25 = vsub.f32 %v9044_v29, %v7542_v19  ;;  %v8055_v50 = vmul.f32 %v7666_v8, %v9047_v4  ;;  %v8087_v19 = vmul.f32 %v7983_v54, %v7723_v20  ;;  %v8103_v2 = vmul.f32 %v7983_v54, %v7747_v31  ;;  %v9051_v4 = vld [vmem:[#allocation20_spill] sm:$0xff]  ;;  %v9053_v29 = vld [vmem:[#allocation18_spill] sm:$0xff] }
 0x390   : > { %v8107_v9 = vmul.f32 %v7983_v54, %v7758_v35  ;;  %v8111_v20 = vmul.f32 %v7983_v54, %v7764_v24  ;;  %v8127_v31 = vmul.f32 %v7983_v54, %v7788_v56  ;;  %v8131_v35 = vmul.f32 %v7983_v54, %v7794_v55 }
 0x391   : > { %v8049_v46 = vmul.f32 %v7666_v8, %v9045_v25  ;;  %v8071_v25 = vmul.f32 %v7983_v54, %v7699_v62  ;;  %v8075_v8 = vmul.f32 %v7983_v54, %v7705_v23  ;;  %v8095_v62 = vmul.f32 %v7983_v54, %v7735_v43 }
 0x392   : > { %v8099_v23 = vmul.f32 %v7983_v54, %v7741_v14  ;;  %v8119_v43 = vmul.f32 %v7983_v54, %v7776_v3  ;;  %v8123_v14 = vmul.f32 %v7983_v54, %v7782_v57  ;;  %v8135_v24 = vmul.f32 %v7983_v54, %v7800_v60 }
 0x393   : > { %v8139_v49 = vmul.f32 %v7983_v54, %v7806_v39  ;;  %v8143_v3 = vmul.f32 %v7983_v54, %v7812_v41  ;;  %v8147_v57 = vmul.f32 %v7983_v54, %v7818_v10  ;;  %v8151_v56 = vmul.f32 %v7983_v54, %v7824_v40 }
 0x394   : > { %v8155_v55 = vmul.f32 %v7983_v54, %v7830_v58  ;;  %v8159_v60 = vmul.f32 %v7983_v54, %v7836_v11  ;;  %v8163_v39 = vmul.f32 %v7983_v54, %v7842_v21  ;;  %v8167_v41 = vmul.f32 %v7983_v54, %v7848_v63 }
 0x395   : > { %v8171_v10 = vmul.f32 %v7983_v54, %v7855_v52  ;;  %v8175_v40 = vmul.f32 %v7983_v54, %v7861_v44  ;;  %v8179_v58 = vmul.f32 %v7983_v54, %v7867_v38  ;;  %v8183_v11 = vmul.f32 %v7983_v54, %v7873_v47 }
 0x396   : > { %v8187_v21 = vmul.f32 %v7983_v54, %v7879_v7  ;;  %v8191_v63 = vmul.f32 %v7983_v54, %v7885_v17  ;;  %v8195_v52 = vmul.f32 %v7983_v54, %v7891_v59  ;;  %v8199_v44 = vmul.f32 %v7983_v54, %v7897_v33 }
 0x397   : > { %v8203_v38 = vmul.f32 %v7983_v54, %v7903_v6  ;;  %v8207_v47 = vmul.f32 %v7983_v54, %v7909_v5  ;;  %v8211_v7 = vmul.f32 %v7983_v54, %v7915_v51  ;;  %v8215_v17 = vmul.f32 %v7983_v54, %v7921_v32 }
 0x398   : > { %v8219_v59 = vmul.f32 %v7983_v54, %v7932_v28  ;;  %v8223_v33 = vmul.f32 %v7983_v54, %v7938_v45  ;;  %v8227_v6 = vmul.f32 %v7983_v54, %v7941_v48  ;;  %v8231_v5 = vmul.f32 %v7983_v54, %v7944_v1  ;;  %v9050_v48 = vld [vmem:[#allocation19_spill] sm:$0xff] }
 0x399   : > { %v8235_v51 = vmul.f32 %v7983_v54, %v7947_v37  ;;  %v8239_v32 = vmul.f32 %v7983_v54, %v7950_v42  ;;  %v8243_v28 = vmul.f32 %v7983_v54, %v7953_v16  ;;  %v8247_v45 = vmul.f32 %v7983_v54, %v7956_v22  ;;  %v9057_v22 = vld [vmem:[#allocation22_spill] sm:$0xff] }
 0x39a   : > { %v8251_v1 = vmul.f32 %v7983_v54, %v9050_v48  ;;  %v8255_v37 = vmul.f32 %v7983_v54, %v9051_v4  ;;  %v8259_v42 = vmul.f32 %v7983_v54, %v9053_v29  ;;  %v8263_v16 = vmul.f32 %v7983_v54, %v9055_v30  ;;  %v9060_v4 = vld [vmem:[#allocation23_spill] sm:$0xff]  ;;  %v9061_v30 = vld [vmem:[#allocation4_spill] sm:$0xff] }
 0x39b   : > { %9048 = vst [vmem:[#allocation27_spill] sm:$0xff] %v8243_v28  ;;  %9049 = vst [vmem:[#allocation5_spill] sm:$0xff] %v8247_v45  ;;  %v8266_v28 = vld [vmem:[%s7926_s11 + $0x1] ss:$0 sm:$0xff]  ;;  %v8270_v45 = vmul.f32 %v7983_v54, %v9057_v22  ;;  %v8274_v48 = vmul.f32 %v7983_v54, %v7995_v18  ;;  %v8282_v29 = vmul.f32 %v7983_v54, %v8007_v15 }
 0x39c   : > { %9052 = vst [vmem:[#allocation6_spill] sm:$0xff] %v8255_v37  ;;  %9054 = vst [vmem:[#allocation8_spill] sm:$0xff] %v8259_v42  ;;  %v8278_v37 = vmul.f32 %v7983_v54, %v9060_v4  ;;  %v9062_v42 = vld [vmem:[#allocation7_spill] sm:$0xff]  ;;  %v8302_v15 = vmul.f32 %v7983_v54, %v8037_v61  ;;  %v8322_v61 = vadd.f32 %v8266_v28, %v8063_v13 }
 0x39d   : > { %9056 = vst [vmem:[#allocation9_spill] sm:$0xff] %v8263_v16  ;;  %9058 = vst [vmem:[#allocation24_spill] sm:$0xff] %v8270_v45  ;;  %v8286_v16 = vmul.f32 %v7983_v54, %v9061_v30  ;;  %v8290_v22 = vmul.f32 %v7983_v54, %v9062_v42  ;;  %v9063_v45 = vld [vmem:[#allocation11_spill] sm:$0xff]  ;;  %v8306_v30 = vmul.f32 %v7983_v54, %v8043_v34 }
 0x39e   : > { %9059 = vst [vmem:[#allocation25_spill] sm:$0xff] %v8274_v48  ;;  %v8294_v18 = vmul.f32 %v7983_v54, %v9063_v45  ;;  %v9064_v48 = vld [vmem:[#allocation15_spill] sm:$0xff]  ;;  %v8310_v42 = vmul.f32 %v7983_v54, %v8049_v46  ;;  %v8314_v45 = vmul.f32 %v7983_v54, %v8055_v50  ;;  %v8326_v34 = vadd.f32 %v8266_v28, %v8067_v27 }
 0x39f   : > { %v8298_v4 = vmul.f32 %v7983_v54, %v9064_v48  ;;  %v8318_v48 = vadd.f32 %v8266_v28, %v8059_v0  ;;  %v8330_v46 = vadd.f32 %v8266_v28, %v8071_v25  ;;  %v8334_v54 = vadd.f32 %v8266_v28, %v8075_v8 }
 0x3a0   : > { %v8338_v50 = vadd.f32 %v8266_v28, %v8079_v26  ;;  %v8342_v0 = vadd.f32 %v8266_v28, %v8083_v12  ;;  %v8346_v13 = vadd.f32 %v8266_v28, %v8087_v19  ;;  %v8350_v27 = vadd.f32 %v8266_v28, %v8091_v53 }
 0x3a1   : > { %v8354_v25 = vadd.f32 %v8266_v28, %v8095_v62  ;;  %v8358_v8 = vadd.f32 %v8266_v28, %v8099_v23  ;;  %v8362_v26 = vadd.f32 %v8266_v28, %v8103_v2  ;;  %v8366_v12 = vadd.f32 %v8266_v28, %v8107_v9 }
 0x3a2   : > { %v8370_v19 = vadd.f32 %v8266_v28, %v8111_v20  ;;  %v8374_v53 = vadd.f32 %v8266_v28, %v8115_v36  ;;  %v8378_v62 = vadd.f32 %v8266_v28, %v8119_v43  ;;  %v8382_v23 = vadd.f32 %v8266_v28, %v8123_v14 }
 0x3a3   : > { %v8386_v2 = vadd.f32 %v8266_v28, %v8127_v31  ;;  %v8390_v9 = vadd.f32 %v8266_v28, %v8131_v35  ;;  %v8394_v20 = vadd.f32 %v8266_v28, %v8135_v24  ;;  %v8398_v36 = vadd.f32 %v8266_v28, %v8139_v49 }
 0x3a4   : > { %v8402_v43 = vadd.f32 %v8266_v28, %v8143_v3  ;;  %v8406_v14 = vadd.f32 %v8266_v28, %v8147_v57  ;;  %v8410_v31 = vadd.f32 %v8266_v28, %v8151_v56  ;;  %v8414_v35 = vadd.f32 %v8266_v28, %v8155_v55 }
 0x3a5   : > { %v8418_v24 = vadd.f32 %v8266_v28, %v8159_v60  ;;  %v8422_v49 = vadd.f32 %v8266_v28, %v8163_v39  ;;  %v8426_v3 = vadd.f32 %v8266_v28, %v8167_v41  ;;  %v8430_v57 = vadd.f32 %v8266_v28, %v8171_v10 }
 0x3a6   : > { %v8434_v56 = vadd.f32 %v8266_v28, %v8175_v40  ;;  %v8438_v55 = vadd.f32 %v8266_v28, %v8179_v58  ;;  %v8442_v60 = vadd.f32 %v8266_v28, %v8183_v11  ;;  %v8446_v39 = vadd.f32 %v8266_v28, %v8187_v21 }
 0x3a7   : > { %v8450_v41 = vadd.f32 %v8266_v28, %v8191_v63  ;;  %v8454_v10 = vadd.f32 %v8266_v28, %v8195_v52  ;;  %v8458_v40 = vadd.f32 %v8266_v28, %v8199_v44  ;;  %v8462_v58 = vadd.f32 %v8266_v28, %v8203_v38 }
 0x3a8   : > { %v8466_v11 = vadd.f32 %v8266_v28, %v8207_v47  ;;  %v8470_v21 = vadd.f32 %v8266_v28, %v8211_v7  ;;  %v8474_v63 = vadd.f32 %v8266_v28, %v8215_v17  ;;  %v8478_v52 = vadd.f32 %v8266_v28, %v8219_v59  ;;  %v9069_v59 = vld [vmem:[#allocation27_spill] sm:$0xff] }
 0x3a9   : > { %v8482_v44 = vadd.f32 %v8266_v28, %v8223_v33  ;;  %v8486_v38 = vadd.f32 %v8266_v28, %v8227_v6  ;;  %v8490_v47 = vadd.f32 %v8266_v28, %v8231_v5  ;;  %v8494_v7 = vadd.f32 %v8266_v28, %v8235_v51  ;;  %v9073_v51 = vld [vmem:[#allocation6_spill] sm:$0xff] }
 0x3aa   : > { %v8498_v17 = vadd.f32 %v8266_v28, %v8239_v32  ;;  %v8502_v33 = vadd.f32 %v8266_v28, %v9069_v59  ;;  %v8512_v5 = vadd.f32 %v8266_v28, %v8251_v1  ;;  %v9074_v32 = vld [vmem:[#allocation8_spill] sm:$0xff]  ;;  %v9075_v59 = vld [vmem:[#allocation9_spill] sm:$0xff] }
 0x3ab   : > { %9065 = vst [vmem:[#allocation13_spill] sm:$0xff] %v8482_v44  ;;  %9066 = vst [vmem:[#allocation10_spill] sm:$0xff] %v8490_v47  ;;  %v9071_v44 = vld [vmem:[#allocation5_spill] sm:$0xff] }
 0x3ac   : > { %9067 = vst [vmem:[#allocation12_spill] sm:$0xff] %v8494_v7  ;;  %9068 = vst [vmem:[#allocation14_spill] sm:$0xff] %v8498_v17  ;;  %v8506_v6 = vadd.f32 %v8266_v28, %v9071_v44  ;;  %v8516_v7 = vadd.f32 %v8266_v28, %v9073_v51  ;;  %v8520_v17 = vadd.f32 %v8266_v28, %v9074_v32  ;;  %v9076_v44 = vld [vmem:[#allocation24_spill] sm:$0xff]  ;;  %v9077_v47 = vld [vmem:[#allocation25_spill] sm:$0xff] }
 0x3ad   : > { %9070 = vst [vmem:[#allocation26_spill] sm:$0xff] %v8502_v33  ;;  %v8524_v33 = vadd.f32 %v8266_v28, %v9075_v59  ;;  %v8532_v1 = vadd.f32 %v8266_v28, %v9077_v47  ;;  %v8536_v51 = vadd.f32 %v8266_v28, %v8278_v37  ;;  %v8540_v32 = vadd.f32 %v8266_v28, %v8282_v29 }
 0x3ae   : > { %9072 = vst [vmem:[#allocation16_spill] sm:$0xff] %v8506_v6  ;;  %v8528_v6 = vadd.f32 %v8266_v28, %v9076_v44  ;;  %v8544_v59 = vadd.f32 %v8266_v28, %v8286_v16  ;;  %v8548_v44 = vadd.f32 %v8266_v28, %v8290_v22  ;;  %v8552_v47 = vadd.f32 %v8266_v28, %v8294_v18 }
 0x3af   : > { %v8556_v37 = vadd.f32 %v8266_v28, %v8298_v4  ;;  %v8560_v29 = vadd.f32 %v8266_v28, %v8302_v15  ;;  %v8564_v16 = vadd.f32 %v8266_v28, %v8306_v30  ;;  %v8568_v22 = vadd.f32 %v8266_v28, %v8310_v42 }
 0x3b0   : > { %9078 = vst [vmem:[#allocation17_spill] sm:$0xff] %v8552_v47  ;;  %v8572_v18 = vadd.f32 %v8266_v28, %v8314_v45  ;;  %v4155_v47 = vmax.f32 %v8318_v48, 0.0  ;;  %v4156_v4 = vmax.f32 %v8322_v61, 0.0  ;;  %v4158_v15 = vmax.f32 %v8330_v46, 0.0 }
 0x3b1   : > { %9079 = vst [vmem:[#allocation28_spill] sm:$0xff] %v8556_v37  ;;  %9080 = vst [vmem:[#allocation29_spill] sm:$0xff] %v8560_v29  ;;  %v4157_v37 = vmax.f32 %v8326_v34, 0.0  ;;  %v4159_v29 = vmax.f32 %v8334_v54, 0.0  ;;  %v4160_v30 = vmax.f32 %v8338_v50, 0.0  ;;  %v4162_v42 = vmax.f32 %v8346_v13, 0.0 }
 0x3b2   : > { %9081 = vst [vmem:[#allocation19_spill] sm:$0xff] %v8564_v16  ;;  %9082 = vst [vmem:[#allocation20_spill] sm:$0xff] %v8568_v22  ;;  %v4161_v16 = vmax.f32 %v8342_v0, 0.0  ;;  %v4163_v22 = vmax.f32 %v8350_v27, 0.0  ;;  %v4164_v28 = vmax.f32 %v8354_v25, 0.0  ;;  %v4165_v45 = vmax.f32 %v8358_v8, 0.0 }
 0x3b3   : > { %v4166_v48 = vmax.f32 %v8362_v26, 0.0  ;;  %4219 = vst [vmem:[%s8586_s12] sm:$0xff] %v4155_v47  ;;  %4220 = vst [vmem:[%s8586_s12 + $0x8] sm:$0xff] %v4156_v4  ;;  %v4167_v61 = vmax.f32 %v8366_v12, 0.0  ;;  %v4168_v34 = vmax.f32 %v8370_v19, 0.0  ;;  %v4169_v46 = vmax.f32 %v8374_v53, 0.0 }
 0x3b4   : > { %4221 = vst [vmem:[%s8586_s12 + $0x10] sm:$0xff] %v4157_v37  ;;  %4222 = vst [vmem:[%s8586_s12 + $0x18] sm:$0xff] %v4158_v15  ;;  %v4170_v54 = vmax.f32 %v8378_v62, 0.0  ;;  %v4171_v50 = vmax.f32 %v8382_v23, 0.0  ;;  %v4172_v0 = vmax.f32 %v8386_v2, 0.0  ;;  %v4173_v13 = vmax.f32 %v8390_v9, 0.0 }
 0x3b5   : > { %4223 = vst [vmem:[%s8586_s12 + $0x20] sm:$0xff] %v4159_v29  ;;  %4224 = vst [vmem:[%s8586_s12 + $0x28] sm:$0xff] %v4160_v30  ;;  %v4174_v27 = vmax.f32 %v8394_v20, 0.0  ;;  %v4175_v25 = vmax.f32 %v8398_v36, 0.0  ;;  %v4176_v8 = vmax.f32 %v8402_v43, 0.0  ;;  %v4177_v26 = vmax.f32 %v8406_v14, 0.0 }
 0x3b6   : > { %4225 = vst [vmem:[%s8586_s12 + $0x30] sm:$0xff] %v4161_v16  ;;  %4226 = vst [vmem:[%s8586_s12 + $0x38] sm:$0xff] %v4162_v42  ;;  %v4178_v12 = vmax.f32 %v8410_v31, 0.0  ;;  %v4179_v19 = vmax.f32 %v8414_v35, 0.0  ;;  %v4180_v53 = vmax.f32 %v8418_v24, 0.0  ;;  %v4181_v62 = vmax.f32 %v8422_v49, 0.0 }
 0x3b7   : > { %4227 = vst [vmem:[%s8586_s12 + $0x40] sm:$0xff] %v4163_v22  ;;  %4228 = vst [vmem:[%s8586_s12 + $0x48] sm:$0xff] %v4164_v28  ;;  %v4182_v23 = vmax.f32 %v8426_v3, 0.0  ;;  %v4183_v2 = vmax.f32 %v8430_v57, 0.0  ;;  %v4184_v9 = vmax.f32 %v8434_v56, 0.0  ;;  %v4185_v20 = vmax.f32 %v8438_v55, 0.0 }
 0x3b8   : > { %4229 = vst [vmem:[%s8586_s12 + $0x50] sm:$0xff] %v4165_v45  ;;  %4230 = vst [vmem:[%s8586_s12 + $0x58] sm:$0xff] %v4166_v48  ;;  %v4186_v36 = vmax.f32 %v8442_v60, 0.0  ;;  %v4187_v43 = vmax.f32 %v8446_v39, 0.0  ;;  %v4188_v14 = vmax.f32 %v8450_v41, 0.0  ;;  %v4189_v31 = vmax.f32 %v8454_v10, 0.0 }
 0x3b9   : > { %4231 = vst [vmem:[%s8586_s12 + $0x60] sm:$0xff] %v4167_v61  ;;  %4232 = vst [vmem:[%s8586_s12 + $0x68] sm:$0xff] %v4168_v34  ;;  %v4190_v35 = vmax.f32 %v8458_v40, 0.0  ;;  %v4191_v24 = vmax.f32 %v8462_v58, 0.0  ;;  %v4192_v49 = vmax.f32 %v8466_v11, 0.0  ;;  %v4193_v3 = vmax.f32 %v8470_v21, 0.0 }
 0x3ba   : > { %4233 = vst [vmem:[%s8586_s12 + $0x70] sm:$0xff] %v4169_v46  ;;  %4234 = vst [vmem:[%s8586_s12 + $0x78] sm:$0xff] %v4170_v54  ;;  %v4194_v57 = vmax.f32 %v8474_v63, 0.0  ;;  %v4195_v56 = vmax.f32 %v8478_v52, 0.0  ;;  %v9083_v55 = vld [vmem:[#allocation13_spill] sm:$0xff]  ;;  %v4197_v39 = vmax.f32 %v8486_v38, 0.0 }
 0x3bb   : > { %4235 = vst [vmem:[%s8586_s12 + $0x80] sm:$0xff] %v4171_v50  ;;  %4236 = vst [vmem:[%s8586_s12 + $0x88] sm:$0xff] %v4172_v0  ;;  %v4196_v60 = vmax.f32 %v9083_v55, 0.0  ;;  %v9084_v41 = vld [vmem:[#allocation10_spill] sm:$0xff]  ;;  %v9085_v40 = vld [vmem:[#allocation12_spill] sm:$0xff]  ;;  %v4203_v38 = vmax.f32 %v8512_v5, 0.0 }
 0x3bc   : > { %4237 = vst [vmem:[%s8586_s12 + $0x90] sm:$0xff] %v4173_v13  ;;  %4238 = vst [vmem:[%s8586_s12 + $0x98] sm:$0xff] %v4174_v27  ;;  %v4198_v10 = vmax.f32 %v9084_v41, 0.0  ;;  %v4199_v58 = vmax.f32 %v9085_v40, 0.0  ;;  %v9086_v11 = vld [vmem:[#allocation14_spill] sm:$0xff]  ;;  %v9088_v47 = vld [vmem:[#allocation16_spill] sm:$0xff] }
 0x3bd   : > { %4239 = vst [vmem:[%s8586_s12 + $0xa0] sm:$0xff] %v4175_v25  ;;  %4240 = vst [vmem:[%s8586_s12 + $0xa8] sm:$0xff] %v4176_v8  ;;  %v4200_v21 = vmax.f32 %v9086_v11, 0.0  ;;  %v9087_v63 = vld [vmem:[#allocation26_spill] sm:$0xff]  ;;  %v4202_v37 = vmax.f32 %v9088_v47, 0.0  ;;  %v4204_v29 = vmax.f32 %v8516_v7, 0.0 }
 0x3be   : > { %4241 = vst [vmem:[%s8586_s12 + $0xb0] sm:$0xff] %v4177_v26  ;;  %4242 = vst [vmem:[%s8586_s12 + $0xb8] sm:$0xff] %v4178_v12  ;;  %v4201_v52 = vmax.f32 %v9087_v63, 0.0  ;;  %v4205_v16 = vmax.f32 %v8520_v17, 0.0  ;;  %v4206_v22 = vmax.f32 %v8524_v33, 0.0  ;;  %v4207_v4 = vmax.f32 %v8528_v6, 0.0 }
 0x3bf   : > { %4243 = vst [vmem:[%s8586_s12 + $0xc0] sm:$0xff] %v4179_v19  ;;  %4244 = vst [vmem:[%s8586_s12 + $0xc8] sm:$0xff] %v4180_v53  ;;  %v4208_v15 = vmax.f32 %v8532_v1, 0.0  ;;  %v4209_v5 = vmax.f32 %v8536_v51, 0.0  ;;  %v4210_v7 = vmax.f32 %v8540_v32, 0.0  ;;  %v4211_v17 = vmax.f32 %v8544_v59, 0.0 }
 0x3c0   : > { %4245 = vst [vmem:[%s8586_s12 + $0xd0] sm:$0xff] %v4181_v62  ;;  %4246 = vst [vmem:[%s8586_s12 + $0xd8] sm:$0xff] %v4182_v23  ;;  %v4212_v33 = vmax.f32 %v8548_v44, 0.0  ;;  %v9089_v6 = vld [vmem:[#allocation17_spill] sm:$0xff]  ;;  %v9090_v30 = vld [vmem:[#allocation28_spill] sm:$0xff]  ;;  %v4218_v48 = vmax.f32 %v8572_v18, 0.0 }
 0x3c1   : > { %4247 = vst [vmem:[%s8586_s12 + $0xe0] sm:$0xff] %v4183_v2  ;;  %4248 = vst [vmem:[%s8586_s12 + $0xe8] sm:$0xff] %v4184_v9  ;;  %v4213_v1 = vmax.f32 %v9089_v6, 0.0  ;;  %v4214_v51 = vmax.f32 %v9090_v30, 0.0  ;;  %v9091_v32 = vld [vmem:[#allocation29_spill] sm:$0xff]  ;;  %v9092_v42 = vld [vmem:[#allocation19_spill] sm:$0xff] }
 0x3c2   : > { %4249 = vst [vmem:[%s8586_s12 + $0xf0] sm:$0xff] %v4185_v20  ;;  %4250 = vst [vmem:[%s8586_s12 + $0xf8] sm:$0xff] %v4186_v36  ;;  %v4215_v59 = vmax.f32 %v9091_v32, 0.0  ;;  %v4216_v28 = vmax.f32 %v9092_v42, 0.0  ;;  %v9093_v44 = vld [vmem:[#allocation20_spill] sm:$0xff]  ;;  %v4447_v61 = vld [vmem:[%s8586_s12 + $0x8] sm:$0xff] (%p5763_p5) }
 0x3c3   : > { %4251 = vst [vmem:[%s8586_s12 + $0x100] sm:$0xff] %v4187_v43  ;;  %4252 = vst [vmem:[%s8586_s12 + $0x108] sm:$0xff] %v4188_v14  ;;  %v4217_v45 = vmax.f32 %v9093_v44, 0.0  ;;  %v4445_v18 = vld [vmem:[%s8586_s12] sm:$0xff] (%p5763_p5)  ;;  %v4449_v34 = vld [vmem:[%s8586_s12 + $0x10] sm:$0xff] (%p5763_p5) }
 0x3c4   : > { %4253 = vst [vmem:[%s8586_s12 + $0x110] sm:$0xff] %v4189_v31  ;;  %4254 = vst [vmem:[%s8586_s12 + $0x118] sm:$0xff] %v4190_v35  ;;  %v4451_v46 = vld [vmem:[%s8586_s12 + $0x18] sm:$0xff] (%p5763_p5)  ;;  %v4453_v54 = vld [vmem:[%s8586_s12 + $0x20] sm:$0xff] (%p5763_p5) }
 0x3c5   : > { %4255 = vst [vmem:[%s8586_s12 + $0x120] sm:$0xff] %v4191_v24  ;;  %4256 = vst [vmem:[%s8586_s12 + $0x128] sm:$0xff] %v4192_v49  ;;  %v4455_v50 = vld [vmem:[%s8586_s12 + $0x28] sm:$0xff] (%p5763_p5)  ;;  %v4457_v0 = vld [vmem:[%s8586_s12 + $0x30] sm:$0xff] (%p5763_p5) }
 0x3c6   : > { %4257 = vst [vmem:[%s8586_s12 + $0x130] sm:$0xff] %v4193_v3  ;;  %4258 = vst [vmem:[%s8586_s12 + $0x138] sm:$0xff] %v4194_v57  ;;  %v4459_v13 = vld [vmem:[%s8586_s12 + $0x38] sm:$0xff] (%p5763_p5)  ;;  %v4461_v27 = vld [vmem:[%s8586_s12 + $0x40] sm:$0xff] (%p5763_p5) }
 0x3c7   : > { %4259 = vst [vmem:[%s8586_s12 + $0x140] sm:$0xff] %v4195_v56  ;;  %4260 = vst [vmem:[%s8586_s12 + $0x148] sm:$0xff] %v4196_v60  ;;  %v4463_v25 = vld [vmem:[%s8586_s12 + $0x48] sm:$0xff] (%p5763_p5)  ;;  %v4465_v8 = vld [vmem:[%s8586_s12 + $0x50] sm:$0xff] (%p5763_p5) }
 0x3c8   : > { %4261 = vst [vmem:[%s8586_s12 + $0x150] sm:$0xff] %v4197_v39  ;;  %4262 = vst [vmem:[%s8586_s12 + $0x158] sm:$0xff] %v4198_v10  ;;  %v4467_v26 = vld [vmem:[%s8586_s12 + $0x58] sm:$0xff] (%p5763_p5)  ;;  %v4469_v12 = vld [vmem:[%s8586_s12 + $0x60] sm:$0xff] (%p5763_p5) }
 0x3c9   : > { %4263 = vst [vmem:[%s8586_s12 + $0x160] sm:$0xff] %v4199_v58  ;;  %4264 = vst [vmem:[%s8586_s12 + $0x168] sm:$0xff] %v4200_v21  ;;  %v4471_v19 = vld [vmem:[%s8586_s12 + $0x68] sm:$0xff] (%p5763_p5)  ;;  %v4473_v53 = vld [vmem:[%s8586_s12 + $0x70] sm:$0xff] (%p5763_p5) }
 0x3ca   : > { %4265 = vst [vmem:[%s8586_s12 + $0x170] sm:$0xff] %v4201_v52  ;;  %4266 = vst [vmem:[%s8586_s12 + $0x178] sm:$0xff] %v4202_v37  ;;  %v4475_v62 = vld [vmem:[%s8586_s12 + $0x78] sm:$0xff] (%p5763_p5)  ;;  %v4477_v23 = vld [vmem:[%s8586_s12 + $0x80] sm:$0xff] (%p5763_p5) }
 0x3cb   : > { %4267 = vst [vmem:[%s8586_s12 + $0x180] sm:$0xff] %v4203_v38  ;;  %4268 = vst [vmem:[%s8586_s12 + $0x188] sm:$0xff] %v4204_v29  ;;  %v4479_v2 = vld [vmem:[%s8586_s12 + $0x88] sm:$0xff] (%p5763_p5)  ;;  %v4481_v9 = vld [vmem:[%s8586_s12 + $0x90] sm:$0xff] (%p5763_p5) }
 0x3cc   : > { %4269 = vst [vmem:[%s8586_s12 + $0x190] sm:$0xff] %v4205_v16  ;;  %4270 = vst [vmem:[%s8586_s12 + $0x198] sm:$0xff] %v4206_v22  ;;  %4289 = sbr.rel (!%p5763_p5) target bundleno = 1011 (0x3f3), region = 77  ;;  %v4483_v20 = vld [vmem:[%s8586_s12 + $0x98] sm:$0xff] (%p5763_p5)  ;;  %v4485_v36 = vld [vmem:[%s8586_s12 + $0xa0] sm:$0xff] (%p5763_p5) }
 0x3cd   : > { %4271 = vst [vmem:[%s8586_s12 + $0x1a0] sm:$0xff] %v4207_v4  ;;  %4272 = vst [vmem:[%s8586_s12 + $0x1a8] sm:$0xff] %v4208_v15  ;;  %v4487_v43 = vld [vmem:[%s8586_s12 + $0xa8] sm:$0xff] (%p5763_p5)  ;;  %v4489_v14 = vld [vmem:[%s8586_s12 + $0xb0] sm:$0xff] (%p5763_p5) }
 0x3ce   : > { %4273 = vst [vmem:[%s8586_s12 + $0x1b0] sm:$0xff] %v4209_v5  ;;  %4274 = vst [vmem:[%s8586_s12 + $0x1b8] sm:$0xff] %v4210_v7  ;;  %v4491_v31 = vld [vmem:[%s8586_s12 + $0xb8] sm:$0xff] (%p5763_p5)  ;;  %v4493_v35 = vld [vmem:[%s8586_s12 + $0xc0] sm:$0xff] (%p5763_p5) }
 0x3cf   : > { %4275 = vst [vmem:[%s8586_s12 + $0x1c0] sm:$0xff] %v4211_v17  ;;  %4276 = vst [vmem:[%s8586_s12 + $0x1c8] sm:$0xff] %v4212_v33  ;;  %v4495_v24 = vld [vmem:[%s8586_s12 + $0xc8] sm:$0xff] (%p5763_p5)  ;;  %v4497_v49 = vld [vmem:[%s8586_s12 + $0xd0] sm:$0xff] (%p5763_p5) }
 0x3d0   : > { %4277 = vst [vmem:[%s8586_s12 + $0x1d0] sm:$0xff] %v4213_v1  ;;  %4278 = vst [vmem:[%s8586_s12 + $0x1d8] sm:$0xff] %v4214_v51  ;;  %v4499_v3 = vld [vmem:[%s8586_s12 + $0xd8] sm:$0xff] (%p5763_p5)  ;;  %v4501_v57 = vld [vmem:[%s8586_s12 + $0xe0] sm:$0xff] (%p5763_p5) }
 0x3d1   : > { %4279 = vst [vmem:[%s8586_s12 + $0x1e0] sm:$0xff] %v4215_v59  ;;  %4280 = vst [vmem:[%s8586_s12 + $0x1e8] sm:$0xff] %v4216_v28  ;;  %v4503_v56 = vld [vmem:[%s8586_s12 + $0xe8] sm:$0xff] (%p5763_p5)  ;;  %v4505_v55 = vld [vmem:[%s8586_s12 + $0xf0] sm:$0xff] (%p5763_p5) }
 0x3d2   : > { %4281 = vst [vmem:[%s8586_s12 + $0x1f0] sm:$0xff] %v4217_v45  ;;  %4282 = vst [vmem:[%s8586_s12 + $0x1f8] sm:$0xff] %v4218_v48  ;;  %v4507_v60 = vld [vmem:[%s8586_s12 + $0xf8] sm:$0xff] (%p5763_p5)  ;;  %v4509_v39 = vld [vmem:[%s8586_s12 + $0x100] sm:$0xff] (%p5763_p5) }
 0x3d3   : > { %4446 = vst [vmem:[%s8713_s7] sm:$0xff] %v4445_v18  ;;  %4448 = vst [vmem:[%s8713_s7 + $0x10] sm:$0xff] %v4447_v61  ;;  %v4511_v41 = vld [vmem:[%s8586_s12 + $0x108] sm:$0xff]  ;;  %v4513_v10 = vld [vmem:[%s8586_s12 + $0x110] sm:$0xff] }
 0x3d4   : > { %4450 = vst [vmem:[%s8713_s7 + $0x20] sm:$0xff] %v4449_v34  ;;  %4452 = vst [vmem:[%s8713_s7 + $0x30] sm:$0xff] %v4451_v46  ;;  %v4515_v40 = vld [vmem:[%s8586_s12 + $0x118] sm:$0xff]  ;;  %v4517_v58 = vld [vmem:[%s8586_s12 + $0x120] sm:$0xff] }
 0x3d5   : > { %4454 = vst [vmem:[%s8713_s7 + $0x40] sm:$0xff] %v4453_v54  ;;  %4456 = vst [vmem:[%s8713_s7 + $0x50] sm:$0xff] %v4455_v50  ;;  %v4519_v11 = vld [vmem:[%s8586_s12 + $0x128] sm:$0xff]  ;;  %v4521_v21 = vld [vmem:[%s8586_s12 + $0x130] sm:$0xff] }
 0x3d6   : > { %4458 = vst [vmem:[%s8713_s7 + $0x60] sm:$0xff] %v4457_v0  ;;  %4460 = vst [vmem:[%s8713_s7 + $0x70] sm:$0xff] %v4459_v13  ;;  %v4523_v63 = vld [vmem:[%s8586_s12 + $0x138] sm:$0xff]  ;;  %v4525_v52 = vld [vmem:[%s8586_s12 + $0x140] sm:$0xff] }
 0x3d7   : > { %4462 = vst [vmem:[%s8713_s7 + $0x80] sm:$0xff] %v4461_v27  ;;  %4464 = vst [vmem:[%s8713_s7 + $0x90] sm:$0xff] %v4463_v25  ;;  %v4527_v47 = vld [vmem:[%s8586_s12 + $0x148] sm:$0xff]  ;;  %v4529_v37 = vld [vmem:[%s8586_s12 + $0x150] sm:$0xff] }
 0x3d8   : > { %4466 = vst [vmem:[%s8713_s7 + $0xa0] sm:$0xff] %v4465_v8  ;;  %4468 = vst [vmem:[%s8713_s7 + $0xb0] sm:$0xff] %v4467_v26  ;;  %v4531_v38 = vld [vmem:[%s8586_s12 + $0x158] sm:$0xff]  ;;  %v4533_v29 = vld [vmem:[%s8586_s12 + $0x160] sm:$0xff] }
 0x3d9   : > { %4470 = vst [vmem:[%s8713_s7 + $0xc0] sm:$0xff] %v4469_v12  ;;  %4472 = vst [vmem:[%s8713_s7 + $0xd0] sm:$0xff] %v4471_v19  ;;  %v4535_v16 = vld [vmem:[%s8586_s12 + $0x168] sm:$0xff]  ;;  %v4537_v22 = vld [vmem:[%s8586_s12 + $0x170] sm:$0xff] }
 0x3da   : > { %4474 = vst [vmem:[%s8713_s7 + $0xe0] sm:$0xff] %v4473_v53  ;;  %4476 = vst [vmem:[%s8713_s7 + $0xf0] sm:$0xff] %v4475_v62  ;;  %v4539_v4 = vld [vmem:[%s8586_s12 + $0x178] sm:$0xff]  ;;  %v4541_v15 = vld [vmem:[%s8586_s12 + $0x180] sm:$0xff] }
 0x3db   : > { %4478 = vst [vmem:[%s8713_s7 + $0x100] sm:$0xff] %v4477_v23  ;;  %4480 = vst [vmem:[%s8713_s7 + $0x110] sm:$0xff] %v4479_v2  ;;  %v4543_v5 = vld [vmem:[%s8586_s12 + $0x188] sm:$0xff]  ;;  %v4545_v7 = vld [vmem:[%s8586_s12 + $0x190] sm:$0xff] }
 0x3dc   : > { %4482 = vst [vmem:[%s8713_s7 + $0x120] sm:$0xff] %v4481_v9  ;;  %4484 = vst [vmem:[%s8713_s7 + $0x130] sm:$0xff] %v4483_v20  ;;  %v4547_v17 = vld [vmem:[%s8586_s12 + $0x198] sm:$0xff]  ;;  %v4549_v33 = vld [vmem:[%s8586_s12 + $0x1a0] sm:$0xff] }
 0x3dd   : > { %4486 = vst [vmem:[%s8713_s7 + $0x140] sm:$0xff] %v4485_v36  ;;  %4488 = vst [vmem:[%s8713_s7 + $0x150] sm:$0xff] %v4487_v43  ;;  %v4551_v6 = vld [vmem:[%s8586_s12 + $0x1a8] sm:$0xff]  ;;  %v4553_v1 = vld [vmem:[%s8586_s12 + $0x1b0] sm:$0xff] }
 0x3de   : > { %4490 = vst [vmem:[%s8713_s7 + $0x160] sm:$0xff] %v4489_v14  ;;  %4492 = vst [vmem:[%s8713_s7 + $0x170] sm:$0xff] %v4491_v31  ;;  %v4555_v30 = vld [vmem:[%s8586_s12 + $0x1b8] sm:$0xff]  ;;  %v4557_v51 = vld [vmem:[%s8586_s12 + $0x1c0] sm:$0xff] }
 0x3df   : > { %4494 = vst [vmem:[%s8713_s7 + $0x180] sm:$0xff] %v4493_v35  ;;  %4496 = vst [vmem:[%s8713_s7 + $0x190] sm:$0xff] %v4495_v24  ;;  %v4559_v32 = vld [vmem:[%s8586_s12 + $0x1c8] sm:$0xff]  ;;  %v4561_v59 = vld [vmem:[%s8586_s12 + $0x1d0] sm:$0xff] }
 0x3e0   : > { %4498 = vst [vmem:[%s8713_s7 + $0x1a0] sm:$0xff] %v4497_v49  ;;  %4500 = vst [vmem:[%s8713_s7 + $0x1b0] sm:$0xff] %v4499_v3  ;;  %v4563_v42 = vld [vmem:[%s8586_s12 + $0x1d8] sm:$0xff]  ;;  %v4565_v28 = vld [vmem:[%s8586_s12 + $0x1e0] sm:$0xff] }
 0x3e1   : > { %4502 = vst [vmem:[%s8713_s7 + $0x1c0] sm:$0xff] %v4501_v57  ;;  %4504 = vst [vmem:[%s8713_s7 + $0x1d0] sm:$0xff] %v4503_v56  ;;  %v4567_v44 = vld [vmem:[%s8586_s12 + $0x1e8] sm:$0xff]  ;;  %v4569_v45 = vld [vmem:[%s8586_s12 + $0x1f0] sm:$0xff] }
 0x3e2   : > { %4506 = vst [vmem:[%s8713_s7 + $0x1e0] sm:$0xff] %v4505_v55  ;;  %4508 = vst [vmem:[%s8713_s7 + $0x1f0] sm:$0xff] %v4507_v60  ;;  %v4571_v48 = vld [vmem:[%s8586_s12 + $0x1f8] sm:$0xff] }
 0x3e3   : > { %4510 = vst [vmem:[%s8713_s7 + $0x200] sm:$0xff] %v4509_v39  ;;  %4512 = vst [vmem:[%s8713_s7 + $0x210] sm:$0xff] %v4511_v41 }
 0x3e4   : > { %4514 = vst [vmem:[%s8713_s7 + $0x220] sm:$0xff] %v4513_v10  ;;  %4516 = vst [vmem:[%s8713_s7 + $0x230] sm:$0xff] %v4515_v40 }
 0x3e5   : > { %4518 = vst [vmem:[%s8713_s7 + $0x240] sm:$0xff] %v4517_v58  ;;  %4520 = vst [vmem:[%s8713_s7 + $0x250] sm:$0xff] %v4519_v11 }
 0x3e6   : > { %4522 = vst [vmem:[%s8713_s7 + $0x260] sm:$0xff] %v4521_v21  ;;  %4524 = vst [vmem:[%s8713_s7 + $0x270] sm:$0xff] %v4523_v63 }
 0x3e7   : > { %4526 = vst [vmem:[%s8713_s7 + $0x280] sm:$0xff] %v4525_v52  ;;  %4528 = vst [vmem:[%s8713_s7 + $0x290] sm:$0xff] %v4527_v47 }
 0x3e8   : > { %4530 = vst [vmem:[%s8713_s7 + $0x2a0] sm:$0xff] %v4529_v37  ;;  %4532 = vst [vmem:[%s8713_s7 + $0x2b0] sm:$0xff] %v4531_v38 }
 0x3e9   : > { %4534 = vst [vmem:[%s8713_s7 + $0x2c0] sm:$0xff] %v4533_v29  ;;  %4536 = vst [vmem:[%s8713_s7 + $0x2d0] sm:$0xff] %v4535_v16 }
 0x3ea   : > { %4538 = vst [vmem:[%s8713_s7 + $0x2e0] sm:$0xff] %v4537_v22  ;;  %4540 = vst [vmem:[%s8713_s7 + $0x2f0] sm:$0xff] %v4539_v4 }
 0x3eb   : > { %4542 = vst [vmem:[%s8713_s7 + $0x300] sm:$0xff] %v4541_v15  ;;  %4544 = vst [vmem:[%s8713_s7 + $0x310] sm:$0xff] %v4543_v5 }
 0x3ec   : > { %4546 = vst [vmem:[%s8713_s7 + $0x320] sm:$0xff] %v4545_v7  ;;  %4548 = vst [vmem:[%s8713_s7 + $0x330] sm:$0xff] %v4547_v17 }
 0x3ed   : > { %4550 = vst [vmem:[%s8713_s7 + $0x340] sm:$0xff] %v4549_v33  ;;  %4552 = vst [vmem:[%s8713_s7 + $0x350] sm:$0xff] %v4551_v6 }
 0x3ee   : > { %4554 = vst [vmem:[%s8713_s7 + $0x360] sm:$0xff] %v4553_v1  ;;  %4556 = vst [vmem:[%s8713_s7 + $0x370] sm:$0xff] %v4555_v30 }
 0x3ef   : > { %4558 = vst [vmem:[%s8713_s7 + $0x380] sm:$0xff] %v4557_v51  ;;  %4560 = vst [vmem:[%s8713_s7 + $0x390] sm:$0xff] %v4559_v32 }
 0x3f0   : > { %4562 = vst [vmem:[%s8713_s7 + $0x3a0] sm:$0xff] %v4561_v59  ;;  %4564 = vst [vmem:[%s8713_s7 + $0x3b0] sm:$0xff] %v4563_v42 }
 0x3f1   : > { %4566 = vst [vmem:[%s8713_s7 + $0x3c0] sm:$0xff] %v4565_v28  ;;  %4568 = vst [vmem:[%s8713_s7 + $0x3d0] sm:$0xff] %v4567_v44 }
 0x3f2   : > { %4570 = vst [vmem:[%s8713_s7 + $0x3e0] sm:$0xff] %v4569_v45  ;;  %4572 = vst [vmem:[%s8713_s7 + $0x3f0] sm:$0xff] %v4571_v48 }
 0x3f3 PF: > { %p10_p11 = scmp.ge.s32.totalorder %s5751_s16, 4   ;;  %s9094_s12 = smov %s5705_s13 }
 0x3f4   : > { %s9095_s13 = smov %s5761_s19  ;;  %s9096_s14 = smov %s5751_s16 }
 0x3f5   :  { %12 = sbr.rel (!%p10_p11) target bundleno = 2 (0x2), region = 149 }

</bundles_post_ra>
